<compile_context>
chip_gen: v5e
topology: v5e:2x2
jax: 0.10.0
libtpu: 0.0.40
codegen_flags: <defaults>
</compile_context>

<pallas_src>
import jax
import jax.numpy as jnp
from jax.experimental import pallas as pl
from jax.experimental.pallas import tpu as pltpu

CONV1_OUT, CONV2_OUT = 16, 32
VMEM_LIMIT = 32 * 1024 * 1024        # safe on v5e / v6e / v7x


def _compiler_params(semantics):
    return pltpu.CompilerParams(
        dimension_semantics=semantics,
        vmem_limit_bytes=VMEM_LIMIT,
    )


# ----------------------------------------------------------------------------
# Pallas kernel 1: matmul + bias + ReLU (both convs).  Output keeps the true
# (unpadded) channel count; the grid tiles M so the patch DMA double-buffers
# and steps can split across TensorCores on v7x.
# ----------------------------------------------------------------------------
def _matmul_bias_relu_kernel(a_ref, w_ref, b_ref, o_ref):
    acc = jnp.dot(a_ref[...], w_ref[...], preferred_element_type=jnp.float32)
    o_ref[...] = jnp.maximum(acc + b_ref[...], 0.0).astype(o_ref.dtype)


def conv_matmul_bias_relu(a, w, b2d, *, tile_m=None):
    """a: (M, K) f32 patches, w: (K, N) f32, b2d: (1, N) f32 -> (M, N) f32."""
    M, K = a.shape
    N = w.shape[1]
    if tile_m is None or tile_m >= M:
        tile_m = M
    assert M % tile_m == 0 and (tile_m % 8 == 0 or tile_m == M)
    steps = M // tile_m
    return pl.pallas_call(
        _matmul_bias_relu_kernel,
        out_shape=jax.ShapeDtypeStruct((M, N), jnp.float32),
        grid_spec=pltpu.PrefetchScalarGridSpec(
            num_scalar_prefetch=0,
            grid=(steps,),
            in_specs=[
                pl.BlockSpec((tile_m, K), lambda i: (i, 0)),   # patches (M-tiled)
                pl.BlockSpec((K, N), lambda i: (0, 0)),        # weight
                pl.BlockSpec((1, N), lambda i: (0, 0)),        # bias row
            ],
            out_specs=pl.BlockSpec((tile_m, N), lambda i: (i, 0)),
        ),
        compiler_params=_compiler_params(("parallel",)),
    )(a, w, b2d)


# ----------------------------------------------------------------------------
# Pallas kernel 2: the whole FC stack (fc1 -> fc2+ReLU -> fc3+ReLU -> fc4)
# fused into one VMEM-resident kernel.  fc1 runs bf16 x bf16 -> f32 on the MXU.
# ----------------------------------------------------------------------------
def _fc_stack_kernel(x_ref, w1_ref, b1_ref, w2_ref, b2_ref,
                     w3_ref, b3_ref, w4_ref, b4_ref, o_ref):
    # fc1: bf16 operands (w1 stored bf16 -> half the dominant DMA), f32 accumulate.
    h = jnp.dot(x_ref[...].astype(jnp.bfloat16), w1_ref[...],
                preferred_element_type=jnp.float32) + b1_ref[...]
    # NOTE: the PyTorch Sequential has NO ReLU between fc1 and fc2.
    h = jnp.dot(h, w2_ref[...], preferred_element_type=jnp.float32) + b2_ref[...]
    h = jnp.maximum(h, 0.0)
    # TODO(synk): Dropout(0.2) has no clean Pallas equivalent for training-mode
    # parity; treated as inference-mode identity (deterministic).
    h = jnp.dot(h, w3_ref[...], preferred_element_type=jnp.float32) + b3_ref[...]
    h = jnp.maximum(h, 0.0)
    h = jnp.dot(h, w4_ref[...], preferred_element_type=jnp.float32) + b4_ref[...]
    o_ref[...] = h.astype(o_ref.dtype)


def fc_stack(x, w1, b1, w2, b2, w3, b3, w4, b4):
    B = x.shape[0]
    A = w4.shape[1]
    args = (x, w1, b1, w2, b2, w3, b3, w4, b4)          # all 2-D arrays
    in_specs = [pl.BlockSpec(a.shape, lambda i: (0, 0)) for a in args]
    return pl.pallas_call(
        _fc_stack_kernel,
        out_shape=jax.ShapeDtypeStruct((B, A), jnp.float32),
        grid_spec=pltpu.PrefetchScalarGridSpec(
            num_scalar_prefetch=0,
            grid=(1,),
            in_specs=in_specs,
            out_specs=pl.BlockSpec((B, A), lambda i: (0, 0)),
        ),
        compiler_params=_compiler_params(("arbitrary",)),
    )(*args)


# ----------------------------------------------------------------------------
# Thin JAX glue: NHWC im2col (fused by XLA under jit).
# Column order is tap-major, channel-minor: K index = (i*kw + j)*C + c.
# ----------------------------------------------------------------------------
def _im2col_nhwc(x, kh, kw, stride):
    B, H, W, C = x.shape
    oh = (H - kh) // stride + 1
    ow = (W - kw) // stride + 1
    taps = []
    for i in range(kh):
        for j in range(kw):
            taps.append(x[:, i:i + stride * oh:stride, j:j + stride * ow:stride, :])
    p = jnp.concatenate(taps, axis=-1)                   # (B, oh, ow, kh*kw*C)
    return p.reshape(B * oh * ow, kh * kw * C), oh, ow


def _largest_dividing_tile(M, max_tile=512):
    """Largest multiple of 8 <= max_tile that divides M (else the full M)."""
    best = M
    for t in range(8, min(M, max_tile) + 1, 8):
        if M % t == 0:
            best = t
    return best


# ----------------------------------------------------------------------------
# Parameters: init in PyTorch layout, then prepare kernel-ready tensors once.
# ----------------------------------------------------------------------------
def init_params(key, state_dim, action_dim):
    ks = jax.random.split(key, 12)

    def uinit(kw, kb, fan_in, shape_w, shape_b):
        bound = 1.0 / (fan_in ** 0.5)
        w = jax.random.uniform(kw, shape_w, jnp.float32, -bound, bound)
        b = jax.random.uniform(kb, shape_b, jnp.float32, -bound, bound)
        return w, b

    in_features = CONV2_OUT * 14 * 14  # 6272
    p = {}
    p["conv1_w"], p["conv1_b"] = uinit(ks[0], ks[1], state_dim * 8 * 8,
                                       (CONV1_OUT, state_dim, 8, 8), (CONV1_OUT,))
    p["conv2_w"], p["conv2_b"] = uinit(ks[2], ks[3], CONV1_OUT * 4 * 4,
                                       (CONV2_OUT, CONV1_OUT, 4, 4), (CONV2_OUT,))
    p["fc1_w"], p["fc1_b"] = uinit(ks[4], ks[5], in_features, (in_features, 256), (256,))
    p["fc2_w"], p["fc2_b"] = uinit(ks[6], ks[7], 256, (256, 128), (128,))
    p["fc3_w"], p["fc3_b"] = uinit(ks[8], ks[9], 128, (128, 64), (64,))
    p["fc4_w"], p["fc4_b"] = uinit(ks[10], ks[11], 64, (64, action_dim), (action_dim,))
    return p


def prepare_params(params):
    """One-time reshuffle of PyTorch-layout params into kernel-ready tensors."""
    c1w, c2w = params["conv1_w"], params["conv2_w"]
    co1, ci1, kh1, kw1 = c1w.shape
    co2, ci2, kh2, kw2 = c2w.shape

    # (Cout, Cin, kh, kw) -> (kh*kw*Cin, Cout): matches tap-major/channel-minor im2col.
    wf1 = c1w.transpose(2, 3, 1, 0).reshape(kh1 * kw1 * ci1, co1)
    wf2 = c2w.transpose(2, 3, 1, 0).reshape(kh2 * kw2 * ci2, co2)

    # Permute fc1 rows so the NHWC flatten equals PyTorch's NCHW .view flatten:
    # new row (h*14 + w)*32 + c  <-  old row c*196 + h*14 + w.
    hh, ww, cc = jnp.meshgrid(jnp.arange(14), jnp.arange(14), jnp.arange(co2),
                              indexing="ij")
    perm = (cc * (14 * 14) + hh * 14 + ww).reshape(-1)
    fc1_w = params["fc1_w"][perm, :].astype(jnp.bfloat16)   # bf16: halves largest DMA

    return {
        "conv1_w": wf1, "conv1_b": params["conv1_b"].reshape(1, -1),
        "conv2_w": wf2, "conv2_b": params["conv2_b"].reshape(1, -1),
        "fc1_w": fc1_w, "fc1_b": params["fc1_b"].reshape(1, -1),
        "fc2_w": params["fc2_w"], "fc2_b": params["fc2_b"].reshape(1, -1),
        "fc3_w": params["fc3_w"], "fc3_b": params["fc3_b"].reshape(1, -1),
        "fc4_w": params["fc4_w"], "fc4_b": params["fc4_b"].reshape(1, -1),
    }


# ----------------------------------------------------------------------------
# Forward pass matching Network.forward (inference semantics).
# ----------------------------------------------------------------------------
def network_forward(kp, x):
    B = x.shape[0]
    x = x.transpose(0, 2, 3, 1)                              # NCHW -> NHWC, once

    # conv1: k=8, s=4 -> (B*30*30, 16); M-tiled grid pipelines the patch DMA.
    p1, oh1, ow1 = _im2col_nhwc(x, 8, 8, 4)
    h1 = conv_matmul_bias_relu(p1, kp["conv1_w"], kp["conv1_b"],
                               tile_m=_largest_dividing_tile(p1.shape[0]))
    h1 = h1.reshape(B, oh1, ow1, CONV1_OUT)                  # free row-major reshape

    # conv2: k=4, s=2 -> (B*14*14, 32); single step (patches ~0.4 MB).
    p2, oh2, ow2 = _im2col_nhwc(h1, 4, 4, 2)
    h2 = conv_matmul_bias_relu(p2, kp["conv2_w"], kp["conv2_b"], tile_m=None)

    # NHWC flatten is a free bitcast; fc1 weight rows were pre-permuted so it
    # matches PyTorch's NCHW .view(-1, 32*14*14) exactly.
    flat = h2.reshape(B, oh2 * ow2 * CONV2_OUT)

    # Entire FC stack in one fused, VMEM-resident Pallas kernel.
    return fc_stack(flat, kp["fc1_w"], kp["fc1_b"], kp["fc2_w"], kp["fc2_b"],
                    kp["fc3_w"], kp["fc3_b"], kp["fc4_w"], kp["fc4_b"])


# ----------------------------------------------------------------------------
# Pure-JAX reference (f32, HIGHEST precision) for correctness validation.
# ----------------------------------------------------------------------------
def _reference_forward(params, x):
    hp = jax.lax.Precision.HIGHEST
    dn = ("NCHW", "OIHW", "NCHW")
    h = jax.lax.conv_general_dilated(x, params["conv1_w"], (4, 4), "VALID",
                                     dimension_numbers=dn, precision=hp)
    h = jax.nn.relu(h + params["conv1_b"].reshape(1, -1, 1, 1))
    h = jax.lax.conv_general_dilated(h, params["conv2_w"], (2, 2), "VALID",
                                     dimension_numbers=dn, precision=hp)
    h = jax.nn.relu(h + params["conv2_b"].reshape(1, -1, 1, 1))
    h = h.reshape(x.shape[0], -1)
    h = jnp.dot(h, params["fc1_w"], precision=hp) + params["fc1_b"]
    h = jax.nn.relu(jnp.dot(h, params["fc2_w"], precision=hp) + params["fc2_b"])
    h = jax.nn.relu(jnp.dot(h, params["fc3_w"], precision=hp) + params["fc3_b"])
    return jnp.dot(h, params["fc4_w"], precision=hp) + params["fc4_b"]


if __name__ == "__main__":
    key = jax.random.PRNGKey(0)
    k_param, k_x = jax.random.split(key)

    batch, state_dim, action_dim = 2, 4, 6
    # 124x124 so conv1(k=8,s=4) -> 30 and conv2(k=4,s=2) -> 14, giving 32*14*14.
    x = jax.random.normal(k_x, (batch, state_dim, 124, 124), dtype=jnp.float32)

    params = init_params(k_param, state_dim, action_dim)
    kparams = prepare_params(params)

    fwd = jax.jit(network_forward)
    out = jax.block_until_ready(fwd(kparams, x))

    assert out.shape == (batch, action_dim), out.shape
    assert out.dtype == jnp.float32

    ref = jax.block_until_ready(jax.jit(_reference_forward)(params, x))
    err = float(jnp.max(jnp.abs(out - ref)))
    assert err < 5e-3, f"max abs err vs reference: {err}"

    print("KERNEL_OK")
</pallas_src>

<mosaic_0001>
module attributes {stable_mosaic.version = 11 : i64} {
  func.func @_matmul_bias_relu_kernel(%arg0: i32, %arg1: memref<360x256xf32, #tpu.memory_space<vmem>>, %arg2: memref<256x16xf32, #tpu.memory_space<vmem>>, %arg3: memref<1x16xf32, #tpu.memory_space<vmem>>, %arg4: memref<360x16xf32, #tpu.memory_space<vmem>>) attributes {dimension_semantics = [#tpu.dimension_semantics<parallel>], iteration_bounds = array<i64: 5>, scalar_prefetch = 0 : i64, scratch_operands = 0 : i64, tpu.core_type = #tpu.core_type<tc>, window_params = [{transform_indices = @transform_0, window_bounds = array<i64: 360, 256>}, {pipeline_mode = #tpu.pipeline_mode<synchronous>, transform_indices = @transform_1, window_bounds = array<i64: 256, 16>}, {pipeline_mode = #tpu.pipeline_mode<synchronous>, transform_indices = @transform_2, window_bounds = array<i64: 1, 16>}, {transform_indices = @transform_3, window_bounds = array<i64: 360, 16>}]} {
    %c0 = arith.constant 0 : index
    %c0_0 = arith.constant 0 : index
    %0 = vector.load %arg1[%c0, %c0_0] : memref<360x256xf32, #tpu.memory_space<vmem>>, vector<360x256xf32>
    %c0_1 = arith.constant 0 : index
    %c0_2 = arith.constant 0 : index
    %1 = vector.load %arg2[%c0_1, %c0_2] : memref<256x16xf32, #tpu.memory_space<vmem>>, vector<256x16xf32>
    %cst = arith.constant dense<0.000000e+00> : vector<360x16xf32>
    %2 = tpu.matmul %0, %1, %cst {dimension_numbers = #tpu.dot_dimension_numbers<[1], [0], [0], [1], [0, 0, 1, 1], [], []>} : vector<360x256xf32>, vector<256x16xf32>, vector<360x16xf32> -> vector<360x16xf32>
    %c0_3 = arith.constant 0 : index
    %c0_4 = arith.constant 0 : index
    %3 = vector.load %arg3[%c0_3, %c0_4] : memref<1x16xf32, #tpu.memory_space<vmem>>, vector<1x16xf32>
    %4 = vector.broadcast %3 : vector<1x16xf32> to vector<360x16xf32>
    %5 = arith.addf %2, %4 : vector<360x16xf32>
    %cst_5 = arith.constant 0.000000e+00 : f32
    %6 = vector.broadcast %cst_5 : f32 to vector<360x16xf32>
    %7 = arith.maximumf %5, %6 : vector<360x16xf32>
    %c0_6 = arith.constant 0 : index
    %c0_7 = arith.constant 0 : index
    %8 = vector.load %arg4[%c0_6, %c0_7] : memref<360x16xf32, #tpu.memory_space<vmem>>, vector<360x16xf32>
    tpu.vector_store %arg4[%c0_6, %c0_7], %7 {strides = array<i32>} : memref<360x16xf32, #tpu.memory_space<vmem>>, vector<360x16xf32>,
    return
  }
  func.func @transform_0(%arg0: i32) -> (i32, i32) {
    %c0_i32 = arith.constant 0 : i32
    %c0_i32_0 = arith.constant 0 : i32
    return %arg0, %c0_i32 : i32, i32
  }
  func.func @transform_1(%arg0: i32) -> (i32, i32) {
    %c0_i32 = arith.constant 0 : i32
    %c0_i32_0 = arith.constant 0 : i32
    %c0_i32_1 = arith.constant 0 : i32
    return %c0_i32, %c0_i32_0 : i32, i32
  }
  func.func @transform_2(%arg0: i32) -> (i32, i32) {
    %c0_i32 = arith.constant 0 : i32
    %c0_i32_0 = arith.constant 0 : i32
    %c0_i32_1 = arith.constant 0 : i32
    return %c0_i32, %c0_i32_0 : i32, i32
  }
  func.func @transform_3(%arg0: i32) -> (i32, i32) {
    %c0_i32 = arith.constant 0 : i32
    %c0_i32_0 = arith.constant 0 : i32
    return %arg0, %c0_i32 : i32, i32
  }
}

module attributes {stable_mosaic.version = 11 : i64} {
  func.func @_matmul_bias_relu_kernel(%arg0: i32, %arg1: memref<392x256xf32, #tpu.memory_space<vmem>>, %arg2: memref<256x32xf32, #tpu.memory_space<vmem>>, %arg3: memref<1x32xf32, #tpu.memory_space<vmem>>, %arg4: memref<392x32xf32, #tpu.memory_space<vmem>>) attributes {dimension_semantics = [#tpu.dimension_semantics<parallel>], iteration_bounds = array<i64: 1>, scalar_prefetch = 0 : i64, scratch_operands = 0 : i64, tpu.core_type = #tpu.core_type<tc>, window_params = [{transform_indices = @transform_0, window_bounds = array<i64: 392, 256>}, {pipeline_mode = #tpu.pipeline_mode<synchronous>, transform_indices = @transform_1, window_bounds = array<i64: 256, 32>}, {pipeline_mode = #tpu.pipeline_mode<synchronous>, transform_indices = @transform_2, window_bounds = array<i64: 1, 32>}, {transform_indices = @transform_3, window_bounds = array<i64: 392, 32>}]} {
    %c0 = arith.constant 0 : index
    %c0_0 = arith.constant 0 : index
    %0 = vector.load %arg1[%c0, %c0_0] : memref<392x256xf32, #tpu.memory_space<vmem>>, vector<392x256xf32>
    %c0_1 = arith.constant 0 : index
    %c0_2 = arith.constant 0 : index
    %1 = vector.load %arg2[%c0_1, %c0_2] : memref<256x32xf32, #tpu.memory_space<vmem>>, vector<256x32xf32>
    %cst = arith.constant dense<0.000000e+00> : vector<392x32xf32>
    %2 = tpu.matmul %0, %1, %cst {dimension_numbers = #tpu.dot_dimension_numbers<[1], [0], [0], [1], [0, 0, 1, 1], [], []>} : vector<392x256xf32>, vector<256x32xf32>, vector<392x32xf32> -> vector<392x32xf32>
    %c0_3 = arith.constant 0 : index
    %c0_4 = arith.constant 0 : index
    %3 = vector.load %arg3[%c0_3, %c0_4] : memref<1x32xf32, #tpu.memory_space<vmem>>, vector<1x32xf32>
    %4 = vector.broadcast %3 : vector<1x32xf32> to vector<392x32xf32>
    %5 = arith.addf %2, %4 : vector<392x32xf32>
    %cst_5 = arith.constant 0.000000e+00 : f32
    %6 = vector.broadcast %cst_5 : f32 to vector<392x32xf32>
    %7 = arith.maximumf %5, %6 : vector<392x32xf32>
    %c0_6 = arith.constant 0 : index
    %c0_7 = arith.constant 0 : index
    %8 = vector.load %arg4[%c0_6, %c0_7] : memref<392x32xf32, #tpu.memory_space<vmem>>, vector<392x32xf32>
    tpu.vector_store %arg4[%c0_6, %c0_7], %7 {strides = array<i32>} : memref<392x32xf32, #tpu.memory_space<vmem>>, vector<392x32xf32>,
    return
  }
  func.func @transform_0(%arg0: i32) -> (i32, i32) {
    %c0_i32 = arith.constant 0 : i32
    %c0_i32_0 = arith.constant 0 : i32
    return %arg0, %c0_i32 : i32, i32
  }
  func.func @transform_1(%arg0: i32) -> (i32, i32) {
    %c0_i32 = arith.constant 0 : i32
    %c0_i32_0 = arith.constant 0 : i32
    %c0_i32_1 = arith.constant 0 : i32
    return %c0_i32, %c0_i32_0 : i32, i32
  }
  func.func @transform_2(%arg0: i32) -> (i32, i32) {
    %c0_i32 = arith.constant 0 : i32
    %c0_i32_0 = arith.constant 0 : i32
    %c0_i32_1 = arith.constant 0 : i32
    return %c0_i32, %c0_i32_0 : i32, i32
  }
  func.func @transform_3(%arg0: i32) -> (i32, i32) {
    %c0_i32 = arith.constant 0 : i32
    %c0_i32_0 = arith.constant 0 : i32
    return %arg0, %c0_i32 : i32, i32
  }
}

module attributes {stable_mosaic.version = 11 : i64} {
  func.func @_fc_stack_kernel(%arg0: i32, %arg1: memref<2x6272xf32, #tpu.memory_space<vmem>>, %arg2: memref<6272x256xbf16, #tpu.memory_space<vmem>>, %arg3: memref<1x256xf32, #tpu.memory_space<vmem>>, %arg4: memref<256x128xf32, #tpu.memory_space<vmem>>, %arg5: memref<1x128xf32, #tpu.memory_space<vmem>>, %arg6: memref<128x64xf32, #tpu.memory_space<vmem>>, %arg7: memref<1x64xf32, #tpu.memory_space<vmem>>, %arg8: memref<64x6xf32, #tpu.memory_space<vmem>>, %arg9: memref<1x6xf32, #tpu.memory_space<vmem>>, %arg10: memref<2x6xf32, #tpu.memory_space<vmem>>) attributes {dimension_semantics = [#tpu.dimension_semantics<arbitrary>], iteration_bounds = array<i64: 1>, scalar_prefetch = 0 : i64, scratch_operands = 0 : i64, tpu.core_type = #tpu.core_type<tc>, window_params = [{pipeline_mode = #tpu.pipeline_mode<synchronous>, transform_indices = @transform_0, window_bounds = array<i64: 2, 6272>}, {pipeline_mode = #tpu.pipeline_mode<synchronous>, transform_indices = @transform_1, window_bounds = array<i64: 6272, 256>}, {pipeline_mode = #tpu.pipeline_mode<synchronous>, transform_indices = @transform_2, window_bounds = array<i64: 1, 256>}, {pipeline_mode = #tpu.pipeline_mode<synchronous>, transform_indices = @transform_3, window_bounds = array<i64: 256, 128>}, {pipeline_mode = #tpu.pipeline_mode<synchronous>, transform_indices = @transform_4, window_bounds = array<i64: 1, 128>}, {pipeline_mode = #tpu.pipeline_mode<synchronous>, transform_indices = @transform_5, window_bounds = array<i64: 128, 64>}, {pipeline_mode = #tpu.pipeline_mode<synchronous>, transform_indices = @transform_6, window_bounds = array<i64: 1, 64>}, {pipeline_mode = #tpu.pipeline_mode<synchronous>, transform_indices = @transform_7, window_bounds = array<i64: 64, 6>}, {pipeline_mode = #tpu.pipeline_mode<synchronous>, transform_indices = @transform_8, window_bounds = array<i64: 1, 6>}, {pipeline_mode = #tpu.pipeline_mode<synchronous>, transform_indices = @transform_9, window_bounds = array<i64: 2, 6>}]} {
    %c0 = arith.constant 0 : index
    %c0_0 = arith.constant 0 : index
    %0 = vector.load %arg1[%c0, %c0_0] : memref<2x6272xf32, #tpu.memory_space<vmem>>, vector<2x6272xf32>
    %1 = arith.truncf %0 : vector<2x6272xf32> to vector<2x6272xbf16>
    %c0_1 = arith.constant 0 : index
    %c0_2 = arith.constant 0 : index
    %2 = vector.load %arg2[%c0_1, %c0_2] : memref<6272x256xbf16, #tpu.memory_space<vmem>>, vector<6272x256xbf16>
    %cst = arith.constant dense<0.000000e+00> : vector<2x256xf32>
    %3 = tpu.matmul %1, %2, %cst {dimension_numbers = #tpu.dot_dimension_numbers<[1], [0], [0], [1], [0, 0, 1, 1], [], []>} : vector<2x6272xbf16>, vector<6272x256xbf16>, vector<2x256xf32> -> vector<2x256xf32>
    %c0_3 = arith.constant 0 : index
    %c0_4 = arith.constant 0 : index
    %4 = vector.load %arg3[%c0_3, %c0_4] : memref<1x256xf32, #tpu.memory_space<vmem>>, vector<1x256xf32>
    %5 = vector.broadcast %4 : vector<1x256xf32> to vector<2x256xf32>
    %6 = arith.addf %3, %5 : vector<2x256xf32>
    %c0_5 = arith.constant 0 : index
    %c0_6 = arith.constant 0 : index
    %7 = vector.load %arg4[%c0_5, %c0_6] : memref<256x128xf32, #tpu.memory_space<vmem>>, vector<256x128xf32>
    %cst_7 = arith.constant dense<0.000000e+00> : vector<2x128xf32>
    %8 = tpu.matmul %6, %7, %cst_7 {dimension_numbers = #tpu.dot_dimension_numbers<[1], [0], [0], [1], [0, 0, 1, 1], [], []>} : vector<2x256xf32>, vector<256x128xf32>, vector<2x128xf32> -> vector<2x128xf32>
    %c0_8 = arith.constant 0 : index
    %c0_9 = arith.constant 0 : index
    %9 = vector.load %arg5[%c0_8, %c0_9] : memref<1x128xf32, #tpu.memory_space<vmem>>, vector<1x128xf32>
    %10 = vector.broadcast %9 : vector<1x128xf32> to vector<2x128xf32>
    %11 = arith.addf %8, %10 : vector<2x128xf32>
    %cst_10 = arith.constant 0.000000e+00 : f32
    %12 = vector.broadcast %cst_10 : f32 to vector<2x128xf32>
    %13 = arith.maximumf %11, %12 : vector<2x128xf32>
    %c0_11 = arith.constant 0 : index
    %c0_12 = arith.constant 0 : index
    %14 = vector.load %arg6[%c0_11, %c0_12] : memref<128x64xf32, #tpu.memory_space<vmem>>, vector<128x64xf32>
    %cst_13 = arith.constant dense<0.000000e+00> : vector<2x64xf32>
    %15 = tpu.matmul %13, %14, %cst_13 {dimension_numbers = #tpu.dot_dimension_numbers<[1], [0], [0], [1], [0, 0, 1, 1], [], []>} : vector<2x128xf32>, vector<128x64xf32>, vector<2x64xf32> -> vector<2x64xf32>
    %c0_14 = arith.constant 0 : index
    %c0_15 = arith.constant 0 : index
    %16 = vector.load %arg7[%c0_14, %c0_15] : memref<1x64xf32, #tpu.memory_space<vmem>>, vector<1x64xf32>
    %17 = vector.broadcast %16 : vector<1x64xf32> to vector<2x64xf32>
    %18 = arith.addf %15, %17 : vector<2x64xf32>
    %cst_16 = arith.constant 0.000000e+00 : f32
    %19 = vector.broadcast %cst_16 : f32 to vector<2x64xf32>
    %20 = arith.maximumf %18, %19 : vector<2x64xf32>
    %c0_17 = arith.constant 0 : index
    %c0_18 = arith.constant 0 : index
    %21 = vector.load %arg8[%c0_17, %c0_18] : memref<64x6xf32, #tpu.memory_space<vmem>>, vector<64x6xf32>
    %cst_19 = arith.constant dense<0.000000e+00> : vector<2x6xf32>
    %22 = tpu.matmul %20, %21, %cst_19 {dimension_numbers = #tpu.dot_dimension_numbers<[1], [0], [0], [1], [0, 0, 1, 1], [], []>} : vector<2x64xf32>, vector<64x6xf32>, vector<2x6xf32> -> vector<2x6xf32>
    %c0_20 = arith.constant 0 : index
    %c0_21 = arith.constant 0 : index
    %23 = vector.load %arg9[%c0_20, %c0_21] : memref<1x6xf32, #tpu.memory_space<vmem>>, vector<1x6xf32>
    %24 = vector.broadcast %23 : vector<1x6xf32> to vector<2x6xf32>
    %25 = arith.addf %22, %24 : vector<2x6xf32>
    %c0_22 = arith.constant 0 : index
    %c0_23 = arith.constant 0 : index
    %26 = vector.load %arg10[%c0_22, %c0_23] : memref<2x6xf32, #tpu.memory_space<vmem>>, vector<2x6xf32>
    tpu.vector_store %arg10[%c0_22, %c0_23], %25 {strides = array<i32>} : memref<2x6xf32, #tpu.memory_space<vmem>>, vector<2x6xf32>,
    return
  }
  func.func @transform_0(%arg0: i32) -> (i32, i32) {
    %c0_i32 = arith.constant 0 : i32
    %c0_i32_0 = arith.constant 0 : i32
    %c0_i32_1 = arith.constant 0 : i32
    return %c0_i32, %c0_i32_0 : i32, i32
  }
  func.func @transform_1(%arg0: i32) -> (i32, i32) {
    %c0_i32 = arith.constant 0 : i32
    %c0_i32_0 = arith.constant 0 : i32
    %c0_i32_1 = arith.constant 0 : i32
    return %c0_i32, %c0_i32_0 : i32, i32
  }
  func.func @transform_2(%arg0: i32) -> (i32, i32) {
    %c0_i32 = arith.constant 0 : i32
    %c0_i32_0 = arith.constant 0 : i32
    %c0_i32_1 = arith.constant 0 : i32
    return %c0_i32, %c0_i32_0 : i32, i32
  }
  func.func @transform_3(%arg0: i32) -> (i32, i32) {
    %c0_i32 = arith.constant 0 : i32
    %c0_i32_0 = arith.constant 0 : i32
    %c0_i32_1 = arith.constant 0 : i32
    return %c0_i32, %c0_i32_0 : i32, i32
  }
  func.func @transform_4(%arg0: i32) -> (i32, i32) {
    %c0_i32 = arith.constant 0 : i32
    %c0_i32_0 = arith.constant 0 : i32
    %c0_i32_1 = arith.constant 0 : i32
    return %c0_i32, %c0_i32_0 : i32, i32
  }
  func.func @transform_5(%arg0: i32) -> (i32, i32) {
    %c0_i32 = arith.constant 0 : i32
    %c0_i32_0 = arith.constant 0 : i32
    %c0_i32_1 = arith.constant 0 : i32
    return %c0_i32, %c0_i32_0 : i32, i32
  }
  func.func @transform_6(%arg0: i32) -> (i32, i32) {
    %c0_i32 = arith.constant 0 : i32
    %c0_i32_0 = arith.constant 0 : i32
    %c0_i32_1 = arith.constant 0 : i32
    return %c0_i32, %c0_i32_0 : i32, i32
  }
  func.func @transform_7(%arg0: i32) -> (i32, i32) {
    %c0_i32 = arith.constant 0 : i32
    %c0_i32_0 = arith.constant 0 : i32
    %c0_i32_1 = arith.constant 0 : i32
    return %c0_i32, %c0_i32_0 : i32, i32
  }
  func.func @transform_8(%arg0: i32) -> (i32, i32) {
    %c0_i32 = arith.constant 0 : i32
    %c0_i32_0 = arith.constant 0 : i32
    %c0_i32_1 = arith.constant 0 : i32
    return %c0_i32, %c0_i32_0 : i32, i32
  }
  func.func @transform_9(%arg0: i32) -> (i32, i32) {
    %c0_i32 = arith.constant 0 : i32
    %c0_i32_0 = arith.constant 0 : i32
    %c0_i32_1 = arith.constant 0 : i32
    return %c0_i32, %c0_i32_0 : i32, i32
  }
}

</mosaic_0001>

<bundles_post_ra>
// kernel: network_forward.3
= control target key start
LH: loop header
LB: loop body
LE: loop exit
PB: predicated region body
PF: predicated region fallthrough
CT: control target
= control target key end

     0   :  { %s834_s12 = smov 0   ;;  %s1190_s0 = inlined_call_operand.vmem [shape: f32[1800,256], index: 0, kind: input, shape index: {}]   ;;  %s1191_s1 = inlined_call_operand.vmem [shape: f32[256,16], index: 1, kind: input, shape index: {}]   ;;  %s1192_s2 = inlined_call_operand.vmem [shape: f32[1,16], index: 2, kind: input, shape index: {}]   ;;  %s1193_s3 = inlined_call_operand.vmem [shape: f32[1800,16], index: 3, kind: output, shape index: {}]  }
   0x1 LB: > { %s754_s13 = sadd.s32 4294967295, %s812_s12   ;;  %p758_p0 = scmp.ge.s32.totalorder %s812_s12, 1  ;;  %s812_s12 = sphi %s834_s12, %s13_s12  }
   0x2   : > { %p139_p1 = scmp.lt.s32.totalorder %s812_s12, 6 }
   0x4   : > { %p140_p2 = pnand %p758_p0, %p139_p1 }
   0x5   : > { %s164_s17 = smul.u32 (!%p140_p2), 45, %s754_s13 }
   0x6   : > { %143 = sbr.rel (%p140_p2) target bundleno = 358 (0x166), region = 32 }
   0x7   : > { %p165_p3 = scmp.lt.s32.totalorder (!%p140_p2), %s164_s17, 224 }
   0xb   : > { %v282_v0 = vld [vmem:[%s1191_s1 + $0x78] sm:$0xff]  ;;  %v281_v2 = vld [vmem:[%s1191_s1 + $0x70] sm:$0xff]  ;;  %v280_v4 = vld [vmem:[%s1191_s1 + $0x68] sm:$0xff]  ;;  %s1195_s17 = smov (!%p165_p3, %s164_s17), 224  ;;  %vm652_vm0 = vcmask 130048  }
   0xc   : > { %v298_v1 = vld [vmem:[%s1191_s1 + $0xf8] sm:$0xff]  ;;  %765 = vmatpush.msra.mxu2 %v282_v0  ;;  %v297_v3 = vld [vmem:[%s1191_s1 + $0xf0] sm:$0xff]  ;;  %v296_v5 = vld [vmem:[%s1191_s1 + $0xe8] sm:$0xff]  ;;  %303 = vmatpush.msra.mxu0 %v282_v0  ;;  %s764_s16 = sshll.u32 %s1195_s17, 4  ;;  %s761_s7 = sshll.u32 %s1195_s17, 3 }
   0xd   : > { %455 = vmatpush.msra.mxu1 %v298_v1  ;;  %781 = vmatpush.msra.mxu3 %v298_v1  ;;  %v279_v6 = vld [vmem:[%s1191_s1 + $0x60] sm:$0xff]  ;;  %v278_v8 = vld [vmem:[%s1191_s1 + $0x58] sm:$0xff]  ;;  %v277_v10 = vld [vmem:[%s1191_s1 + $0x50] sm:$0xff]  ;;  %s940_s27 = scalar_lea.vmem %s1190_s0, %s764_s16  ;;  %s1026_s10 = scalar_lea.vmem %s1193_s3, %s761_s7 }
   0xe   : > { %766 = vmatpush.msra.mxu2 %v281_v2  ;;  %v295_v7 = vld [vmem:[%s1191_s1 + $0xe0] sm:$0xff]  ;;  %304 = vmatpush.msra.mxu0 %v281_v2  ;;  %v294_v9 = vld [vmem:[%s1191_s1 + $0xd8] sm:$0xff]  ;;  %v293_v11 = vld [vmem:[%s1191_s1 + $0xd0] sm:$0xff] }
   0xf   : > { %456 = vmatpush.msra.mxu1 %v297_v3  ;;  %782 = vmatpush.msra.mxu3 %v297_v3  ;;  %v276_v12 = vld [vmem:[%s1191_s1 + $0x48] sm:$0xff]  ;;  %v275_v14 = vld [vmem:[%s1191_s1 + $0x40] sm:$0xff]  ;;  %v274_v16 = vld [vmem:[%s1191_s1 + $0x38] sm:$0xff] }
  0x10   : > { %767 = vmatpush.msra.mxu2 %v280_v4  ;;  %305 = vmatpush.msra.mxu0 %v280_v4  ;;  %v292_v13 = vld [vmem:[%s1191_s1 + $0xc8] sm:$0xff]  ;;  %v291_v15 = vld [vmem:[%s1191_s1 + $0xc0] sm:$0xff]  ;;  %v290_v17 = vld [vmem:[%s1191_s1 + $0xb8] sm:$0xff] }
  0x11   : > { %457 = vmatpush.msra.mxu1 %v296_v5  ;;  %783 = vmatpush.msra.mxu3 %v296_v5  ;;  %v273_v18 = vld [vmem:[%s1191_s1 + $0x30] sm:$0xff]  ;;  %v272_v20 = vld [vmem:[%s1191_s1 + $0x28] sm:$0xff]  ;;  %v271_v22 = vld [vmem:[%s1191_s1 + $0x20] sm:$0xff] }
  0x12   : > { %768 = vmatpush.msra.mxu2 %v279_v6  ;;  %306 = vmatpush.msra.mxu0 %v279_v6  ;;  %v289_v19 = vld [vmem:[%s1191_s1 + $0xb0] sm:$0xff]  ;;  %v288_v21 = vld [vmem:[%s1191_s1 + $0xa8] sm:$0xff]  ;;  %v287_v23 = vld [vmem:[%s1191_s1 + $0xa0] sm:$0xff] }
  0x13   : > { %458 = vmatpush.msra.mxu1 %v295_v7  ;;  %784 = vmatpush.msra.mxu3 %v295_v7  ;;  %v270_v24 = vld [vmem:[%s1191_s1 + $0x18] sm:$0xff]  ;;  %v269_v26 = vld [vmem:[%s1191_s1 + $0x10] sm:$0xff]  ;;  %v268_v28 = vld [vmem:[%s1191_s1 + $0x8] sm:$0xff] }
  0x14   : > { %769 = vmatpush.msra.mxu2 %v278_v8  ;;  %307 = vmatpush.msra.mxu0 %v278_v8  ;;  %v286_v25 = vld [vmem:[%s1191_s1 + $0x98] sm:$0xff]  ;;  %v285_v27 = vld [vmem:[%s1191_s1 + $0x90] sm:$0xff]  ;;  %v284_v29 = vld [vmem:[%s1191_s1 + $0x88] sm:$0xff] }
  0x15   : > { %459 = vmatpush.msra.mxu1 %v294_v9  ;;  %785 = vmatpush.msra.mxu3 %v294_v9  ;;  %v267_v30 = vld [vmem:[%s1191_s1] sm:$0xff]  ;;  %v178_v33 = vld [vmem:[%s940_s27 + $0x8] sm:$0xff]  ;;  %v224_v35 = vld [vmem:[%s940_s27 + $0x178] sm:$0xff] }
  0x16   : > { %770 = vmatpush.msra.mxu2 %v277_v10  ;;  %308 = vmatpush.msra.mxu0 %v277_v10  ;;  %v283_v31 = vld [vmem:[%s1191_s1 + $0x80] sm:$0xff]  ;;  %v223_v36 = vld [vmem:[%s940_s27 + $0x170] sm:$0xff]  ;;  %v180_v37 = vld [vmem:[%s940_s27 + $0x18] sm:$0xff] }
  0x17   : > { %460 = vmatpush.msra.mxu1 %v293_v11  ;;  %786 = vmatpush.msra.mxu3 %v293_v11  ;;  %v221_v32 = vld [vmem:[%s940_s27 + $0x160] sm:$0xff]  ;;  %v179_v38 = vld [vmem:[%s940_s27 + $0x10] sm:$0xff]  ;;  %v226_v39 = vld [vmem:[%s940_s27 + $0x188] sm:$0xff] }
  0x18   : > { %771 = vmatpush.msra.mxu2 %v276_v12  ;;  %309 = vmatpush.msra.mxu0 %v276_v12  ;;  %v177_v34 = vld [vmem:[%s940_s27] sm:$0xff]  ;;  %v182_v41 = vld [vmem:[%s940_s27 + $0x28] sm:$0xff]  ;;  %v228_v43 = vld [vmem:[%s940_s27 + $0x198] sm:$0xff] }
  0x19   : > { %461 = vmatpush.msra.mxu1 %v292_v13  ;;  %787 = vmatpush.msra.mxu3 %v292_v13  ;;  %v225_v40 = vld [vmem:[%s940_s27 + $0x180] sm:$0xff]  ;;  %v227_v44 = vld [vmem:[%s940_s27 + $0x190] sm:$0xff]  ;;  %v184_v45 = vld [vmem:[%s940_s27 + $0x38] sm:$0xff] }
  0x1a   : > { %772 = vmatpush.msra.mxu2 %v275_v14  ;;  %310 = vmatpush.msra.mxu0 %v275_v14  ;;  %v181_v42 = vld [vmem:[%s940_s27 + $0x20] sm:$0xff]  ;;  %v183_v46 = vld [vmem:[%s940_s27 + $0x30] sm:$0xff]  ;;  %v230_v47 = vld [vmem:[%s940_s27 + $0x1a8] sm:$0xff] }
  0x1b   : > { %462 = vmatpush.msra.mxu1 %v291_v15  ;;  %788 = vmatpush.msra.mxu3 %v291_v15  ;;  %v229_v48 = vld [vmem:[%s940_s27 + $0x1a0] sm:$0xff]  ;;  %v186_v49 = vld [vmem:[%s940_s27 + $0x48] sm:$0xff]  ;;  %v232_v51 = vld [vmem:[%s940_s27 + $0x1b8] sm:$0xff] }
  0x1c   : > { %773 = vmatpush.msra.mxu2 %v274_v16  ;;  %311 = vmatpush.msra.mxu0 %v274_v16  ;;  %v185_v50 = vld [vmem:[%s940_s27 + $0x40] sm:$0xff]  ;;  %v231_v52 = vld [vmem:[%s940_s27 + $0x1b0] sm:$0xff]  ;;  %v188_v53 = vld [vmem:[%s940_s27 + $0x58] sm:$0xff] }
  0x1d   : > { %463 = vmatpush.msra.mxu1 %v290_v17  ;;  %789 = vmatpush.msra.mxu3 %v290_v17  ;;  %v187_v54 = vld [vmem:[%s940_s27 + $0x50] sm:$0xff]  ;;  %v234_v55 = vld [vmem:[%s940_s27 + $0x1c8] sm:$0xff]  ;;  %v233_v56 = vld [vmem:[%s940_s27 + $0x1c0] sm:$0xff] }
  0x1e   : > { %774 = vmatpush.msra.mxu2 %v273_v18  ;;  %312 = vmatpush.msra.mxu0 %v273_v18  ;;  %v190_v57 = vld [vmem:[%s940_s27 + $0x68] sm:$0xff]  ;;  %v189_v58 = vld [vmem:[%s940_s27 + $0x60] sm:$0xff]  ;;  %v236_v59 = vld [vmem:[%s940_s27 + $0x1d8] sm:$0xff] }
  0x1f   : > { %464 = vmatpush.msra.mxu1 %v289_v19  ;;  %790 = vmatpush.msra.mxu3 %v289_v19  ;;  %v235_v60 = vld [vmem:[%s940_s27 + $0x1d0] sm:$0xff]  ;;  %v192_v61 = vld [vmem:[%s940_s27 + $0x78] sm:$0xff]  ;;  %v238_v63 = vld [vmem:[%s940_s27 + $0x1e8] sm:$0xff] }
  0x20   : > { %775 = vmatpush.msra.mxu2 %v272_v20  ;;  %313 = vmatpush.msra.mxu0 %v272_v20  ;;  %v191_v62 = vld [vmem:[%s940_s27 + $0x70] sm:$0xff]  ;;  %v237_v0 = vld [vmem:[%s940_s27 + $0x1e0] sm:$0xff]  ;;  %v194_v1 = vld [vmem:[%s940_s27 + $0x88] sm:$0xff] }
  0x21   : > { %465 = vmatpush.msra.mxu1 %v288_v21  ;;  %791 = vmatpush.msra.mxu3 %v288_v21  ;;  %v193_v2 = vld [vmem:[%s940_s27 + $0x80] sm:$0xff]  ;;  %v240_v3 = vld [vmem:[%s940_s27 + $0x1f8] sm:$0xff]  ;;  %v239_v4 = vld [vmem:[%s940_s27 + $0x1f0] sm:$0xff] }
  0x22   : > { %776 = vmatpush.msra.mxu2 %v271_v22  ;;  %314 = vmatpush.msra.mxu0 %v271_v22  ;;  %v196_v5 = vld [vmem:[%s940_s27 + $0x98] sm:$0xff]  ;;  %v195_v6 = vld [vmem:[%s940_s27 + $0x90] sm:$0xff]  ;;  %v242_v7 = vld [vmem:[%s940_s27 + $0x208] sm:$0xff] }
  0x23   : > { %466 = vmatpush.msra.mxu1 %v287_v23  ;;  %792 = vmatpush.msra.mxu3 %v287_v23  ;;  %v241_v8 = vld [vmem:[%s940_s27 + $0x200] sm:$0xff]  ;;  %v198_v9 = vld [vmem:[%s940_s27 + $0xa8] sm:$0xff]  ;;  %v244_v11 = vld [vmem:[%s940_s27 + $0x218] sm:$0xff] }
  0x24   : > { %777 = vmatpush.msra.mxu2 %v270_v24  ;;  %315 = vmatpush.msra.mxu0 %v270_v24  ;;  %v197_v10 = vld [vmem:[%s940_s27 + $0xa0] sm:$0xff]  ;;  %v243_v12 = vld [vmem:[%s940_s27 + $0x210] sm:$0xff]  ;;  %v200_v13 = vld [vmem:[%s940_s27 + $0xb8] sm:$0xff] }
  0x25   : > { %467 = vmatpush.msra.mxu1 %v286_v25  ;;  %793 = vmatpush.msra.mxu3 %v286_v25  ;;  %v199_v14 = vld [vmem:[%s940_s27 + $0xb0] sm:$0xff]  ;;  %v246_v15 = vld [vmem:[%s940_s27 + $0x228] sm:$0xff]  ;;  %v245_v16 = vld [vmem:[%s940_s27 + $0x220] sm:$0xff] }
  0x26   : > { %778 = vmatpush.msra.mxu2 %v269_v26  ;;  %316 = vmatpush.msra.mxu0 %v269_v26  ;;  %v202_v17 = vld [vmem:[%s940_s27 + $0xc8] sm:$0xff]  ;;  %v201_v18 = vld [vmem:[%s940_s27 + $0xc0] sm:$0xff]  ;;  %v248_v19 = vld [vmem:[%s940_s27 + $0x238] sm:$0xff] }
  0x27   : > { %468 = vmatpush.msra.mxu1 %v285_v27  ;;  %794 = vmatpush.msra.mxu3 %v285_v27  ;;  %v247_v20 = vld [vmem:[%s940_s27 + $0x230] sm:$0xff]  ;;  %v204_v21 = vld [vmem:[%s940_s27 + $0xd8] sm:$0xff]  ;;  %v250_v23 = vld [vmem:[%s940_s27 + $0x248] sm:$0xff] }
  0x28   : > { %779 = vmatpush.msra.mxu2 %v268_v28  ;;  %317 = vmatpush.msra.mxu0 %v268_v28  ;;  %v203_v22 = vld [vmem:[%s940_s27 + $0xd0] sm:$0xff]  ;;  %v249_v24 = vld [vmem:[%s940_s27 + $0x240] sm:$0xff]  ;;  %v206_v25 = vld [vmem:[%s940_s27 + $0xe8] sm:$0xff] }
  0x29   : > { %469 = vmatpush.msra.mxu1 %v284_v29  ;;  %795 = vmatpush.msra.mxu3 %v284_v29  ;;  %v205_v26 = vld [vmem:[%s940_s27 + $0xe0] sm:$0xff]  ;;  %v252_v27 = vld [vmem:[%s940_s27 + $0x258] sm:$0xff]  ;;  %v251_v28 = vld [vmem:[%s940_s27 + $0x250] sm:$0xff] }
  0x2a   : > { %780 = vmatpush.msra.mxu2 %v267_v30  ;;  %318 = vmatpush.msra.mxu0 %v267_v30  ;;  %v208_v29 = vld [vmem:[%s940_s27 + $0xf8] sm:$0xff]  ;;  %v207_v30 = vld [vmem:[%s940_s27 + $0xf0] sm:$0xff] }
  0x2b   : > { %470 = vmatpush.msra.mxu1 %v283_v31  ;;  %385 = vmatmul.f32.vlgmr.msra.gmra.mxu2 %v221_v32  ;;  %v1015_v32 = vld [vmem:[%s1192_s2] ss:$0 sm:$0xff] }
  0x2c   : > { %471 = vmatmul.f32.vlgmr.msra.gmra.mxu1 %v178_v33  ;;  %796 = vmatpush.msra.mxu3 %v283_v31  ;;  %v254_v31 = vld [vmem:[%s940_s27 + $0x268] sm:$0xff] }
  0x2d   : > { %319 = vmatmul.f32.vlgmr.msra.gmra.mxu0 %v177_v34  ;;  %540 = vmatmul.f32.vlgmr.msra.gmra.mxu3 %v224_v35  ;;  %v253_v34 = vld [vmem:[%s940_s27 + $0x260] sm:$0xff]  ;;  %v210_v35 = vld [vmem:[%s940_s27 + $0x108] sm:$0xff] }
  0x33   : > { %388 = vmatmul.f32.gmra.mxu2 %v223_v36 }
  0x34   : > { %474 = vmatmul.f32.gmra.mxu1 %v180_v37  ;;  %v209_v37 = vld [vmem:[%s940_s27 + $0x100] sm:$0xff] }
  0x35   : > { %322 = vmatmul.f32.gmra.mxu0 %v179_v38  ;;  %543 = vmatmul.f32.gmra.mxu3 %v226_v39  ;;  %v256_v38 = vld [vmem:[%s940_s27 + $0x278] sm:$0xff] }
  0x3b   : > { %391 = vmatmul.f32.gmra.mxu2 %v225_v40 }
  0x3c   : > { %477 = vmatmul.f32.gmra.mxu1 %v182_v41 }
  0x3d   : > { %325 = vmatmul.f32.gmra.mxu0 %v181_v42  ;;  %546 = vmatmul.f32.gmra.mxu3 %v228_v43 }
  0x43   : > { %394 = vmatmul.f32.gmra.mxu2 %v227_v44  ;;  %v255_v44 = vld [vmem:[%s940_s27 + $0x270] sm:$0xff] }
  0x44   : > { %480 = vmatmul.f32.gmra.mxu1 %v184_v45  ;;  %v212_v45 = vld [vmem:[%s940_s27 + $0x118] sm:$0xff] }
  0x45   : > { %328 = vmatmul.f32.gmra.mxu0 %v183_v46  ;;  %549 = vmatmul.f32.gmra.mxu3 %v230_v47 }
  0x4b   : > { %397 = vmatmul.f32.gmra.mxu2 %v229_v48  ;;  %v211_v48 = vld [vmem:[%s940_s27 + $0x110] sm:$0xff] }
  0x4c   : > { %483 = vmatmul.f32.gmra.mxu1 %v186_v49  ;;  %v258_v49 = vld [vmem:[%s940_s27 + $0x288] sm:$0xff] }
  0x4d   : > { %331 = vmatmul.f32.gmra.mxu0 %v185_v50  ;;  %552 = vmatmul.f32.gmra.mxu3 %v232_v51 }
  0x53   : > { %400 = vmatmul.f32.gmra.mxu2 %v231_v52 }
  0x54   : > { %486 = vmatmul.f32.gmra.mxu1 %v188_v53 }
  0x55   : > { %334 = vmatmul.f32.gmra.mxu0 %v187_v54  ;;  %555 = vmatmul.f32.gmra.mxu3 %v234_v55 }
  0x5b   : > { %403 = vmatmul.f32.gmra.mxu2 %v233_v56  ;;  %v257_v56 = vld [vmem:[%s940_s27 + $0x280] sm:$0xff] }
  0x5c   : > { %489 = vmatmul.f32.gmra.mxu1 %v190_v57  ;;  %v214_v57 = vld [vmem:[%s940_s27 + $0x128] sm:$0xff] }
  0x5d   : > { %337 = vmatmul.f32.gmra.mxu0 %v189_v58  ;;  %558 = vmatmul.f32.gmra.mxu3 %v236_v59 }
  0x63   : > { %406 = vmatmul.f32.gmra.mxu2 %v235_v60 }
  0x64   : > { %492 = vmatmul.f32.gmra.mxu1 %v192_v61  ;;  %v213_v61 = vld [vmem:[%s940_s27 + $0x120] sm:$0xff] }
  0x65   : > { %340 = vmatmul.f32.gmra.mxu0 %v191_v62  ;;  %561 = vmatmul.f32.gmra.mxu3 %v238_v63  ;;  %v260_v62 = vld [vmem:[%s940_s27 + $0x298] sm:$0xff] }
  0x6b   : > { %409 = vmatmul.f32.gmra.mxu2 %v237_v0 }
  0x6c   : > { %495 = vmatmul.f32.gmra.mxu1 %v194_v1 }
  0x6d   : > { %343 = vmatmul.f32.gmra.mxu0 %v193_v2  ;;  %564 = vmatmul.f32.gmra.mxu3 %v240_v3 }
  0x73   : > { %412 = vmatmul.f32.gmra.mxu2 %v239_v4 }
  0x74   : > { %498 = vmatmul.f32.gmra.mxu1 %v196_v5 }
  0x75   : > { %346 = vmatmul.f32.gmra.mxu0 %v195_v6  ;;  %567 = vmatmul.f32.gmra.mxu3 %v242_v7  ;;  %v259_v6 = vld [vmem:[%s940_s27 + $0x290] sm:$0xff]  ;;  %v216_v7 = vld [vmem:[%s940_s27 + $0x138] sm:$0xff] }
  0x7b   : > { %415 = vmatmul.f32.gmra.mxu2 %v241_v8 }
  0x7c   : > { %501 = vmatmul.f32.gmra.mxu1 %v198_v9 }
  0x7d   : > { %349 = vmatmul.f32.gmra.mxu0 %v197_v10  ;;  %570 = vmatmul.f32.gmra.mxu3 %v244_v11  ;;  %v215_v11 = vld [vmem:[%s940_s27 + $0x130] sm:$0xff] }
  0x83   : > { %418 = vmatmul.f32.gmra.mxu2 %v243_v12  ;;  %v262_v12 = vld [vmem:[%s940_s27 + $0x2a8] sm:$0xff] }
  0x84   : > { %504 = vmatmul.f32.gmra.mxu1 %v200_v13 }
  0x85   : > { %352 = vmatmul.f32.gmra.mxu0 %v199_v14  ;;  %573 = vmatmul.f32.gmra.mxu3 %v246_v15 }
  0x8b   : > { %421 = vmatmul.f32.gmra.mxu2 %v245_v16 }
  0x8c   : > { %507 = vmatmul.f32.gmra.mxu1 %v202_v17 }
  0x8d   : > { %355 = vmatmul.f32.gmra.mxu0 %v201_v18  ;;  %576 = vmatmul.f32.gmra.mxu3 %v248_v19 }
  0x93   : > { %424 = vmatmul.f32.gmra.mxu2 %v247_v20  ;;  %v261_v20 = vld [vmem:[%s940_s27 + $0x2a0] sm:$0xff] }
  0x94   : > { %510 = vmatmul.f32.gmra.mxu1 %v204_v21  ;;  %v218_v21 = vld [vmem:[%s940_s27 + $0x148] sm:$0xff] }
  0x95   : > { %358 = vmatmul.f32.gmra.mxu0 %v203_v22  ;;  %579 = vmatmul.f32.gmra.mxu3 %v250_v23 }
  0x9b   : > { %427 = vmatmul.f32.gmra.mxu2 %v249_v24 }
  0x9c   : > { %513 = vmatmul.f32.gmra.mxu1 %v206_v25  ;;  %v217_v25 = vld [vmem:[%s940_s27 + $0x140] sm:$0xff] }
  0x9d   : > { %361 = vmatmul.f32.gmra.mxu0 %v205_v26  ;;  %582 = vmatmul.f32.gmra.mxu3 %v252_v27  ;;  %v264_v26 = vld [vmem:[%s940_s27 + $0x2b8] sm:$0xff] }
  0xa3   : > { %430 = vmatmul.f32.gmra.mxu2 %v251_v28 }
  0xa4   : > { %516 = vmatmul.f32.gmra.mxu1 %v208_v29 }
  0xa5   : > { %364 = vmatmul.f32.gmra.mxu0 %v207_v30  ;;  %585 = vmatmul.f32.gmra.mxu3 %v254_v31 }
  0xa9   : > { %v472_v33 = vpop.f32.mrf.mxu1 }
  0xaa   : > { %v320_v36 = vpop.f32.mrf.mxu0 }
  0xab   : > { %433 = vmatmul.f32.gmra.mxu2 %v253_v34  ;;  %v321_v39 = vadd.f32 %v1015_v32, %v320_v36  ;;  %v220_v36 = vld [vmem:[%s940_s27 + $0x158] sm:$0xff] }
  0xac   : > { %519 = vmatmul.f32.gmra.mxu1 %v210_v35  ;;  %v263_v35 = vld [vmem:[%s940_s27 + $0x2b0] sm:$0xff] }
  0xad   : > { %v473_v40 = vadd.f32 %v472_v33, %v321_v39  ;;  %367 = vmatmul.f32.gmra.mxu0 %v209_v37  ;;  %588 = vmatmul.f32.gmra.mxu3 %v256_v38 }
  0xae   : > { %v1028_v41 = vpop.f32.mrf.mxu2 }
  0xaf   : > { %v607_v42 = vmax.f32 %v473_v40, 0.0  ;;  %v219_v40 = vld [vmem:[%s940_s27 + $0x150] sm:$0xff] }
  0xb0   : > { %v541_v46 = vpop.f32.mrf.mxu3 }
  0xb1   : > { %v475_v43 = vpop.f32.mrf.mxu1  ;;  %653 = vst.msk [vmem:[%s1026_s10] sm:$0xff] %vm652_vm0, %v607_v42  ;;  %v266_v42 = vld [vmem:[%s940_s27 + $0x2c8] sm:$0xff] }
  0xb2   : > { %v323_v47 = vpop.f32.mrf.mxu0 }
  0xb3   : > { %436 = vmatmul.f32.gmra.mxu2 %v255_v44  ;;  %v324_v50 = vadd.f32 %v1015_v32, %v323_v47 }
  0xb4   : > { %522 = vmatmul.f32.gmra.mxu1 %v212_v45 }
  0xb5   : > { %v476_v51 = vadd.f32 %v475_v43, %v324_v50  ;;  %370 = vmatmul.f32.gmra.mxu0 %v211_v48  ;;  %591 = vmatmul.f32.gmra.mxu3 %v258_v49  ;;  %v265_v50 = vld [vmem:[%s940_s27 + $0x2c0] sm:$0xff] }
  0xb6   : > { %v389_v52 = vpop.f32.mrf.mxu2 }
  0xb7   : > { %v608_v53 = vmax.f32 %v476_v51, 0.0  ;;  %v390_v54 = vadd.f32 %v1015_v32, %v389_v52  ;;  %v222_v51 = vld [vmem:[%s940_s27 + $0x168] sm:$0xff] }
  0xb8   : > { %v544_v58 = vpop.f32.mrf.mxu3 }
  0xb9   : > { %v478_v55 = vpop.f32.mrf.mxu1  ;;  %654 = vst.msk [vmem:[%s1026_s10 + $0x8] sm:$0xff] %vm652_vm0, %v608_v53  ;;  %v542_v59 = vadd.f32 %v541_v46, %v390_v54 }
  0xba   : > { %v326_v60 = vpop.f32.mrf.mxu0 }
  0xbb   : > { %v630_v63 = vmax.f32 %v542_v59, 0.0  ;;  %439 = vmatmul.f32.gmra.mxu2 %v257_v56  ;;  %v327_v0 = vadd.f32 %v1015_v32, %v326_v60 }
  0xbc   : > { %525 = vmatmul.f32.gmra.mxu1 %v214_v57 }
  0xbd   : > { %676 = vst.msk [vmem:[%s1026_s10 + $0xb8] sm:$0xff] %vm652_vm0, %v630_v63  ;;  %v479_v1 = vadd.f32 %v478_v55, %v327_v0  ;;  %373 = vmatmul.f32.gmra.mxu0 %v213_v61  ;;  %594 = vmatmul.f32.gmra.mxu3 %v260_v62 }
  0xbe   : > { %v392_v2 = vpop.f32.mrf.mxu2 }
  0xbf   : > { %v609_v3 = vmax.f32 %v479_v1, 0.0  ;;  %v393_v4 = vadd.f32 %v1015_v32, %v392_v2 }
  0xc0   : > { %v547_v8 = vpop.f32.mrf.mxu3 }
  0xc1   : > { %v481_v5 = vpop.f32.mrf.mxu1  ;;  %655 = vst.msk [vmem:[%s1026_s10 + $0x10] sm:$0xff] %vm652_vm0, %v609_v3  ;;  %v545_v9 = vadd.f32 %v544_v58, %v393_v4 }
  0xc2   : > { %v329_v10 = vpop.f32.mrf.mxu0 }
  0xc3   : > { %v631_v13 = vmax.f32 %v545_v9, 0.0  ;;  %442 = vmatmul.f32.gmra.mxu2 %v259_v6  ;;  %v330_v14 = vadd.f32 %v1015_v32, %v329_v10 }
  0xc4   : > { %528 = vmatmul.f32.gmra.mxu1 %v216_v7 }
  0xc5   : > { %677 = vst.msk [vmem:[%s1026_s10 + $0xc0] sm:$0xff] %vm652_vm0, %v631_v13  ;;  %v482_v15 = vadd.f32 %v481_v5, %v330_v14  ;;  %376 = vmatmul.f32.gmra.mxu0 %v215_v11  ;;  %597 = vmatmul.f32.gmra.mxu3 %v262_v12 }
  0xc6   : > { %v395_v16 = vpop.f32.mrf.mxu2 }
  0xc7   : > { %v610_v17 = vmax.f32 %v482_v15, 0.0  ;;  %v396_v18 = vadd.f32 %v1015_v32, %v395_v16 }
  0xc8   : > { %v550_v22 = vpop.f32.mrf.mxu3 }
  0xc9   : > { %v484_v19 = vpop.f32.mrf.mxu1  ;;  %656 = vst.msk [vmem:[%s1026_s10 + $0x18] sm:$0xff] %vm652_vm0, %v610_v17  ;;  %v548_v23 = vadd.f32 %v547_v8, %v396_v18 }
  0xca   : > { %v332_v24 = vpop.f32.mrf.mxu0 }
  0xcb   : > { %v632_v27 = vmax.f32 %v548_v23, 0.0  ;;  %445 = vmatmul.f32.gmra.mxu2 %v261_v20  ;;  %v333_v28 = vadd.f32 %v1015_v32, %v332_v24 }
  0xcc   : > { %531 = vmatmul.f32.gmra.mxu1 %v218_v21 }
  0xcd   : > { %678 = vst.msk [vmem:[%s1026_s10 + $0xc8] sm:$0xff] %vm652_vm0, %v632_v27  ;;  %v485_v29 = vadd.f32 %v484_v19, %v333_v28  ;;  %379 = vmatmul.f32.gmra.mxu0 %v217_v25  ;;  %600 = vmatmul.f32.gmra.mxu3 %v264_v26 }
  0xce   : > { %v398_v30 = vpop.f32.mrf.mxu2 }
  0xcf   : > { %v611_v31 = vmax.f32 %v485_v29, 0.0  ;;  %v399_v33 = vadd.f32 %v1015_v32, %v398_v30 }
  0xd0   : > { %v553_v37 = vpop.f32.mrf.mxu3 }
  0xd1   : > { %v487_v34 = vpop.f32.mrf.mxu1  ;;  %657 = vst.msk [vmem:[%s1026_s10 + $0x20] sm:$0xff] %vm652_vm0, %v611_v31  ;;  %v551_v38 = vadd.f32 %v550_v22, %v399_v33 }
  0xd2   : > { %v335_v39 = vpop.f32.mrf.mxu0 }
  0xd3   : > { %v633_v43 = vmax.f32 %v551_v38, 0.0  ;;  %448 = vmatmul.f32.gmra.mxu2 %v263_v35  ;;  %v336_v44 = vadd.f32 %v1015_v32, %v335_v39 }
  0xd4   : > { %534 = vmatmul.f32.gmra.mxu1 %v220_v36 }
  0xd5   : > { %679 = vst.msk [vmem:[%s1026_s10 + $0xd0] sm:$0xff] %vm652_vm0, %v633_v43  ;;  %v488_v45 = vadd.f32 %v487_v34, %v336_v44  ;;  %382 = vmatmul.f32.gmra.mxu0 %v219_v40  ;;  %603 = vmatmul.f32.gmra.mxu3 %v266_v42 }
  0xd6   : > { %v401_v46 = vpop.f32.mrf.mxu2 }
  0xd7   : > { %v612_v47 = vmax.f32 %v488_v45, 0.0  ;;  %v402_v48 = vadd.f32 %v1015_v32, %v401_v46 }
  0xd8   : > { %v556_v52 = vpop.f32.mrf.mxu3 }
  0xd9   : > { %v490_v49 = vpop.f32.mrf.mxu1  ;;  %658 = vst.msk [vmem:[%s1026_s10 + $0x28] sm:$0xff] %vm652_vm0, %v612_v47  ;;  %v554_v53 = vadd.f32 %v553_v37, %v402_v48 }
  0xda   : > { %v338_v54 = vpop.f32.mrf.mxu0 }
  0xdb   : > { %v634_v55 = vmax.f32 %v554_v53, 0.0  ;;  %451 = vmatmul.f32.gmra.mxu2 %v265_v50  ;;  %v339_v56 = vadd.f32 %v1015_v32, %v338_v54 }
  0xdc   : > { %537 = vmatmul.f32.gmra.mxu1 %v222_v51 }
  0xdd   : > { %680 = vst.msk [vmem:[%s1026_s10 + $0xd8] sm:$0xff] %vm652_vm0, %v634_v55  ;;  %v491_v57 = vadd.f32 %v490_v49, %v339_v56 }
  0xde   : > { %v404_v58 = vpop.f32.mrf.mxu2 }
  0xdf   : > { %v613_v59 = vmax.f32 %v491_v57, 0.0  ;;  %v405_v60 = vadd.f32 %v1015_v32, %v404_v58 }
  0xe0   : > { %v559_v62 = vpop.f32.mrf.mxu3 }
  0xe1   : > { %v493_v61 = vpop.f32.mrf.mxu1  ;;  %659 = vst.msk [vmem:[%s1026_s10 + $0x30] sm:$0xff] %vm652_vm0, %v613_v59  ;;  %v557_v63 = vadd.f32 %v556_v52, %v405_v60 }
  0xe2   : > { %v341_v0 = vpop.f32.mrf.mxu0 }
  0xe3   : > { %v635_v1 = vmax.f32 %v557_v63, 0.0  ;;  %v342_v2 = vadd.f32 %v1015_v32, %v341_v0 }
  0xe5   : > { %681 = vst.msk [vmem:[%s1026_s10 + $0xe0] sm:$0xff] %vm652_vm0, %v635_v1  ;;  %v494_v3 = vadd.f32 %v493_v61, %v342_v2 }
  0xe6   : > { %v407_v4 = vpop.f32.mrf.mxu2 }
  0xe7   : > { %v614_v5 = vmax.f32 %v494_v3, 0.0  ;;  %v408_v6 = vadd.f32 %v1015_v32, %v407_v4 }
  0xe8   : > { %v562_v8 = vpop.f32.mrf.mxu3 }
  0xe9   : > { %v496_v7 = vpop.f32.mrf.mxu1  ;;  %660 = vst.msk [vmem:[%s1026_s10 + $0x38] sm:$0xff] %vm652_vm0, %v614_v5  ;;  %v560_v9 = vadd.f32 %v559_v62, %v408_v6 }
  0xea   : > { %v344_v10 = vpop.f32.mrf.mxu0 }
  0xeb   : > { %v636_v11 = vmax.f32 %v560_v9, 0.0  ;;  %v345_v12 = vadd.f32 %v1015_v32, %v344_v10 }
  0xed   : > { %682 = vst.msk [vmem:[%s1026_s10 + $0xe8] sm:$0xff] %vm652_vm0, %v636_v11  ;;  %v497_v13 = vadd.f32 %v496_v7, %v345_v12 }
  0xee   : > { %v410_v14 = vpop.f32.mrf.mxu2 }
  0xef   : > { %v615_v15 = vmax.f32 %v497_v13, 0.0  ;;  %v411_v16 = vadd.f32 %v1015_v32, %v410_v14 }
  0xf0   : > { %v565_v18 = vpop.f32.mrf.mxu3 }
  0xf1   : > { %v499_v17 = vpop.f32.mrf.mxu1  ;;  %661 = vst.msk [vmem:[%s1026_s10 + $0x40] sm:$0xff] %vm652_vm0, %v615_v15  ;;  %v563_v19 = vadd.f32 %v562_v8, %v411_v16 }
  0xf2   : > { %v347_v20 = vpop.f32.mrf.mxu0 }
  0xf3   : > { %v637_v21 = vmax.f32 %v563_v19, 0.0  ;;  %v348_v22 = vadd.f32 %v1015_v32, %v347_v20 }
  0xf5   : > { %683 = vst.msk [vmem:[%s1026_s10 + $0xf0] sm:$0xff] %vm652_vm0, %v637_v21  ;;  %v500_v23 = vadd.f32 %v499_v17, %v348_v22 }
  0xf6   : > { %v413_v24 = vpop.f32.mrf.mxu2 }
  0xf7   : > { %v616_v25 = vmax.f32 %v500_v23, 0.0  ;;  %v414_v26 = vadd.f32 %v1015_v32, %v413_v24 }
  0xf8   : > { %v568_v28 = vpop.f32.mrf.mxu3 }
  0xf9   : > { %v502_v27 = vpop.f32.mrf.mxu1  ;;  %662 = vst.msk [vmem:[%s1026_s10 + $0x48] sm:$0xff] %vm652_vm0, %v616_v25  ;;  %v566_v29 = vadd.f32 %v565_v18, %v414_v26 }
  0xfa   : > { %v350_v30 = vpop.f32.mrf.mxu0 }
  0xfb   : > { %v638_v31 = vmax.f32 %v566_v29, 0.0  ;;  %v351_v33 = vadd.f32 %v1015_v32, %v350_v30 }
  0xfd   : > { %684 = vst.msk [vmem:[%s1026_s10 + $0xf8] sm:$0xff] %vm652_vm0, %v638_v31  ;;  %v503_v34 = vadd.f32 %v502_v27, %v351_v33 }
  0xfe   : > { %v416_v35 = vpop.f32.mrf.mxu2 }
  0xff   : > { %v617_v36 = vmax.f32 %v503_v34, 0.0  ;;  %v417_v37 = vadd.f32 %v1015_v32, %v416_v35 }
 0x100   : > { %v571_v39 = vpop.f32.mrf.mxu3 }
 0x101   : > { %v505_v38 = vpop.f32.mrf.mxu1  ;;  %663 = vst.msk [vmem:[%s1026_s10 + $0x50] sm:$0xff] %vm652_vm0, %v617_v36  ;;  %v569_v40 = vadd.f32 %v568_v28, %v417_v37 }
 0x102   : > { %v353_v42 = vpop.f32.mrf.mxu0 }
 0x103   : > { %v639_v43 = vmax.f32 %v569_v40, 0.0  ;;  %v354_v44 = vadd.f32 %v1015_v32, %v353_v42 }
 0x105   : > { %685 = vst.msk [vmem:[%s1026_s10 + $0x100] sm:$0xff] %vm652_vm0, %v639_v43  ;;  %v506_v45 = vadd.f32 %v505_v38, %v354_v44 }
 0x106   : > { %v419_v46 = vpop.f32.mrf.mxu2 }
 0x107   : > { %v618_v47 = vmax.f32 %v506_v45, 0.0  ;;  %v420_v48 = vadd.f32 %v1015_v32, %v419_v46 }
 0x108   : > { %v574_v50 = vpop.f32.mrf.mxu3 }
 0x109   : > { %v508_v49 = vpop.f32.mrf.mxu1  ;;  %664 = vst.msk [vmem:[%s1026_s10 + $0x58] sm:$0xff] %vm652_vm0, %v618_v47  ;;  %v572_v51 = vadd.f32 %v571_v39, %v420_v48 }
 0x10a   : > { %v356_v52 = vpop.f32.mrf.mxu0 }
 0x10b   : > { %v640_v53 = vmax.f32 %v572_v51, 0.0  ;;  %v357_v54 = vadd.f32 %v1015_v32, %v356_v52 }
 0x10d   : > { %686 = vst.msk [vmem:[%s1026_s10 + $0x108] sm:$0xff] %vm652_vm0, %v640_v53  ;;  %v509_v55 = vadd.f32 %v508_v49, %v357_v54 }
 0x10e   : > { %v422_v56 = vpop.f32.mrf.mxu2 }
 0x10f   : > { %v619_v57 = vmax.f32 %v509_v55, 0.0  ;;  %v423_v58 = vadd.f32 %v1015_v32, %v422_v56 }
 0x110   : > { %v577_v60 = vpop.f32.mrf.mxu3 }
 0x111   : > { %v511_v59 = vpop.f32.mrf.mxu1  ;;  %665 = vst.msk [vmem:[%s1026_s10 + $0x60] sm:$0xff] %vm652_vm0, %v619_v57  ;;  %v575_v61 = vadd.f32 %v574_v50, %v423_v58 }
 0x112   : > { %v359_v62 = vpop.f32.mrf.mxu0 }
 0x113   : > { %v641_v63 = vmax.f32 %v575_v61, 0.0  ;;  %v360_v0 = vadd.f32 %v1015_v32, %v359_v62 }
 0x115   : > { %687 = vst.msk [vmem:[%s1026_s10 + $0x110] sm:$0xff] %vm652_vm0, %v641_v63  ;;  %v512_v1 = vadd.f32 %v511_v59, %v360_v0 }
 0x116   : > { %v425_v2 = vpop.f32.mrf.mxu2 }
 0x117   : > { %v620_v3 = vmax.f32 %v512_v1, 0.0  ;;  %v426_v4 = vadd.f32 %v1015_v32, %v425_v2 }
 0x118   : > { %v580_v6 = vpop.f32.mrf.mxu3 }
 0x119   : > { %v514_v5 = vpop.f32.mrf.mxu1  ;;  %666 = vst.msk [vmem:[%s1026_s10 + $0x68] sm:$0xff] %vm652_vm0, %v620_v3  ;;  %v578_v7 = vadd.f32 %v577_v60, %v426_v4 }
 0x11a   : > { %v362_v8 = vpop.f32.mrf.mxu0 }
 0x11b   : > { %v642_v9 = vmax.f32 %v578_v7, 0.0  ;;  %v363_v10 = vadd.f32 %v1015_v32, %v362_v8 }
 0x11d   : > { %688 = vst.msk [vmem:[%s1026_s10 + $0x118] sm:$0xff] %vm652_vm0, %v642_v9  ;;  %v515_v11 = vadd.f32 %v514_v5, %v363_v10 }
 0x11e   : > { %v428_v12 = vpop.f32.mrf.mxu2 }
 0x11f   : > { %v621_v13 = vmax.f32 %v515_v11, 0.0  ;;  %v429_v14 = vadd.f32 %v1015_v32, %v428_v12 }
 0x120   : > { %v583_v16 = vpop.f32.mrf.mxu3 }
 0x121   : > { %v517_v15 = vpop.f32.mrf.mxu1  ;;  %667 = vst.msk [vmem:[%s1026_s10 + $0x70] sm:$0xff] %vm652_vm0, %v621_v13  ;;  %v581_v17 = vadd.f32 %v580_v6, %v429_v14 }
 0x122   : > { %v365_v18 = vpop.f32.mrf.mxu0 }
 0x123   : > { %v643_v19 = vmax.f32 %v581_v17, 0.0  ;;  %v366_v20 = vadd.f32 %v1015_v32, %v365_v18 }
 0x125   : > { %689 = vst.msk [vmem:[%s1026_s10 + $0x120] sm:$0xff] %vm652_vm0, %v643_v19  ;;  %v518_v21 = vadd.f32 %v517_v15, %v366_v20 }
 0x126   : > { %v431_v22 = vpop.f32.mrf.mxu2 }
 0x127   : > { %v622_v23 = vmax.f32 %v518_v21, 0.0  ;;  %v432_v24 = vadd.f32 %v1015_v32, %v431_v22  ;;  %v387_v21 = vadd.f32 %v1015_v32, %v1028_v41 }
 0x128   : > { %v586_v26 = vpop.f32.mrf.mxu3 }
 0x129   : > { %v520_v25 = vpop.f32.mrf.mxu1  ;;  %668 = vst.msk [vmem:[%s1026_s10 + $0x78] sm:$0xff] %vm652_vm0, %v622_v23  ;;  %v584_v27 = vadd.f32 %v583_v16, %v432_v24 }
 0x12a   : > { %v368_v28 = vpop.f32.mrf.mxu0 }
 0x12b   : > { %v644_v29 = vmax.f32 %v584_v27, 0.0  ;;  %v369_v30 = vadd.f32 %v1015_v32, %v368_v28 }
 0x12d   : > { %690 = vst.msk [vmem:[%s1026_s10 + $0x128] sm:$0xff] %vm652_vm0, %v644_v29  ;;  %v521_v31 = vadd.f32 %v520_v25, %v369_v30 }
 0x12e   : > { %v434_v33 = vpop.f32.mrf.mxu2 }
 0x12f   : > { %v623_v34 = vmax.f32 %v521_v31, 0.0  ;;  %v435_v35 = vadd.f32 %v1015_v32, %v434_v33 }
 0x130   : > { %v589_v37 = vpop.f32.mrf.mxu3 }
 0x131   : > { %v523_v36 = vpop.f32.mrf.mxu1  ;;  %669 = vst.msk [vmem:[%s1026_s10 + $0x80] sm:$0xff] %vm652_vm0, %v623_v34  ;;  %v587_v38 = vadd.f32 %v586_v26, %v435_v35 }
 0x132   : > { %v371_v39 = vpop.f32.mrf.mxu0 }
 0x133   : > { %v645_v40 = vmax.f32 %v587_v38, 0.0  ;;  %v372_v42 = vadd.f32 %v1015_v32, %v371_v39 }
 0x135   : > { %691 = vst.msk [vmem:[%s1026_s10 + $0x130] sm:$0xff] %vm652_vm0, %v645_v40  ;;  %v524_v43 = vadd.f32 %v523_v36, %v372_v42 }
 0x136   : > { %v437_v44 = vpop.f32.mrf.mxu2 }
 0x137   : > { %v624_v45 = vmax.f32 %v524_v43, 0.0  ;;  %v438_v46 = vadd.f32 %v1015_v32, %v437_v44 }
 0x138   : > { %v592_v48 = vpop.f32.mrf.mxu3 }
 0x139   : > { %v526_v47 = vpop.f32.mrf.mxu1  ;;  %670 = vst.msk [vmem:[%s1026_s10 + $0x88] sm:$0xff] %vm652_vm0, %v624_v45  ;;  %v590_v49 = vadd.f32 %v589_v37, %v438_v46 }
 0x13a   : > { %v374_v50 = vpop.f32.mrf.mxu0 }
 0x13b   : > { %v646_v51 = vmax.f32 %v590_v49, 0.0  ;;  %v375_v52 = vadd.f32 %v1015_v32, %v374_v50 }
 0x13d   : > { %692 = vst.msk [vmem:[%s1026_s10 + $0x138] sm:$0xff] %vm652_vm0, %v646_v51  ;;  %v527_v53 = vadd.f32 %v526_v47, %v375_v52 }
 0x13e   : > { %v440_v54 = vpop.f32.mrf.mxu2 }
 0x13f   : > { %v625_v55 = vmax.f32 %v527_v53, 0.0  ;;  %v441_v56 = vadd.f32 %v1015_v32, %v440_v54 }
 0x140   : > { %v595_v58 = vpop.f32.mrf.mxu3 }
 0x141   : > { %v529_v57 = vpop.f32.mrf.mxu1  ;;  %671 = vst.msk [vmem:[%s1026_s10 + $0x90] sm:$0xff] %vm652_vm0, %v625_v55  ;;  %v593_v59 = vadd.f32 %v592_v48, %v441_v56 }
 0x142   : > { %v377_v60 = vpop.f32.mrf.mxu0 }
 0x143   : > { %v647_v61 = vmax.f32 %v593_v59, 0.0  ;;  %v378_v62 = vadd.f32 %v1015_v32, %v377_v60 }
 0x145   : > { %693 = vst.msk [vmem:[%s1026_s10 + $0x140] sm:$0xff] %vm652_vm0, %v647_v61  ;;  %v530_v63 = vadd.f32 %v529_v57, %v378_v62 }
 0x146   : > { %v443_v0 = vpop.f32.mrf.mxu2 }
 0x147   : > { %v626_v1 = vmax.f32 %v530_v63, 0.0  ;;  %v444_v2 = vadd.f32 %v1015_v32, %v443_v0 }
 0x148   : > { %v598_v6 = vpop.f32.mrf.mxu3 }
 0x149   : > { %v532_v3 = vpop.f32.mrf.mxu1  ;;  %672 = vst.msk [vmem:[%s1026_s10 + $0x98] sm:$0xff] %vm652_vm0, %v626_v1  ;;  %v596_v4 = vadd.f32 %v595_v58, %v444_v2 }
 0x14a   : > { %v380_v5 = vpop.f32.mrf.mxu0 }
 0x14b   : > { %v648_v7 = vmax.f32 %v596_v4, 0.0  ;;  %v381_v8 = vadd.f32 %v1015_v32, %v380_v5 }
 0x14d   : > { %694 = vst.msk [vmem:[%s1026_s10 + $0x148] sm:$0xff] %vm652_vm0, %v648_v7  ;;  %v533_v9 = vadd.f32 %v532_v3, %v381_v8 }
 0x14e   : > { %v446_v10 = vpop.f32.mrf.mxu2 }
 0x14f   : > { %v627_v11 = vmax.f32 %v533_v9, 0.0  ;;  %v447_v12 = vadd.f32 %v1015_v32, %v446_v10 }
 0x150   : > { %v601_v18 = vpop.f32.mrf.mxu3 }
 0x151   : > { %v535_v13 = vpop.f32.mrf.mxu1  ;;  %673 = vst.msk [vmem:[%s1026_s10 + $0xa0] sm:$0xff] %vm652_vm0, %v627_v11  ;;  %v599_v14 = vadd.f32 %v598_v6, %v447_v12 }
 0x152   : > { %v383_v15 = vpop.f32.mrf.mxu0 }
 0x153   : > { %v649_v16 = vmax.f32 %v599_v14, 0.0  ;;  %v384_v17 = vadd.f32 %v1015_v32, %v383_v15 }
 0x155   : > { %695 = vst.msk [vmem:[%s1026_s10 + $0x150] sm:$0xff] %vm652_vm0, %v649_v16  ;;  %v536_v19 = vadd.f32 %v535_v13, %v384_v17 }
 0x156   : > { %v449_v20 = vpop.f32.mrf.mxu2 }
 0x157   : > { %v628_v22 = vmax.f32 %v536_v19, 0.0  ;;  %v450_v23 = vadd.f32 %v1015_v32, %v449_v20 }
 0x158   : > { %v604_v30 = vpop.f32.mrf.mxu3 }
 0x159   : > { %v538_v24 = vpop.f32.mrf.mxu1  ;;  %674 = vst.msk [vmem:[%s1026_s10 + $0xa8] sm:$0xff] %vm652_vm0, %v628_v22  ;;  %v602_v26 = vadd.f32 %v601_v18, %v450_v23 }
 0x15a   : > { %v539_v25 = vadd.f32 %v538_v24, %v387_v21 }
 0x15b   : > { %v650_v28 = vmax.f32 %v602_v26, 0.0 }
 0x15c   : > { %v629_v27 = vmax.f32 %v539_v25, 0.0 }
 0x15d   : > { %696 = vst.msk [vmem:[%s1026_s10 + $0x158] sm:$0xff] %vm652_vm0, %v650_v28 }
 0x15e   : > { %675 = vst.msk [vmem:[%s1026_s10 + $0xb0] sm:$0xff] %vm652_vm0, %v629_v27  ;;  %v452_v29 = vpop.f32.mrf.mxu2 }
 0x15f   : > { %v453_v31 = vadd.f32 %v1015_v32, %v452_v29 }
 0x161   : > { %v605_v41 = vadd.f32 %v604_v30, %v453_v31 }
 0x163   : > { %v651_v33 = vmax.f32 %v605_v41, 0.0 }
 0x165   : > { %697 = vst.msk [vmem:[%s1026_s10 + $0x160] sm:$0xff] %vm652_vm0, %v651_v33 }
 0x166 PF: > { %s13_s12 = sadd.s32 1, %s812_s12  }
 0x167   : > { %p10_p4 = scmp.ge.s32.totalorder %s13_s12, 7  }
 0x169   :  { %12 = sbr.rel (!%p10_p4) target bundleno = 1 (0x1), region = 62 }

// kernel: network_forward.4
= control target key start
LH: loop header
LB: loop body
LE: loop exit
PB: predicated region body
PF: predicated region fallthrough
CT: control target
= control target key end

     0   :  { %vm525_vm0 = vcmask 261120   ;;  %s1275_s1 = inlined_call_operand.vmem [shape: f32[256,32], index: 1, kind: input, shape index: {}]   ;;  %s1276_s0 = inlined_call_operand.vmem [shape: f32[392,256], index: 0, kind: input, shape index: {}]   ;;  %s1277_s2 = inlined_call_operand.vmem [shape: f32[1,32], index: 2, kind: input, shape index: {}]   ;;  %s1278_s3 = inlined_call_operand.vmem [shape: f32[392,32], index: 3, kind: output, shape index: {}]  }
   0x1   :  { %v127_v0 = vld [vmem:[%s1275_s1 + $0x78] sm:$0xff]  ;;  %v126_v2 = vld [vmem:[%s1275_s1 + $0x70] sm:$0xff]  ;;  %v125_v4 = vld [vmem:[%s1275_s1 + $0x68] sm:$0xff] }
   0x2   :  { %v143_v1 = vld [vmem:[%s1275_s1 + $0xf8] sm:$0xff]  ;;  %579 = vmatpush.msra.mxu2 %v127_v0  ;;  %v142_v3 = vld [vmem:[%s1275_s1 + $0xf0] sm:$0xff]  ;;  %v141_v5 = vld [vmem:[%s1275_s1 + $0xe8] sm:$0xff]  ;;  %148 = vmatpush.msra.mxu0 %v127_v0 }
   0x3   :  { %312 = vmatpush.msra.mxu1 %v143_v1  ;;  %595 = vmatpush.msra.mxu3 %v143_v1  ;;  %v124_v6 = vld [vmem:[%s1275_s1 + $0x60] sm:$0xff]  ;;  %v123_v8 = vld [vmem:[%s1275_s1 + $0x58] sm:$0xff]  ;;  %v122_v10 = vld [vmem:[%s1275_s1 + $0x50] sm:$0xff] }
   0x4   :  { %580 = vmatpush.msra.mxu2 %v126_v2  ;;  %v140_v7 = vld [vmem:[%s1275_s1 + $0xe0] sm:$0xff]  ;;  %149 = vmatpush.msra.mxu0 %v126_v2  ;;  %v139_v9 = vld [vmem:[%s1275_s1 + $0xd8] sm:$0xff]  ;;  %v138_v11 = vld [vmem:[%s1275_s1 + $0xd0] sm:$0xff] }
   0x5   :  { %313 = vmatpush.msra.mxu1 %v142_v3  ;;  %596 = vmatpush.msra.mxu3 %v142_v3  ;;  %v121_v12 = vld [vmem:[%s1275_s1 + $0x48] sm:$0xff]  ;;  %v120_v14 = vld [vmem:[%s1275_s1 + $0x40] sm:$0xff]  ;;  %v119_v16 = vld [vmem:[%s1275_s1 + $0x38] sm:$0xff] }
   0x6   :  { %581 = vmatpush.msra.mxu2 %v125_v4  ;;  %150 = vmatpush.msra.mxu0 %v125_v4  ;;  %v137_v13 = vld [vmem:[%s1275_s1 + $0xc8] sm:$0xff]  ;;  %v136_v15 = vld [vmem:[%s1275_s1 + $0xc0] sm:$0xff]  ;;  %v135_v17 = vld [vmem:[%s1275_s1 + $0xb8] sm:$0xff] }
   0x7   :  { %314 = vmatpush.msra.mxu1 %v141_v5  ;;  %597 = vmatpush.msra.mxu3 %v141_v5  ;;  %v118_v18 = vld [vmem:[%s1275_s1 + $0x30] sm:$0xff]  ;;  %v117_v20 = vld [vmem:[%s1275_s1 + $0x28] sm:$0xff]  ;;  %v116_v22 = vld [vmem:[%s1275_s1 + $0x20] sm:$0xff] }
   0x8   :  { %582 = vmatpush.msra.mxu2 %v124_v6  ;;  %151 = vmatpush.msra.mxu0 %v124_v6  ;;  %v134_v19 = vld [vmem:[%s1275_s1 + $0xb0] sm:$0xff]  ;;  %v133_v21 = vld [vmem:[%s1275_s1 + $0xa8] sm:$0xff]  ;;  %v132_v23 = vld [vmem:[%s1275_s1 + $0xa0] sm:$0xff] }
   0x9   :  { %315 = vmatpush.msra.mxu1 %v140_v7  ;;  %598 = vmatpush.msra.mxu3 %v140_v7  ;;  %v115_v24 = vld [vmem:[%s1275_s1 + $0x18] sm:$0xff]  ;;  %v114_v26 = vld [vmem:[%s1275_s1 + $0x10] sm:$0xff]  ;;  %v113_v28 = vld [vmem:[%s1275_s1 + $0x8] sm:$0xff] }
   0xa   :  { %583 = vmatpush.msra.mxu2 %v123_v8  ;;  %152 = vmatpush.msra.mxu0 %v123_v8  ;;  %v131_v25 = vld [vmem:[%s1275_s1 + $0x98] sm:$0xff]  ;;  %v130_v27 = vld [vmem:[%s1275_s1 + $0x90] sm:$0xff]  ;;  %v129_v29 = vld [vmem:[%s1275_s1 + $0x88] sm:$0xff] }
   0xb   :  { %316 = vmatpush.msra.mxu1 %v139_v9  ;;  %599 = vmatpush.msra.mxu3 %v139_v9  ;;  %v112_v30 = vld [vmem:[%s1275_s1] sm:$0xff]  ;;  %v15_v33 = vld [vmem:[%s1276_s0 + $0x8] sm:$0xff]  ;;  %v65_v35 = vld [vmem:[%s1276_s0 + $0x198] sm:$0xff] }
   0xc   :  { %584 = vmatpush.msra.mxu2 %v122_v10  ;;  %153 = vmatpush.msra.mxu0 %v122_v10  ;;  %v128_v31 = vld [vmem:[%s1275_s1 + $0x80] sm:$0xff]  ;;  %v64_v36 = vld [vmem:[%s1276_s0 + $0x190] sm:$0xff]  ;;  %v17_v37 = vld [vmem:[%s1276_s0 + $0x18] sm:$0xff] }
   0xd   :  { %317 = vmatpush.msra.mxu1 %v138_v11  ;;  %600 = vmatpush.msra.mxu3 %v138_v11  ;;  %v62_v32 = vld [vmem:[%s1276_s0 + $0x180] sm:$0xff]  ;;  %v16_v38 = vld [vmem:[%s1276_s0 + $0x10] sm:$0xff]  ;;  %v67_v39 = vld [vmem:[%s1276_s0 + $0x1a8] sm:$0xff] }
   0xe   :  { %585 = vmatpush.msra.mxu2 %v121_v12  ;;  %154 = vmatpush.msra.mxu0 %v121_v12  ;;  %v14_v34 = vld [vmem:[%s1276_s0] sm:$0xff]  ;;  %v19_v41 = vld [vmem:[%s1276_s0 + $0x28] sm:$0xff]  ;;  %v69_v43 = vld [vmem:[%s1276_s0 + $0x1b8] sm:$0xff] }
   0xf   :  { %318 = vmatpush.msra.mxu1 %v137_v13  ;;  %601 = vmatpush.msra.mxu3 %v137_v13  ;;  %v66_v40 = vld [vmem:[%s1276_s0 + $0x1a0] sm:$0xff]  ;;  %v68_v44 = vld [vmem:[%s1276_s0 + $0x1b0] sm:$0xff]  ;;  %v21_v45 = vld [vmem:[%s1276_s0 + $0x38] sm:$0xff] }
  0x10   :  { %586 = vmatpush.msra.mxu2 %v120_v14  ;;  %155 = vmatpush.msra.mxu0 %v120_v14  ;;  %v18_v42 = vld [vmem:[%s1276_s0 + $0x20] sm:$0xff]  ;;  %v20_v46 = vld [vmem:[%s1276_s0 + $0x30] sm:$0xff]  ;;  %v71_v47 = vld [vmem:[%s1276_s0 + $0x1c8] sm:$0xff] }
  0x11   :  { %319 = vmatpush.msra.mxu1 %v136_v15  ;;  %602 = vmatpush.msra.mxu3 %v136_v15  ;;  %v70_v48 = vld [vmem:[%s1276_s0 + $0x1c0] sm:$0xff]  ;;  %v23_v49 = vld [vmem:[%s1276_s0 + $0x48] sm:$0xff]  ;;  %v73_v51 = vld [vmem:[%s1276_s0 + $0x1d8] sm:$0xff] }
  0x12   :  { %587 = vmatpush.msra.mxu2 %v119_v16  ;;  %156 = vmatpush.msra.mxu0 %v119_v16  ;;  %v22_v50 = vld [vmem:[%s1276_s0 + $0x40] sm:$0xff]  ;;  %v72_v52 = vld [vmem:[%s1276_s0 + $0x1d0] sm:$0xff]  ;;  %v25_v53 = vld [vmem:[%s1276_s0 + $0x58] sm:$0xff] }
  0x13   :  { %320 = vmatpush.msra.mxu1 %v135_v17  ;;  %603 = vmatpush.msra.mxu3 %v135_v17  ;;  %v24_v54 = vld [vmem:[%s1276_s0 + $0x50] sm:$0xff]  ;;  %v75_v55 = vld [vmem:[%s1276_s0 + $0x1e8] sm:$0xff]  ;;  %v74_v56 = vld [vmem:[%s1276_s0 + $0x1e0] sm:$0xff] }
  0x14   :  { %588 = vmatpush.msra.mxu2 %v118_v18  ;;  %157 = vmatpush.msra.mxu0 %v118_v18  ;;  %v27_v57 = vld [vmem:[%s1276_s0 + $0x68] sm:$0xff]  ;;  %v26_v58 = vld [vmem:[%s1276_s0 + $0x60] sm:$0xff]  ;;  %v77_v59 = vld [vmem:[%s1276_s0 + $0x1f8] sm:$0xff] }
  0x15   :  { %321 = vmatpush.msra.mxu1 %v134_v19  ;;  %604 = vmatpush.msra.mxu3 %v134_v19  ;;  %v76_v60 = vld [vmem:[%s1276_s0 + $0x1f0] sm:$0xff]  ;;  %v29_v61 = vld [vmem:[%s1276_s0 + $0x78] sm:$0xff]  ;;  %v79_v63 = vld [vmem:[%s1276_s0 + $0x208] sm:$0xff] }
  0x16   :  { %589 = vmatpush.msra.mxu2 %v117_v20  ;;  %158 = vmatpush.msra.mxu0 %v117_v20  ;;  %v28_v62 = vld [vmem:[%s1276_s0 + $0x70] sm:$0xff]  ;;  %v78_v0 = vld [vmem:[%s1276_s0 + $0x200] sm:$0xff]  ;;  %v31_v1 = vld [vmem:[%s1276_s0 + $0x88] sm:$0xff] }
  0x17   :  { %322 = vmatpush.msra.mxu1 %v133_v21  ;;  %605 = vmatpush.msra.mxu3 %v133_v21  ;;  %v30_v2 = vld [vmem:[%s1276_s0 + $0x80] sm:$0xff]  ;;  %v81_v3 = vld [vmem:[%s1276_s0 + $0x218] sm:$0xff]  ;;  %v80_v4 = vld [vmem:[%s1276_s0 + $0x210] sm:$0xff] }
  0x18   :  { %590 = vmatpush.msra.mxu2 %v116_v22  ;;  %159 = vmatpush.msra.mxu0 %v116_v22  ;;  %v33_v5 = vld [vmem:[%s1276_s0 + $0x98] sm:$0xff]  ;;  %v32_v6 = vld [vmem:[%s1276_s0 + $0x90] sm:$0xff]  ;;  %v83_v7 = vld [vmem:[%s1276_s0 + $0x228] sm:$0xff] }
  0x19   :  { %323 = vmatpush.msra.mxu1 %v132_v23  ;;  %606 = vmatpush.msra.mxu3 %v132_v23  ;;  %v82_v8 = vld [vmem:[%s1276_s0 + $0x220] sm:$0xff]  ;;  %v35_v9 = vld [vmem:[%s1276_s0 + $0xa8] sm:$0xff]  ;;  %v85_v11 = vld [vmem:[%s1276_s0 + $0x238] sm:$0xff] }
  0x1a   :  { %591 = vmatpush.msra.mxu2 %v115_v24  ;;  %160 = vmatpush.msra.mxu0 %v115_v24  ;;  %v34_v10 = vld [vmem:[%s1276_s0 + $0xa0] sm:$0xff]  ;;  %v84_v12 = vld [vmem:[%s1276_s0 + $0x230] sm:$0xff]  ;;  %v37_v13 = vld [vmem:[%s1276_s0 + $0xb8] sm:$0xff] }
  0x1b   :  { %324 = vmatpush.msra.mxu1 %v131_v25  ;;  %607 = vmatpush.msra.mxu3 %v131_v25  ;;  %v36_v14 = vld [vmem:[%s1276_s0 + $0xb0] sm:$0xff]  ;;  %v87_v15 = vld [vmem:[%s1276_s0 + $0x248] sm:$0xff]  ;;  %v86_v16 = vld [vmem:[%s1276_s0 + $0x240] sm:$0xff] }
  0x1c   :  { %592 = vmatpush.msra.mxu2 %v114_v26  ;;  %161 = vmatpush.msra.mxu0 %v114_v26  ;;  %v39_v17 = vld [vmem:[%s1276_s0 + $0xc8] sm:$0xff]  ;;  %v38_v18 = vld [vmem:[%s1276_s0 + $0xc0] sm:$0xff]  ;;  %v89_v19 = vld [vmem:[%s1276_s0 + $0x258] sm:$0xff] }
  0x1d   :  { %325 = vmatpush.msra.mxu1 %v130_v27  ;;  %608 = vmatpush.msra.mxu3 %v130_v27  ;;  %v88_v20 = vld [vmem:[%s1276_s0 + $0x250] sm:$0xff]  ;;  %v41_v21 = vld [vmem:[%s1276_s0 + $0xd8] sm:$0xff]  ;;  %v91_v23 = vld [vmem:[%s1276_s0 + $0x268] sm:$0xff] }
  0x1e   :  { %593 = vmatpush.msra.mxu2 %v113_v28  ;;  %162 = vmatpush.msra.mxu0 %v113_v28  ;;  %v40_v22 = vld [vmem:[%s1276_s0 + $0xd0] sm:$0xff]  ;;  %v90_v24 = vld [vmem:[%s1276_s0 + $0x260] sm:$0xff]  ;;  %v43_v25 = vld [vmem:[%s1276_s0 + $0xe8] sm:$0xff] }
  0x1f   :  { %326 = vmatpush.msra.mxu1 %v129_v29  ;;  %609 = vmatpush.msra.mxu3 %v129_v29  ;;  %v42_v26 = vld [vmem:[%s1276_s0 + $0xe0] sm:$0xff]  ;;  %v93_v27 = vld [vmem:[%s1276_s0 + $0x278] sm:$0xff]  ;;  %v92_v28 = vld [vmem:[%s1276_s0 + $0x270] sm:$0xff] }
  0x20   :  { %594 = vmatpush.msra.mxu2 %v112_v30  ;;  %163 = vmatpush.msra.mxu0 %v112_v30  ;;  %v45_v29 = vld [vmem:[%s1276_s0 + $0xf8] sm:$0xff]  ;;  %v44_v30 = vld [vmem:[%s1276_s0 + $0xf0] sm:$0xff] }
  0x21   :  { %327 = vmatpush.msra.mxu1 %v128_v31  ;;  %236 = vmatmul.f32.vlgmr.msra.gmra.mxu2 %v62_v32  ;;  %v923_v32 = vld [vmem:[%s1277_s2] ss:$0 sm:$0xff] }
  0x22   :  { %328 = vmatmul.f32.vlgmr.msra.gmra.mxu1 %v15_v33  ;;  %610 = vmatpush.msra.mxu3 %v128_v31  ;;  %v95_v31 = vld [vmem:[%s1276_s0 + $0x288] sm:$0xff] }
  0x23   :  { %164 = vmatmul.f32.vlgmr.msra.gmra.mxu0 %v14_v34  ;;  %403 = vmatmul.f32.vlgmr.msra.gmra.mxu3 %v65_v35  ;;  %v94_v34 = vld [vmem:[%s1276_s0 + $0x280] sm:$0xff]  ;;  %v47_v35 = vld [vmem:[%s1276_s0 + $0x108] sm:$0xff] }
  0x29   :  { %239 = vmatmul.f32.gmra.mxu2 %v64_v36 }
  0x2a   :  { %331 = vmatmul.f32.gmra.mxu1 %v17_v37  ;;  %v46_v37 = vld [vmem:[%s1276_s0 + $0x100] sm:$0xff] }
  0x2b   :  { %167 = vmatmul.f32.gmra.mxu0 %v16_v38  ;;  %406 = vmatmul.f32.gmra.mxu3 %v67_v39  ;;  %v97_v38 = vld [vmem:[%s1276_s0 + $0x298] sm:$0xff] }
  0x31   :  { %242 = vmatmul.f32.gmra.mxu2 %v66_v40 }
  0x32   :  { %334 = vmatmul.f32.gmra.mxu1 %v19_v41 }
  0x33   :  { %170 = vmatmul.f32.gmra.mxu0 %v18_v42  ;;  %409 = vmatmul.f32.gmra.mxu3 %v69_v43 }
  0x39   :  { %245 = vmatmul.f32.gmra.mxu2 %v68_v44  ;;  %v96_v44 = vld [vmem:[%s1276_s0 + $0x290] sm:$0xff] }
  0x3a   :  { %337 = vmatmul.f32.gmra.mxu1 %v21_v45  ;;  %v49_v45 = vld [vmem:[%s1276_s0 + $0x118] sm:$0xff] }
  0x3b   :  { %173 = vmatmul.f32.gmra.mxu0 %v20_v46  ;;  %412 = vmatmul.f32.gmra.mxu3 %v71_v47 }
  0x41   :  { %248 = vmatmul.f32.gmra.mxu2 %v70_v48  ;;  %v48_v48 = vld [vmem:[%s1276_s0 + $0x110] sm:$0xff] }
  0x42   :  { %340 = vmatmul.f32.gmra.mxu1 %v23_v49  ;;  %v99_v49 = vld [vmem:[%s1276_s0 + $0x2a8] sm:$0xff] }
  0x43   :  { %176 = vmatmul.f32.gmra.mxu0 %v22_v50  ;;  %415 = vmatmul.f32.gmra.mxu3 %v73_v51 }
  0x49   :  { %251 = vmatmul.f32.gmra.mxu2 %v72_v52 }
  0x4a   :  { %343 = vmatmul.f32.gmra.mxu1 %v25_v53 }
  0x4b   :  { %179 = vmatmul.f32.gmra.mxu0 %v24_v54  ;;  %418 = vmatmul.f32.gmra.mxu3 %v75_v55 }
  0x51   :  { %254 = vmatmul.f32.gmra.mxu2 %v74_v56  ;;  %v98_v56 = vld [vmem:[%s1276_s0 + $0x2a0] sm:$0xff] }
  0x52   :  { %346 = vmatmul.f32.gmra.mxu1 %v27_v57  ;;  %v51_v57 = vld [vmem:[%s1276_s0 + $0x128] sm:$0xff] }
  0x53   :  { %182 = vmatmul.f32.gmra.mxu0 %v26_v58  ;;  %421 = vmatmul.f32.gmra.mxu3 %v77_v59 }
  0x59   :  { %257 = vmatmul.f32.gmra.mxu2 %v76_v60 }
  0x5a   :  { %349 = vmatmul.f32.gmra.mxu1 %v29_v61  ;;  %v50_v61 = vld [vmem:[%s1276_s0 + $0x120] sm:$0xff] }
  0x5b   :  { %185 = vmatmul.f32.gmra.mxu0 %v28_v62  ;;  %424 = vmatmul.f32.gmra.mxu3 %v79_v63  ;;  %v101_v62 = vld [vmem:[%s1276_s0 + $0x2b8] sm:$0xff] }
  0x61   :  { %260 = vmatmul.f32.gmra.mxu2 %v78_v0 }
  0x62   :  { %352 = vmatmul.f32.gmra.mxu1 %v31_v1 }
  0x63   :  { %188 = vmatmul.f32.gmra.mxu0 %v30_v2  ;;  %427 = vmatmul.f32.gmra.mxu3 %v81_v3 }
  0x69   :  { %263 = vmatmul.f32.gmra.mxu2 %v80_v4 }
  0x6a   :  { %355 = vmatmul.f32.gmra.mxu1 %v33_v5 }
  0x6b   :  { %191 = vmatmul.f32.gmra.mxu0 %v32_v6  ;;  %430 = vmatmul.f32.gmra.mxu3 %v83_v7  ;;  %v100_v6 = vld [vmem:[%s1276_s0 + $0x2b0] sm:$0xff]  ;;  %v53_v7 = vld [vmem:[%s1276_s0 + $0x138] sm:$0xff] }
  0x71   :  { %266 = vmatmul.f32.gmra.mxu2 %v82_v8 }
  0x72   :  { %358 = vmatmul.f32.gmra.mxu1 %v35_v9 }
  0x73   :  { %194 = vmatmul.f32.gmra.mxu0 %v34_v10  ;;  %433 = vmatmul.f32.gmra.mxu3 %v85_v11  ;;  %v52_v11 = vld [vmem:[%s1276_s0 + $0x130] sm:$0xff] }
  0x79   :  { %269 = vmatmul.f32.gmra.mxu2 %v84_v12  ;;  %v103_v12 = vld [vmem:[%s1276_s0 + $0x2c8] sm:$0xff] }
  0x7a   :  { %361 = vmatmul.f32.gmra.mxu1 %v37_v13 }
  0x7b   :  { %197 = vmatmul.f32.gmra.mxu0 %v36_v14  ;;  %436 = vmatmul.f32.gmra.mxu3 %v87_v15 }
  0x81   :  { %272 = vmatmul.f32.gmra.mxu2 %v86_v16 }
  0x82   :  { %364 = vmatmul.f32.gmra.mxu1 %v39_v17 }
  0x83   :  { %200 = vmatmul.f32.gmra.mxu0 %v38_v18  ;;  %439 = vmatmul.f32.gmra.mxu3 %v89_v19 }
  0x89   :  { %275 = vmatmul.f32.gmra.mxu2 %v88_v20  ;;  %v102_v20 = vld [vmem:[%s1276_s0 + $0x2c0] sm:$0xff] }
  0x8a   :  { %367 = vmatmul.f32.gmra.mxu1 %v41_v21  ;;  %v55_v21 = vld [vmem:[%s1276_s0 + $0x148] sm:$0xff] }
  0x8b   :  { %203 = vmatmul.f32.gmra.mxu0 %v40_v22  ;;  %442 = vmatmul.f32.gmra.mxu3 %v91_v23 }
  0x91   :  { %278 = vmatmul.f32.gmra.mxu2 %v90_v24 }
  0x92   :  { %370 = vmatmul.f32.gmra.mxu1 %v43_v25  ;;  %v54_v25 = vld [vmem:[%s1276_s0 + $0x140] sm:$0xff] }
  0x93   :  { %206 = vmatmul.f32.gmra.mxu0 %v42_v26  ;;  %445 = vmatmul.f32.gmra.mxu3 %v93_v27  ;;  %v105_v26 = vld [vmem:[%s1276_s0 + $0x2d8] sm:$0xff] }
  0x99   :  { %281 = vmatmul.f32.gmra.mxu2 %v92_v28 }
  0x9a   :  { %373 = vmatmul.f32.gmra.mxu1 %v45_v29 }
  0x9b   :  { %209 = vmatmul.f32.gmra.mxu0 %v44_v30  ;;  %448 = vmatmul.f32.gmra.mxu3 %v95_v31 }
  0x9f   :  { %v329_v33 = vpop.f32.mrf.mxu1 }
  0xa0   :  { %v165_v36 = vpop.f32.mrf.mxu0 }
  0xa1   :  { %284 = vmatmul.f32.gmra.mxu2 %v94_v34  ;;  %v166_v39 = vadd.f32 %v923_v32, %v165_v36  ;;  %v57_v36 = vld [vmem:[%s1276_s0 + $0x158] sm:$0xff] }
  0xa2   :  { %376 = vmatmul.f32.gmra.mxu1 %v47_v35  ;;  %v104_v35 = vld [vmem:[%s1276_s0 + $0x2d0] sm:$0xff] }
  0xa3   :  { %v330_v40 = vadd.f32 %v329_v33, %v166_v39  ;;  %212 = vmatmul.f32.gmra.mxu0 %v46_v37  ;;  %451 = vmatmul.f32.gmra.mxu3 %v97_v38 }
  0xa4   :  { %v938_v41 = vpop.f32.mrf.mxu2 }
  0xa5   :  { %v476_v42 = vmax.f32 %v330_v40, 0.0  ;;  %v56_v40 = vld [vmem:[%s1276_s0 + $0x150] sm:$0xff] }
  0xa6   :  { %v404_v46 = vpop.f32.mrf.mxu3 }
  0xa7   :  { %v332_v43 = vpop.f32.mrf.mxu1  ;;  %526 = vst.msk [vmem:[%s1278_s3] sm:$0xff] %vm525_vm0, %v476_v42  ;;  %v107_v42 = vld [vmem:[%s1276_s0 + $0x2e8] sm:$0xff] }
  0xa8   :  { %v168_v47 = vpop.f32.mrf.mxu0 }
  0xa9   :  { %287 = vmatmul.f32.gmra.mxu2 %v96_v44  ;;  %v169_v50 = vadd.f32 %v923_v32, %v168_v47 }
  0xaa   :  { %379 = vmatmul.f32.gmra.mxu1 %v49_v45 }
  0xab   :  { %v333_v51 = vadd.f32 %v332_v43, %v169_v50  ;;  %215 = vmatmul.f32.gmra.mxu0 %v48_v48  ;;  %454 = vmatmul.f32.gmra.mxu3 %v99_v49  ;;  %v106_v50 = vld [vmem:[%s1276_s0 + $0x2e0] sm:$0xff] }
  0xac   :  { %v240_v52 = vpop.f32.mrf.mxu2 }
  0xad   :  { %v477_v53 = vmax.f32 %v333_v51, 0.0  ;;  %v241_v54 = vadd.f32 %v923_v32, %v240_v52  ;;  %v59_v51 = vld [vmem:[%s1276_s0 + $0x168] sm:$0xff] }
  0xae   :  { %v407_v58 = vpop.f32.mrf.mxu3 }
  0xaf   :  { %v335_v55 = vpop.f32.mrf.mxu1  ;;  %527 = vst.msk [vmem:[%s1278_s3 + $0x8] sm:$0xff] %vm525_vm0, %v477_v53  ;;  %v405_v59 = vadd.f32 %v404_v46, %v241_v54 }
  0xb0   :  { %v171_v60 = vpop.f32.mrf.mxu0 }
  0xb1   :  { %v501_v63 = vmax.f32 %v405_v59, 0.0  ;;  %290 = vmatmul.f32.gmra.mxu2 %v98_v56  ;;  %v172_v0 = vadd.f32 %v923_v32, %v171_v60  ;;  %v109_v56 = vld [vmem:[%s1276_s0 + $0x2f8] sm:$0xff] }
  0xb2   :  { %382 = vmatmul.f32.gmra.mxu1 %v51_v57 }
  0xb3   :  { %551 = vst.msk [vmem:[%s1278_s3 + $0xc8] sm:$0xff] %vm525_vm0, %v501_v63  ;;  %v336_v1 = vadd.f32 %v335_v55, %v172_v0  ;;  %218 = vmatmul.f32.gmra.mxu0 %v50_v61  ;;  %457 = vmatmul.f32.gmra.mxu3 %v101_v62  ;;  %v58_v55 = vld [vmem:[%s1276_s0 + $0x160] sm:$0xff]  ;;  %v108_v0 = vld [vmem:[%s1276_s0 + $0x2f0] sm:$0xff] }
  0xb4   :  { %v243_v2 = vpop.f32.mrf.mxu2 }
  0xb5   :  { %v478_v3 = vmax.f32 %v336_v1, 0.0  ;;  %v244_v4 = vadd.f32 %v923_v32, %v243_v2  ;;  %v61_v1 = vld [vmem:[%s1276_s0 + $0x178] sm:$0xff] }
  0xb6   :  { %v410_v8 = vpop.f32.mrf.mxu3 }
  0xb7   :  { %v338_v5 = vpop.f32.mrf.mxu1  ;;  %528 = vst.msk [vmem:[%s1278_s3 + $0x10] sm:$0xff] %vm525_vm0, %v478_v3  ;;  %v408_v9 = vadd.f32 %v407_v58, %v244_v4 }
  0xb8   :  { %v174_v10 = vpop.f32.mrf.mxu0 }
  0xb9   :  { %v502_v13 = vmax.f32 %v408_v9, 0.0  ;;  %293 = vmatmul.f32.gmra.mxu2 %v100_v6  ;;  %v175_v14 = vadd.f32 %v923_v32, %v174_v10  ;;  %v111_v6 = vld [vmem:[%s1276_s0 + $0x308] sm:$0xff] }
  0xba   :  { %385 = vmatmul.f32.gmra.mxu1 %v53_v7 }
  0xbb   :  { %552 = vst.msk [vmem:[%s1278_s3 + $0xd0] sm:$0xff] %vm525_vm0, %v502_v13  ;;  %v339_v15 = vadd.f32 %v338_v5, %v175_v14  ;;  %221 = vmatmul.f32.gmra.mxu0 %v52_v11  ;;  %460 = vmatmul.f32.gmra.mxu3 %v103_v12  ;;  %v60_v5 = vld [vmem:[%s1276_s0 + $0x170] sm:$0xff]  ;;  %v110_v14 = vld [vmem:[%s1276_s0 + $0x300] sm:$0xff] }
  0xbc   :  { %v246_v16 = vpop.f32.mrf.mxu2 }
  0xbd   :  { %v479_v17 = vmax.f32 %v339_v15, 0.0  ;;  %v247_v18 = vadd.f32 %v923_v32, %v246_v16  ;;  %v63_v15 = vld [vmem:[%s1276_s0 + $0x188] sm:$0xff] }
  0xbe   :  { %v413_v22 = vpop.f32.mrf.mxu3 }
  0xbf   :  { %v341_v19 = vpop.f32.mrf.mxu1  ;;  %529 = vst.msk [vmem:[%s1278_s3 + $0x18] sm:$0xff] %vm525_vm0, %v479_v17  ;;  %v411_v23 = vadd.f32 %v410_v8, %v247_v18 }
  0xc0   :  { %v177_v24 = vpop.f32.mrf.mxu0 }
  0xc1   :  { %v503_v27 = vmax.f32 %v411_v23, 0.0  ;;  %296 = vmatmul.f32.gmra.mxu2 %v102_v20  ;;  %v178_v28 = vadd.f32 %v923_v32, %v177_v24 }
  0xc2   :  { %388 = vmatmul.f32.gmra.mxu1 %v55_v21 }
  0xc3   :  { %553 = vst.msk [vmem:[%s1278_s3 + $0xd8] sm:$0xff] %vm525_vm0, %v503_v27  ;;  %v342_v29 = vadd.f32 %v341_v19, %v178_v28  ;;  %224 = vmatmul.f32.gmra.mxu0 %v54_v25  ;;  %463 = vmatmul.f32.gmra.mxu3 %v105_v26 }
  0xc4   :  { %v249_v30 = vpop.f32.mrf.mxu2 }
  0xc5   :  { %v480_v31 = vmax.f32 %v342_v29, 0.0  ;;  %v250_v33 = vadd.f32 %v923_v32, %v249_v30 }
  0xc6   :  { %v416_v37 = vpop.f32.mrf.mxu3 }
  0xc7   :  { %v344_v34 = vpop.f32.mrf.mxu1  ;;  %530 = vst.msk [vmem:[%s1278_s3 + $0x20] sm:$0xff] %vm525_vm0, %v480_v31  ;;  %v414_v38 = vadd.f32 %v413_v22, %v250_v33 }
  0xc8   :  { %v180_v39 = vpop.f32.mrf.mxu0 }
  0xc9   :  { %v504_v43 = vmax.f32 %v414_v38, 0.0  ;;  %299 = vmatmul.f32.gmra.mxu2 %v104_v35  ;;  %v181_v44 = vadd.f32 %v923_v32, %v180_v39 }
  0xca   :  { %391 = vmatmul.f32.gmra.mxu1 %v57_v36 }
  0xcb   :  { %554 = vst.msk [vmem:[%s1278_s3 + $0xe0] sm:$0xff] %vm525_vm0, %v504_v43  ;;  %v345_v45 = vadd.f32 %v344_v34, %v181_v44  ;;  %227 = vmatmul.f32.gmra.mxu0 %v56_v40  ;;  %466 = vmatmul.f32.gmra.mxu3 %v107_v42 }
  0xcc   :  { %v252_v46 = vpop.f32.mrf.mxu2 }
  0xcd   :  { %v481_v47 = vmax.f32 %v345_v45, 0.0  ;;  %v253_v48 = vadd.f32 %v923_v32, %v252_v46 }
  0xce   :  { %v419_v52 = vpop.f32.mrf.mxu3 }
  0xcf   :  { %v347_v49 = vpop.f32.mrf.mxu1  ;;  %531 = vst.msk [vmem:[%s1278_s3 + $0x28] sm:$0xff] %vm525_vm0, %v481_v47  ;;  %v417_v53 = vadd.f32 %v416_v37, %v253_v48 }
  0xd0   :  { %v183_v54 = vpop.f32.mrf.mxu0 }
  0xd1   :  { %v505_v57 = vmax.f32 %v417_v53, 0.0  ;;  %302 = vmatmul.f32.gmra.mxu2 %v106_v50  ;;  %v184_v58 = vadd.f32 %v923_v32, %v183_v54 }
  0xd2   :  { %394 = vmatmul.f32.gmra.mxu1 %v59_v51 }
  0xd3   :  { %555 = vst.msk [vmem:[%s1278_s3 + $0xe8] sm:$0xff] %vm525_vm0, %v505_v57  ;;  %v348_v59 = vadd.f32 %v347_v49, %v184_v58  ;;  %230 = vmatmul.f32.gmra.mxu0 %v58_v55  ;;  %469 = vmatmul.f32.gmra.mxu3 %v109_v56 }
  0xd4   :  { %v255_v60 = vpop.f32.mrf.mxu2 }
  0xd5   :  { %v482_v61 = vmax.f32 %v348_v59, 0.0  ;;  %v256_v62 = vadd.f32 %v923_v32, %v255_v60 }
  0xd6   :  { %v422_v2 = vpop.f32.mrf.mxu3 }
  0xd7   :  { %v350_v63 = vpop.f32.mrf.mxu1  ;;  %532 = vst.msk [vmem:[%s1278_s3 + $0x30] sm:$0xff] %vm525_vm0, %v482_v61  ;;  %v420_v3 = vadd.f32 %v419_v52, %v256_v62 }
  0xd8   :  { %v186_v4 = vpop.f32.mrf.mxu0 }
  0xd9   :  { %v506_v7 = vmax.f32 %v420_v3, 0.0  ;;  %305 = vmatmul.f32.gmra.mxu2 %v108_v0  ;;  %v187_v8 = vadd.f32 %v923_v32, %v186_v4 }
  0xda   :  { %397 = vmatmul.f32.gmra.mxu1 %v61_v1 }
  0xdb   :  { %556 = vst.msk [vmem:[%s1278_s3 + $0xf0] sm:$0xff] %vm525_vm0, %v506_v7  ;;  %v351_v9 = vadd.f32 %v350_v63, %v187_v8  ;;  %233 = vmatmul.f32.gmra.mxu0 %v60_v5  ;;  %472 = vmatmul.f32.gmra.mxu3 %v111_v6 }
  0xdc   :  { %v258_v10 = vpop.f32.mrf.mxu2 }
  0xdd   :  { %v483_v11 = vmax.f32 %v351_v9, 0.0  ;;  %v259_v12 = vadd.f32 %v923_v32, %v258_v10 }
  0xde   :  { %v425_v16 = vpop.f32.mrf.mxu3 }
  0xdf   :  { %v353_v13 = vpop.f32.mrf.mxu1  ;;  %533 = vst.msk [vmem:[%s1278_s3 + $0x38] sm:$0xff] %vm525_vm0, %v483_v11  ;;  %v423_v17 = vadd.f32 %v422_v2, %v259_v12 }
  0xe0   :  { %v189_v18 = vpop.f32.mrf.mxu0 }
  0xe1   :  { %v507_v19 = vmax.f32 %v423_v17, 0.0  ;;  %308 = vmatmul.f32.gmra.mxu2 %v110_v14  ;;  %v190_v20 = vadd.f32 %v923_v32, %v189_v18 }
  0xe2   :  { %400 = vmatmul.f32.gmra.mxu1 %v63_v15 }
  0xe3   :  { %557 = vst.msk [vmem:[%s1278_s3 + $0xf8] sm:$0xff] %vm525_vm0, %v507_v19  ;;  %v354_v21 = vadd.f32 %v353_v13, %v190_v20 }
  0xe4   :  { %v261_v22 = vpop.f32.mrf.mxu2 }
  0xe5   :  { %v484_v23 = vmax.f32 %v354_v21, 0.0  ;;  %v262_v24 = vadd.f32 %v923_v32, %v261_v22 }
  0xe6   :  { %v428_v26 = vpop.f32.mrf.mxu3 }
  0xe7   :  { %v356_v25 = vpop.f32.mrf.mxu1  ;;  %534 = vst.msk [vmem:[%s1278_s3 + $0x40] sm:$0xff] %vm525_vm0, %v484_v23  ;;  %v426_v27 = vadd.f32 %v425_v16, %v262_v24 }
  0xe8   :  { %v192_v28 = vpop.f32.mrf.mxu0 }
  0xe9   :  { %v508_v29 = vmax.f32 %v426_v27, 0.0  ;;  %v193_v30 = vadd.f32 %v923_v32, %v192_v28 }
  0xeb   :  { %558 = vst.msk [vmem:[%s1278_s3 + $0x100] sm:$0xff] %vm525_vm0, %v508_v29  ;;  %v357_v31 = vadd.f32 %v356_v25, %v193_v30 }
  0xec   :  { %v264_v33 = vpop.f32.mrf.mxu2 }
  0xed   :  { %v485_v34 = vmax.f32 %v357_v31, 0.0  ;;  %v265_v35 = vadd.f32 %v923_v32, %v264_v33 }
  0xee   :  { %v431_v37 = vpop.f32.mrf.mxu3 }
  0xef   :  { %v359_v36 = vpop.f32.mrf.mxu1  ;;  %535 = vst.msk [vmem:[%s1278_s3 + $0x48] sm:$0xff] %vm525_vm0, %v485_v34  ;;  %v429_v38 = vadd.f32 %v428_v26, %v265_v35 }
  0xf0   :  { %v195_v39 = vpop.f32.mrf.mxu0 }
  0xf1   :  { %v509_v40 = vmax.f32 %v429_v38, 0.0  ;;  %v196_v42 = vadd.f32 %v923_v32, %v195_v39 }
  0xf3   :  { %559 = vst.msk [vmem:[%s1278_s3 + $0x108] sm:$0xff] %vm525_vm0, %v509_v40  ;;  %v360_v43 = vadd.f32 %v359_v36, %v196_v42 }
  0xf4   :  { %v267_v44 = vpop.f32.mrf.mxu2 }
  0xf5   :  { %v486_v45 = vmax.f32 %v360_v43, 0.0  ;;  %v268_v46 = vadd.f32 %v923_v32, %v267_v44 }
  0xf6   :  { %v434_v48 = vpop.f32.mrf.mxu3 }
  0xf7   :  { %v362_v47 = vpop.f32.mrf.mxu1  ;;  %536 = vst.msk [vmem:[%s1278_s3 + $0x50] sm:$0xff] %vm525_vm0, %v486_v45  ;;  %v432_v49 = vadd.f32 %v431_v37, %v268_v46 }
  0xf8   :  { %v198_v50 = vpop.f32.mrf.mxu0 }
  0xf9   :  { %v510_v51 = vmax.f32 %v432_v49, 0.0  ;;  %v199_v52 = vadd.f32 %v923_v32, %v198_v50 }
  0xfb   :  { %560 = vst.msk [vmem:[%s1278_s3 + $0x110] sm:$0xff] %vm525_vm0, %v510_v51  ;;  %v363_v53 = vadd.f32 %v362_v47, %v199_v52 }
  0xfc   :  { %v270_v54 = vpop.f32.mrf.mxu2 }
  0xfd   :  { %v487_v55 = vmax.f32 %v363_v53, 0.0  ;;  %v271_v56 = vadd.f32 %v923_v32, %v270_v54 }
  0xfe   :  { %v437_v58 = vpop.f32.mrf.mxu3 }
  0xff   :  { %v365_v57 = vpop.f32.mrf.mxu1  ;;  %537 = vst.msk [vmem:[%s1278_s3 + $0x58] sm:$0xff] %vm525_vm0, %v487_v55  ;;  %v435_v59 = vadd.f32 %v434_v48, %v271_v56 }
 0x100   :  { %v201_v60 = vpop.f32.mrf.mxu0 }
 0x101   :  { %v511_v61 = vmax.f32 %v435_v59, 0.0  ;;  %v202_v62 = vadd.f32 %v923_v32, %v201_v60 }
 0x103   :  { %561 = vst.msk [vmem:[%s1278_s3 + $0x118] sm:$0xff] %vm525_vm0, %v511_v61  ;;  %v366_v63 = vadd.f32 %v365_v57, %v202_v62 }
 0x104   :  { %v273_v0 = vpop.f32.mrf.mxu2 }
 0x105   :  { %v488_v1 = vmax.f32 %v366_v63, 0.0  ;;  %v274_v2 = vadd.f32 %v923_v32, %v273_v0 }
 0x106   :  { %v440_v4 = vpop.f32.mrf.mxu3 }
 0x107   :  { %v368_v3 = vpop.f32.mrf.mxu1  ;;  %538 = vst.msk [vmem:[%s1278_s3 + $0x60] sm:$0xff] %vm525_vm0, %v488_v1  ;;  %v438_v5 = vadd.f32 %v437_v58, %v274_v2 }
 0x108   :  { %v204_v6 = vpop.f32.mrf.mxu0 }
 0x109   :  { %v512_v7 = vmax.f32 %v438_v5, 0.0  ;;  %v205_v8 = vadd.f32 %v923_v32, %v204_v6 }
 0x10b   :  { %562 = vst.msk [vmem:[%s1278_s3 + $0x120] sm:$0xff] %vm525_vm0, %v512_v7  ;;  %v369_v9 = vadd.f32 %v368_v3, %v205_v8 }
 0x10c   :  { %v276_v10 = vpop.f32.mrf.mxu2 }
 0x10d   :  { %v489_v11 = vmax.f32 %v369_v9, 0.0  ;;  %v277_v12 = vadd.f32 %v923_v32, %v276_v10 }
 0x10e   :  { %v443_v14 = vpop.f32.mrf.mxu3 }
 0x10f   :  { %v371_v13 = vpop.f32.mrf.mxu1  ;;  %539 = vst.msk [vmem:[%s1278_s3 + $0x68] sm:$0xff] %vm525_vm0, %v489_v11  ;;  %v441_v15 = vadd.f32 %v440_v4, %v277_v12 }
 0x110   :  { %v207_v16 = vpop.f32.mrf.mxu0 }
 0x111   :  { %v513_v17 = vmax.f32 %v441_v15, 0.0  ;;  %v208_v18 = vadd.f32 %v923_v32, %v207_v16 }
 0x113   :  { %563 = vst.msk [vmem:[%s1278_s3 + $0x128] sm:$0xff] %vm525_vm0, %v513_v17  ;;  %v372_v19 = vadd.f32 %v371_v13, %v208_v18 }
 0x114   :  { %v279_v20 = vpop.f32.mrf.mxu2 }
 0x115   :  { %v490_v21 = vmax.f32 %v372_v19, 0.0  ;;  %v280_v22 = vadd.f32 %v923_v32, %v279_v20 }
 0x116   :  { %v446_v24 = vpop.f32.mrf.mxu3 }
 0x117   :  { %v374_v23 = vpop.f32.mrf.mxu1  ;;  %540 = vst.msk [vmem:[%s1278_s3 + $0x70] sm:$0xff] %vm525_vm0, %v490_v21  ;;  %v444_v25 = vadd.f32 %v443_v14, %v280_v22 }
 0x118   :  { %v210_v26 = vpop.f32.mrf.mxu0 }
 0x119   :  { %v514_v27 = vmax.f32 %v444_v25, 0.0  ;;  %v211_v28 = vadd.f32 %v923_v32, %v210_v26 }
 0x11b   :  { %564 = vst.msk [vmem:[%s1278_s3 + $0x130] sm:$0xff] %vm525_vm0, %v514_v27  ;;  %v375_v29 = vadd.f32 %v374_v23, %v211_v28 }
 0x11c   :  { %v282_v30 = vpop.f32.mrf.mxu2 }
 0x11d   :  { %v491_v31 = vmax.f32 %v375_v29, 0.0  ;;  %v283_v33 = vadd.f32 %v923_v32, %v282_v30 }
 0x11e   :  { %v449_v35 = vpop.f32.mrf.mxu3 }
 0x11f   :  { %v377_v34 = vpop.f32.mrf.mxu1  ;;  %541 = vst.msk [vmem:[%s1278_s3 + $0x78] sm:$0xff] %vm525_vm0, %v491_v31  ;;  %v447_v36 = vadd.f32 %v446_v24, %v283_v33 }
 0x120   :  { %v213_v37 = vpop.f32.mrf.mxu0 }
 0x121   :  { %v515_v38 = vmax.f32 %v447_v36, 0.0  ;;  %v214_v39 = vadd.f32 %v923_v32, %v213_v37 }
 0x123   :  { %565 = vst.msk [vmem:[%s1278_s3 + $0x138] sm:$0xff] %vm525_vm0, %v515_v38  ;;  %v378_v40 = vadd.f32 %v377_v34, %v214_v39 }
 0x124   :  { %v285_v42 = vpop.f32.mrf.mxu2 }
 0x125   :  { %v492_v43 = vmax.f32 %v378_v40, 0.0  ;;  %v286_v44 = vadd.f32 %v923_v32, %v285_v42 }
 0x126   :  { %v452_v46 = vpop.f32.mrf.mxu3 }
 0x127   :  { %v380_v45 = vpop.f32.mrf.mxu1  ;;  %542 = vst.msk [vmem:[%s1278_s3 + $0x80] sm:$0xff] %vm525_vm0, %v492_v43  ;;  %v450_v47 = vadd.f32 %v449_v35, %v286_v44 }
 0x128   :  { %v216_v48 = vpop.f32.mrf.mxu0 }
 0x129   :  { %v516_v49 = vmax.f32 %v450_v47, 0.0  ;;  %v217_v50 = vadd.f32 %v923_v32, %v216_v48 }
 0x12b   :  { %566 = vst.msk [vmem:[%s1278_s3 + $0x140] sm:$0xff] %vm525_vm0, %v516_v49  ;;  %v381_v51 = vadd.f32 %v380_v45, %v217_v50 }
 0x12c   :  { %v288_v52 = vpop.f32.mrf.mxu2 }
 0x12d   :  { %v493_v53 = vmax.f32 %v381_v51, 0.0  ;;  %v289_v54 = vadd.f32 %v923_v32, %v288_v52  ;;  %v238_v51 = vadd.f32 %v923_v32, %v938_v41 }
 0x12e   :  { %v455_v56 = vpop.f32.mrf.mxu3 }
 0x12f   :  { %v383_v55 = vpop.f32.mrf.mxu1  ;;  %543 = vst.msk [vmem:[%s1278_s3 + $0x88] sm:$0xff] %vm525_vm0, %v493_v53  ;;  %v453_v57 = vadd.f32 %v452_v46, %v289_v54 }
 0x130   :  { %v219_v58 = vpop.f32.mrf.mxu0 }
 0x131   :  { %v517_v59 = vmax.f32 %v453_v57, 0.0  ;;  %v220_v60 = vadd.f32 %v923_v32, %v219_v58 }
 0x133   :  { %567 = vst.msk [vmem:[%s1278_s3 + $0x148] sm:$0xff] %vm525_vm0, %v517_v59  ;;  %v384_v61 = vadd.f32 %v383_v55, %v220_v60 }
 0x134   :  { %v291_v62 = vpop.f32.mrf.mxu2 }
 0x135   :  { %v494_v63 = vmax.f32 %v384_v61, 0.0  ;;  %v292_v0 = vadd.f32 %v923_v32, %v291_v62 }
 0x136   :  { %v458_v2 = vpop.f32.mrf.mxu3 }
 0x137   :  { %v386_v1 = vpop.f32.mrf.mxu1  ;;  %544 = vst.msk [vmem:[%s1278_s3 + $0x90] sm:$0xff] %vm525_vm0, %v494_v63  ;;  %v456_v3 = vadd.f32 %v455_v56, %v292_v0 }
 0x138   :  { %v222_v4 = vpop.f32.mrf.mxu0 }
 0x139   :  { %v518_v5 = vmax.f32 %v456_v3, 0.0  ;;  %v223_v6 = vadd.f32 %v923_v32, %v222_v4 }
 0x13b   :  { %568 = vst.msk [vmem:[%s1278_s3 + $0x150] sm:$0xff] %vm525_vm0, %v518_v5  ;;  %v387_v7 = vadd.f32 %v386_v1, %v223_v6 }
 0x13c   :  { %v294_v8 = vpop.f32.mrf.mxu2 }
 0x13d   :  { %v495_v9 = vmax.f32 %v387_v7, 0.0  ;;  %v295_v10 = vadd.f32 %v923_v32, %v294_v8 }
 0x13e   :  { %v461_v12 = vpop.f32.mrf.mxu3 }
 0x13f   :  { %v389_v11 = vpop.f32.mrf.mxu1  ;;  %545 = vst.msk [vmem:[%s1278_s3 + $0x98] sm:$0xff] %vm525_vm0, %v495_v9  ;;  %v459_v13 = vadd.f32 %v458_v2, %v295_v10 }
 0x140   :  { %v225_v14 = vpop.f32.mrf.mxu0 }
 0x141   :  { %v519_v15 = vmax.f32 %v459_v13, 0.0  ;;  %v226_v16 = vadd.f32 %v923_v32, %v225_v14 }
 0x143   :  { %569 = vst.msk [vmem:[%s1278_s3 + $0x158] sm:$0xff] %vm525_vm0, %v519_v15  ;;  %v390_v17 = vadd.f32 %v389_v11, %v226_v16 }
 0x144   :  { %v297_v18 = vpop.f32.mrf.mxu2 }
 0x145   :  { %v496_v19 = vmax.f32 %v390_v17, 0.0  ;;  %v298_v20 = vadd.f32 %v923_v32, %v297_v18 }
 0x146   :  { %v464_v22 = vpop.f32.mrf.mxu3 }
 0x147   :  { %v392_v21 = vpop.f32.mrf.mxu1  ;;  %546 = vst.msk [vmem:[%s1278_s3 + $0xa0] sm:$0xff] %vm525_vm0, %v496_v19  ;;  %v462_v23 = vadd.f32 %v461_v12, %v298_v20 }
 0x148   :  { %v228_v24 = vpop.f32.mrf.mxu0 }
 0x149   :  { %v520_v25 = vmax.f32 %v462_v23, 0.0  ;;  %v229_v26 = vadd.f32 %v923_v32, %v228_v24 }
 0x14b   :  { %570 = vst.msk [vmem:[%s1278_s3 + $0x160] sm:$0xff] %vm525_vm0, %v520_v25  ;;  %v393_v27 = vadd.f32 %v392_v21, %v229_v26 }
 0x14c   :  { %v300_v28 = vpop.f32.mrf.mxu2 }
 0x14d   :  { %v497_v29 = vmax.f32 %v393_v27, 0.0  ;;  %v301_v30 = vadd.f32 %v923_v32, %v300_v28 }
 0x14e   :  { %v467_v35 = vpop.f32.mrf.mxu3 }
 0x14f   :  { %v395_v31 = vpop.f32.mrf.mxu1  ;;  %547 = vst.msk [vmem:[%s1278_s3 + $0xa8] sm:$0xff] %vm525_vm0, %v497_v29  ;;  %v465_v33 = vadd.f32 %v464_v22, %v301_v30 }
 0x150   :  { %v231_v34 = vpop.f32.mrf.mxu0 }
 0x151   :  { %v521_v36 = vmax.f32 %v465_v33, 0.0  ;;  %v232_v37 = vadd.f32 %v923_v32, %v231_v34 }
 0x153   :  { %571 = vst.msk [vmem:[%s1278_s3 + $0x168] sm:$0xff] %vm525_vm0, %v521_v36  ;;  %v396_v38 = vadd.f32 %v395_v31, %v232_v37 }
 0x154   :  { %v303_v39 = vpop.f32.mrf.mxu2 }
 0x155   :  { %v498_v40 = vmax.f32 %v396_v38, 0.0  ;;  %v304_v42 = vadd.f32 %v923_v32, %v303_v39 }
 0x156   :  { %v470_v48 = vpop.f32.mrf.mxu3 }
 0x157   :  { %v398_v43 = vpop.f32.mrf.mxu1  ;;  %548 = vst.msk [vmem:[%s1278_s3 + $0xb0] sm:$0xff] %vm525_vm0, %v498_v40  ;;  %v468_v44 = vadd.f32 %v467_v35, %v304_v42 }
 0x158   :  { %v234_v45 = vpop.f32.mrf.mxu0 }
 0x159   :  { %v522_v46 = vmax.f32 %v468_v44, 0.0  ;;  %v235_v47 = vadd.f32 %v923_v32, %v234_v45 }
 0x15b   :  { %572 = vst.msk [vmem:[%s1278_s3 + $0x170] sm:$0xff] %vm525_vm0, %v522_v46  ;;  %v399_v49 = vadd.f32 %v398_v43, %v235_v47 }
 0x15c   :  { %v306_v50 = vpop.f32.mrf.mxu2 }
 0x15d   :  { %v499_v52 = vmax.f32 %v399_v49, 0.0  ;;  %v307_v53 = vadd.f32 %v923_v32, %v306_v50 }
 0x15e   :  { %v473_v59 = vpop.f32.mrf.mxu3 }
 0x15f   :  { %v401_v54 = vpop.f32.mrf.mxu1  ;;  %549 = vst.msk [vmem:[%s1278_s3 + $0xb8] sm:$0xff] %vm525_vm0, %v499_v52  ;;  %v471_v56 = vadd.f32 %v470_v48, %v307_v53 }
 0x160   :  { %v402_v55 = vadd.f32 %v401_v54, %v238_v51 }
 0x161   :  { %v523_v58 = vmax.f32 %v471_v56, 0.0 }
 0x162   :  { %v500_v57 = vmax.f32 %v402_v55, 0.0 }
 0x163   :  { %573 = vst.msk [vmem:[%s1278_s3 + $0x178] sm:$0xff] %vm525_vm0, %v523_v58 }
 0x164   :  { %550 = vst.msk [vmem:[%s1278_s3 + $0xc0] sm:$0xff] %vm525_vm0, %v500_v57  ;;  %v309_v41 = vpop.f32.mrf.mxu2 }
 0x165   :  { %v310_v60 = vadd.f32 %v923_v32, %v309_v41 }
 0x167   :  { %v474_v61 = vadd.f32 %v473_v59, %v310_v60 }
 0x169   :  { %v524_v62 = vmax.f32 %v474_v61, 0.0 }
 0x16b   :  { %574 = vst.msk [vmem:[%s1278_s3 + $0x180] sm:$0xff] %vm525_vm0, %v524_v62 }

// kernel: network_forward.5
= control target key start
LH: loop header
LB: loop body
LE: loop exit
PB: predicated region body
PF: predicated region fallthrough
CT: control target
= control target key end

     0   :  { %s15599_s0 = inlined_call_operand.vmem [shape: f32[2,6272], index: 0, kind: input, shape index: {}]   ;;  %s15600_s1 = inlined_call_operand.vmem [shape: bf16[6272,256], index: 1, kind: input, shape index: {}]   ;;  %s15601_s2 = inlined_call_operand.vmem [shape: f32[1,256], index: 2, kind: input, shape index: {}]   ;;  %s15602_s3 = inlined_call_operand.vmem [shape: f32[256,128], index: 3, kind: input, shape index: {}]   ;;  %s15603_s4 = inlined_call_operand.vmem [shape: f32[1,128], index: 4, kind: input, shape index: {}]   ;;  %s15604_s5 = inlined_call_operand.vmem [shape: f32[128,64], index: 5, kind: input, shape index: {}]   ;;  %s15605_s6 = inlined_call_operand.vmem [shape: f32[1,64], index: 6, kind: input, shape index: {}]   ;;  %s15606_s7 = inlined_call_operand.vmem [shape: f32[64,6], index: 7, kind: input, shape index: {}]   ;;  %s15607_s8 = inlined_call_operand.vmem [shape: f32[1,6], index: 8, kind: input, shape index: {}]   ;;  %s15608_s9 = inlined_call_operand.hbm [shape: f32[2,6], index: 9, kind: output, shape index: {}]  }
   0x1   :  { %v6434_v0 = vld [vmem:[%s15600_s1 + $0x70] sm:$0xf]  ;;  %v9528_v1 = vld [vmem:[%s15600_s1 + $0x74] sm:$0xf0]  ;;  %v6426_v11 = vld [vmem:[%s15600_s1 + $0x60] sm:$0xf] }
   0x2   :  { %v6498_v2 = vld [vmem:[%s15600_s1 + $0xf0] sm:$0xf]  ;;  %v6435_v3 = vor.u32 %v9528_v1, %v6434_v0  ;;  %v9544_v4 = vld [vmem:[%s15600_s1 + $0xf4] sm:$0xf0]  ;;  %v9526_v13 = vld [vmem:[%s15600_s1 + $0x64] sm:$0xf0] }
   0x3   :  { %v6562_v5 = vld [vmem:[%s15600_s1 + $0x170] sm:$0xf]  ;;  %v9560_v6 = vld [vmem:[%s15600_s1 + $0x174] sm:$0xf0]  ;;  %v6499_v7 = vor.u32 %v9544_v4, %v6498_v2  ;;  %v6490_v14 = vld [vmem:[%s15600_s1 + $0xe0] sm:$0xf]  ;;  %v6427_v16 = vor.u32 %v9526_v13, %v6426_v11 }
   0x4   :  { %v6563_v8 = vor.u32 %v9560_v6, %v6562_v5  ;;  %v6626_v9 = vld [vmem:[%s15600_s1 + $0x1f0] sm:$0xf]  ;;  %v9576_v10 = vld [vmem:[%s15600_s1 + $0x1f4] sm:$0xf0]  ;;  %4930 = vmatpush.bf16.msra.mxu0 %v6435_v3  ;;  %v9542_v15 = vld [vmem:[%s15600_s1 + $0xe4] sm:$0xf0] }
   0x5   :  { %v6627_v12 = vor.u32 %v9576_v10, %v6626_v9  ;;  %4943 = vmatpush.bf16.msra.mxu1 %v6499_v7  ;;  %v6491_v17 = vor.u32 %v9542_v15, %v6490_v14  ;;  %v6554_v18 = vld [vmem:[%s15600_s1 + $0x160] sm:$0xf]  ;;  %v9558_v19 = vld [vmem:[%s15600_s1 + $0x164] sm:$0xf0]  ;;  %v6418_v23 = vld [vmem:[%s15600_s1 + $0x50] sm:$0xf] }
   0x6   :  { %4956 = vmatpush.bf16.msra.mxu2 %v6563_v8  ;;  %v6618_v20 = vld [vmem:[%s15600_s1 + $0x1e0] sm:$0xf]  ;;  %v6555_v21 = vor.u32 %v9558_v19, %v6554_v18  ;;  %v9574_v22 = vld [vmem:[%s15600_s1 + $0x1e4] sm:$0xf0]  ;;  %v9524_v24 = vld [vmem:[%s15600_s1 + $0x54] sm:$0xf0] }
   0x7   :  { %4969 = vmatpush.bf16.msra.mxu3 %v6627_v12  ;;  %v6619_v25 = vor.u32 %v9574_v22, %v6618_v20  ;;  %v6482_v26 = vld [vmem:[%s15600_s1 + $0xd0] sm:$0xf]  ;;  %v9540_v27 = vld [vmem:[%s15600_s1 + $0xd4] sm:$0xf0]  ;;  %v6419_v29 = vor.u32 %v9524_v24, %v6418_v23  ;;  %v6410_v35 = vld [vmem:[%s15600_s1 + $0x40] sm:$0xf] }
   0x8   :  { %v6546_v28 = vld [vmem:[%s15600_s1 + $0x150] sm:$0xf]  ;;  %4931 = vmatpush.bf16.msra.mxu0 %v6427_v16  ;;  %v9556_v30 = vld [vmem:[%s15600_s1 + $0x154] sm:$0xf0]  ;;  %v6483_v33 = vor.u32 %v9540_v27, %v6482_v26  ;;  %v9522_v36 = vld [vmem:[%s15600_s1 + $0x44] sm:$0xf0] }
   0x9   :  { %v6610_v31 = vld [vmem:[%s15600_s1 + $0x1d0] sm:$0xf]  ;;  %v9572_v32 = vld [vmem:[%s15600_s1 + $0x1d4] sm:$0xf0]  ;;  %4944 = vmatpush.bf16.msra.mxu1 %v6491_v17  ;;  %v6547_v34 = vor.u32 %v9556_v30, %v6546_v28  ;;  %v6474_v37 = vld [vmem:[%s15600_s1 + $0xc0] sm:$0xf]  ;;  %v6411_v44 = vor.u32 %v9522_v36, %v6410_v35 }
   0xa   :  { %4957 = vmatpush.bf16.msra.mxu2 %v6555_v21  ;;  %v6611_v38 = vor.u32 %v9572_v32, %v6610_v31  ;;  %v9538_v39 = vld [vmem:[%s15600_s1 + $0xc4] sm:$0xf0]  ;;  %v6538_v40 = vld [vmem:[%s15600_s1 + $0x140] sm:$0xf]  ;;  %v6402_v47 = vld [vmem:[%s15600_s1 + $0x30] sm:$0xf] }
   0xb   :  { %4970 = vmatpush.bf16.msra.mxu3 %v6619_v25  ;;  %v9554_v41 = vld [vmem:[%s15600_s1 + $0x144] sm:$0xf0]  ;;  %v6602_v42 = vld [vmem:[%s15600_s1 + $0x1c0] sm:$0xf]  ;;  %v6475_v45 = vor.u32 %v9538_v39, %v6474_v37  ;;  %v9520_v48 = vld [vmem:[%s15600_s1 + $0x34] sm:$0xf0] }
   0xc   :  { %v9570_v43 = vld [vmem:[%s15600_s1 + $0x1c4] sm:$0xf0]  ;;  %4932 = vmatpush.bf16.msra.mxu0 %v6419_v29  ;;  %v6539_v46 = vor.u32 %v9554_v41, %v6538_v40  ;;  %v6466_v49 = vld [vmem:[%s15600_s1 + $0xb0] sm:$0xf]  ;;  %v9536_v51 = vld [vmem:[%s15600_s1 + $0xb4] sm:$0xf0]  ;;  %v6403_v56 = vor.u32 %v9520_v48, %v6402_v47 }
   0xd   :  { %4945 = vmatpush.bf16.msra.mxu1 %v6483_v33  ;;  %v6603_v50 = vor.u32 %v9570_v43, %v6602_v42  ;;  %v6530_v52 = vld [vmem:[%s15600_s1 + $0x130] sm:$0xf]  ;;  %v9552_v53 = vld [vmem:[%s15600_s1 + $0x134] sm:$0xf0]  ;;  %v6467_v57 = vor.u32 %v9536_v51, %v6466_v49  ;;  %v6394_v59 = vld [vmem:[%s15600_s1 + $0x20] sm:$0xf] }
   0xe   :  { %4958 = vmatpush.bf16.msra.mxu2 %v6547_v34  ;;  %v6594_v54 = vld [vmem:[%s15600_s1 + $0x1b0] sm:$0xf]  ;;  %v9568_v55 = vld [vmem:[%s15600_s1 + $0x1b4] sm:$0xf0]  ;;  %v6531_v58 = vor.u32 %v9552_v53, %v6530_v52  ;;  %v9518_v60 = vld [vmem:[%s15600_s1 + $0x24] sm:$0xf0] }
   0xf   :  { %4971 = vmatpush.bf16.msra.mxu3 %v6611_v38  ;;  %v6458_v61 = vld [vmem:[%s15600_s1 + $0xa0] sm:$0xf]  ;;  %v6595_v62 = vor.u32 %v9568_v55, %v6594_v54  ;;  %v9534_v63 = vld [vmem:[%s15600_s1 + $0xa4] sm:$0xf0]  ;;  %v6395_v4 = vor.u32 %v9518_v60, %v6394_v59  ;;  %v6386_v7 = vld [vmem:[%s15600_s1 + $0x10] sm:$0xf] }
  0x10   :  { %4933 = vmatpush.bf16.msra.mxu0 %v6411_v44  ;;  %v6522_v0 = vld [vmem:[%s15600_s1 + $0x120] sm:$0xf]  ;;  %v9550_v1 = vld [vmem:[%s15600_s1 + $0x124] sm:$0xf0]  ;;  %v6459_v5 = vor.u32 %v9534_v63, %v6458_v61  ;;  %v9516_v8 = vld [vmem:[%s15600_s1 + $0x14] sm:$0xf0] }
  0x11   :  { %4946 = vmatpush.bf16.msra.mxu1 %v6475_v45  ;;  %v6586_v2 = vld [vmem:[%s15600_s1 + $0x1a0] sm:$0xf]  ;;  %v9566_v3 = vld [vmem:[%s15600_s1 + $0x1a4] sm:$0xf0]  ;;  %v6523_v6 = vor.u32 %v9550_v1, %v6522_v0  ;;  %v6450_v9 = vld [vmem:[%s15600_s1 + $0x90] sm:$0xf]  ;;  %v6387_v16 = vor.u32 %v9516_v8, %v6386_v7 }
  0x12   :  { %4959 = vmatpush.bf16.msra.mxu2 %v6539_v46  ;;  %v6587_v10 = vor.u32 %v9566_v3, %v6586_v2  ;;  %v9532_v11 = vld [vmem:[%s15600_s1 + $0x94] sm:$0xf0]  ;;  %v6514_v12 = vld [vmem:[%s15600_s1 + $0x110] sm:$0xf]  ;;  %v6378_v17 = vld [vmem:[%s15600_s1] sm:$0xf] }
  0x13   :  { %4972 = vmatpush.bf16.msra.mxu3 %v6603_v50  ;;  %v9548_v13 = vld [vmem:[%s15600_s1 + $0x114] sm:$0xf0]  ;;  %v6578_v14 = vld [vmem:[%s15600_s1 + $0x190] sm:$0xf]  ;;  %v9514_v18 = vld [vmem:[%s15600_s1 + $0x4] sm:$0xf0]  ;;  %v6451_v19 = vor.u32 %v9532_v11, %v6450_v9 }
  0x14   :  { %4934 = vmatpush.bf16.msra.mxu0 %v6403_v56  ;;  %v9564_v15 = vld [vmem:[%s15600_s1 + $0x194] sm:$0xf0]  ;;  %v6515_v20 = vor.u32 %v9548_v13, %v6514_v12  ;;  %v6442_v21 = vld [vmem:[%s15600_s1 + $0x80] sm:$0xf]  ;;  %v9530_v22 = vld [vmem:[%s15600_s1 + $0x84] sm:$0xf0]  ;;  %v6379_v31 = vor.u32 %v9514_v18, %v6378_v17 }
  0x15   :  { %4947 = vmatpush.bf16.msra.mxu1 %v6467_v57  ;;  %v6506_v23 = vld [vmem:[%s15600_s1 + $0x100] sm:$0xf]  ;;  %v6579_v24 = vor.u32 %v9564_v15, %v6578_v14  ;;  %v9546_v25 = vld [vmem:[%s15600_s1 + $0x104] sm:$0xf0]  ;;  %v6690_v26 = vld [vmem:[%s15600_s1 + $0x270] sm:$0xf]  ;;  %v6443_v35 = vor.u32 %v9530_v22, %v6442_v21 }
  0x16   :  { %4960 = vmatpush.bf16.msra.mxu2 %v6531_v58  ;;  %v9592_v27 = vld [vmem:[%s15600_s1 + $0x274] sm:$0xf0]  ;;  %v6754_v28 = vld [vmem:[%s15600_s1 + $0x2f0] sm:$0xf]  ;;  %v6570_v33 = vld [vmem:[%s15600_s1 + $0x180] sm:$0xf]  ;;  %v6507_v36 = vor.u32 %v9546_v25, %v6506_v23 }
  0x17   :  { %4973 = vmatpush.bf16.msra.mxu3 %v6595_v62  ;;  %v9608_v29 = vld [vmem:[%s15600_s1 + $0x2f4] sm:$0xf0]  ;;  %v6818_v30 = vld [vmem:[%s15600_s1 + $0x370] sm:$0xf]  ;;  %v9562_v34 = vld [vmem:[%s15600_s1 + $0x184] sm:$0xf0]  ;;  %v6691_v39 = vor.u32 %v9592_v27, %v6690_v26 }
  0x18   :  { %4935 = vmatpush.bf16.msra.mxu0 %v6395_v4  ;;  %v9624_v32 = vld [vmem:[%s15600_s1 + $0x374] sm:$0xf0]  ;;  %v6882_v37 = vld [vmem:[%s15600_s1 + $0x3f0] sm:$0xf]  ;;  %v6755_v40 = vor.u32 %v9608_v29, %v6754_v28  ;;  %v6682_v41 = vld [vmem:[%s15600_s1 + $0x260] sm:$0xf]  ;;  %v6571_v43 = vor.u32 %v9562_v34, %v6570_v33 }
  0x19   :  { %4948 = vmatpush.bf16.msra.mxu1 %v6459_v5  ;;  %v9640_v38 = vld [vmem:[%s15600_s1 + $0x3f4] sm:$0xf0]  ;;  %v6819_v42 = vor.u32 %v9624_v32, %v6818_v30  ;;  %v9590_v44 = vld [vmem:[%s15600_s1 + $0x264] sm:$0xf0]  ;;  %v6746_v45 = vld [vmem:[%s15600_s1 + $0x2e0] sm:$0xf] }
  0x1a   :  { %4961 = vmatpush.bf16.msra.mxu2 %v6523_v6  ;;  %v9606_v46 = vld [vmem:[%s15600_s1 + $0x2e4] sm:$0xf0]  ;;  %v6883_v47 = vor.u32 %v9640_v38, %v6882_v37  ;;  %v6810_v48 = vld [vmem:[%s15600_s1 + $0x360] sm:$0xf]  ;;  %v6683_v52 = vor.u32 %v9590_v44, %v6682_v41  ;;  %v6674_v54 = vld [vmem:[%s15600_s1 + $0x250] sm:$0xf] }
  0x1b   :  { %4974 = vmatpush.bf16.msra.mxu3 %v6587_v10  ;;  %v9622_v49 = vld [vmem:[%s15600_s1 + $0x364] sm:$0xf0]  ;;  %v6874_v50 = vld [vmem:[%s15600_s1 + $0x3e0] sm:$0xf]  ;;  %v6747_v53 = vor.u32 %v9606_v46, %v6746_v45  ;;  %v9588_v55 = vld [vmem:[%s15600_s1 + $0x254] sm:$0xf0] }
  0x1c   :  { %4936 = vmatpush.bf16.msra.mxu0 %v6387_v16  ;;  %v9638_v51 = vld [vmem:[%s15600_s1 + $0x3e4] sm:$0xf0]  ;;  %v6811_v56 = vor.u32 %v9622_v49, %v6810_v48  ;;  %v6738_v57 = vld [vmem:[%s15600_s1 + $0x2d0] sm:$0xf]  ;;  %v9604_v58 = vld [vmem:[%s15600_s1 + $0x2d4] sm:$0xf0]  ;;  %v6675_v1 = vor.u32 %v9588_v55, %v6674_v54 }
  0x1d   :  { %4949 = vmatpush.bf16.msra.mxu1 %v6451_v19  ;;  %v33_v59 = vld [vmem:[%s15599_s0] sm:$0xff]  ;;  %v6875_v60 = vor.u32 %v9638_v51, %v6874_v50  ;;  %v6802_v61 = vld [vmem:[%s15600_s1 + $0x350] sm:$0xf]  ;;  %v9620_v62 = vld [vmem:[%s15600_s1 + $0x354] sm:$0xf0]  ;;  %v6739_v2 = vor.u32 %v9604_v58, %v6738_v57 }
  0x1e   :  { %4962 = vmatpush.bf16.msra.mxu2 %v6515_v20  ;;  %59 = vst [vmem:[#allocation1] ss:$4 sm:$0xff] %v33_v59  ;;  %v6866_v63 = vld [vmem:[%s15600_s1 + $0x3d0] sm:$0xf]  ;;  %v9636_v0 = vld [vmem:[%s15600_s1 + $0x3d4] sm:$0xf0]  ;;  %v6803_v5 = vor.u32 %v9620_v62, %v6802_v61 }
  0x1f   :  { %4975 = vmatpush.bf16.msra.mxu3 %v6579_v24  ;;  %v6666_v3 = vld [vmem:[%s15600_s1 + $0x240] sm:$0xf]  ;;  %v9586_v4 = vld [vmem:[%s15600_s1 + $0x244] sm:$0xf0]  ;;  %v6867_v9 = vor.u32 %v9636_v0, %v6866_v63  ;;  %v6658_v13 = vld [vmem:[%s15600_s1 + $0x230] sm:$0xf] }
  0x20   :  { %4937 = vmatpush.bf16.msra.mxu0 %v6379_v31  ;;  %v6730_v6 = vld [vmem:[%s15600_s1 + $0x2c0] sm:$0xf]  ;;  %v9602_v7 = vld [vmem:[%s15600_s1 + $0x2c4] sm:$0xf0]  ;;  %v9584_v14 = vld [vmem:[%s15600_s1 + $0x234] sm:$0xf0]  ;;  %v6667_v17 = vor.u32 %v9586_v4, %v6666_v3 }
  0x21   :  { %4950 = vmatpush.bf16.msra.mxu1 %v6443_v35  ;;  %v6794_v8 = vld [vmem:[%s15600_s1 + $0x340] sm:$0xf]  ;;  %v9618_v10 = vld [vmem:[%s15600_s1 + $0x344] sm:$0xf0]  ;;  %v6722_v15 = vld [vmem:[%s15600_s1 + $0x2b0] sm:$0xf]  ;;  %v6731_v18 = vor.u32 %v9602_v7, %v6730_v6  ;;  %v6659_v34 = vor.u32 %v9584_v14, %v6658_v13 }
  0x22   :  { %4963 = vmatpush.bf16.msra.mxu2 %v6507_v36  ;;  %v6858_v11 = vld [vmem:[%s15600_s1 + $0x3c0] sm:$0xf]  ;;  %v9634_v12 = vld [vmem:[%s15600_s1 + $0x3c4] sm:$0xf0]  ;;  %v9600_v16 = vld [vmem:[%s15600_s1 + $0x2b4] sm:$0xf0]  ;;  %v6795_v22 = vor.u32 %v9618_v10, %v6794_v8 }
  0x23   :  { %4976 = vmatpush.bf16.msra.mxu3 %v6571_v43  ;;  %v6786_v19 = vld [vmem:[%s15600_s1 + $0x330] sm:$0xf]  ;;  %v9616_v20 = vld [vmem:[%s15600_s1 + $0x334] sm:$0xf0]  ;;  %v6859_v25 = vor.u32 %v9634_v12, %v6858_v11  ;;  %v6723_v35 = vor.u32 %v9600_v16, %v6722_v15  ;;  %v6650_v36 = vld [vmem:[%s15600_s1 + $0x220] sm:$0xf] }
  0x24   :  { %4982 = vmatpush.bf16.msrb.mxu0 %v6691_v39  ;;  %v35_v21 = vld [vmem:[%s15599_s0 + $0x10] sm:$0xff]  ;;  %v9632_v31 = vld [vmem:[%s15600_s1 + $0x3b4] sm:$0xf0]  ;;  %v6787_v37 = vor.u32 %v9616_v20, %v6786_v19  ;;  %v9582_v38 = vld [vmem:[%s15600_s1 + $0x224] sm:$0xf0] }
  0x25   :  { %4995 = vmatpush.bf16.msrb.mxu1 %v6755_v40  ;;  %v64_v23 = vld.sshfl [vmem:[#allocation1 + $0x10] sm:$0xff pattern:$0x73625140]  ;;  %v62_v24 = vld.sshfl [vmem:[#allocation1] sm:$0xff pattern:$0x73625140] }
  0x26   :  { %5008 = vmatpush.bf16.msrb.mxu2 %v6819_v42  ;;  %v10691_v26 = vpack.c.bf16 %v64_v23, %v64_v23  ;;  %v10693_v27 = vpack.c.bf16 %v62_v24, %v62_v24  ;;  %v65_v28 = vld.sshfl [vmem:[#allocation1 + $0x18] sm:$0xff pattern:$0x73625140]  ;;  %v63_v29 = vld.sshfl [vmem:[#allocation1 + $0x8] sm:$0xff pattern:$0x73625140] }
  0x27   :  { %5021 = vmatpush.bf16.msrb.mxu3 %v6883_v47  ;;  %v6850_v30 = vld [vmem:[%s15600_s1 + $0x3b0] sm:$0xf]  ;;  %v10701_v32 = vpack.c.bf16 %v65_v28, %v65_v28  ;;  %70 = vst [vmem:[#allocation1] ss:$4 sm:$0xff] %v35_v21  ;;  %v10703_v33 = vpack.c.bf16 %v63_v29, %v63_v29  ;;  %v6714_v39 = vld [vmem:[%s15600_s1 + $0x2a0] sm:$0xf]  ;;  %v6651_v47 = vor.u32 %v9582_v38, %v6650_v36 }
  0x28   :  { %4983 = vmatpush.bf16.msrb.mxu0 %v6683_v52  ;;  %v9598_v40 = vld [vmem:[%s15600_s1 + $0x2a4] sm:$0xf0]  ;;  %v6851_v41 = vor.u32 %v9632_v31, %v6850_v30  ;;  %4964 = vmatmul.bf16.vlgmr.msra.gmra.mxu2 %v10691_v26  ;;  %v6778_v42 = vld [vmem:[%s15600_s1 + $0x320] sm:$0xf]  ;;  %v6642_v46 = vld [vmem:[%s15600_s1 + $0x210] sm:$0xf] }
  0x29   :  { %4996 = vmatpush.bf16.msrb.mxu1 %v6747_v53  ;;  %4938 = vmatmul.bf16.vlgmr.msra.gmra.mxu0 %v10693_v27  ;;  %v9614_v43 = vld [vmem:[%s15600_s1 + $0x324] sm:$0xf0]  ;;  %v6842_v44 = vld [vmem:[%s15600_s1 + $0x3a0] sm:$0xf]  ;;  %v6715_v48 = vor.u32 %v9598_v40, %v6714_v39  ;;  %v9580_v49 = vld [vmem:[%s15600_s1 + $0x214] sm:$0xf0] }
  0x2a   :  { %5009 = vmatpush.bf16.msrb.mxu2 %v6811_v56  ;;  %4977 = vmatmul.bf16.vlgmr.msra.gmra.mxu3 %v10701_v32  ;;  %v9630_v45 = vld [vmem:[%s15600_s1 + $0x3a4] sm:$0xf0]  ;;  %v6706_v50 = vld [vmem:[%s15600_s1 + $0x290] sm:$0xf]  ;;  %v9596_v51 = vld [vmem:[%s15600_s1 + $0x294] sm:$0xf0]  ;;  %v6779_v52 = vor.u32 %v9614_v43, %v6778_v42  ;;  %v6643_v63 = vor.u32 %v9580_v49, %v6642_v46 }
  0x2b   :  { %5022 = vmatpush.bf16.msrb.mxu3 %v6875_v60  ;;  %4951 = vmatmul.bf16.vlgmr.msra.gmra.mxu1 %v10703_v33  ;;  %v6770_v53 = vld [vmem:[%s15600_s1 + $0x310] sm:$0xf]  ;;  %v9612_v54 = vld [vmem:[%s15600_s1 + $0x314] sm:$0xf0]  ;;  %v34_v55 = vld [vmem:[%s15599_s0 + $0x8] sm:$0xff]  ;;  %v6843_v56 = vor.u32 %v9630_v45, %v6842_v44  ;;  %v6707_v0 = vor.u32 %v9596_v51, %v6706_v50 }
  0x2c   :  { %4984 = vmatpush.bf16.msrb.mxu0 %v6675_v1  ;;  %v6834_v57 = vld [vmem:[%s15600_s1 + $0x390] sm:$0xf]  ;;  %v9628_v58 = vld [vmem:[%s15600_s1 + $0x394] sm:$0xf0]  ;;  %61 = vst [vmem:[#allocation1 + $0x20] ss:$4 sm:$0xff] %v34_v55  ;;  %v6771_v4 = vor.u32 %v9612_v54, %v6770_v53 }
  0x2d   :  { %4997 = vmatpush.bf16.msrb.mxu1 %v6739_v2  ;;  %v6634_v59 = vld [vmem:[%s15600_s1 + $0x200] sm:$0xf]  ;;  %v9578_v60 = vld [vmem:[%s15600_s1 + $0x204] sm:$0xf0]  ;;  %v6946_v3 = vld [vmem:[%s15600_s1 + $0x470] sm:$0xf]  ;;  %v6835_v8 = vor.u32 %v9628_v58, %v6834_v57 }
  0x2e   :  { %5010 = vmatpush.bf16.msrb.mxu2 %v6803_v5  ;;  %v6698_v61 = vld [vmem:[%s15600_s1 + $0x280] sm:$0xf]  ;;  %v9594_v62 = vld [vmem:[%s15600_s1 + $0x284] sm:$0xf0]  ;;  %v9656_v5 = vld [vmem:[%s15600_s1 + $0x474] sm:$0xf0]  ;;  %v6635_v15 = vor.u32 %v9578_v60, %v6634_v59 }
  0x2f   :  { %5023 = vmatpush.bf16.msrb.mxu3 %v6867_v9  ;;  %v6762_v1 = vld [vmem:[%s15600_s1 + $0x300] sm:$0xf]  ;;  %v9610_v2 = vld [vmem:[%s15600_s1 + $0x304] sm:$0xf0]  ;;  %v7010_v6 = vld [vmem:[%s15600_s1 + $0x4f0] sm:$0xf]  ;;  %v6699_v16 = vor.u32 %v9594_v62, %v6698_v61  ;;  %v6947_v21 = vor.u32 %v9656_v5, %v6946_v3 }
  0x30   :  { %4985 = vmatpush.bf16.msrb.mxu0 %v6667_v17  ;;  %v9672_v7 = vld [vmem:[%s15600_s1 + $0x4f4] sm:$0xf0]  ;;  %v7074_v9 = vld [vmem:[%s15600_s1 + $0x570] sm:$0xf]  ;;  %v6826_v11 = vld [vmem:[%s15600_s1 + $0x380] sm:$0xf]  ;;  %v6763_v20 = vor.u32 %v9610_v2, %v6762_v1 }
  0x31   :  { %4998 = vmatpush.bf16.msrb.mxu1 %v6731_v18  ;;  %v9688_v10 = vld [vmem:[%s15600_s1 + $0x574] sm:$0xf0]  ;;  %v9626_v12 = vld [vmem:[%s15600_s1 + $0x384] sm:$0xf0]  ;;  %v7138_v13 = vld [vmem:[%s15600_s1 + $0x5f0] sm:$0xf]  ;;  %v7011_v28 = vor.u32 %v9672_v7, %v7010_v6 }
  0x32   :  { %5011 = vmatpush.bf16.msrb.mxu2 %v6795_v22  ;;  %v9704_v14 = vld [vmem:[%s15600_s1 + $0x5f4] sm:$0xf0]  ;;  %v6938_v17 = vld [vmem:[%s15600_s1 + $0x460] sm:$0xf]  ;;  %v9654_v18 = vld [vmem:[%s15600_s1 + $0x464] sm:$0xf0]  ;;  %v7075_v29 = vor.u32 %v9688_v10, %v7074_v9 }
  0x33   :  { %5024 = vmatpush.bf16.msrb.mxu3 %v6859_v25  ;;  %v36_v19 = vld [vmem:[%s15599_s0 + $0x18] sm:$0xff]  ;;  %v7002_v22 = vld [vmem:[%s15600_s1 + $0x4e0] sm:$0xf]  ;;  %v9670_v23 = vld [vmem:[%s15600_s1 + $0x4e4] sm:$0xf0]  ;;  %v7139_v38 = vor.u32 %v9704_v14, %v7138_v13  ;;  %v6939_v40 = vor.u32 %v9654_v18, %v6938_v17 }
  0x34   :  { %4986 = vmatpush.bf16.msrb.mxu0 %v6659_v34  ;;  %v68_v24 = vld.sshfl [vmem:[#allocation1 + $0x30] sm:$0xff pattern:$0x73625140]  ;;  %v66_v25 = vld.sshfl [vmem:[#allocation1 + $0x20] sm:$0xff pattern:$0x73625140]  ;;  %v6827_v34 = vor.u32 %v9626_v12, %v6826_v11  ;;  %v7003_v44 = vor.u32 %v9670_v23, %v7002_v22 }
  0x35   :  { %4999 = vmatpush.bf16.msrb.mxu1 %v6723_v35  ;;  %v69_v30 = vld.sshfl [vmem:[#allocation1 + $0x38] sm:$0xff pattern:$0x73625140]  ;;  %v67_v31 = vld.sshfl [vmem:[#allocation1 + $0x28] sm:$0xff pattern:$0x73625140]  ;;  %v10831_v39 = vpack.c.bf16 %v68_v24, %v68_v24 }
  0x36   :  { %5012 = vmatpush.bf16.msrb.mxu2 %v6787_v37  ;;  %v7066_v35 = vld [vmem:[%s15600_s1 + $0x560] sm:$0xf]  ;;  %v9686_v36 = vld [vmem:[%s15600_s1 + $0x564] sm:$0xf0]  ;;  %v10829_v37 = vpack.c.bf16 %v66_v25, %v66_v25  ;;  %71 = vst [vmem:[#allocation1 + $0x20] ss:$4 sm:$0xff] %v36_v19  ;;  %v10839_v43 = vpack.c.bf16 %v67_v31, %v67_v31  ;;  %v10851_v49 = vpack.c.bf16 %v69_v30, %v69_v30 }
  0x37   :  { %5025 = vmatpush.bf16.msrb.mxu3 %v6851_v41  ;;  %v7130_v41 = vld [vmem:[%s15600_s1 + $0x5e0] sm:$0xf]  ;;  %v9702_v42 = vld [vmem:[%s15600_s1 + $0x5e4] sm:$0xf0]  ;;  %v7067_v45 = vor.u32 %v9686_v36, %v7066_v35  ;;  %v6930_v46 = vld [vmem:[%s15600_s1 + $0x450] sm:$0xf] }
  0x38   :  { %4987 = vmatpush.bf16.msrb.mxu0 %v6651_v47  ;;  %v9652_v47 = vld [vmem:[%s15600_s1 + $0x454] sm:$0xf0]  ;;  %v7058_v51 = vld [vmem:[%s15600_s1 + $0x550] sm:$0xf]  ;;  %v7131_v53 = vor.u32 %v9702_v42, %v7130_v41  ;;  %v6922_v59 = vld [vmem:[%s15600_s1 + $0x440] sm:$0xf] }
  0x39   :  { %5000 = vmatpush.bf16.msrb.mxu1 %v6715_v48  ;;  %v6994_v48 = vld [vmem:[%s15600_s1 + $0x4d0] sm:$0xf]  ;;  %v9668_v50 = vld [vmem:[%s15600_s1 + $0x4d4] sm:$0xf0]  ;;  %v6931_v54 = vor.u32 %v9652_v47, %v6930_v46  ;;  %v9650_v60 = vld [vmem:[%s15600_s1 + $0x444] sm:$0xf0] }
  0x3a   :  { %5013 = vmatpush.bf16.msrb.mxu2 %v6779_v52  ;;  %v9684_v52 = vld [vmem:[%s15600_s1 + $0x554] sm:$0xf0]  ;;  %v7122_v55 = vld [vmem:[%s15600_s1 + $0x5d0] sm:$0xf]  ;;  %v6995_v57 = vor.u32 %v9668_v50, %v6994_v48  ;;  %v6986_v61 = vld [vmem:[%s15600_s1 + $0x4c0] sm:$0xf]  ;;  %v6923_v3 = vor.u32 %v9650_v60, %v6922_v59 }
  0x3b   :  { %5026 = vmatpush.bf16.msrb.mxu3 %v6843_v56  ;;  %v9700_v56 = vld [vmem:[%s15600_s1 + $0x5d4] sm:$0xf0]  ;;  %v7059_v58 = vor.u32 %v9684_v52, %v7058_v51  ;;  %v9666_v62 = vld [vmem:[%s15600_s1 + $0x4c4] sm:$0xf0]  ;;  %v7114_v2 = vld [vmem:[%s15600_s1 + $0x5c0] sm:$0xf] }
  0x3c   :  { %4988 = vmatpush.bf16.msrb.mxu0 %v6643_v63  ;;  %v7050_v63 = vld [vmem:[%s15600_s1 + $0x540] sm:$0xf]  ;;  %v7123_v1 = vor.u32 %v9700_v56, %v7122_v55  ;;  %v6914_v5 = vld [vmem:[%s15600_s1 + $0x430] sm:$0xf]  ;;  %v9648_v6 = vld [vmem:[%s15600_s1 + $0x434] sm:$0xf0]  ;;  %v6987_v7 = vor.u32 %v9666_v62, %v6986_v61 }
  0x3d   :  { %5001 = vmatpush.bf16.msrb.mxu1 %v6707_v0  ;;  %v9682_v0 = vld [vmem:[%s15600_s1 + $0x544] sm:$0xf0]  ;;  %v6978_v9 = vld [vmem:[%s15600_s1 + $0x4b0] sm:$0xf]  ;;  %v9664_v10 = vld [vmem:[%s15600_s1 + $0x4b4] sm:$0xf0]  ;;  %v6915_v19 = vor.u32 %v9648_v6, %v6914_v5 }
  0x3e   :  { %5014 = vmatpush.bf16.msrb.mxu2 %v6771_v4  ;;  %v9698_v4 = vld [vmem:[%s15600_s1 + $0x5c4] sm:$0xf0]  ;;  %v7042_v11 = vld [vmem:[%s15600_s1 + $0x530] sm:$0xf]  ;;  %v9680_v12 = vld [vmem:[%s15600_s1 + $0x534] sm:$0xf0]  ;;  %v6979_v24 = vor.u32 %v9664_v10, %v6978_v9 }
  0x3f   :  { %5027 = vmatpush.bf16.msrb.mxu3 %v6835_v8  ;;  %v7051_v8 = vor.u32 %v9682_v0, %v7050_v63  ;;  %v7106_v13 = vld [vmem:[%s15600_s1 + $0x5b0] sm:$0xf]  ;;  %v9696_v14 = vld [vmem:[%s15600_s1 + $0x5b4] sm:$0xf0]  ;;  %v9646_v17 = vld [vmem:[%s15600_s1 + $0x424] sm:$0xf0]  ;;  %v7043_v25 = vor.u32 %v9680_v12, %v7042_v11 }
  0x40   :  { %4989 = vmatpush.bf16.msrb.mxu0 %v6635_v15  ;;  %v7115_v15 = vor.u32 %v9698_v4, %v7114_v2  ;;  %v10925_v18 = vld.sshfl [vmem:[#allocation1] sm:$0xff pattern:$0x73625140]  ;;  %v10933_v22 = vld.sshfl [vmem:[#allocation1 + $0x10] sm:$0xff pattern:$0x73625140] }
  0x41   :  { %5002 = vmatpush.bf16.msrb.mxu1 %v6699_v16  ;;  %v6906_v16 = vld [vmem:[%s15600_s1 + $0x420] sm:$0xf]  ;;  %v9678_v31 = vld [vmem:[%s15600_s1 + $0x524] sm:$0xf0]  ;;  %v6898_v42 = vld [vmem:[%s15600_s1 + $0x410] sm:$0xf] }
  0x42   :  { %5015 = vmatpush.bf16.msrb.mxu2 %v6763_v20  ;;  %v6970_v20 = vld [vmem:[%s15600_s1 + $0x4a0] sm:$0xf]  ;;  %v6907_v35 = vor.u32 %v9646_v17, %v6906_v16  ;;  %v9660_v46 = vld [vmem:[%s15600_s1 + $0x494] sm:$0xf0]  ;;  %v7026_v47 = vld [vmem:[%s15600_s1 + $0x510] sm:$0xf] }
  0x43   :  { %5028 = vmatpush.bf16.msrb.mxu3 %v6827_v34  ;;  %4990 = vmatmul.bf16.vlgmr.msrb.gmra.mxu0 %v10829_v37  ;;  %v37_v23 = vld [vmem:[%s15599_s0 + $0x20] sm:$0xff]  ;;  %v7107_v34 = vor.u32 %v9696_v14, %v7106_v13  ;;  %v9676_v48 = vld [vmem:[%s15600_s1 + $0x514] sm:$0xf0]  ;;  %v7090_v51 = vld [vmem:[%s15600_s1 + $0x590] sm:$0xf] }
  0x44   :  { %5034 = vmatpush.bf16.msra.mxu0 %v6947_v21  ;;  %5003 = vmatmul.bf16.vlgmr.msrb.gmra.mxu1 %v10839_v43  ;;  %v9662_v21 = vld [vmem:[%s15600_s1 + $0x4a4] sm:$0xf0]  ;;  %v7034_v30 = vld [vmem:[%s15600_s1 + $0x520] sm:$0xf]  ;;  %v7202_v62 = vld [vmem:[%s15600_s1 + $0x670] sm:$0xf] }
  0x45   :  { %5047 = vmatpush.bf16.msra.mxu1 %v7011_v28  ;;  %5016 = vmatmul.bf16.vlgmr.msrb.gmra.mxu2 %v10831_v39  ;;  %v10938_v28 = vld.sshfl [vmem:[#allocation1 + $0x8] sm:$0xff pattern:$0x73625140]  ;;  %v7098_v36 = vld [vmem:[%s15600_s1 + $0x5a0] sm:$0xf]  ;;  %v7035_v41 = vor.u32 %v9678_v31, %v7034_v30 }
  0x46   :  { %5060 = vmatpush.bf16.msra.mxu2 %v7075_v29  ;;  %5029 = vmatmul.bf16.vlgmr.msrb.gmra.mxu3 %v10851_v49  ;;  %v10940_v29 = vld.sshfl [vmem:[#allocation1 + $0x18] sm:$0xff pattern:$0x73625140]  ;;  %v9642_v55 = vld [vmem:[%s15600_s1 + $0x404] sm:$0xf0]  ;;  %v11054_v30 = vpack.c.bf16 %v10938_v28, %v10938_v28 }
  0x47   :  { %5073 = vmatpush.bf16.msra.mxu3 %v7139_v38  ;;  %80 = vst [vmem:[#allocation1] ss:$4 sm:$0xff] %v37_v23  ;;  %v9694_v38 = vld [vmem:[%s15600_s1 + $0x5a4] sm:$0xf0]  ;;  %v7018_v60 = vld [vmem:[%s15600_s1 + $0x500] sm:$0xf] }
  0x48   :  { %5035 = vmatpush.bf16.msra.mxu0 %v6939_v40  ;;  %v6971_v40 = vor.u32 %v9662_v21, %v6970_v20  ;;  %v7099_v50 = vor.u32 %v9694_v38, %v7098_v36  ;;  %v9658_v59 = vld [vmem:[%s15600_s1 + $0x484] sm:$0xf0]  ;;  %v9720_v63 = vld [vmem:[%s15600_s1 + $0x674] sm:$0xf0]  ;;  %v7082_v6 = vld [vmem:[%s15600_s1 + $0x580] sm:$0xf]  ;;  %v11037_v20 = vpack.c.bf16 %v10925_v18, %v10925_v18  ;;  %v11041_v21 = vpack.c.bf16 %v10933_v22, %v10933_v22 }
  0x49   :  { %5048 = vmatpush.bf16.msra.mxu1 %v7003_v44  ;;  %v9644_v44 = vld [vmem:[%s15600_s1 + $0x414] sm:$0xf0]  ;;  %v9674_v61 = vld [vmem:[%s15600_s1 + $0x504] sm:$0xf0]  ;;  %v7203_v10 = vor.u32 %v9720_v63, %v7202_v62  ;;  %v7394_v12 = vld [vmem:[%s15600_s1 + $0x7f0] sm:$0xf]  ;;  %v11058_v22 = vpack.c.bf16 %v10940_v29, %v10940_v29 }
  0x4a   :  { %5061 = vmatpush.bf16.msra.mxu2 %v7067_v45  ;;  %v6962_v45 = vld [vmem:[%s15600_s1 + $0x490] sm:$0xf]  ;;  %v6899_v52 = vor.u32 %v9644_v44, %v6898_v42  ;;  %v9736_v2 = vld [vmem:[%s15600_s1 + $0x6f4] sm:$0xf0]  ;;  %v7019_v9 = vor.u32 %v9674_v61, %v7018_v60  ;;  %v7194_v16 = vld [vmem:[%s15600_s1 + $0x660] sm:$0xf] }
  0x4b   :  { %5074 = vmatpush.bf16.msra.mxu3 %v7131_v53  ;;  %v9692_v53 = vld [vmem:[%s15600_s1 + $0x594] sm:$0xf0]  ;;  %v6963_v56 = vor.u32 %v9660_v46, %v6962_v45  ;;  %v9718_v17 = vld [vmem:[%s15600_s1 + $0x664] sm:$0xf0]  ;;  %v7186_v38 = vld [vmem:[%s15600_s1 + $0x650] sm:$0xf] }
  0x4c   :  { %5036 = vmatpush.bf16.msra.mxu0 %v6931_v54  ;;  %v6890_v54 = vld [vmem:[%s15600_s1 + $0x400] sm:$0xf]  ;;  %v7091_v0 = vor.u32 %v9692_v53, %v7090_v51  ;;  %v9752_v5 = vld [vmem:[%s15600_s1 + $0x774] sm:$0xf0]  ;;  %v9734_v23 = vld [vmem:[%s15600_s1 + $0x6e4] sm:$0xf0]  ;;  %v7195_v31 = vor.u32 %v9718_v17, %v7194_v16 }
  0x4d   :  { %5049 = vmatpush.bf16.msra.mxu1 %v6995_v57  ;;  %v7027_v57 = vor.u32 %v9676_v48, %v7026_v47  ;;  %v6891_v4 = vor.u32 %v9642_v55, %v6890_v54  ;;  %v9768_v13 = vld [vmem:[%s15600_s1 + $0x7f4] sm:$0xf0]  ;;  %v7314_v42 = vld [vmem:[%s15600_s1 + $0x750] sm:$0xf]  ;;  %v7178_v48 = vld [vmem:[%s15600_s1 + $0x640] sm:$0xf] }
  0x4e   :  { %5062 = vmatpush.bf16.msra.mxu2 %v7059_v58  ;;  %v6954_v58 = vld [vmem:[%s15600_s1 + $0x480] sm:$0xf]  ;;  %v7395_v18 = vor.u32 %v9768_v13, %v7394_v12  ;;  %v9716_v29 = vld [vmem:[%s15600_s1 + $0x654] sm:$0xf0]  ;;  %v7378_v46 = vld [vmem:[%s15600_s1 + $0x7d0] sm:$0xf] }
  0x4f   :  { %5075 = vmatpush.bf16.msra.mxu3 %v7123_v1  ;;  %v7266_v1 = vld [vmem:[%s15600_s1 + $0x6f0] sm:$0xf]  ;;  %v9748_v44 = vld [vmem:[%s15600_s1 + $0x754] sm:$0xf0]  ;;  %v9714_v51 = vld [vmem:[%s15600_s1 + $0x644] sm:$0xf0] }
  0x50   :  { %5037 = vmatpush.bf16.msra.mxu0 %v6923_v3  ;;  %v7330_v3 = vld [vmem:[%s15600_s1 + $0x770] sm:$0xf]  ;;  %v7267_v11 = vor.u32 %v9736_v2, %v7266_v1  ;;  %v9764_v47 = vld [vmem:[%s15600_s1 + $0x7d4] sm:$0xf0]  ;;  %v9730_v53 = vld [vmem:[%s15600_s1 + $0x6c4] sm:$0xf0]  ;;  %v7315_v55 = vor.u32 %v9748_v44, %v7314_v42 }
  0x51   :  { %5050 = vmatpush.bf16.msra.mxu1 %v6987_v7  ;;  %v9690_v7 = vld [vmem:[%s15600_s1 + $0x584] sm:$0xf0]  ;;  %v7331_v14 = vor.u32 %v9752_v5, %v7330_v3  ;;  %v7379_v61 = vor.u32 %v9764_v47, %v7378_v46  ;;  %v11121_v63 = vld.sshfl [vmem:[#allocation1 + $0x38] sm:$0xff pattern:$0x73625140] }
  0x52   :  { %5063 = vmatpush.bf16.msra.mxu2 %v7051_v8  ;;  %v6955_v8 = vor.u32 %v9658_v59, %v6954_v58  ;;  %v9746_v58 = vld [vmem:[%s15600_s1 + $0x744] sm:$0xf0]  ;;  %v11114_v59 = vld.sshfl [vmem:[#allocation1 + $0x30] sm:$0xff pattern:$0x73625140] }
  0x53   :  { %5076 = vmatpush.bf16.msra.mxu3 %v7115_v15  ;;  %v7083_v15 = vor.u32 %v9690_v7, %v7082_v6  ;;  %v38_v60 = vld [vmem:[%s15599_s0 + $0x28] sm:$0xff]  ;;  %v7370_v1 = vld [vmem:[%s15600_s1 + $0x7c0] sm:$0xf]  ;;  %v7170_v5 = vld [vmem:[%s15600_s1 + $0x630] sm:$0xf] }
  0x54   :  { %5038 = vmatpush.bf16.msra.mxu0 %v6915_v19  ;;  %v7258_v19 = vld [vmem:[%s15600_s1 + $0x6e0] sm:$0xf]  ;;  %v11119_v62 = vld.sshfl [vmem:[#allocation1 + $0x28] sm:$0xff pattern:$0x73625140] }
  0x55   :  { %5051 = vmatpush.bf16.msra.mxu1 %v6979_v24  ;;  %v7322_v24 = vld [vmem:[%s15600_s1 + $0x760] sm:$0xf]  ;;  %v7259_v36 = vor.u32 %v9734_v23, %v7258_v19  ;;  %v9762_v2 = vld [vmem:[%s15600_s1 + $0x7c4] sm:$0xf0]  ;;  %v9712_v6 = vld [vmem:[%s15600_s1 + $0x634] sm:$0xf0] }
  0x56   :  { %5064 = vmatpush.bf16.msra.mxu2 %v7043_v25  ;;  %v9750_v25 = vld [vmem:[%s15600_s1 + $0x764] sm:$0xf0]  ;;  %v7234_v7 = vld [vmem:[%s15600_s1 + $0x6b0] sm:$0xf]  ;;  %v7171_v12 = vor.u32 %v9712_v6, %v7170_v5  ;;  %v7162_v17 = vld [vmem:[%s15600_s1 + $0x620] sm:$0xf] }
  0x57   :  { %5077 = vmatpush.bf16.msra.mxu3 %v7107_v34  ;;  %v7386_v34 = vld [vmem:[%s15600_s1 + $0x7e0] sm:$0xf]  ;;  %v7323_v28 = vor.u32 %v9750_v25, %v7322_v24  ;;  %v7362_v13 = vld [vmem:[%s15600_s1 + $0x7b0] sm:$0xf]  ;;  %v9710_v19 = vld [vmem:[%s15600_s1 + $0x624] sm:$0xf0] }
  0x58   :  { %5039 = vmatpush.bf16.msra.mxu0 %v6907_v35  ;;  %v9766_v35 = vld [vmem:[%s15600_s1 + $0x7e4] sm:$0xf0]  ;;  %v7226_v23 = vld [vmem:[%s15600_s1 + $0x6a0] sm:$0xf]  ;;  %v9724_v42 = vld [vmem:[%s15600_s1 + $0x694] sm:$0xf0] }
  0x59   :  { %5052 = vmatpush.bf16.msra.mxu1 %v6971_v40  ;;  %v7250_v40 = vld [vmem:[%s15600_s1 + $0x6d0] sm:$0xf]  ;;  %v7387_v45 = vor.u32 %v9766_v35, %v7386_v34  ;;  %v9726_v24 = vld [vmem:[%s15600_s1 + $0x6a4] sm:$0xf0]  ;;  %v7290_v25 = vld [vmem:[%s15600_s1 + $0x720] sm:$0xf]  ;;  %v7163_v34 = vor.u32 %v9710_v19, %v7162_v17 }
  0x5a   :  { %5065 = vmatpush.bf16.msra.mxu2 %v7035_v41  ;;  %v9732_v41 = vld [vmem:[%s15600_s1 + $0x6d4] sm:$0xf0]  ;;  %v7354_v35 = vld [vmem:[%s15600_s1 + $0x7a0] sm:$0xf]  ;;  %v7282_v44 = vld [vmem:[%s15600_s1 + $0x710] sm:$0xf] }
  0x5b   :  { %5078 = vmatpush.bf16.msra.mxu3 %v7099_v50  ;;  %v7187_v50 = vor.u32 %v9716_v29, %v7186_v38  ;;  %v7251_v54 = vor.u32 %v9732_v41, %v7250_v40  ;;  %v7154_v29 = vld [vmem:[%s15600_s1 + $0x610] sm:$0xf]  ;;  %v9708_v40 = vld [vmem:[%s15600_s1 + $0x614] sm:$0xf0]  ;;  %v7450_v17 = vld [vmem:[%s15600_s1 + $0x860] sm:$0xf] }
  0x5c   :  { %5040 = vmatpush.bf16.msra.mxu0 %v6899_v52  ;;  %v7242_v52 = vld [vmem:[%s15600_s1 + $0x6c0] sm:$0xf]  ;;  %v7218_v41 = vld [vmem:[%s15600_s1 + $0x690] sm:$0xf]  ;;  %v9816_v6 = vld [vmem:[%s15600_s1 + $0x974] sm:$0xf0] }
  0x5d   :  { %5053 = vmatpush.bf16.msra.mxu1 %v6963_v56  ;;  %v7306_v56 = vld [vmem:[%s15600_s1 + $0x740] sm:$0xf]  ;;  %v7243_v3 = vor.u32 %v9730_v53, %v7242_v52  ;;  %v7346_v47 = vld [vmem:[%s15600_s1 + $0x790] sm:$0xf]  ;;  %v9706_v52 = vld [vmem:[%s15600_s1 + $0x604] sm:$0xf0]  ;;  %v7219_v53 = vor.u32 %v9724_v42, %v7218_v41 }
  0x5e   :  { %5066 = vmatpush.bf16.msra.mxu2 %v7027_v57  ;;  %v11109_v57 = vld.sshfl [vmem:[#allocation1 + $0x20] sm:$0xff pattern:$0x73625140]  ;;  %v9782_v19 = vld [vmem:[%s15600_s1 + $0x864] sm:$0xf0] }
  0x5f   :  { %5079 = vmatpush.bf16.msra.mxu3 %v7091_v0  ;;  %v7179_v0 = vor.u32 %v9714_v51, %v7178_v48  ;;  %81 = vst [vmem:[#allocation1 + $0x20] ss:$4 sm:$0xff] %v38_v60  ;;  %v7155_v48 = vor.u32 %v9708_v40, %v7154_v29  ;;  %v7146_v51 = vld [vmem:[%s15600_s1 + $0x600] sm:$0xf]  ;;  %v9738_v60 = vld [vmem:[%s15600_s1 + $0x704] sm:$0xf0] }
  0x60   :  { %5041 = vmatpush.bf16.msra.mxu0 %v6891_v4  ;;  %v7307_v4 = vor.u32 %v9746_v58, %v7306_v56  ;;  %v9722_v56 = vld [vmem:[%s15600_s1 + $0x684] sm:$0xf0]  ;;  %v7274_v58 = vld [vmem:[%s15600_s1 + $0x700] sm:$0xf]  ;;  %v7147_v5 = vor.u32 %v9706_v52, %v7146_v51  ;;  %v7442_v40 = vld [vmem:[%s15600_s1 + $0x850] sm:$0xf] }
  0x61   :  { %5054 = vmatpush.bf16.msra.mxu1 %v6955_v8  ;;  %v9728_v8 = vld [vmem:[%s15600_s1 + $0x6b4] sm:$0xf0]  ;;  %v7506_v41 = vld [vmem:[%s15600_s1 + $0x8d0] sm:$0xf] }
  0x62   :  { %5067 = vmatpush.bf16.msra.mxu2 %v7019_v9  ;;  %v7298_v9 = vld [vmem:[%s15600_s1 + $0x730] sm:$0xf]  ;;  %v9796_v42 = vld [vmem:[%s15600_s1 + $0x8d4] sm:$0xf0] }
  0x63   :  { %5080 = vmatpush.bf16.msra.mxu3 %v7083_v15  ;;  %5042 = vmatmul.bf16.vlgmr.msra.gmra.mxu0 %v11037_v20  ;;  %v7235_v15 = vor.u32 %v9728_v8, %v7234_v7  ;;  %v7338_v7 = vld [vmem:[%s15600_s1 + $0x780] sm:$0xf]  ;;  %v9754_v8 = vld [vmem:[%s15600_s1 + $0x784] sm:$0xf0]  ;;  %v7507_v51 = vor.u32 %v9796_v42, %v7506_v41 }
  0x64   :  { %5086 = vmatpush.bf16.msrb.mxu0 %v7203_v10  ;;  %5055 = vmatmul.bf16.vlgmr.msra.gmra.mxu1 %v11054_v30  ;;  %v9744_v10 = vld [vmem:[%s15600_s1 + $0x734] sm:$0xf0] }
  0x65   :  { %5099 = vmatpush.bf16.msrb.mxu1 %v7267_v11  ;;  %5068 = vmatmul.bf16.vlgmr.msra.gmra.mxu2 %v11041_v21  ;;  %v7371_v11 = vor.u32 %v9762_v2, %v7370_v1  ;;  %v7299_v16 = vor.u32 %v9744_v10, %v7298_v9  ;;  %v7522_v2 = vld [vmem:[%s15600_s1 + $0x8f0] sm:$0xf]  ;;  %v7275_v10 = vor.u32 %v9738_v60, %v7274_v58  ;;  %v7562_v58 = vld [vmem:[%s15600_s1 + $0x940] sm:$0xf]  ;;  %v9810_v60 = vld [vmem:[%s15600_s1 + $0x944] sm:$0xf0] }
  0x66   :  { %5112 = vmatpush.bf16.msrb.mxu2 %v7331_v14  ;;  %5081 = vmatmul.bf16.vlgmr.msra.gmra.mxu3 %v11058_v22  ;;  %v9760_v14 = vld [vmem:[%s15600_s1 + $0x7b4] sm:$0xf0] }
  0x67   :  { %5125 = vmatpush.bf16.msrb.mxu3 %v7395_v18  ;;  %v9742_v18 = vld [vmem:[%s15600_s1 + $0x724] sm:$0xf0] }
  0x68   :  { %5087 = vmatpush.bf16.msrb.mxu0 %v7195_v31  ;;  %v7363_v31 = vor.u32 %v9760_v14, %v7362_v13  ;;  %v7291_v38 = vor.u32 %v9742_v18, %v7290_v25  ;;  %v7650_v13 = vld [vmem:[%s15600_s1 + $0x9f0] sm:$0xf]  ;;  %v9832_v14 = vld [vmem:[%s15600_s1 + $0x9f4] sm:$0xf0]  ;;  %v11264_v25 = vpack.c.bf16 %v11114_v59, %v11114_v59  ;;  %v9798_v18 = vld [vmem:[%s15600_s1 + $0x8e4] sm:$0xf0]  ;;  %v11281_v59 = vpack.c.bf16 %v11121_v63, %v11121_v63 }
  0x69   :  { %5100 = vmatpush.bf16.msrb.mxu1 %v7259_v36  ;;  %v9758_v36 = vld [vmem:[%s15600_s1 + $0x7a4] sm:$0xf0]  ;;  %v9780_v63 = vld [vmem:[%s15600_s1 + $0x854] sm:$0xf0] }
  0x6a   :  { %5113 = vmatpush.bf16.msrb.mxu2 %v7323_v28  ;;  %v7227_v28 = vor.u32 %v9726_v24, %v7226_v23  ;;  %v7355_v46 = vor.u32 %v9758_v36, %v7354_v35  ;;  %v7514_v23 = vld [vmem:[%s15600_s1 + $0x8e0] sm:$0xf]  ;;  %v11260_v24 = vpack.c.bf16 %v11109_v57, %v11109_v57  ;;  %v7651_v57 = vor.u32 %v9832_v14, %v7650_v13 }
  0x6b   :  { %5126 = vmatpush.bf16.msrb.mxu3 %v7387_v45  ;;  %v9740_v45 = vld [vmem:[%s15600_s1 + $0x714] sm:$0xf0]  ;;  %v11277_v35 = vpack.c.bf16 %v11119_v62, %v11119_v62  ;;  %v7451_v36 = vor.u32 %v9782_v19, %v7450_v17  ;;  %v7515_v29 = vor.u32 %v9798_v18, %v7514_v23 }
  0x6c   :  { %5088 = vmatpush.bf16.msrb.mxu0 %v7187_v50  ;;  %v9756_v50 = vld [vmem:[%s15600_s1 + $0x794] sm:$0xf0] }
  0x6d   :  { %5101 = vmatpush.bf16.msrb.mxu1 %v7251_v54  ;;  %v7283_v54 = vor.u32 %v9740_v45, %v7282_v44  ;;  %v7347_v1 = vor.u32 %v9756_v50, %v7346_v47  ;;  %v7570_v44 = vld [vmem:[%s15600_s1 + $0x950] sm:$0xf]  ;;  %v9812_v45 = vld [vmem:[%s15600_s1 + $0x954] sm:$0xf0]  ;;  %v7443_v47 = vor.u32 %v9780_v63, %v7442_v40 }
  0x6e   :  { %5114 = vmatpush.bf16.msrb.mxu2 %v7315_v55  ;;  %v7210_v55 = vld [vmem:[%s15600_s1 + $0x680] sm:$0xf]  ;;  %v9828_v50 = vld [vmem:[%s15600_s1 + $0x9d4] sm:$0xf0]  ;;  %v7571_v52 = vor.u32 %v9812_v45, %v7570_v44 }
  0x6f   :  { %5127 = vmatpush.bf16.msrb.mxu3 %v7379_v61  ;;  %v7458_v61 = vld [vmem:[%s15600_s1 + $0x870] sm:$0xf]  ;;  %v7211_v9 = vor.u32 %v9722_v56, %v7210_v55  ;;  %v7498_v55 = vld [vmem:[%s15600_s1 + $0x8c0] sm:$0xf]  ;;  %v9794_v56 = vld [vmem:[%s15600_s1 + $0x8c4] sm:$0xf0] }
  0x70   :  { %5089 = vmatpush.bf16.msrb.mxu0 %v7179_v0  ;;  %v9784_v0 = vld [vmem:[%s15600_s1 + $0x874] sm:$0xf0] }
  0x71   :  { %5102 = vmatpush.bf16.msrb.mxu1 %v7243_v3  ;;  %v9800_v3 = vld [vmem:[%s15600_s1 + $0x8f4] sm:$0xf0] }
  0x72   :  { %5115 = vmatpush.bf16.msrb.mxu2 %v7307_v4  ;;  %v7586_v4 = vld [vmem:[%s15600_s1 + $0x970] sm:$0xf] }
  0x73   :  { %5128 = vmatpush.bf16.msrb.mxu3 %v7371_v11  ;;  %v7459_v11 = vor.u32 %v9784_v0, %v7458_v61 }
  0x74   :  { %5090 = vmatpush.bf16.msrb.mxu0 %v7171_v12  ;;  %v7523_v12 = vor.u32 %v9800_v3, %v7522_v2  ;;  %v9826_v2 = vld [vmem:[%s15600_s1 + $0x9c4] sm:$0xf0]  ;;  %v7426_v3 = vld [vmem:[%s15600_s1 + $0x830] sm:$0xf] }
  0x75   :  { %5103 = vmatpush.bf16.msrb.mxu1 %v7235_v15  ;;  %v7587_v15 = vor.u32 %v9816_v6, %v7586_v4  ;;  %v7499_v4 = vor.u32 %v9794_v56, %v7498_v55  ;;  %v9776_v6 = vld [vmem:[%s15600_s1 + $0x834] sm:$0xf0] }
  0x76   :  { %5116 = vmatpush.bf16.msrb.mxu2 %v7299_v16  ;;  %v7339_v16 = vor.u32 %v9754_v8, %v7338_v7  ;;  %v7490_v7 = vld [vmem:[%s15600_s1 + $0x8b0] sm:$0xf]  ;;  %v9792_v8 = vld [vmem:[%s15600_s1 + $0x8b4] sm:$0xf0] }
  0x77   :  { %5129 = vmatpush.bf16.msrb.mxu3 %v7363_v31  ;;  %v7578_v31 = vld [vmem:[%s15600_s1 + $0x960] sm:$0xf] }
  0x78   :  { %5091 = vmatpush.bf16.msrb.mxu0 %v7163_v34  ;;  %v9814_v34 = vld [vmem:[%s15600_s1 + $0x964] sm:$0xf0] }
  0x79   :  { %5104 = vmatpush.bf16.msrb.mxu1 %v7227_v28  ;;  %v7642_v28 = vld [vmem:[%s15600_s1 + $0x9e0] sm:$0xf]  ;;  %v7579_v62 = vor.u32 %v9814_v34, %v7578_v31 }
  0x7a   :  { %5117 = vmatpush.bf16.msrb.mxu2 %v7291_v38  ;;  %v9830_v38 = vld [vmem:[%s15600_s1 + $0x9e4] sm:$0xf0] }
  0x7b   :  { %5130 = vmatpush.bf16.msrb.mxu3 %v7355_v46  ;;  %v7643_v46 = vor.u32 %v9830_v38, %v7642_v28 }
  0x7c   :  { %5092 = vmatpush.bf16.msrb.mxu0 %v7155_v48  ;;  %v7634_v48 = vld [vmem:[%s15600_s1 + $0x9d0] sm:$0xf] }
  0x7d   :  { %5105 = vmatpush.bf16.msrb.mxu1 %v7219_v53  ;;  %v7434_v53 = vld [vmem:[%s15600_s1 + $0x840] sm:$0xf]  ;;  %v7635_v61 = vor.u32 %v9828_v50, %v7634_v48 }
  0x7e   :  { %5118 = vmatpush.bf16.msrb.mxu2 %v7283_v54  ;;  %v9778_v54 = vld [vmem:[%s15600_s1 + $0x844] sm:$0xf0] }
  0x7f   :  { %5131 = vmatpush.bf16.msrb.mxu3 %v7347_v1  ;;  %v7435_v0 = vor.u32 %v9778_v54, %v7434_v53  ;;  %v7626_v1 = vld [vmem:[%s15600_s1 + $0x9c0] sm:$0xf] }
  0x80   :  { %5093 = vmatpush.bf16.msrb.mxu0 %v7147_v5  ;;  %v7563_v5 = vor.u32 %v9810_v60, %v7562_v58 }
  0x81   :  { %5106 = vmatpush.bf16.msrb.mxu1 %v7211_v9  ;;  %v7554_v9 = vld [vmem:[%s15600_s1 + $0x930] sm:$0xf] }
  0x82   :  { %5119 = vmatpush.bf16.msrb.mxu2 %v7275_v10  ;;  %v9808_v10 = vld [vmem:[%s15600_s1 + $0x934] sm:$0xf0] }
  0x83   :  { %5132 = vmatpush.bf16.msrb.mxu3 %v7339_v16  ;;  %5094 = vmatmul.bf16.vlgmr.msrb.gmra.mxu0 %v11260_v24 }
  0x84   :  { %5138 = vmatpush.bf16.msra.mxu0 %v7459_v11  ;;  %5107 = vmatmul.bf16.vlgmr.msrb.gmra.mxu1 %v11277_v35 }
  0x85   :  { %5151 = vmatpush.bf16.msra.mxu1 %v7523_v12  ;;  %5120 = vmatmul.bf16.vlgmr.msrb.gmra.mxu2 %v11264_v25 }
  0x86   :  { %5164 = vmatpush.bf16.msra.mxu2 %v7587_v15  ;;  %5133 = vmatmul.bf16.vlgmr.msrb.gmra.mxu3 %v11281_v59 }
  0x87   :  { %5177 = vmatpush.bf16.msra.mxu3 %v7651_v57 }
  0x88   :  { %5139 = vmatpush.bf16.msra.mxu0 %v7451_v36 }
  0x89   :  { %5152 = vmatpush.bf16.msra.mxu1 %v7515_v29 }
  0x8a   :  { %5165 = vmatpush.bf16.msra.mxu2 %v7579_v62 }
  0x8b   :  { %5178 = vmatpush.bf16.msra.mxu3 %v7643_v46 }
  0x8c   :  { %5140 = vmatpush.bf16.msra.mxu0 %v7443_v47 }
  0x8d   :  { %5153 = vmatpush.bf16.msra.mxu1 %v7507_v51 }
  0x8e   :  { %5166 = vmatpush.bf16.msra.mxu2 %v7571_v52 }
  0x8f   :  { %14 = vsyncpa [#allocation3], 0  ;;  %5179 = vmatpush.bf16.msra.mxu3 %v7635_v61  ;;  %v7627_v11 = vor.u32 %v9826_v2, %v7626_v1  ;;  %v7427_v12 = vor.u32 %v9776_v6, %v7426_v3  ;;  %v7618_v13 = vld [vmem:[%s15600_s1 + $0x9b0] sm:$0xf]  ;;  %v9824_v14 = vld [vmem:[%s15600_s1 + $0x9b4] sm:$0xf0]  ;;  %v7491_v15 = vor.u32 %v9792_v8, %v7490_v7  ;;  %v7555_v16 = vor.u32 %v9808_v10, %v7554_v9 }
  0x90   :  { %5141 = vmatpush.bf16.msra.mxu0 %v7435_v0  ;;  %v7418_v17 = vld [vmem:[%s15600_s1 + $0x820] sm:$0xf]  ;;  %v9774_v19 = vld [vmem:[%s15600_s1 + $0x824] sm:$0xf0]  ;;  %v7619_v57 = vor.u32 %v9824_v14, %v7618_v13  ;;  %v7410_v29 = vld [vmem:[%s15600_s1 + $0x810] sm:$0xf] }
  0x91   :  { %5154 = vmatpush.bf16.msra.mxu1 %v7499_v4  ;;  %v7482_v23 = vld [vmem:[%s15600_s1 + $0x8a0] sm:$0xf]  ;;  %v9790_v18 = vld [vmem:[%s15600_s1 + $0x8a4] sm:$0xf0]  ;;  %v7419_v36 = vor.u32 %v9774_v19, %v7418_v17  ;;  %v9772_v63 = vld [vmem:[%s15600_s1 + $0x814] sm:$0xf0] }
  0x92   :  { %5167 = vmatpush.bf16.msra.mxu2 %v7563_v5  ;;  %v7546_v31 = vld [vmem:[%s15600_s1 + $0x920] sm:$0xf]  ;;  %v9806_v34 = vld [vmem:[%s15600_s1 + $0x924] sm:$0xf0]  ;;  %v7483_v62 = vor.u32 %v9790_v18, %v7482_v23  ;;  %v7474_v41 = vld [vmem:[%s15600_s1 + $0x890] sm:$0xf]  ;;  %v7411_v52 = vor.u32 %v9772_v63, %v7410_v29 }
  0x93   :  { %5180 = vmatpush.bf16.msra.mxu3 %v7627_v11  ;;  %v7610_v28 = vld [vmem:[%s15600_s1 + $0x9a0] sm:$0xf]  ;;  %v9822_v38 = vld [vmem:[%s15600_s1 + $0x9a4] sm:$0xf0]  ;;  %v7547_v40 = vor.u32 %v9806_v34, %v7546_v31  ;;  %v9788_v42 = vld [vmem:[%s15600_s1 + $0x894] sm:$0xf0] }
  0x94   :  { %5142 = vmatpush.bf16.msra.mxu0 %v7427_v12  ;;  %v7538_v44 = vld [vmem:[%s15600_s1 + $0x910] sm:$0xf]  ;;  %v9804_v45 = vld [vmem:[%s15600_s1 + $0x914] sm:$0xf0]  ;;  %v7611_v47 = vor.u32 %v9822_v38, %v7610_v28  ;;  %v7402_v50 = vld [vmem:[%s15600_s1 + $0x800] sm:$0xf]  ;;  %v7475_v56 = vor.u32 %v9788_v42, %v7474_v41 }
  0x95   :  { %5155 = vmatpush.bf16.msra.mxu1 %v7491_v15  ;;  %v7602_v46 = vld [vmem:[%s15600_s1 + $0x990] sm:$0xf]  ;;  %v9820_v48 = vld [vmem:[%s15600_s1 + $0x994] sm:$0xf0]  ;;  %v9770_v51 = vld [vmem:[%s15600_s1 + $0x804] sm:$0xf0]  ;;  %v7539_v58 = vor.u32 %v9804_v45, %v7538_v44 }
  0x96   :  { %5168 = vmatpush.bf16.msra.mxu2 %v7555_v16  ;;  %v7466_v53 = vld [vmem:[%s15600_s1 + $0x880] sm:$0xf]  ;;  %v9786_v54 = vld [vmem:[%s15600_s1 + $0x884] sm:$0xf0]  ;;  %v7714_v61 = vld [vmem:[%s15600_s1 + $0xa70] sm:$0xf]  ;;  %v7603_v4 = vor.u32 %v9820_v48, %v7602_v46  ;;  %v7403_v8 = vor.u32 %v9770_v51, %v7402_v50 }
  0x97   :  { %5181 = vmatpush.bf16.msra.mxu3 %v7619_v57  ;;  %v7530_v55 = vld [vmem:[%s15600_s1 + $0x900] sm:$0xf]  ;;  %v9802_v60 = vld [vmem:[%s15600_s1 + $0x904] sm:$0xf0]  ;;  %v9848_v0 = vld [vmem:[%s15600_s1 + $0xa74] sm:$0xf0]  ;;  %v7467_v11 = vor.u32 %v9786_v54, %v7466_v53 }
  0x98   :  { %5143 = vmatpush.bf16.msra.mxu0 %v7419_v36  ;;  %v7778_v1 = vld [vmem:[%s15600_s1 + $0xaf0] sm:$0xf]  ;;  %v9864_v2 = vld [vmem:[%s15600_s1 + $0xaf4] sm:$0xf0]  ;;  %v7594_v6 = vld [vmem:[%s15600_s1 + $0x980] sm:$0xf]  ;;  %v7531_v12 = vor.u32 %v9802_v60, %v7530_v55  ;;  %v7715_v15 = vor.u32 %v9848_v0, %v7714_v61 }
  0x99   :  { %5156 = vmatpush.bf16.msra.mxu1 %v7483_v62  ;;  %v7842_v3 = vld [vmem:[%s15600_s1 + $0xb70] sm:$0xf]  ;;  %v9880_v5 = vld [vmem:[%s15600_s1 + $0xb74] sm:$0xf0]  ;;  %v9818_v7 = vld [vmem:[%s15600_s1 + $0x984] sm:$0xf0]  ;;  %v7779_v16 = vor.u32 %v9864_v2, %v7778_v1 }
  0x9a   :  { %5169 = vmatpush.bf16.msra.mxu2 %v7547_v40  ;;  %v82_v9 = vld.sshfl [vmem:[#allocation1] sm:$0xff pattern:$0x73625140]  ;;  %v7906_v10 = vld [vmem:[%s15600_s1 + $0xbf0] sm:$0xf]  ;;  %v7843_v23 = vor.u32 %v9880_v5, %v7842_v3  ;;  %v7595_v18 = vor.u32 %v9818_v7, %v7594_v6  ;;  %vm6334_vm0 = vcmask 523264  }
  0x9b   :  { %5182 = vmatpush.bf16.msra.mxu3 %v7611_v47  ;;  %v84_v13 = vld.sshfl [vmem:[#allocation1 + $0x10] sm:$0xff pattern:$0x73625140]  ;;  %v9896_v14 = vld [vmem:[%s15600_s1 + $0xbf4] sm:$0xf0]  ;;  %v11470_v36 = vpack.c.bf16 %v82_v9, %v82_v9  ;;  %s10328_s18 = smov [#allocation2]  }
  0x9c   :  { %5144 = vmatpush.bf16.msra.mxu0 %v7411_v52  ;;  %v83_v17 = vld.sshfl [vmem:[#allocation1 + $0x8] sm:$0xff pattern:$0x73625140]  ;;  %v85_v19 = vld.sshfl [vmem:[#allocation1 + $0x18] sm:$0xff pattern:$0x73625140]  ;;  %v11472_v28 = vpack.c.bf16 %v84_v13, %v84_v13  ;;  %v7907_v40 = vor.u32 %v9896_v14, %v7906_v10 }
  0x9d   :  { %5157 = vmatpush.bf16.msra.mxu1 %v7475_v56  ;;  %v7706_v31 = vld [vmem:[%s15600_s1 + $0xa60] sm:$0xf]  ;;  %v9846_v34 = vld [vmem:[%s15600_s1 + $0xa64] sm:$0xf0]  ;;  %v11483_v63 = vpack.c.bf16 %v83_v17, %v83_v17  ;;  %v11485_v41 = vpack.c.bf16 %v85_v19, %v85_v19  ;;  %v7698_v48 = vld [vmem:[%s15600_s1 + $0xa50] sm:$0xf] }
  0x9e   :  { %5170 = vmatpush.bf16.msra.mxu2 %v7539_v58  ;;  %v7770_v57 = vld [vmem:[%s15600_s1 + $0xae0] sm:$0xf]  ;;  %v9862_v38 = vld [vmem:[%s15600_s1 + $0xae4] sm:$0xf0]  ;;  %v7707_v42 = vor.u32 %v9846_v34, %v7706_v31  ;;  %v9844_v50 = vld [vmem:[%s15600_s1 + $0xa54] sm:$0xf0] }
  0x9f   :  { %5183 = vmatpush.bf16.msra.mxu3 %v7603_v4  ;;  %v7834_v29 = vld [vmem:[%s15600_s1 + $0xb60] sm:$0xf]  ;;  %v9878_v62 = vld [vmem:[%s15600_s1 + $0xb64] sm:$0xf0]  ;;  %v7771_v46 = vor.u32 %v9862_v38, %v7770_v57  ;;  %v7762_v51 = vld [vmem:[%s15600_s1 + $0xad0] sm:$0xf]  ;;  %v7699_v56 = vor.u32 %v9844_v50, %v7698_v48 }
  0xa0   :  { %5145 = vmatpush.bf16.msra.mxu0 %v7403_v8  ;;  %v7898_v44 = vld [vmem:[%s15600_s1 + $0xbe0] sm:$0xf]  ;;  %v9894_v45 = vld [vmem:[%s15600_s1 + $0xbe4] sm:$0xf0]  ;;  %v7835_v47 = vor.u32 %v9878_v62, %v7834_v29  ;;  %v9860_v52 = vld [vmem:[%s15600_s1 + $0xad4] sm:$0xf0] }
  0xa1   :  { %5158 = vmatpush.bf16.msra.mxu1 %v7467_v11  ;;  %v7826_v53 = vld [vmem:[%s15600_s1 + $0xb50] sm:$0xf]  ;;  %v9876_v54 = vld [vmem:[%s15600_s1 + $0xb54] sm:$0xf0]  ;;  %v7899_v55 = vor.u32 %v9894_v45, %v7898_v44  ;;  %v7763_v61 = vor.u32 %v9860_v52, %v7762_v51  ;;  %v7690_v1 = vld [vmem:[%s15600_s1 + $0xa40] sm:$0xf] }
  0xa2   :  { %5171 = vmatpush.bf16.msra.mxu2 %v7531_v12  ;;  %v7890_v58 = vld [vmem:[%s15600_s1 + $0xbd0] sm:$0xf]  ;;  %v9892_v60 = vld [vmem:[%s15600_s1 + $0xbd4] sm:$0xf0]  ;;  %v7827_v0 = vor.u32 %v9876_v54, %v7826_v53  ;;  %v9842_v2 = vld [vmem:[%s15600_s1 + $0xa44] sm:$0xf0] }
  0xa3   :  { %5184 = vmatpush.bf16.msra.mxu3 %v7595_v18  ;;  %5146 = vmatmul.bf16.vlgmr.msra.gmra.mxu0 %v11470_v36  ;;  %v7754_v3 = vld [vmem:[%s15600_s1 + $0xac0] sm:$0xf]  ;;  %v9858_v4 = vld [vmem:[%s15600_s1 + $0xac4] sm:$0xf0]  ;;  %v7891_v7 = vor.u32 %v9892_v60, %v7890_v58  ;;  %v7691_v8 = vor.u32 %v9842_v2, %v7690_v1  ;;  %v7682_v13 = vld [vmem:[%s15600_s1 + $0xa30] sm:$0xf] }
  0xa4   :  { %5190 = vmatpush.bf16.msrb.mxu0 %v7715_v15  ;;  %5159 = vmatmul.bf16.vlgmr.msra.gmra.mxu1 %v11483_v63  ;;  %v7818_v5 = vld [vmem:[%s15600_s1 + $0xb40] sm:$0xf]  ;;  %v9874_v6 = vld [vmem:[%s15600_s1 + $0xb44] sm:$0xf0]  ;;  %v7755_v11 = vor.u32 %v9858_v4, %v7754_v3  ;;  %v9840_v14 = vld [vmem:[%s15600_s1 + $0xa34] sm:$0xf0] }
  0xa5   :  { %5203 = vmatpush.bf16.msrb.mxu1 %v7779_v16  ;;  %5172 = vmatmul.bf16.vlgmr.msra.gmra.mxu2 %v11472_v28  ;;  %v7882_v9 = vld [vmem:[%s15600_s1 + $0xbc0] sm:$0xf]  ;;  %v9890_v10 = vld [vmem:[%s15600_s1 + $0xbc4] sm:$0xf0]  ;;  %v7819_v12 = vor.u32 %v9874_v6, %v7818_v5  ;;  %v7746_v15 = vld [vmem:[%s15600_s1 + $0xab0] sm:$0xf]  ;;  %v7683_v18 = vor.u32 %v9840_v14, %v7682_v13 }
  0xa6   :  { %5216 = vmatpush.bf16.msrb.mxu2 %v7843_v23  ;;  %5185 = vmatmul.bf16.vlgmr.msra.gmra.mxu3 %v11485_v41  ;;  %v9856_v16 = vld [vmem:[%s15600_s1 + $0xab4] sm:$0xf0]  ;;  %v7810_v17 = vld [vmem:[%s15600_s1 + $0xb30] sm:$0xf]  ;;  %v7883_v23 = vor.u32 %v9890_v10, %v7882_v9  ;;  %v7674_v57 = vld [vmem:[%s15600_s1 + $0xa20] sm:$0xf]  ;;  %v4939_v6 = vpop.f32.mrf.mxu0 }
  0xa7   :  { %5229 = vmatpush.bf16.msrb.mxu3 %v7907_v40  ;;  %v9872_v19 = vld [vmem:[%s15600_s1 + $0xb34] sm:$0xf0]  ;;  %v7874_v31 = vld [vmem:[%s15600_s1 + $0xbb0] sm:$0xf]  ;;  %v7747_v38 = vor.u32 %v9856_v16, %v7746_v15  ;;  %v9838_v62 = vld [vmem:[%s15600_s1 + $0xa24] sm:$0xf0] }
  0xa8   :  { %5191 = vmatpush.bf16.msrb.mxu0 %v7707_v42  ;;  %v9888_v34 = vld [vmem:[%s15600_s1 + $0xbb4] sm:$0xf0]  ;;  %v7811_v29 = vor.u32 %v9872_v19, %v7810_v17  ;;  %v7738_v40 = vld [vmem:[%s15600_s1 + $0xaa0] sm:$0xf]  ;;  %v9854_v44 = vld [vmem:[%s15600_s1 + $0xaa4] sm:$0xf0]  ;;  %v7675_v50 = vor.u32 %v9838_v62, %v7674_v57 }
  0xa9   :  { %5204 = vmatpush.bf16.msrb.mxu1 %v7771_v46  ;;  %v1004_v42 = vld [vmem:[%s15601_s2] sm:$0x3]  ;;  %v9870_v46 = vld [vmem:[%s15600_s1 + $0xb24] sm:$0xf0]  ;;  %v7666_v52 = vld [vmem:[%s15600_s1 + $0xa10] sm:$0xf]  ;;  %v7739_v54 = vor.u32 %v9854_v44, %v7738_v40 }
  0xaa   :  { %5217 = vmatpush.bf16.msrb.mxu2 %v7835_v47  ;;  %v7802_v45 = vld [vmem:[%s15600_s1 + $0xb20] sm:$0xf]  ;;  %v7875_v47 = vor.u32 %v9888_v34, %v7874_v31  ;;  %v9886_v51 = vld [vmem:[%s15600_s1 + $0xba4] sm:$0xf0]  ;;  %v1006_v53 = vperm.slane %v1004_v42, 0  ;;  %v39_v57 = vld [vmem:[%s15599_s0 + $0x30] sm:$0xff] }
  0xab   :  { %5230 = vmatpush.bf16.msrb.mxu3 %v7899_v55  ;;  %v7866_v48 = vld [vmem:[%s15600_s1 + $0xba0] sm:$0xf]  ;;  %v7803_v55 = vor.u32 %v9870_v46, %v7802_v45  ;;  %v7730_v58 = vld [vmem:[%s15600_s1 + $0xa90] sm:$0xf]  ;;  %v9852_v60 = vld [vmem:[%s15600_s1 + $0xa94] sm:$0xf0] }
  0xac   :  { %5192 = vmatpush.bf16.msrb.mxu0 %v7699_v56  ;;  %v9836_v56 = vld [vmem:[%s15600_s1 + $0xa14] sm:$0xf0]  ;;  %v7858_v1 = vld [vmem:[%s15600_s1 + $0xb90] sm:$0xf]  ;;  %v7867_v2 = vor.u32 %v9886_v51, %v7866_v48  ;;  %v7658_v4 = vld [vmem:[%s15600_s1 + $0xa00] sm:$0xf]  ;;  %v7731_v13 = vor.u32 %v9852_v60, %v7730_v58 }
  0xad   :  { %5205 = vmatpush.bf16.msrb.mxu1 %v7763_v61  ;;  %v7794_v61 = vld [vmem:[%s15600_s1 + $0xb10] sm:$0xf]  ;;  %v9884_v3 = vld [vmem:[%s15600_s1 + $0xb94] sm:$0xf0]  ;;  %v9834_v5 = vld [vmem:[%s15600_s1 + $0xa04] sm:$0xf0] }
  0xae   :  { %5218 = vmatpush.bf16.msrb.mxu2 %v7827_v0  ;;  %v9868_v0 = vld [vmem:[%s15600_s1 + $0xb14] sm:$0xf0]  ;;  %v9850_v9 = vld [vmem:[%s15600_s1 + $0xa84] sm:$0xf0]  ;;  %v7786_v10 = vld [vmem:[%s15600_s1 + $0xb00] sm:$0xf]  ;;  %v7659_v40 = vor.u32 %v9834_v5, %v7658_v4 }
  0xaf   :  { %5231 = vmatpush.bf16.msrb.mxu3 %v7891_v7  ;;  %v7667_v7 = vor.u32 %v9836_v56, %v7666_v52  ;;  %v7795_v14 = vor.u32 %v9868_v0, %v7794_v61  ;;  %v7970_v15 = vld [vmem:[%s15600_s1 + $0xc70] sm:$0xf]  ;;  %v9912_v16 = vld [vmem:[%s15600_s1 + $0xc74] sm:$0xf0]  ;;  %v9882_v62 = vld [vmem:[%s15600_s1 + $0xb84] sm:$0xf0] }
  0xb0   :  { %5193 = vmatpush.bf16.msrb.mxu0 %v7691_v8  ;;  %v7722_v8 = vld [vmem:[%s15600_s1 + $0xa80] sm:$0xf]  ;;  %v8034_v17 = vld [vmem:[%s15600_s1 + $0xcf0] sm:$0xf]  ;;  %v9928_v19 = vld [vmem:[%s15600_s1 + $0xcf4] sm:$0xf0] }
  0xb1   :  { %5206 = vmatpush.bf16.msrb.mxu1 %v7755_v11  ;;  %v9866_v11 = vld [vmem:[%s15600_s1 + $0xb04] sm:$0xf0]  ;;  %v9944_v31 = vld [vmem:[%s15600_s1 + $0xd74] sm:$0xf0]  ;;  %90 = vst [vmem:[#allocation1] ss:$4 sm:$0xff] %v39_v57  ;;  %v7723_v45 = vor.u32 %v9850_v9, %v7722_v8  ;;  %v8035_v51 = vor.u32 %v9928_v19, %v8034_v17 }
  0xb2   :  { %5219 = vmatpush.bf16.msrb.mxu2 %v7819_v12  ;;  %v4940_v12 = vadd.f32 %v4939_v6, %v1006_v53  ;;  %v86_v42 = vld.sshfl [vmem:[#allocation1 + $0x20] sm:$0xff pattern:$0x73625140]  ;;  %v8162_v44 = vld [vmem:[%s15600_s1 + $0xdf0] sm:$0xf]  ;;  %v7787_v46 = vor.u32 %v9866_v11, %v7786_v10  ;;  %s6365_s19 = sshll.u32 %s10328_s18, 4  ;;  %s6366_s19 = int_to_ptr.vmem [resolvable:$true] %s6365_s19 }
  0xb3   :  { %5232 = vmatpush.bf16.msrb.mxu3 %v7883_v23  ;;  %v4952_v23 = vpop.f32.mrf.mxu1  ;;  %v9960_v48 = vld [vmem:[%s15600_s1 + $0xdf4] sm:$0xf0]  ;;  %v87_v52 = vld.sshfl [vmem:[#allocation1 + $0x28] sm:$0xff pattern:$0x73625140]  ;;  %vm6358_vm1 = vcmask 41984  }
  0xb4   :  { %5194 = vmatpush.bf16.msrb.mxu0 %v7683_v18  ;;  %v8098_v18 = vld [vmem:[%s15600_s1 + $0xd70] sm:$0xf]  ;;  %v4953_v34 = vadd.f32 %v4952_v23, %v4940_v12  ;;  %v89_v53 = vld.sshfl [vmem:[#allocation1 + $0x38] sm:$0xff pattern:$0x73625140]  ;;  %v8163_v8 = vor.u32 %v9960_v48, %v8162_v44  ;;  %v11693_v9 = vpack.c.bf16 %v87_v52, %v87_v52 }
  0xb5   :  { %5207 = vmatpush.bf16.msrb.mxu1 %v7747_v38  ;;  %v7859_v38 = vor.u32 %v9884_v3, %v7858_v1  ;;  %v7962_v58 = vld [vmem:[%s15600_s1 + $0xc60] sm:$0xf]  ;;  %v9910_v60 = vld [vmem:[%s15600_s1 + $0xc64] sm:$0xf0]  ;;  %v4978_v1 = vpop.f32.mrf.mxu3  ;;  %v11680_v3 = vpack.c.bf16 %v86_v42, %v86_v42  ;;  %v11695_v12 = vpack.c.bf16 %v89_v53, %v89_v53  ;;  %v7954_v19 = vld [vmem:[%s15600_s1 + $0xc50] sm:$0xf] }
  0xb6   :  { %5220 = vmatpush.bf16.msrb.mxu2 %v7811_v29  ;;  %v7850_v29 = vld [vmem:[%s15600_s1 + $0xb80] sm:$0xf]  ;;  %v9926_v5 = vld [vmem:[%s15600_s1 + $0xce4] sm:$0xf0]  ;;  %v9908_v23 = vld [vmem:[%s15600_s1 + $0xc54] sm:$0xf0] }
  0xb7   :  { %5233 = vmatpush.bf16.msrb.mxu3 %v7875_v47  ;;  %v88_v47 = vld.sshfl [vmem:[#allocation1 + $0x30] sm:$0xff pattern:$0x73625140]  ;;  %v7851_v56 = vor.u32 %v9882_v62, %v7850_v29  ;;  %v8026_v61 = vld [vmem:[%s15600_s1 + $0xce0] sm:$0xf]  ;;  %v7955_v29 = vor.u32 %v9908_v23, %v7954_v19 }
  0xb8   :  { %5195 = vmatpush.bf16.msrb.mxu0 %v7675_v50  ;;  %v7971_v50 = vor.u32 %v9912_v16, %v7970_v15  ;;  %v11682_v4 = vpack.c.bf16 %v88_v47, %v88_v47  ;;  %v8090_v6 = vld [vmem:[%s15600_s1 + $0xd60] sm:$0xf]  ;;  %v9958_v15 = vld [vmem:[%s15600_s1 + $0xde4] sm:$0xf0]  ;;  %v8027_v16 = vor.u32 %v9926_v5, %v8026_v61  ;;  %v9940_v57 = vld [vmem:[%s15600_s1 + $0xd54] sm:$0xf0] }
  0xb9   :  { %5208 = vmatpush.bf16.msrb.mxu1 %v7739_v54  ;;  %v4965_v54 = vpop.f32.mrf.mxu2  ;;  %v8146_v62 = vld [vmem:[%s15600_s1 + $0xdd0] sm:$0xf]  ;;  %v9906_v47 = vld [vmem:[%s15600_s1 + $0xc44] sm:$0xf0]  ;;  %v8010_v48 = vld [vmem:[%s15600_s1 + $0xcc0] sm:$0xf] }
  0xba   :  { %5221 = vmatpush.bf16.msrb.mxu2 %v7803_v55  ;;  %v8099_v55 = vor.u32 %v9944_v31, %v8098_v18  ;;  %v4966_v0 = vadd.f32 %v4965_v54, %v4953_v34  ;;  %v8018_v18 = vld [vmem:[%s15600_s1 + $0xcd0] sm:$0xf]  ;;  %v9924_v31 = vld [vmem:[%s15600_s1 + $0xcd4] sm:$0xf0]  ;;  %v8074_v52 = vld [vmem:[%s15600_s1 + $0xd40] sm:$0xf] }
  0xbb   :  { %5234 = vmatpush.bf16.msrb.mxu3 %v7867_v2  ;;  %v4941_v2 = vpop.f32.mrf.mxu0  ;;  %v4954_v11 = vpop.f32.mrf.mxu1  ;;  %v8082_v34 = vld [vmem:[%s15600_s1 + $0xd50] sm:$0xf]  ;;  %v8019_v44 = vor.u32 %v9924_v31, %v8018_v18  ;;  %v9938_v53 = vld [vmem:[%s15600_s1 + $0xd44] sm:$0xf0]  ;;  %v9904_v5 = vld [vmem:[%s15600_s1 + $0xc34] sm:$0xf0] }
  0xbc   :  { %5196 = vmatpush.bf16.msrb.mxu0 %v7667_v7  ;;  %v9942_v7 = vld [vmem:[%s15600_s1 + $0xd64] sm:$0xf0]  ;;  %v4979_v10 = vadd.f32 %v4978_v1, %v4966_v0  ;;  %v8075_v1 = vor.u32 %v9938_v53, %v8074_v52  ;;  %v7938_v2 = vld [vmem:[%s15600_s1 + $0xc30] sm:$0xf]  ;;  %v9936_v11 = vld [vmem:[%s15600_s1 + $0xd34] sm:$0xf0] }
  0xbd   :  { %5209 = vmatpush.bf16.msrb.mxu1 %v7731_v13  ;;  %v7963_v13 = vor.u32 %v9910_v60, %v7962_v58  ;;  %v8091_v17 = vor.u32 %v9942_v7, %v8090_v6  ;;  %v8138_v58 = vld [vmem:[%s15600_s1 + $0xdc0] sm:$0xf]  ;;  %v9954_v60 = vld [vmem:[%s15600_s1 + $0xdc4] sm:$0xf0]  ;;  %v8002_v6 = vld [vmem:[%s15600_s1 + $0xcb0] sm:$0xf] }
  0xbe   :  { %5222 = vmatpush.bf16.msrb.mxu2 %v7795_v14  ;;  %v8154_v14 = vld [vmem:[%s15600_s1 + $0xde0] sm:$0xf]  ;;  %v9902_v31 = vld [vmem:[%s15600_s1 + $0xc24] sm:$0xf0]  ;;  %v9900_v53 = vld [vmem:[%s15600_s1 + $0xc14] sm:$0xf0] }
  0xbf   :  { %5235 = vmatpush.bf16.msrb.mxu3 %v7859_v38  ;;  %v8155_v38 = vor.u32 %v9958_v15, %v8154_v14  ;;  %v8139_v14 = vor.u32 %v9954_v60, %v8138_v58  ;;  %v7939_v15 = vor.u32 %v9904_v5, %v7938_v2  ;;  %v7930_v18 = vld [vmem:[%s15600_s1 + $0xc20] sm:$0xf]  ;;  %v8050_v60 = vld [vmem:[%s15600_s1 + $0xd10] sm:$0xf]  ;;  %v9948_v2 = vld [vmem:[%s15600_s1 + $0xd94] sm:$0xf0] }
  0xc0   :  { %5197 = vmatpush.bf16.msrb.mxu0 %v7659_v40  ;;  %v9956_v40 = vld [vmem:[%s15600_s1 + $0xdd4] sm:$0xf0]  ;;  %v7914_v5 = vld [vmem:[%s15600_s1 + $0xc00] sm:$0xf] }
  0xc1   :  { %5210 = vmatpush.bf16.msrb.mxu1 %v7723_v45  ;;  %v4967_v42 = vpop.f32.mrf.mxu2  ;;  %v8083_v45 = vor.u32 %v9940_v57, %v8082_v34  ;;  %v8147_v54 = vor.u32 %v9956_v40, %v8146_v62  ;;  %v7994_v34 = vld [vmem:[%s15600_s1 + $0xca0] sm:$0xf]  ;;  %v9918_v57 = vld [vmem:[%s15600_s1 + $0xca4] sm:$0xf0] }
  0xc2   :  { %5223 = vmatpush.bf16.msrb.mxu2 %v7787_v46  ;;  %v7946_v46 = vld [vmem:[%s15600_s1 + $0xc40] sm:$0xf] }
  0xc3   :  { %5236 = vmatpush.bf16.msrb.mxu3 %v7851_v56  ;;  %5198 = vmatmul.bf16.vlgmr.msrb.gmra.mxu0 %v11680_v3  ;;  %v7947_v56 = vor.u32 %v9906_v47, %v7946_v46  ;;  %v5004_v7 = vpop.f32.mrf.mxu1  ;;  %v8122_v46 = vld [vmem:[%s15600_s1 + $0xda0] sm:$0xf]  ;;  %v9950_v47 = vld [vmem:[%s15600_s1 + $0xda4] sm:$0xf0] }
  0xc4   :  { %5242 = vmatpush.bf16.msra.mxu0 %v7971_v50  ;;  %5211 = vmatmul.bf16.vlgmr.msrb.gmra.mxu1 %v11693_v9  ;;  %v4980_v50 = vpop.f32.mrf.mxu3 }
  0xc5   :  { %5255 = vmatpush.bf16.msra.mxu1 %v8035_v51  ;;  %5224 = vmatmul.bf16.vlgmr.msrb.gmra.mxu2 %v11682_v4  ;;  %v9922_v51 = vld [vmem:[%s15600_s1 + $0xcc4] sm:$0xf0]  ;;  %v7995_v50 = vor.u32 %v9918_v57, %v7994_v34  ;;  %v40_v34 = vld [vmem:[%s15599_s0 + $0x38] sm:$0xff] }
  0xc6   :  { %5268 = vmatpush.bf16.msra.mxu2 %v8099_v55  ;;  %5237 = vmatmul.bf16.vlgmr.msrb.gmra.mxu3 %v11695_v12  ;;  %v4991_v55 = vpop.f32.mrf.mxu0  ;;  %v8011_v0 = vor.u32 %v9922_v51, %v8010_v48  ;;  %v7922_v48 = vld [vmem:[%s15600_s1 + $0xc10] sm:$0xf]  ;;  %91 = vst [vmem:[#allocation1 + $0x20] ss:$4 sm:$0xff] %v40_v34 }
  0xc7   :  { %5281 = vmatpush.bf16.msra.mxu3 %v8163_v8  ;;  %v4992_v61 = vadd.f32 %v4991_v55, %v4979_v10  ;;  %v9920_v8 = vld [vmem:[%s15600_s1 + $0xcb4] sm:$0xf0]  ;;  %v8066_v10 = vld [vmem:[%s15600_s1 + $0xd30] sm:$0xf] }
  0xc8   :  { %5243 = vmatpush.bf16.msra.mxu0 %v7963_v13  ;;  %v8003_v19 = vor.u32 %v9920_v8, %v8002_v6  ;;  %v8067_v23 = vor.u32 %v9936_v11, %v8066_v10  ;;  %v9916_v55 = vld [vmem:[%s15600_s1 + $0xc94] sm:$0xf0]  ;;  %v9898_v6 = vld [vmem:[%s15600_s1 + $0xc04] sm:$0xf0]  ;;  %v7978_v8 = vld [vmem:[%s15600_s1 + $0xc80] sm:$0xf] }
  0xc9   :  { %5256 = vmatpush.bf16.msra.mxu1 %v8027_v16  ;;  %v5005_v13 = vadd.f32 %v5004_v7, %v4992_v61  ;;  %v8130_v16 = vld [vmem:[%s15600_s1 + $0xdb0] sm:$0xf]  ;;  %v5017_v62 = vpop.f32.mrf.mxu2  ;;  %v9932_v61 = vld [vmem:[%s15600_s1 + $0xd14] sm:$0xf0]  ;;  %v7923_v7 = vor.u32 %v9900_v53, %v7922_v48  ;;  %v9914_v10 = vld [vmem:[%s15600_s1 + $0xc84] sm:$0xf0] }
  0xca   :  { %5269 = vmatpush.bf16.msra.mxu2 %v8091_v17  ;;  %v9952_v17 = vld [vmem:[%s15600_s1 + $0xdb4] sm:$0xf0]  ;;  %v8042_v11 = vld [vmem:[%s15600_s1 + $0xd00] sm:$0xf]  ;;  %v8338_v34 = vld [vmem:[%s15600_s1 + $0xf50] sm:$0xf] }
  0xcb   :  { %5282 = vmatpush.bf16.msra.mxu3 %v8155_v38  ;;  %v8058_v38 = vld [vmem:[%s15600_s1 + $0xd20] sm:$0xf]  ;;  %v8131_v40 = vor.u32 %v9952_v17, %v8130_v16  ;;  %v5018_v42 = vadd.f32 %v5017_v62, %v5005_v13  ;;  %v9930_v13 = vld [vmem:[%s15600_s1 + $0xd04] sm:$0xf0]  ;;  %v8226_v16 = vld [vmem:[%s15600_s1 + $0xe70] sm:$0xf]  ;;  %v7915_v62 = vor.u32 %v9898_v6, %v7914_v5 }
  0xcc   :  { %5244 = vmatpush.bf16.msra.mxu0 %v7955_v29  ;;  %v9934_v29 = vld [vmem:[%s15600_s1 + $0xd24] sm:$0xf0]  ;;  %v5030_v52 = vpop.f32.mrf.mxu3  ;;  %v9976_v17 = vld [vmem:[%s15600_s1 + $0xe74] sm:$0xf0]  ;;  %v8346_v6 = vld [vmem:[%s15600_s1 + $0xf60] sm:$0xf] }
  0xcd   :  { %5257 = vmatpush.bf16.msra.mxu1 %v8019_v44  ;;  %v8059_v51 = vor.u32 %v9934_v29, %v8058_v38  ;;  %v11815_v58 = vadd.f32 %v5030_v52, %v5018_v42  ;;  %v10008_v38 = vld [vmem:[%s15600_s1 + $0xf74] sm:$0xf0]  ;;  %v8106_v29 = vld [vmem:[%s15600_s1 + $0xd80] sm:$0xf]  ;;  %v8418_v42 = vld [vmem:[%s15600_s1 + $0xff0] sm:$0xf] }
  0xce   :  { %5270 = vmatpush.bf16.msra.mxu2 %v8083_v45  ;;  %v4993_v44 = vpop.f32.mrf.mxu0  ;;  %v7931_v45 = vor.u32 %v9902_v31, %v7930_v18  ;;  %v8354_v18 = vld [vmem:[%s15600_s1 + $0xf70] sm:$0xf]  ;;  %v93_v53 = vld.sshfl [vmem:[#allocation1 + $0x8] sm:$0xff pattern:$0x73625140] }
  0xcf   :  { %5283 = vmatpush.bf16.msra.mxu3 %v8147_v54  ;;  %v7986_v54 = vld [vmem:[%s15600_s1 + $0xc90] sm:$0xf]  ;;  %v10024_v44 = vld [vmem:[%s15600_s1 + $0xff4] sm:$0xf0]  ;;  %v9990_v5 = vld [vmem:[%s15600_s1 + $0xee4] sm:$0xf0] }
  0xd0   :  { %5245 = vmatpush.bf16.msra.mxu0 %v7947_v56  ;;  %v5006_v56 = vpop.f32.mrf.mxu1  ;;  %v94_v48 = vld.sshfl [vmem:[#allocation1 + $0x10] sm:$0xff pattern:$0x73625140] }
  0xd1   :  { %5258 = vmatpush.bf16.msra.mxu1 %v8011_v0  ;;  %v8114_v0 = vld [vmem:[%s15600_s1 + $0xd90] sm:$0xf]  ;;  %v5019_v31 = vpop.f32.mrf.mxu2 }
  0xd2   :  { %5271 = vmatpush.bf16.msra.mxu2 %v8075_v1  ;;  %v8123_v1 = vor.u32 %v9950_v47, %v8122_v46  ;;  %v8115_v57 = vor.u32 %v9948_v2, %v8114_v0  ;;  %v8043_v46 = vor.u32 %v9930_v13, %v8042_v11  ;;  %v92_v47 = vld.sshfl [vmem:[#allocation1] sm:$0xff pattern:$0x73625140]  ;;  %v11891_v2 = vpack.c.bf16 %v94_v48, %v94_v48  ;;  %v9988_v31 = vld [vmem:[%s15600_s1 + $0xed4] sm:$0xf0] }
  0xd3   :  { %5284 = vmatpush.bf16.msra.mxu3 %v8139_v14  ;;  %v7987_v14 = vor.u32 %v9916_v55, %v7986_v54  ;;  %v95_v54 = vld.sshfl [vmem:[#allocation1 + $0x18] sm:$0xff pattern:$0x73625140]  ;;  %v8355_v55 = vor.u32 %v10008_v38, %v8354_v18  ;;  %v8282_v0 = vld [vmem:[%s15600_s1 + $0xee0] sm:$0xf] }
  0xd4   :  { %5246 = vmatpush.bf16.msra.mxu0 %v7939_v15  ;;  %v8051_v15 = vor.u32 %v9932_v61, %v8050_v60  ;;  %v8218_v60 = vld [vmem:[%s15600_s1 + $0xe60] sm:$0xf]  ;;  %v9974_v61 = vld [vmem:[%s15600_s1 + $0xe64] sm:$0xf0]  ;;  %v11904_v11 = vpack.c.bf16 %v95_v54, %v95_v54  ;;  %v8274_v18 = vld [vmem:[%s15600_s1 + $0xed0] sm:$0xf] }
  0xd5   :  { %5259 = vmatpush.bf16.msra.mxu1 %v8003_v19  ;;  %v8290_v19 = vld [vmem:[%s15600_s1 + $0xef0] sm:$0xf]  ;;  %v8219_v13 = vor.u32 %v9974_v61, %v8218_v60  ;;  %v9986_v48 = vld [vmem:[%s15600_s1 + $0xec4] sm:$0xf0]  ;;  %v8394_v60 = vld [vmem:[%s15600_s1 + $0xfc0] sm:$0xf] }
  0xd6   :  { %5272 = vmatpush.bf16.msra.mxu2 %v8067_v23  ;;  %v9992_v23 = vld [vmem:[%s15600_s1 + $0xef4] sm:$0xf0]  ;;  %v10018_v61 = vld [vmem:[%s15600_s1 + $0xfc4] sm:$0xf0] }
  0xd7   :  { %5285 = vmatpush.bf16.msra.mxu3 %v8131_v40  ;;  %v9946_v40 = vld [vmem:[%s15600_s1 + $0xd84] sm:$0xf0]  ;;  %v8291_v52 = vor.u32 %v9992_v23, %v8290_v19  ;;  %v8210_v19 = vld [vmem:[%s15600_s1 + $0xe50] sm:$0xf]  ;;  %v9972_v23 = vld [vmem:[%s15600_s1 + $0xe54] sm:$0xf0] }
  0xd8   :  { %5247 = vmatpush.bf16.msra.mxu0 %v7931_v45  ;;  %v7979_v45 = vor.u32 %v9914_v10, %v7978_v8  ;;  %v8107_v56 = vor.u32 %v9946_v40, %v8106_v29  ;;  %v8419_v8 = vor.u32 %v10024_v44, %v8418_v42  ;;  %v11902_v10 = vpack.c.bf16 %v93_v53, %v93_v53  ;;  %v10020_v40 = vld [vmem:[%s15600_s1 + $0xfd4] sm:$0xf0] }
  0xd9   :  { %5260 = vmatpush.bf16.msra.mxu1 %v7995_v50  ;;  %v5032_v50 = vpop.f32.mrf.mxu3  ;;  %v8211_v29 = vor.u32 %v9972_v23, %v8210_v19  ;;  %v8275_v42 = vor.u32 %v9988_v31, %v8274_v18  ;;  %v8386_v19 = vld [vmem:[%s15600_s1 + $0xfb0] sm:$0xf]  ;;  %v10016_v23 = vld [vmem:[%s15600_s1 + $0xfb4] sm:$0xf0] }
  0xda   :  { %5273 = vmatpush.bf16.msra.mxu2 %v8059_v51  ;;  %v8227_v51 = vor.u32 %v9976_v17, %v8226_v16  ;;  %v8283_v16 = vor.u32 %v9990_v5, %v8282_v0  ;;  %v8330_v50 = vld [vmem:[%s15600_s1 + $0xf40] sm:$0xf] }
  0xdb   :  { %5286 = vmatpush.bf16.msra.mxu3 %v8123_v1  ;;  %v11889_v1 = vpack.c.bf16 %v92_v47, %v92_v47  ;;  %v8266_v47 = vld [vmem:[%s15600_s1 + $0xec0] sm:$0xf] }
  0xdc   :  { %5248 = vmatpush.bf16.msra.mxu0 %v7923_v7  ;;  %v10006_v7 = vld [vmem:[%s15600_s1 + $0xf64] sm:$0xf0]  ;;  %v8267_v0 = vor.u32 %v9986_v48, %v8266_v47 }
  0xdd   :  { %5261 = vmatpush.bf16.msra.mxu1 %v7987_v14  ;;  %v8410_v14 = vld [vmem:[%s15600_s1 + $0xfe0] sm:$0xf]  ;;  %v8347_v17 = vor.u32 %v10006_v7, %v8346_v6  ;;  %v8194_v6 = vld [vmem:[%s15600_s1 + $0xe30] sm:$0xf] }
  0xde   :  { %5274 = vmatpush.bf16.msra.mxu2 %v8051_v15  ;;  %v10022_v15 = vld [vmem:[%s15600_s1 + $0xfe4] sm:$0xf0]  ;;  %v8258_v7 = vld [vmem:[%s15600_s1 + $0xeb0] sm:$0xf] }
  0xdf   :  { %5287 = vmatpush.bf16.msra.mxu3 %v8115_v57  ;;  %v10004_v57 = vld [vmem:[%s15600_s1 + $0xf54] sm:$0xf0]  ;;  %v8411_v38 = vor.u32 %v10022_v15, %v8410_v14  ;;  %v8322_v14 = vld [vmem:[%s15600_s1 + $0xf30] sm:$0xf] }
  0xe0   :  { %5249 = vmatpush.bf16.msra.mxu0 %v7915_v62  ;;  %v8402_v62 = vld [vmem:[%s15600_s1 + $0xfd0] sm:$0xf]  ;;  %v8339_v44 = vor.u32 %v10004_v57, %v8338_v34  ;;  %v5043_v53 = vpop.f32.mrf.mxu0  ;;  %v10000_v15 = vld [vmem:[%s15600_s1 + $0xf34] sm:$0xf0]  ;;  %v8186_v57 = vld [vmem:[%s15600_s1 + $0xe20] sm:$0xf] }
  0xe1   :  { %5262 = vmatpush.bf16.msra.mxu1 %v7979_v45  ;;  %v8202_v45 = vld [vmem:[%s15600_s1 + $0xe40] sm:$0xf]  ;;  %v5044_v54 = vadd.f32 %v5043_v53, %v11815_v58  ;;  %v9968_v58 = vld [vmem:[%s15600_s1 + $0xe34] sm:$0xf0]  ;;  %v8323_v31 = vor.u32 %v10000_v15, %v8322_v14  ;;  %v8178_v53 = vld [vmem:[%s15600_s1 + $0xe10] sm:$0xf] }
  0xe2   :  { %5275 = vmatpush.bf16.msra.mxu2 %v8043_v46  ;;  %v9970_v46 = vld [vmem:[%s15600_s1 + $0xe44] sm:$0xf0] }
  0xe3   :  { %5288 = vmatpush.bf16.msra.mxu3 %v8107_v56  ;;  %5250 = vmatmul.bf16.vlgmr.msra.gmra.mxu0 %v11889_v1  ;;  %v5056_v56 = vpop.f32.mrf.mxu1  ;;  %v9962_v14 = vld [vmem:[%s15600_s1 + $0xe04] sm:$0xf0] }
  0xe4   :  { %5294 = vmatpush.bf16.msrb.mxu0 %v8227_v51  ;;  %5263 = vmatmul.bf16.vlgmr.msra.gmra.mxu1 %v11902_v10  ;;  %v10002_v51 = vld [vmem:[%s15600_s1 + $0xf44] sm:$0xf0] }
  0xe5   :  { %5307 = vmatpush.bf16.msrb.mxu1 %v8291_v52  ;;  %5276 = vmatmul.bf16.vlgmr.msra.gmra.mxu2 %v11891_v2  ;;  %v8403_v52 = vor.u32 %v10020_v40, %v8402_v62  ;;  %v8331_v5 = vor.u32 %v10002_v51, %v8330_v50  ;;  %v9982_v40 = vld [vmem:[%s15600_s1 + $0xea4] sm:$0xf0]  ;;  %v8378_v51 = vld [vmem:[%s15600_s1 + $0xfa0] sm:$0xf] }
  0xe6   :  { %5320 = vmatpush.bf16.msrb.mxu2 %v8355_v55  ;;  %5289 = vmatmul.bf16.vlgmr.msra.gmra.mxu3 %v11904_v11  ;;  %v8203_v55 = vor.u32 %v9970_v46, %v8202_v45  ;;  %v8387_v45 = vor.u32 %v10016_v23, %v8386_v19  ;;  %v8298_v19 = vld [vmem:[%s15600_s1 + $0xf00] sm:$0xf]  ;;  %v9994_v23 = vld [vmem:[%s15600_s1 + $0xf04] sm:$0xf0] }
  0xe7   :  { %5333 = vmatpush.bf16.msrb.mxu3 %v8419_v8  ;;  %v5057_v8 = vadd.f32 %v5056_v56, %v5044_v54 }
  0xe8   :  { %5295 = vmatpush.bf16.msrb.mxu0 %v8219_v13  ;;  %v9984_v13 = vld [vmem:[%s15600_s1 + $0xeb4] sm:$0xf0]  ;;  %v5069_v34 = vpop.f32.mrf.mxu2  ;;  %v5045_v47 = vpop.f32.mrf.mxu0 }
  0xe9   :  { %5308 = vmatpush.bf16.msrb.mxu1 %v8283_v16  ;;  %v8395_v16 = vor.u32 %v10018_v61, %v8394_v60  ;;  %v8259_v18 = vor.u32 %v9984_v13, %v8258_v7  ;;  %v5070_v62 = vadd.f32 %v5069_v34, %v5057_v8  ;;  %v5082_v46 = vpop.f32.mrf.mxu3  ;;  %v9964_v60 = vld [vmem:[%s15600_s1 + $0xe14] sm:$0xf0]  ;;  %v8242_v61 = vld [vmem:[%s15600_s1 + $0xe90] sm:$0xf]  ;;  %v8170_v13 = vld [vmem:[%s15600_s1 + $0xe00] sm:$0xf] }
  0xea   :  { %5321 = vmatpush.bf16.msrb.mxu2 %v8347_v17  ;;  %v8195_v17 = vor.u32 %v9968_v58, %v8194_v6  ;;  %v9996_v6 = vld [vmem:[%s15600_s1 + $0xf14] sm:$0xf0]  ;;  %v8370_v58 = vld [vmem:[%s15600_s1 + $0xf90] sm:$0xf]  ;;  %v8179_v15 = vor.u32 %v9964_v60, %v8178_v53 }
  0xeb   :  { %5334 = vmatpush.bf16.msrb.mxu3 %v8411_v38  ;;  %v9966_v38 = vld [vmem:[%s15600_s1 + $0xe24] sm:$0xf0]  ;;  %v12007_v48 = vadd.f32 %v5082_v46, %v5070_v62  ;;  %v5058_v54 = vpop.f32.mrf.mxu1  ;;  %v10012_v8 = vld [vmem:[%s15600_s1 + $0xf94] sm:$0xf0]  ;;  %v8482_v34 = vld [vmem:[%s15600_s1 + $0x1070] sm:$0xf] }
  0xec   :  { %5296 = vmatpush.bf16.msrb.mxu0 %v8211_v29  ;;  %v8250_v29 = vld [vmem:[%s15600_s1 + $0xea0] sm:$0xf]  ;;  %v8187_v50 = vor.u32 %v9966_v38, %v8186_v57  ;;  %v10040_v57 = vld [vmem:[%s15600_s1 + $0x1074] sm:$0xf0]  ;;  %v8546_v38 = vld [vmem:[%s15600_s1 + $0x10f0] sm:$0xf] }
  0xed   :  { %5309 = vmatpush.bf16.msrb.mxu1 %v8275_v42  ;;  %v8314_v42 = vld [vmem:[%s15600_s1 + $0xf20] sm:$0xf]  ;;  %v10056_v62 = vld [vmem:[%s15600_s1 + $0x10f4] sm:$0xf0] }
  0xee   :  { %5322 = vmatpush.bf16.msrb.mxu2 %v8339_v44  ;;  %v9998_v44 = vld [vmem:[%s15600_s1 + $0xf24] sm:$0xf0]  ;;  %v8362_v46 = vld [vmem:[%s15600_s1 + $0xf80] sm:$0xf]  ;;  %v10088_v53 = vld [vmem:[%s15600_s1 + $0x11f4] sm:$0xf0] }
  0xef   :  { %5335 = vmatpush.bf16.msrb.mxu3 %v8403_v52  ;;  %v10014_v52 = vld [vmem:[%s15600_s1 + $0xfa4] sm:$0xf0]  ;;  %v8315_v56 = vor.u32 %v9998_v44, %v8314_v42  ;;  %v41_v42 = vld [vmem:[%s15599_s0 + $0x40] sm:$0xff]  ;;  %v8371_v44 = vor.u32 %v10012_v8, %v8370_v58  ;;  %v98_v60 = vld.sshfl [vmem:[#allocation1 + $0x30] sm:$0xff pattern:$0x73625140] }
  0xf0   :  { %5297 = vmatpush.bf16.msrb.mxu0 %v8203_v55  ;;  %v8251_v55 = vor.u32 %v9982_v40, %v8250_v29  ;;  %v8379_v7 = vor.u32 %v10014_v52, %v8378_v51  ;;  %v5071_v29 = vpop.f32.mrf.mxu2  ;;  %v8610_v40 = vld [vmem:[%s15600_s1 + $0x1170] sm:$0xf]  ;;  %100 = vst [vmem:[#allocation1] ss:$4 sm:$0xff] %v41_v42  ;;  %v10010_v51 = vld [vmem:[%s15600_s1 + $0xf84] sm:$0xf0] }
  0xf1   :  { %5310 = vmatpush.bf16.msrb.mxu1 %v8267_v0  ;;  %v9980_v0 = vld [vmem:[%s15600_s1 + $0xe94] sm:$0xf0]  ;;  %v5084_v47 = vpop.f32.mrf.mxu3  ;;  %v8674_v52 = vld [vmem:[%s15600_s1 + $0x11f0] sm:$0xf]  ;;  %v8474_v8 = vld [vmem:[%s15600_s1 + $0x1060] sm:$0xf] }
  0xf2   :  { %5323 = vmatpush.bf16.msrb.mxu2 %v8331_v5  ;;  %v8306_v5 = vld [vmem:[%s15600_s1 + $0xf10] sm:$0xf]  ;;  %v10086_v29 = vld [vmem:[%s15600_s1 + $0x11e4] sm:$0xf0] }
  0xf3   :  { %5336 = vmatpush.bf16.msrb.mxu3 %v8395_v16  ;;  %v8234_v16 = vld [vmem:[%s15600_s1 + $0xe80] sm:$0xf]  ;;  %v8466_v42 = vld [vmem:[%s15600_s1 + $0x1050] sm:$0xf] }
  0xf4   :  { %5298 = vmatpush.bf16.msrb.mxu0 %v8195_v17  ;;  %v9978_v17 = vld [vmem:[%s15600_s1 + $0xe84] sm:$0xf0]  ;;  %v8594_v47 = vld [vmem:[%s15600_s1 + $0x1150] sm:$0xf] }
  0xf5   :  { %5311 = vmatpush.bf16.msrb.mxu1 %v8259_v18  ;;  %v8243_v18 = vor.u32 %v9980_v0, %v8242_v61  ;;  %v8235_v54 = vor.u32 %v9978_v17, %v8234_v16  ;;  %v8483_v61 = vor.u32 %v10040_v57, %v8482_v34  ;;  %v8547_v0 = vor.u32 %v10056_v62, %v8546_v38  ;;  %v10054_v17 = vld [vmem:[%s15600_s1 + $0x10e4] sm:$0xf0]  ;;  %v8666_v38 = vld [vmem:[%s15600_s1 + $0x11e0] sm:$0xf] }
  0xf6   :  { %5324 = vmatpush.bf16.msrb.mxu2 %v8323_v31  ;;  %v8307_v31 = vor.u32 %v9996_v6, %v8306_v5  ;;  %v97_v5 = vld.sshfl [vmem:[#allocation1 + $0x28] sm:$0xff pattern:$0x73625140]  ;;  %v99_v6 = vld.sshfl [vmem:[#allocation1 + $0x38] sm:$0xff pattern:$0x73625140]  ;;  %v12101_v16 = vpack.c.bf16 %v98_v60, %v98_v60 }
  0xf7   :  { %5337 = vmatpush.bf16.msrb.mxu3 %v8387_v45  ;;  %v10072_v45 = vld [vmem:[%s15600_s1 + $0x1174] sm:$0xf0]  ;;  %v12114_v34 = vpack.c.bf16 %v99_v6, %v99_v6  ;;  %v8458_v60 = vld [vmem:[%s15600_s1 + $0x1040] sm:$0xf] }
  0xf8   :  { %5299 = vmatpush.bf16.msrb.mxu0 %v8187_v50  ;;  %v8171_v50 = vor.u32 %v9962_v14, %v8170_v13  ;;  %v8611_v58 = vor.u32 %v10072_v45, %v8610_v40  ;;  %v10038_v13 = vld [vmem:[%s15600_s1 + $0x1064] sm:$0xf0]  ;;  %v8538_v14 = vld [vmem:[%s15600_s1 + $0x10e0] sm:$0xf]  ;;  %v8530_v45 = vld [vmem:[%s15600_s1 + $0x10d0] sm:$0xf] }
  0xf9   :  { %5312 = vmatpush.bf16.msrb.mxu1 %v8251_v55  ;;  %v8299_v55 = vor.u32 %v9994_v23, %v8298_v19  ;;  %v8602_v19 = vld [vmem:[%s15600_s1 + $0x1160] sm:$0xf]  ;;  %v10070_v23 = vld [vmem:[%s15600_s1 + $0x1164] sm:$0xf0]  ;;  %v8475_v57 = vor.u32 %v10038_v13, %v8474_v8  ;;  %v8539_v62 = vor.u32 %v10054_v17, %v8538_v14 }
  0xfa   :  { %5325 = vmatpush.bf16.msrb.mxu2 %v8315_v56  ;;  %v96_v56 = vld.sshfl [vmem:[#allocation1 + $0x20] sm:$0xff pattern:$0x73625140]  ;;  %v8603_v40 = vor.u32 %v10070_v23, %v8602_v19  ;;  %v10082_v23 = vld [vmem:[%s15600_s1 + $0x11c4] sm:$0xf0] }
  0xfb   :  { %5338 = vmatpush.bf16.msrb.mxu3 %v8379_v7  ;;  %v8363_v7 = vor.u32 %v10010_v51, %v8362_v46  ;;  %v10052_v46 = vld [vmem:[%s15600_s1 + $0x10d4] sm:$0xf0]  ;;  %v8667_v51 = vor.u32 %v10086_v29, %v8666_v38  ;;  %v8586_v6 = vld [vmem:[%s15600_s1 + $0x1140] sm:$0xf]  ;;  %v8450_v38 = vld [vmem:[%s15600_s1 + $0x1030] sm:$0xf] }
  0xfc   :  { %5300 = vmatpush.bf16.msrb.mxu0 %v8179_v15  ;;  %v12099_v15 = vpack.c.bf16 %v96_v56, %v96_v56  ;;  %v8650_v19 = vld [vmem:[%s15600_s1 + $0x11c0] sm:$0xf]  ;;  %v8514_v29 = vld [vmem:[%s15600_s1 + $0x10b0] sm:$0xf] }
  0xfd   :  { %5313 = vmatpush.bf16.msrb.mxu1 %v8243_v18  ;;  %v8675_v18 = vor.u32 %v10088_v53, %v8674_v52  ;;  %v8658_v53 = vld [vmem:[%s15600_s1 + $0x11d0] sm:$0xf] }
  0xfe   :  { %5326 = vmatpush.bf16.msrb.mxu2 %v8307_v31  ;;  %v12112_v31 = vpack.c.bf16 %v97_v5, %v97_v5  ;;  %v10050_v5 = vld [vmem:[%s15600_s1 + $0x10c4] sm:$0xf0] }
  0xff   :  { %5339 = vmatpush.bf16.msrb.mxu3 %v8371_v44  ;;  %v10036_v44 = vld [vmem:[%s15600_s1 + $0x1054] sm:$0xf0] }
 0x100   :  { %5301 = vmatpush.bf16.msrb.mxu0 %v8171_v50  ;;  %v10068_v50 = vld [vmem:[%s15600_s1 + $0x1154] sm:$0xf0]  ;;  %v8467_v52 = vor.u32 %v10036_v44, %v8466_v42  ;;  %v5095_v8 = vpop.f32.mrf.mxu0  ;;  %v8578_v42 = vld [vmem:[%s15600_s1 + $0x1130] sm:$0xf] }
 0x101   :  { %5314 = vmatpush.bf16.msrb.mxu1 %v8235_v54  ;;  %v10084_v54 = vld [vmem:[%s15600_s1 + $0x11d4] sm:$0xf0]  ;;  %v8595_v56 = vor.u32 %v10068_v50, %v8594_v47  ;;  %v5096_v13 = vadd.f32 %v5095_v8, %v12007_v48  ;;  %v5108_v17 = vpop.f32.mrf.mxu1  ;;  %v8642_v47 = vld [vmem:[%s15600_s1 + $0x11b0] sm:$0xf] }
 0x102   :  { %5327 = vmatpush.bf16.msrb.mxu2 %v8299_v55  ;;  %v8531_v55 = vor.u32 %v10052_v46, %v8530_v45  ;;  %v10032_v48 = vld [vmem:[%s15600_s1 + $0x1034] sm:$0xf0]  ;;  %v8651_v45 = vor.u32 %v10082_v23, %v8650_v19  ;;  %v8434_v19 = vld [vmem:[%s15600_s1 + $0x1010] sm:$0xf] }
 0x103   :  { %5340 = vmatpush.bf16.msrb.mxu3 %v8363_v7  ;;  %5302 = vmatmul.bf16.vlgmr.msrb.gmra.mxu0 %v12099_v15  ;;  %v8659_v7 = vor.u32 %v10084_v54, %v8658_v53  ;;  %v10064_v44 = vld [vmem:[%s15600_s1 + $0x1134] sm:$0xf0]  ;;  %v8451_v46 = vor.u32 %v10032_v48, %v8450_v38  ;;  %v8442_v54 = vld [vmem:[%s15600_s1 + $0x1020] sm:$0xf]  ;;  %v8498_v48 = vld [vmem:[%s15600_s1 + $0x1090] sm:$0xf] }
 0x104   :  { %5346 = vmatpush.bf16.msra.mxu0 %v8483_v61  ;;  %5315 = vmatmul.bf16.vlgmr.msrb.gmra.mxu1 %v12112_v31  ;;  %v10034_v61 = vld [vmem:[%s15600_s1 + $0x1044] sm:$0xf0]  ;;  %v10080_v50 = vld [vmem:[%s15600_s1 + $0x11b4] sm:$0xf0] }
 0x105   :  { %5359 = vmatpush.bf16.msra.mxu1 %v8547_v0  ;;  %5328 = vmatmul.bf16.vlgmr.msrb.gmra.mxu2 %v12101_v16  ;;  %v8522_v0 = vld [vmem:[%s15600_s1 + $0x10c0] sm:$0xf]  ;;  %v8459_v14 = vor.u32 %v10034_v61, %v8458_v60  ;;  %v10046_v61 = vld [vmem:[%s15600_s1 + $0x10a4] sm:$0xf0]  ;;  %v10028_v38 = vld [vmem:[%s15600_s1 + $0x1014] sm:$0xf0] }
 0x106   :  { %5372 = vmatpush.bf16.msra.mxu2 %v8611_v58  ;;  %5341 = vmatmul.bf16.vlgmr.msrb.gmra.mxu3 %v12114_v34  ;;  %v10066_v58 = vld [vmem:[%s15600_s1 + $0x1144] sm:$0xf0] }
 0x107   :  { %5385 = vmatpush.bf16.msra.mxu3 %v8675_v18  ;;  %v8523_v18 = vor.u32 %v10050_v5, %v8522_v0  ;;  %v8570_v0 = vld [vmem:[%s15600_s1 + $0x1120] sm:$0xf]  ;;  %v10062_v5 = vld [vmem:[%s15600_s1 + $0x1124] sm:$0xf0] }
 0x108   :  { %5347 = vmatpush.bf16.msra.mxu0 %v8475_v57  ;;  %v8587_v57 = vor.u32 %v10066_v58, %v8586_v6  ;;  %v5121_v53 = vpop.f32.mrf.mxu2  ;;  %v8643_v6 = vor.u32 %v10080_v50, %v8642_v47  ;;  %v10026_v47 = vld [vmem:[%s15600_s1 + $0x1004] sm:$0xf0]  ;;  %v8435_v50 = vor.u32 %v10028_v38, %v8434_v19  ;;  %v10152_v38 = vld [vmem:[%s15600_s1 + $0x13f4] sm:$0xf0] }
 0x109   :  { %5360 = vmatpush.bf16.msra.mxu1 %v8539_v62  ;;  %v5109_v62 = vadd.f32 %v5108_v17, %v5096_v13  ;;  %v5134_v58 = vpop.f32.mrf.mxu3  ;;  %v10078_v17 = vld [vmem:[%s15600_s1 + $0x11a4] sm:$0xf0]  ;;  %v5110_v23 = vpop.f32.mrf.mxu1 }
 0x10a   :  { %5373 = vmatpush.bf16.msra.mxu2 %v8603_v40  ;;  %v10048_v40 = vld [vmem:[%s15600_s1 + $0x10b4] sm:$0xf0] }
 0x10b   :  { %5386 = vmatpush.bf16.msra.mxu3 %v8667_v51  ;;  %v8515_v51 = vor.u32 %v10048_v40, %v8514_v29  ;;  %v5122_v60 = vadd.f32 %v5121_v53, %v5109_v62  ;;  %v10044_v29 = vld [vmem:[%s15600_s1 + $0x1094] sm:$0xf0]  ;;  %v8562_v62 = vld [vmem:[%s15600_s1 + $0x1110] sm:$0xf]  ;;  %v8554_v53 = vld [vmem:[%s15600_s1 + $0x1100] sm:$0xf] }
 0x10c   :  { %5348 = vmatpush.bf16.msra.mxu0 %v8467_v52  ;;  %v8579_v52 = vor.u32 %v10064_v44, %v8578_v42  ;;  %v10060_v40 = vld [vmem:[%s15600_s1 + $0x1114] sm:$0xf0]  ;;  %v8626_v42 = vld [vmem:[%s15600_s1 + $0x1190] sm:$0xf] }
 0x10d   :  { %5361 = vmatpush.bf16.msra.mxu1 %v8531_v55  ;;  %v10030_v55 = vld [vmem:[%s15600_s1 + $0x1024] sm:$0xf0]  ;;  %v12217_v8 = vadd.f32 %v5134_v58, %v5122_v60  ;;  %v8738_v60 = vld [vmem:[%s15600_s1 + $0x1270] sm:$0xf] }
 0x10e   :  { %5374 = vmatpush.bf16.msra.mxu2 %v8595_v56  ;;  %v8506_v56 = vld [vmem:[%s15600_s1 + $0x10a0] sm:$0xf]  ;;  %v8443_v13 = vor.u32 %v10030_v55, %v8442_v54  ;;  %v10058_v54 = vld [vmem:[%s15600_s1 + $0x1104] sm:$0xf0]  ;;  %v8499_v55 = vor.u32 %v10044_v29, %v8498_v48  ;;  %v8866_v58 = vld [vmem:[%s15600_s1 + $0x1370] sm:$0xf] }
 0x10f   :  { %5387 = vmatpush.bf16.msra.mxu3 %v8659_v7  ;;  %v5097_v7 = vpop.f32.mrf.mxu0  ;;  %v8555_v29 = vor.u32 %v10058_v54, %v8554_v53  ;;  %v10118_v54 = vld [vmem:[%s15600_s1 + $0x12e4] sm:$0xf0] }
 0x110   :  { %5349 = vmatpush.bf16.msra.mxu0 %v8459_v14  ;;  %v8634_v14 = vld [vmem:[%s15600_s1 + $0x11a0] sm:$0xf]  ;;  %v42_v7 = vld [vmem:[%s15599_s0 + $0x48] sm:$0xff] }
 0x111   :  { %5362 = vmatpush.bf16.msra.mxu1 %v8523_v18  ;;  %v8507_v18 = vor.u32 %v10046_v61, %v8506_v56  ;;  %v8635_v44 = vor.u32 %v10078_v17, %v8634_v14  ;;  %v8563_v56 = vor.u32 %v10060_v40, %v8562_v62  ;;  %v10104_v61 = vld [vmem:[%s15600_s1 + $0x1274] sm:$0xf0]  ;;  %v8618_v17 = vld [vmem:[%s15600_s1 + $0x1180] sm:$0xf]  ;;  %v5136_v19 = vpop.f32.mrf.mxu3  ;;  %101 = vst [vmem:[#allocation1 + $0x20] ss:$4 sm:$0xff] %v42_v7 }
 0x112   :  { %5375 = vmatpush.bf16.msra.mxu2 %v8587_v57  ;;  %v8571_v57 = vor.u32 %v10062_v5, %v8570_v0  ;;  %v8802_v0 = vld [vmem:[%s15600_s1 + $0x12f0] sm:$0xf]  ;;  %v5123_v5 = vpop.f32.mrf.mxu2  ;;  %v10136_v14 = vld [vmem:[%s15600_s1 + $0x1374] sm:$0xf0]  ;;  %v8922_v7 = vld [vmem:[%s15600_s1 + $0x13e0] sm:$0xf] }
 0x113   :  { %5388 = vmatpush.bf16.msra.mxu3 %v8651_v45  ;;  %v10076_v45 = vld [vmem:[%s15600_s1 + $0x1194] sm:$0xf0]  ;;  %v102_v62 = vld.sshfl [vmem:[#allocation1] sm:$0xff pattern:$0x73625140] }
 0x114   :  { %5350 = vmatpush.bf16.msra.mxu0 %v8451_v46  ;;  %v8426_v46 = vld [vmem:[%s15600_s1 + $0x1000] sm:$0xf]  ;;  %v104_v40 = vld.sshfl [vmem:[#allocation1 + $0x10] sm:$0xff pattern:$0x73625140] }
 0x115   :  { %5363 = vmatpush.bf16.msra.mxu1 %v8515_v51  ;;  %v8490_v51 = vld [vmem:[%s15600_s1 + $0x1080] sm:$0xf]  ;;  %v8427_v23 = vor.u32 %v10026_v47, %v8426_v46  ;;  %v105_v46 = vld.sshfl [vmem:[#allocation1 + $0x18] sm:$0xff pattern:$0x73625140]  ;;  %v8867_v47 = vor.u32 %v10136_v14, %v8866_v58  ;;  %v12311_v53 = vpack.c.bf16 %v104_v40, %v104_v40 }
 0x116   :  { %5376 = vmatpush.bf16.msra.mxu2 %v8579_v52  ;;  %v10042_v52 = vld [vmem:[%s15600_s1 + $0x1084] sm:$0xf0]  ;;  %v8730_v5 = vld [vmem:[%s15600_s1 + $0x1260] sm:$0xf]  ;;  %v8722_v19 = vld [vmem:[%s15600_s1 + $0x1250] sm:$0xf] }
 0x117   :  { %5389 = vmatpush.bf16.msra.mxu3 %v8643_v6  ;;  %v10120_v6 = vld [vmem:[%s15600_s1 + $0x12f4] sm:$0xf0]  ;;  %v8491_v48 = vor.u32 %v10042_v52, %v8490_v51  ;;  %v8794_v51 = vld [vmem:[%s15600_s1 + $0x12e0] sm:$0xf]  ;;  %v12309_v52 = vpack.c.bf16 %v102_v62, %v102_v62  ;;  %15620 = vst [vmem:[#allocation5_spill] sm:$0xff] %v12311_v53 }
 0x118   :  { %5351 = vmatpush.bf16.msra.mxu0 %v8443_v13  ;;  %v8627_v13 = vor.u32 %v10076_v45, %v8626_v42  ;;  %v8739_v42 = vor.u32 %v10104_v61, %v8738_v60  ;;  %v103_v45 = vld.sshfl [vmem:[#allocation1 + $0x8] sm:$0xff pattern:$0x73625140]  ;;  %v8795_v14 = vor.u32 %v10118_v54, %v8794_v51  ;;  %v8914_v40 = vld [vmem:[%s15600_s1 + $0x13d0] sm:$0xf] }
 0x119   :  { %5364 = vmatpush.bf16.msra.mxu1 %v8507_v18  ;;  %v10074_v18 = vld [vmem:[%s15600_s1 + $0x1184] sm:$0xf0] }
 0x11a   :  { %5377 = vmatpush.bf16.msra.mxu2 %v8571_v57  ;;  %v8930_v57 = vld [vmem:[%s15600_s1 + $0x13f0] sm:$0xf]  ;;  %v10134_v60 = vld [vmem:[%s15600_s1 + $0x1364] sm:$0xf0] }
 0x11b   :  { %5390 = vmatpush.bf16.msra.mxu3 %v8635_v44  ;;  %v8803_v44 = vor.u32 %v10120_v6, %v8802_v0  ;;  %v8931_v61 = vor.u32 %v10152_v38, %v8930_v57  ;;  %v12322_v0 = vpack.c.bf16 %v103_v45, %v103_v45  ;;  %v12324_v6 = vpack.c.bf16 %v105_v46, %v105_v46  ;;  %v10116_v57 = vld [vmem:[%s15600_s1 + $0x12d4] sm:$0xf0]  ;;  %v8850_v38 = vld [vmem:[%s15600_s1 + $0x1350] sm:$0xf]  ;;  %v8714_v46 = vld [vmem:[%s15600_s1 + $0x1240] sm:$0xf] }
 0x11c   :  { %5352 = vmatpush.bf16.msra.mxu0 %v8435_v50  ;;  %v8619_v50 = vor.u32 %v10074_v18, %v8618_v17  ;;  %v8786_v18 = vld [vmem:[%s15600_s1 + $0x12d0] sm:$0xf]  ;;  %v10130_v51 = vld [vmem:[%s15600_s1 + $0x1344] sm:$0xf0] }
 0x11d   :  { %5365 = vmatpush.bf16.msra.mxu1 %v8499_v55  ;;  %v10102_v55 = vld [vmem:[%s15600_s1 + $0x1264] sm:$0xf0]  ;;  %15621 = vst [vmem:[#allocation6_spill] sm:$0xff] %v12324_v6 }
 0x11e   :  { %5378 = vmatpush.bf16.msra.mxu2 %v8563_v56  ;;  %v8858_v56 = vld [vmem:[%s15600_s1 + $0x1360] sm:$0xf]  ;;  %v8731_v58 = vor.u32 %v10102_v55, %v8730_v5  ;;  %v10114_v5 = vld [vmem:[%s15600_s1 + $0x12c4] sm:$0xf0] }
 0x11f   :  { %5391 = vmatpush.bf16.msra.mxu3 %v8627_v13  ;;  %v10150_v13 = vld [vmem:[%s15600_s1 + $0x13e4] sm:$0xf0]  ;;  %v8859_v17 = vor.u32 %v10134_v60, %v8858_v56  ;;  %v8842_v55 = vld [vmem:[%s15600_s1 + $0x1340] sm:$0xf] }
 0x120   :  { %5353 = vmatpush.bf16.msra.mxu0 %v8427_v23  ;;  %v10100_v23 = vld [vmem:[%s15600_s1 + $0x1254] sm:$0xf0]  ;;  %v5147_v56 = vpop.f32.mrf.mxu0 }
 0x121   :  { %5366 = vmatpush.bf16.msra.mxu1 %v8491_v48  ;;  %v10132_v48 = vld [vmem:[%s15600_s1 + $0x1354] sm:$0xf0]  ;;  %v8723_v62 = vor.u32 %v10100_v23, %v8722_v19  ;;  %v5148_v60 = vadd.f32 %v5147_v56, %v12217_v8  ;;  %v8706_v19 = vld [vmem:[%s15600_s1 + $0x1230] sm:$0xf]  ;;  %v10126_v56 = vld [vmem:[%s15600_s1 + $0x1324] sm:$0xf0] }
 0x122   :  { %5379 = vmatpush.bf16.msra.mxu2 %v8555_v29  ;;  %v8923_v29 = vor.u32 %v10150_v13, %v8922_v7  ;;  %v8851_v45 = vor.u32 %v10132_v48, %v8850_v38  ;;  %v8906_v7 = vld [vmem:[%s15600_s1 + $0x13c0] sm:$0xf]  ;;  %v10146_v13 = vld [vmem:[%s15600_s1 + $0x13c4] sm:$0xf0]  ;;  %v10096_v8 = vld [vmem:[%s15600_s1 + $0x1234] sm:$0xf0] }
 0x123   :  { %5392 = vmatpush.bf16.msra.mxu3 %v8619_v50  ;;  %5354 = vmatmul.bf16.vlgmr.msra.gmra.mxu0 %v12309_v52  ;;  %v8778_v50 = vld [vmem:[%s15600_s1 + $0x12c0] sm:$0xf]  ;;  %v8770_v23 = vld [vmem:[%s15600_s1 + $0x12b0] sm:$0xf]  ;;  %v10128_v48 = vld [vmem:[%s15600_s1 + $0x1334] sm:$0xf0] }
 0x124   :  { %5398 = vmatpush.bf16.msrb.mxu0 %v8739_v42  ;;  %5367 = vmatmul.bf16.vlgmr.msra.gmra.mxu1 %v12322_v0  ;;  %v10148_v42 = vld [vmem:[%s15600_s1 + $0x13d4] sm:$0xf0]  ;;  %v8834_v38 = vld [vmem:[%s15600_s1 + $0x1330] sm:$0xf] }
 0x125   :  { %5411 = vmatpush.bf16.msrb.mxu1 %v8803_v44  ;;  %5380 = vmatmul.bf16.vlgmr.msra.gmra.mxu2 %v12311_v53  ;;  %v8787_v44 = vor.u32 %v10116_v57, %v8786_v18  ;;  %v8915_v54 = vor.u32 %v10148_v42, %v8914_v40  ;;  %v10112_v57 = vld [vmem:[%s15600_s1 + $0x12b4] sm:$0xf0]  ;;  %v8898_v40 = vld [vmem:[%s15600_s1 + $0x13b0] sm:$0xf]  ;;  %v8986_v53 = vld [vmem:[%s15600_s1 + $0x1460] sm:$0xf] }
 0x126   :  { %5424 = vmatpush.bf16.msrb.mxu2 %v8867_v47  ;;  %5393 = vmatmul.bf16.vlgmr.msra.gmra.mxu3 %v12324_v6  ;;  %v10098_v47 = vld [vmem:[%s15600_s1 + $0x1244] sm:$0xf0]  ;;  %v10144_v42 = vld [vmem:[%s15600_s1 + $0x13b4] sm:$0xf0] }
 0x127   :  { %5437 = vmatpush.bf16.msrb.mxu3 %v8931_v61  ;;  %v8715_v61 = vor.u32 %v10098_v47, %v8714_v46  ;;  %v8698_v47 = vld [vmem:[%s15600_s1 + $0x1220] sm:$0xf] }
 0x128   :  { %5399 = vmatpush.bf16.msrb.mxu0 %v8731_v58  ;;  %v5160_v58 = vpop.f32.mrf.mxu1  ;;  %v5173_v46 = vpop.f32.mrf.mxu2 }
 0x129   :  { %5412 = vmatpush.bf16.msrb.mxu1 %v8795_v14  ;;  %v8779_v14 = vor.u32 %v10114_v5, %v8778_v50  ;;  %v5161_v18 = vadd.f32 %v5160_v58, %v5148_v60  ;;  %v10094_v50 = vld [vmem:[%s15600_s1 + $0x1224] sm:$0xf0]  ;;  %v8762_v5 = vld [vmem:[%s15600_s1 + $0x12a0] sm:$0xf]  ;;  %v8899_v60 = vor.u32 %v10144_v42, %v8898_v40  ;;  %v5149_v58 = vpop.f32.mrf.mxu0  ;;  %v8882_v40 = vld [vmem:[%s15600_s1 + $0x1390] sm:$0xf] }
 0x12a   :  { %5425 = vmatpush.bf16.msrb.mxu2 %v8859_v17  ;;  %v8843_v17 = vor.u32 %v10130_v51, %v8842_v55  ;;  %v10110_v51 = vld [vmem:[%s15600_s1 + $0x12a4] sm:$0xf0]  ;;  %v9058_v58 = vld [vmem:[%s15600_s1 + $0x14f0] sm:$0xf] }
 0x12b   :  { %5438 = vmatpush.bf16.msrb.mxu3 %v8923_v29  ;;  %v8907_v29 = vor.u32 %v10146_v13, %v8906_v7  ;;  %v5174_v55 = vadd.f32 %v5173_v46, %v5161_v18  ;;  %v8699_v13 = vor.u32 %v10094_v50, %v8698_v47  ;;  %v10090_v46 = vld [vmem:[%s15600_s1 + $0x1204] sm:$0xf0]  ;;  %v8746_v50 = vld [vmem:[%s15600_s1 + $0x1280] sm:$0xf] }
 0x12c   :  { %5400 = vmatpush.bf16.msrb.mxu0 %v8723_v62  ;;  %v8707_v62 = vor.u32 %v10096_v8, %v8706_v19  ;;  %v8690_v19 = vld [vmem:[%s15600_s1 + $0x1210] sm:$0xf] }
 0x12d   :  { %5413 = vmatpush.bf16.msrb.mxu1 %v8787_v44  ;;  %v8771_v44 = vor.u32 %v10112_v57, %v8770_v23  ;;  %v8763_v23 = vor.u32 %v10110_v51, %v8762_v5  ;;  %v10092_v57 = vld [vmem:[%s15600_s1 + $0x1214] sm:$0xf0]  ;;  %v10106_v5 = vld [vmem:[%s15600_s1 + $0x1284] sm:$0xf0] }
 0x12e   :  { %5426 = vmatpush.bf16.msrb.mxu2 %v8851_v45  ;;  %v8835_v45 = vor.u32 %v10128_v48, %v8834_v38  ;;  %v8754_v38 = vld [vmem:[%s15600_s1 + $0x1290] sm:$0xf]  ;;  %v10108_v48 = vld [vmem:[%s15600_s1 + $0x1294] sm:$0xf0]  ;;  %v8691_v47 = vor.u32 %v10092_v57, %v8690_v19  ;;  %v10122_v51 = vld [vmem:[%s15600_s1 + $0x1304] sm:$0xf0] }
 0x12f   :  { %5439 = vmatpush.bf16.msrb.mxu3 %v8915_v54  ;;  %v8826_v54 = vld [vmem:[%s15600_s1 + $0x1320] sm:$0xf]  ;;  %v43_v19 = vld [vmem:[%s15599_s0 + $0x50] sm:$0xff] }
 0x130   :  { %5401 = vmatpush.bf16.msrb.mxu0 %v8715_v61  ;;  %v5186_v61 = vpop.f32.mrf.mxu3  ;;  %v5162_v8 = vpop.f32.mrf.mxu1  ;;  %v8827_v18 = vor.u32 %v10126_v56, %v8826_v54  ;;  %v8755_v54 = vor.u32 %v10108_v48, %v8754_v38  ;;  %110 = vst [vmem:[#allocation1] ss:$4 sm:$0xff] %v43_v19  ;;  %v10138_v48 = vld [vmem:[%s15600_s1 + $0x1384] sm:$0xf0] }
 0x131   :  { %5414 = vmatpush.bf16.msrb.mxu1 %v8779_v14  ;;  %v12427_v7 = vadd.f32 %v5186_v61, %v5174_v55  ;;  %v8890_v14 = vld [vmem:[%s15600_s1 + $0x13a0] sm:$0xf]  ;;  %v10168_v61 = vld [vmem:[%s15600_s1 + $0x1474] sm:$0xf0] }
 0x132   :  { %5427 = vmatpush.bf16.msrb.mxu2 %v8843_v17  ;;  %v10142_v17 = vld [vmem:[%s15600_s1 + $0x13a4] sm:$0xf0]  ;;  %v8810_v55 = vld [vmem:[%s15600_s1 + $0x1300] sm:$0xf] }
 0x133   :  { %5440 = vmatpush.bf16.msrb.mxu3 %v8907_v29  ;;  %v8818_v29 = vld [vmem:[%s15600_s1 + $0x1310] sm:$0xf]  ;;  %v8891_v42 = vor.u32 %v10142_v17, %v8890_v14  ;;  %v10184_v14 = vld [vmem:[%s15600_s1 + $0x14f4] sm:$0xf0] }
 0x134   :  { %5402 = vmatpush.bf16.msrb.mxu0 %v8707_v62  ;;  %v10124_v62 = vld [vmem:[%s15600_s1 + $0x1314] sm:$0xf0]  ;;  %v9122_v17 = vld [vmem:[%s15600_s1 + $0x1570] sm:$0xf] }
 0x135   :  { %5415 = vmatpush.bf16.msrb.mxu1 %v8771_v44  ;;  %v10140_v44 = vld [vmem:[%s15600_s1 + $0x1394] sm:$0xf0]  ;;  %v8819_v56 = vor.u32 %v10124_v62, %v8818_v29  ;;  %v9186_v29 = vld [vmem:[%s15600_s1 + $0x15f0] sm:$0xf] }
 0x136   :  { %5428 = vmatpush.bf16.msrb.mxu2 %v8835_v45  ;;  %v8682_v45 = vld [vmem:[%s15600_s1 + $0x1200] sm:$0xf]  ;;  %v8883_v8 = vor.u32 %v10140_v44, %v8882_v40  ;;  %v10216_v62 = vld [vmem:[%s15600_s1 + $0x15f4] sm:$0xf0]  ;;  %v8747_v40 = vor.u32 %v10106_v5, %v8746_v50 }
 0x137   :  { %5441 = vmatpush.bf16.msrb.mxu3 %v8899_v60  ;;  %v8994_v60 = vld [vmem:[%s15600_s1 + $0x1470] sm:$0xf]  ;;  %v8683_v38 = vor.u32 %v10090_v46, %v8682_v45  ;;  %v106_v44 = vld.sshfl [vmem:[#allocation1 + $0x20] sm:$0xff pattern:$0x73625140]  ;;  %v9059_v45 = vor.u32 %v10184_v14, %v9058_v58 }
 0x138   :  { %5403 = vmatpush.bf16.msrb.mxu0 %v8699_v13  ;;  %v5175_v13 = vpop.f32.mrf.mxu2  ;;  %v5188_v57 = vpop.f32.mrf.mxu3  ;;  %v107_v46 = vld.sshfl [vmem:[#allocation1 + $0x28] sm:$0xff pattern:$0x73625140]  ;;  %v109_v19 = vld.sshfl [vmem:[#allocation1 + $0x38] sm:$0xff pattern:$0x73625140]  ;;  %v12519_v5 = vpack.c.bf16 %v106_v44, %v106_v44 }
 0x139   :  { %5416 = vmatpush.bf16.msrb.mxu1 %v8763_v23  ;;  %v10200_v23 = vld [vmem:[%s15600_s1 + $0x1574] sm:$0xf0]  ;;  %v108_v13 = vld.sshfl [vmem:[#allocation1 + $0x30] sm:$0xff pattern:$0x73625140]  ;;  %v12532_v58 = vpack.c.bf16 %v107_v46, %v107_v46  ;;  %v12534_v14 = vpack.c.bf16 %v109_v19, %v109_v19 }
 0x13a   :  { %5429 = vmatpush.bf16.msrb.mxu2 %v8827_v18  ;;  %v8874_v18 = vld [vmem:[%s15600_s1 + $0x1380] sm:$0xf]  ;;  %v9123_v57 = vor.u32 %v10200_v23, %v9122_v17  ;;  %15622 = vst [vmem:[#allocation7_spill] sm:$0xff] %v12519_v5  ;;  %v10214_v23 = vld [vmem:[%s15600_s1 + $0x15e4] sm:$0xf0] }
 0x13b   :  { %5442 = vmatpush.bf16.msrb.mxu3 %v8891_v42  ;;  %v8811_v42 = vor.u32 %v10122_v51, %v8810_v55  ;;  %v8875_v6 = vor.u32 %v10138_v48, %v8874_v18  ;;  %v9050_v50 = vld [vmem:[%s15600_s1 + $0x14e0] sm:$0xf]  ;;  %v12521_v55 = vpack.c.bf16 %v108_v13, %v108_v13  ;;  %v10182_v51 = vld [vmem:[%s15600_s1 + $0x14e4] sm:$0xf0]  ;;  %15624 = vst [vmem:[#allocation9_spill] sm:$0xff] %v12532_v58 }
 0x13c   :  { %5404 = vmatpush.bf16.msrb.mxu0 %v8691_v47  ;;  %v8995_v47 = vor.u32 %v10168_v61, %v8994_v60  ;;  %v10198_v60 = vld [vmem:[%s15600_s1 + $0x1564] sm:$0xf0]  ;;  %v9187_v61 = vor.u32 %v10216_v62, %v9186_v29  ;;  %15625 = vst [vmem:[#allocation10_spill] sm:$0xff] %v12534_v14  ;;  %v9051_v18 = vor.u32 %v10182_v51, %v9050_v50  ;;  %v8978_v48 = vld [vmem:[%s15600_s1 + $0x1450] sm:$0xf] }
 0x13d   :  { %5417 = vmatpush.bf16.msrb.mxu1 %v8755_v54  ;;  %v10166_v54 = vld [vmem:[%s15600_s1 + $0x1464] sm:$0xf0]  ;;  %15623 = vst [vmem:[#allocation8_spill] sm:$0xff] %v12521_v55  ;;  %v9042_v29 = vld [vmem:[%s15600_s1 + $0x14d0] sm:$0xf] }
 0x13e   :  { %5430 = vmatpush.bf16.msrb.mxu2 %v8819_v56  ;;  %v9114_v56 = vld [vmem:[%s15600_s1 + $0x1560] sm:$0xf]  ;;  %v8987_v17 = vor.u32 %v10166_v54, %v8986_v53  ;;  %v10164_v53 = vld [vmem:[%s15600_s1 + $0x1454] sm:$0xf0]  ;;  %v9106_v62 = vld [vmem:[%s15600_s1 + $0x1550] sm:$0xf] }
 0x13f   :  { %5443 = vmatpush.bf16.msrb.mxu3 %v8883_v8  ;;  %v9178_v8 = vld [vmem:[%s15600_s1 + $0x15e0] sm:$0xf]  ;;  %v8979_v44 = vor.u32 %v10164_v53, %v8978_v48  ;;  %v9170_v13 = vld [vmem:[%s15600_s1 + $0x15d0] sm:$0xf]  ;;  %v10178_v50 = vld [vmem:[%s15600_s1 + $0x14c4] sm:$0xf0] }
 0x140   :  { %5405 = vmatpush.bf16.msrb.mxu0 %v8683_v38  ;;  %v9115_v38 = vor.u32 %v10198_v60, %v9114_v56  ;;  %v8970_v19 = vld [vmem:[%s15600_s1 + $0x1440] sm:$0xf]  ;;  %v10194_v56 = vld [vmem:[%s15600_s1 + $0x1544] sm:$0xf0] }
 0x141   :  { %5418 = vmatpush.bf16.msrb.mxu1 %v8747_v40  ;;  %v10196_v40 = vld [vmem:[%s15600_s1 + $0x1554] sm:$0xf0]  ;;  %v9034_v54 = vld [vmem:[%s15600_s1 + $0x14c0] sm:$0xf] }
 0x142   :  { %5431 = vmatpush.bf16.msrb.mxu2 %v8811_v42  ;;  %v9179_v42 = vor.u32 %v10214_v23, %v9178_v8  ;;  %v9107_v46 = vor.u32 %v10196_v40, %v9106_v62  ;;  %v9098_v51 = vld [vmem:[%s15600_s1 + $0x1540] sm:$0xf]  ;;  %v5212_v23 = vpop.f32.mrf.mxu1  ;;  %v9035_v48 = vor.u32 %v10178_v50, %v9034_v54  ;;  %v10176_v40 = vld [vmem:[%s15600_s1 + $0x14b4] sm:$0xf0] }
 0x143   :  { %5444 = vmatpush.bf16.msrb.mxu3 %v8875_v6  ;;  %5406 = vmatmul.bf16.vlgmr.msrb.gmra.mxu0 %v12519_v5  ;;  %v10180_v6 = vld [vmem:[%s15600_s1 + $0x14d4] sm:$0xf0]  ;;  %v9099_v53 = vor.u32 %v10194_v56, %v9098_v51  ;;  %v8954_v50 = vld [vmem:[%s15600_s1 + $0x1420] sm:$0xf]  ;;  %v10158_v51 = vld [vmem:[%s15600_s1 + $0x1424] sm:$0xf0] }
 0x144   :  { %5450 = vmatpush.bf16.msra.mxu0 %v8995_v47  ;;  %5419 = vmatmul.bf16.vlgmr.msrb.gmra.mxu1 %v12532_v58  ;;  %v10212_v47 = vld [vmem:[%s15600_s1 + $0x15d4] sm:$0xf0]  ;;  %v9018_v56 = vld [vmem:[%s15600_s1 + $0x14a0] sm:$0xf] }
 0x145   :  { %5463 = vmatpush.bf16.msra.mxu1 %v9059_v45  ;;  %5432 = vmatmul.bf16.vlgmr.msrb.gmra.mxu2 %v12521_v55  ;;  %v9043_v45 = vor.u32 %v10180_v6, %v9042_v29  ;;  %v9171_v60 = vor.u32 %v10212_v47, %v9170_v13  ;;  %v8962_v29 = vld [vmem:[%s15600_s1 + $0x1430] sm:$0xf]  ;;  %v9242_v58 = vld [vmem:[%s15600_s1 + $0x1660] sm:$0xf] }
 0x146   :  { %5476 = vmatpush.bf16.msra.mxu2 %v9123_v57  ;;  %5445 = vmatmul.bf16.vlgmr.msrb.gmra.mxu3 %v12534_v14  ;;  %v10162_v57 = vld [vmem:[%s15600_s1 + $0x1444] sm:$0xf0]  ;;  %v9026_v6 = vld [vmem:[%s15600_s1 + $0x14b0] sm:$0xf] }
 0x147   :  { %5489 = vmatpush.bf16.msra.mxu3 %v9187_v61  ;;  %v5199_v61 = vpop.f32.mrf.mxu0  ;;  %v8971_v8 = vor.u32 %v10162_v57, %v8970_v19  ;;  %v9027_v19 = vor.u32 %v10176_v40, %v9026_v6  ;;  %v8946_v6 = vld [vmem:[%s15600_s1 + $0x1410] sm:$0xf]  ;;  %v115_v14 = vld.sshfl [vmem:[#allocation1 + $0x18] sm:$0xff pattern:$0x73625140] }
 0x148   :  { %5451 = vmatpush.bf16.msra.mxu0 %v8987_v17  ;;  %v5200_v17 = vadd.f32 %v5199_v61, %v12427_v7  ;;  %v10160_v7 = vld [vmem:[%s15600_s1 + $0x1434] sm:$0xf0]  ;;  %v5225_v54 = vpop.f32.mrf.mxu2  ;;  %v10174_v61 = vld [vmem:[%s15600_s1 + $0x14a4] sm:$0xf0] }
 0x149   :  { %5464 = vmatpush.bf16.msra.mxu1 %v9051_v18  ;;  %v9162_v18 = vld [vmem:[%s15600_s1 + $0x15c0] sm:$0xf]  ;;  %v8963_v47 = vor.u32 %v10160_v7, %v8962_v29  ;;  %v10206_v7 = vld [vmem:[%s15600_s1 + $0x15a4] sm:$0xf0]  ;;  %v9019_v40 = vor.u32 %v10174_v61, %v9018_v56 }
 0x14a   :  { %5477 = vmatpush.bf16.msra.mxu2 %v9115_v38  ;;  %v10210_v38 = vld [vmem:[%s15600_s1 + $0x15c4] sm:$0xf0]  ;;  %v5213_v62 = vadd.f32 %v5212_v23, %v5200_v17  ;;  %v9082_v17 = vld [vmem:[%s15600_s1 + $0x1520] sm:$0xf] }
 0x14b   :  { %5490 = vmatpush.bf16.msra.mxu3 %v9179_v42  ;;  %v9090_v42 = vld [vmem:[%s15600_s1 + $0x1530] sm:$0xf]  ;;  %v9163_v13 = vor.u32 %v10210_v38, %v9162_v18  ;;  %v5238_v18 = vpop.f32.mrf.mxu3  ;;  %v9146_v29 = vld [vmem:[%s15600_s1 + $0x15a0] sm:$0xf]  ;;  %v10170_v61 = vld [vmem:[%s15600_s1 + $0x1484] sm:$0xf0] }
 0x14c   :  { %5452 = vmatpush.bf16.msra.mxu0 %v8979_v44  ;;  %v10192_v44 = vld [vmem:[%s15600_s1 + $0x1534] sm:$0xf0] }
 0x14d   :  { %5465 = vmatpush.bf16.msra.mxu1 %v9043_v45  ;;  %v9154_v45 = vld [vmem:[%s15600_s1 + $0x15b0] sm:$0xf]  ;;  %v9091_v57 = vor.u32 %v10192_v44, %v9090_v42  ;;  %v10156_v44 = vld [vmem:[%s15600_s1 + $0x1414] sm:$0xf0] }
 0x14e   :  { %5478 = vmatpush.bf16.msra.mxu2 %v9107_v46  ;;  %v10208_v46 = vld [vmem:[%s15600_s1 + $0x15b4] sm:$0xf0]  ;;  %v8947_v56 = vor.u32 %v10156_v44, %v8946_v6 }
 0x14f   :  { %5491 = vmatpush.bf16.msra.mxu3 %v9171_v60  ;;  %v5226_v60 = vadd.f32 %v5225_v54, %v5213_v62  ;;  %v9155_v23 = vor.u32 %v10208_v46, %v9154_v45  ;;  %v5201_v38 = vpop.f32.mrf.mxu0  ;;  %v5214_v62 = vpop.f32.mrf.mxu1  ;;  %v9074_v45 = vld [vmem:[%s15600_s1 + $0x1510] sm:$0xf]  ;;  %v10188_v46 = vld [vmem:[%s15600_s1 + $0x1514] sm:$0xf0] }
 0x150   :  { %5453 = vmatpush.bf16.msra.mxu0 %v8971_v8  ;;  %v10190_v8 = vld [vmem:[%s15600_s1 + $0x1524] sm:$0xf0]  ;;  %v10204_v54 = vld [vmem:[%s15600_s1 + $0x1594] sm:$0xf0]  ;;  %v9250_v38 = vld [vmem:[%s15600_s1 + $0x1670] sm:$0xf] }
 0x151   :  { %5466 = vmatpush.bf16.msra.mxu1 %v9035_v48  ;;  %v12637_v48 = vadd.f32 %v5238_v18, %v5226_v60  ;;  %v9083_v42 = vor.u32 %v10190_v8, %v9082_v17  ;;  %v9002_v60 = vld [vmem:[%s15600_s1 + $0x1480] sm:$0xf]  ;;  %v10186_v8 = vld [vmem:[%s15600_s1 + $0x1504] sm:$0xf0]  ;;  %v9075_v18 = vor.u32 %v10188_v46, %v9074_v45  ;;  %v10248_v6 = vld [vmem:[%s15600_s1 + $0x16f4] sm:$0xf0] }
 0x152   :  { %5479 = vmatpush.bf16.msra.mxu2 %v9099_v53  ;;  %v8955_v53 = vor.u32 %v10158_v51, %v8954_v50  ;;  %v8938_v50 = vld [vmem:[%s15600_s1 + $0x1400] sm:$0xf]  ;;  %v10154_v51 = vld [vmem:[%s15600_s1 + $0x1404] sm:$0xf0]  ;;  %v9378_v62 = vld [vmem:[%s15600_s1 + $0x1770] sm:$0xf] }
 0x153   :  { %5492 = vmatpush.bf16.msra.mxu3 %v9163_v13  ;;  %v9010_v13 = vld [vmem:[%s15600_s1 + $0x1490] sm:$0xf]  ;;  %v9066_v17 = vld [vmem:[%s15600_s1 + $0x1500] sm:$0xf]  ;;  %v10264_v44 = vld [vmem:[%s15600_s1 + $0x1774] sm:$0xf0]  ;;  %v8939_v45 = vor.u32 %v10154_v51, %v8938_v50 }
 0x154   :  { %5454 = vmatpush.bf16.msra.mxu0 %v8963_v47  ;;  %v10172_v47 = vld [vmem:[%s15600_s1 + $0x1494] sm:$0xf0]  ;;  %v10202_v46 = vld [vmem:[%s15600_s1 + $0x1584] sm:$0xf0]  ;;  %v9379_v55 = vor.u32 %v10264_v44, %v9378_v62 }
 0x155   :  { %5467 = vmatpush.bf16.msra.mxu1 %v9027_v19  ;;  %v9138_v19 = vld [vmem:[%s15600_s1 + $0x1590] sm:$0xf]  ;;  %v113_v51 = vld.sshfl [vmem:[#allocation1 + $0x8] sm:$0xff pattern:$0x73625140] }
 0x156   :  { %5480 = vmatpush.bf16.msra.mxu2 %v9091_v57  ;;  %v9147_v57 = vor.u32 %v10206_v7, %v9146_v29  ;;  %v9314_v29 = vld [vmem:[%s15600_s1 + $0x16f0] sm:$0xf]  ;;  %v5227_v7 = vpop.f32.mrf.mxu2  ;;  %v10278_v44 = vld [vmem:[%s15600_s1 + $0x17e4] sm:$0xf0] }
 0x157   :  { %5493 = vmatpush.bf16.msra.mxu3 %v9155_v23  ;;  %v9011_v23 = vor.u32 %v10172_v47, %v9010_v13  ;;  %v9130_v13 = vld [vmem:[%s15600_s1 + $0x1580] sm:$0xf]  ;;  %v5240_v47 = vpop.f32.mrf.mxu3  ;;  %v9067_v7 = vor.u32 %v10186_v8, %v9066_v17  ;;  %v9315_v50 = vor.u32 %v10248_v6, %v9314_v29  ;;  %v10246_v8 = vld [vmem:[%s15600_s1 + $0x16e4] sm:$0xf0]  ;;  %v12742_v29 = vpack.c.bf16 %v113_v51, %v113_v51 }
 0x158   :  { %5455 = vmatpush.bf16.msra.mxu0 %v8955_v53  ;;  %v10232_v53 = vld [vmem:[%s15600_s1 + $0x1674] sm:$0xf0]  ;;  %v112_v47 = vld.sshfl [vmem:[#allocation1] sm:$0xff pattern:$0x73625140]  ;;  %v9131_v5 = vor.u32 %v10202_v46, %v9130_v13  ;;  %v12744_v6 = vpack.c.bf16 %v115_v14, %v115_v14 }
 0x159   :  { %5468 = vmatpush.bf16.msra.mxu1 %v9019_v40  ;;  %v44_v40 = vld [vmem:[%s15599_s0 + $0x58] sm:$0xff]  ;;  %15628 = vst [vmem:[#allocation13_spill] sm:$0xff] %v12742_v29  ;;  %v9234_v46 = vld [vmem:[%s15600_s1 + $0x1650] sm:$0xf]  ;;  %v10226_v51 = vld [vmem:[%s15600_s1 + $0x1644] sm:$0xf0] }
 0x15a   :  { %5481 = vmatpush.bf16.msra.mxu2 %v9083_v42  ;;  %v9139_v42 = vor.u32 %v10204_v54, %v9138_v19  ;;  %111 = vst [vmem:[#allocation1 + $0x20] ss:$4 sm:$0xff] %v44_v40  ;;  %v9442_v19 = vld [vmem:[%s15600_s1 + $0x17f0] sm:$0xf]  ;;  %v9003_v54 = vor.u32 %v10170_v61, %v9002_v60  ;;  %v9306_v60 = vld [vmem:[%s15600_s1 + $0x16e0] sm:$0xf]  ;;  %v12729_v61 = vpack.c.bf16 %v112_v47, %v112_v47 }
 0x15b   :  { %5494 = vmatpush.bf16.msra.mxu3 %v9147_v57  ;;  %v10280_v57 = vld [vmem:[%s15600_s1 + $0x17f4] sm:$0xf0]  ;;  %v114_v40 = vld.sshfl [vmem:[#allocation1 + $0x10] sm:$0xff pattern:$0x73625140]  ;;  %15629 = vst [vmem:[#allocation14_spill] sm:$0xff] %v12744_v6  ;;  %v9307_v13 = vor.u32 %v10246_v8, %v9306_v60 }
 0x15c   :  { %5456 = vmatpush.bf16.msra.mxu0 %v8947_v56  ;;  %v9251_v56 = vor.u32 %v10232_v53, %v9250_v38  ;;  %15626 = vst [vmem:[#allocation11_spill] sm:$0xff] %v12729_v61  ;;  %v12731_v17 = vpack.c.bf16 %v114_v40, %v114_v40  ;;  %v10262_v38 = vld [vmem:[%s15600_s1 + $0x1764] sm:$0xf0]  ;;  %v9443_v53 = vor.u32 %v10280_v57, %v9442_v19  ;;  %v9298_v14 = vld [vmem:[%s15600_s1 + $0x16d0] sm:$0xf] }
 0x15d   :  { %5469 = vmatpush.bf16.msra.mxu1 %v9011_v23  ;;  %v10230_v23 = vld [vmem:[%s15600_s1 + $0x1664] sm:$0xf0]  ;;  %v10260_v19 = vld [vmem:[%s15600_s1 + $0x1754] sm:$0xf0]  ;;  %v9354_v8 = vld [vmem:[%s15600_s1 + $0x1740] sm:$0xf] }
 0x15e   :  { %5482 = vmatpush.bf16.msra.mxu2 %v9075_v18  ;;  %15627 = vst [vmem:[#allocation12_spill] sm:$0xff] %v12731_v17  ;;  %v9370_v18 = vld [vmem:[%s15600_s1 + $0x1760] sm:$0xf]  ;;  %v9243_v62 = vor.u32 %v10230_v23, %v9242_v58  ;;  %v10228_v58 = vld [vmem:[%s15600_s1 + $0x1654] sm:$0xf0] }
 0x15f   :  { %5495 = vmatpush.bf16.msra.mxu3 %v9139_v42  ;;  %v9434_v42 = vld [vmem:[%s15600_s1 + $0x17e0] sm:$0xf]  ;;  %v10276_v47 = vld [vmem:[%s15600_s1 + $0x17d4] sm:$0xf0]  ;;  %v10242_v60 = vld [vmem:[%s15600_s1 + $0x16c4] sm:$0xf0] }
 0x160   :  { %5457 = vmatpush.bf16.msra.mxu0 %v8939_v45  ;;  %v9371_v45 = vor.u32 %v10262_v38, %v9370_v18  ;;  %v9435_v57 = vor.u32 %v10278_v44, %v9434_v42  ;;  %v9290_v23 = vld [vmem:[%s15600_s1 + $0x16c0] sm:$0xf]  ;;  %v10258_v18 = vld [vmem:[%s15600_s1 + $0x1744] sm:$0xf0] }
 0x161   :  { %5470 = vmatpush.bf16.msra.mxu1 %v9003_v54  ;;  %v9235_v54 = vor.u32 %v10228_v58, %v9234_v46  ;;  %v5264_v44 = vpop.f32.mrf.mxu1  ;;  %v9291_v46 = vor.u32 %v10242_v60, %v9290_v23  ;;  %v9355_v58 = vor.u32 %v10258_v18, %v9354_v8  ;;  %v9210_v60 = vld [vmem:[%s15600_s1 + $0x1620] sm:$0xf]  ;;  %v10222_v8 = vld [vmem:[%s15600_s1 + $0x1624] sm:$0xf0] }
 0x162   :  { %5483 = vmatpush.bf16.msra.mxu2 %v9067_v7  ;;  %v9426_v7 = vld [vmem:[%s15600_s1 + $0x17d0] sm:$0xf]  ;;  %v9274_v18 = vld [vmem:[%s15600_s1 + $0x16a0] sm:$0xf] }
 0x163   :  { %5496 = vmatpush.bf16.msra.mxu3 %v9131_v5  ;;  %5458 = vmatmul.bf16.vlgmr.msra.gmra.mxu0 %v12729_v61  ;;  %v10244_v5 = vld [vmem:[%s15600_s1 + $0x16d4] sm:$0xf0]  ;;  %v9427_v38 = vor.u32 %v10276_v47, %v9426_v7 }
 0x164   :  { %5502 = vmatpush.bf16.msrb.mxu0 %v9251_v56  ;;  %5471 = vmatmul.bf16.vlgmr.msra.gmra.mxu1 %v12742_v29  ;;  %v9299_v40 = vor.u32 %v10244_v5, %v9298_v14  ;;  %v9218_v14 = vld [vmem:[%s15600_s1 + $0x1630] sm:$0xf]  ;;  %v9498_v29 = vld [vmem:[%s15600_s1 + $0x1860] sm:$0xf] }
 0x165   :  { %5515 = vmatpush.bf16.msrb.mxu1 %v9315_v50  ;;  %5484 = vmatmul.bf16.vlgmr.msra.gmra.mxu2 %v12731_v17  ;;  %v9226_v50 = vld [vmem:[%s15600_s1 + $0x1640] sm:$0xf]  ;;  %v9282_v5 = vld [vmem:[%s15600_s1 + $0x16b0] sm:$0xf] }
 0x166   :  { %5528 = vmatpush.bf16.msrb.mxu2 %v9379_v55  ;;  %v9362_v55 = vld [vmem:[%s15600_s1 + $0x1750] sm:$0xf]  ;;  %5497 = vmatmul.bf16.vlgmr.msra.gmra.mxu3 %v12744_v6  ;;  %v9227_v42 = vor.u32 %v10226_v51, %v9226_v50  ;;  %v119_v6 = vld.sshfl [vmem:[#allocation1 + $0x38] sm:$0xff pattern:$0x73625140] }
 0x167   :  { %5541 = vmatpush.bf16.msrb.mxu3 %v9443_v53  ;;  %v9363_v56 = vor.u32 %v10260_v19, %v9362_v55  ;;  %v5251_v53 = vpop.f32.mrf.mxu0  ;;  %v10240_v19 = vld [vmem:[%s15600_s1 + $0x16b4] sm:$0xf0] }
 0x168   :  { %5503 = vmatpush.bf16.msrb.mxu0 %v9243_v62  ;;  %v5252_v62 = vadd.f32 %v5251_v53, %v12637_v48  ;;  %v10224_v48 = vld [vmem:[%s15600_s1 + $0x1634] sm:$0xf0]  ;;  %v9283_v50 = vor.u32 %v10240_v19, %v9282_v5  ;;  %v5277_v23 = vpop.f32.mrf.mxu2  ;;  %v10238_v53 = vld [vmem:[%s15600_s1 + $0x16a4] sm:$0xf0]  ;;  %v9202_v5 = vld [vmem:[%s15600_s1 + $0x1610] sm:$0xf] }
 0x169   :  { %5516 = vmatpush.bf16.msrb.mxu1 %v9307_v13  ;;  %v9418_v13 = vld [vmem:[%s15600_s1 + $0x17c0] sm:$0xf]  ;;  %v9219_v47 = vor.u32 %v10224_v48, %v9218_v14  ;;  %v10270_v48 = vld [vmem:[%s15600_s1 + $0x17a4] sm:$0xf0]  ;;  %v9275_v19 = vor.u32 %v10238_v53, %v9274_v18 }
 0x16a   :  { %5529 = vmatpush.bf16.msrb.mxu2 %v9371_v45  ;;  %v10274_v45 = vld [vmem:[%s15600_s1 + $0x17c4] sm:$0xf0]  ;;  %v5265_v55 = vadd.f32 %v5264_v44, %v5252_v62  ;;  %v9338_v62 = vld [vmem:[%s15600_s1 + $0x1720] sm:$0xf] }
 0x16b   :  { %5542 = vmatpush.bf16.msrb.mxu3 %v9435_v57  ;;  %v9346_v57 = vld [vmem:[%s15600_s1 + $0x1730] sm:$0xf]  ;;  %v9419_v7 = vor.u32 %v10274_v45, %v9418_v13  ;;  %v5290_v13 = vpop.f32.mrf.mxu3  ;;  %v9402_v14 = vld [vmem:[%s15600_s1 + $0x17a0] sm:$0xf]  ;;  %v10234_v53 = vld [vmem:[%s15600_s1 + $0x1684] sm:$0xf0] }
 0x16c   :  { %5504 = vmatpush.bf16.msrb.mxu0 %v9235_v54  ;;  %v10256_v54 = vld [vmem:[%s15600_s1 + $0x1734] sm:$0xf0] }
 0x16d   :  { %5517 = vmatpush.bf16.msrb.mxu1 %v9299_v40  ;;  %v9410_v40 = vld [vmem:[%s15600_s1 + $0x17b0] sm:$0xf]  ;;  %v9347_v51 = vor.u32 %v10256_v54, %v9346_v57  ;;  %v10220_v54 = vld [vmem:[%s15600_s1 + $0x1614] sm:$0xf0] }
 0x16e   :  { %5530 = vmatpush.bf16.msrb.mxu2 %v9363_v56  ;;  %v10272_v56 = vld [vmem:[%s15600_s1 + $0x17b4] sm:$0xf0]  ;;  %v9203_v18 = vor.u32 %v10220_v54, %v9202_v5  ;;  %v6436_v5 = vld [vmem:[%s15600_s1 + $0x78] sm:$0xf0] }
 0x16f   :  { %5543 = vmatpush.bf16.msrb.mxu3 %v9427_v38  ;;  %v5278_v38 = vadd.f32 %v5277_v23, %v5265_v55  ;;  %v9411_v44 = vor.u32 %v10272_v56, %v9410_v40  ;;  %v5253_v45 = vpop.f32.mrf.mxu0  ;;  %v5266_v55 = vpop.f32.mrf.mxu1  ;;  %v9330_v40 = vld [vmem:[%s15600_s1 + $0x1710] sm:$0xf]  ;;  %v10252_v56 = vld [vmem:[%s15600_s1 + $0x1714] sm:$0xf0]  ;;  %v6500_v54 = vld [vmem:[%s15600_s1 + $0xf8] sm:$0xf0] }
 0x170   :  { %5505 = vmatpush.bf16.msrb.mxu0 %v9227_v42  ;;  %v10254_v42 = vld [vmem:[%s15600_s1 + $0x1724] sm:$0xf0]  ;;  %v10268_v23 = vld [vmem:[%s15600_s1 + $0x1794] sm:$0xf0]  ;;  %v9506_v45 = vld [vmem:[%s15600_s1 + $0x1870] sm:$0xf] }
 0x171   :  { %5518 = vmatpush.bf16.msrb.mxu1 %v9291_v46  ;;  %v12847_v46 = vadd.f32 %v5290_v13, %v5278_v38  ;;  %v9339_v57 = vor.u32 %v10254_v42, %v9338_v62  ;;  %v9258_v38 = vld [vmem:[%s15600_s1 + $0x1680] sm:$0xf]  ;;  %v10250_v42 = vld [vmem:[%s15600_s1 + $0x1704] sm:$0xf0]  ;;  %v9331_v13 = vor.u32 %v10252_v56, %v9330_v40  ;;  %v9543_v55 = vld [vmem:[%s15600_s1 + $0xf4] sm:$0xf] }
 0x172   :  { %5531 = vmatpush.bf16.msrb.mxu2 %v9355_v58  ;;  %v9211_v58 = vor.u32 %v10222_v8, %v9210_v60  ;;  %v9194_v60 = vld [vmem:[%s15600_s1 + $0x1600] sm:$0xf]  ;;  %v10218_v8 = vld [vmem:[%s15600_s1 + $0x1604] sm:$0xf0]  ;;  %v6503_v17 = vor.u32 %v9543_v55, %v6500_v54  ;;  %v6556_v54 = vld [vmem:[%s15600_s1 + $0x168] sm:$0xf0] }
 0x173   :  { %5544 = vmatpush.bf16.msrb.mxu3 %v9419_v7  ;;  %v9266_v7 = vld [vmem:[%s15600_s1 + $0x1690] sm:$0xf]  ;;  %v9322_v62 = vld [vmem:[%s15600_s1 + $0x1700] sm:$0xf]  ;;  %v9195_v40 = vor.u32 %v10218_v8, %v9194_v60  ;;  %v10266_v56 = vld [vmem:[%s15600_s1 + $0x1784] sm:$0xf0] }
 0x174   :  { %5506 = vmatpush.bf16.msrb.mxu0 %v9219_v47  ;;  %v10236_v47 = vld [vmem:[%s15600_s1 + $0x1694] sm:$0xf0]  ;;  %v117_v8 = vld.sshfl [vmem:[#allocation1 + $0x28] sm:$0xff pattern:$0x73625140] }
 0x175   :  { %5519 = vmatpush.bf16.msrb.mxu1 %v9283_v50  ;;  %v9394_v50 = vld [vmem:[%s15600_s1 + $0x1790] sm:$0xf] }
 0x176   :  { %5532 = vmatpush.bf16.msrb.mxu2 %v9347_v51  ;;  %v9403_v51 = vor.u32 %v10270_v48, %v9402_v14  ;;  %v9527_v14 = vld [vmem:[%s15600_s1 + $0x74] sm:$0xf]  ;;  %v5279_v48 = vpop.f32.mrf.mxu2 }
 0x177   :  { %5545 = vmatpush.bf16.msrb.mxu3 %v9411_v44  ;;  %v9267_v44 = vor.u32 %v10236_v47, %v9266_v7  ;;  %v9386_v7 = vld [vmem:[%s15600_s1 + $0x1780] sm:$0xf]  ;;  %v5292_v47 = vpop.f32.mrf.mxu3  ;;  %v9323_v48 = vor.u32 %v10250_v42, %v9322_v62  ;;  %v6439_v60 = vor.u32 %v9527_v14, %v6436_v5  ;;  %v6428_v42 = vld [vmem:[%s15600_s1 + $0x68] sm:$0xf0]  ;;  %v12952_v14 = vpack.c.bf16 %v117_v8, %v117_v8  ;;  %v10290_v8 = vld [vmem:[%s15600_s1 + $0x1844] sm:$0xf0] }
 0x178   :  { %5507 = vmatpush.bf16.msrb.mxu0 %v9211_v58  ;;  %v10296_v58 = vld [vmem:[%s15600_s1 + $0x1874] sm:$0xf0]  ;;  %v116_v47 = vld.sshfl [vmem:[#allocation1 + $0x20] sm:$0xff pattern:$0x73625140]  ;;  %v9387_v61 = vor.u32 %v10266_v56, %v9386_v7  ;;  %v12954_v5 = vpack.c.bf16 %v119_v6, %v119_v6 }
 0x179   :  { %5520 = vmatpush.bf16.msrb.mxu1 %v9275_v19  ;;  %v45_v19 = vld [vmem:[%s15599_s0 + $0x60] sm:$0x3]  ;;  %v9490_v56 = vld [vmem:[%s15600_s1 + $0x1850] sm:$0xf]  ;;  %v9523_v6 = vld [vmem:[%s15600_s1 + $0x54] sm:$0xf] }
 0x17a   :  { %5533 = vmatpush.bf16.msrb.mxu2 %v9339_v57  ;;  %v9395_v57 = vor.u32 %v10268_v23, %v9394_v50  ;;  %120 = vst [vmem:[#allocation1] ss:$4 sm:$0xff] %v45_v19  ;;  %v9559_v50 = vld [vmem:[%s15600_s1 + $0x174] sm:$0xf]  ;;  %v9259_v23 = vor.u32 %v10234_v53, %v9258_v38  ;;  %v9525_v38 = vld [vmem:[%s15600_s1 + $0x64] sm:$0xf]  ;;  %v12939_v53 = vpack.c.bf16 %v116_v47, %v116_v47 }
 0x17b   :  { %5546 = vmatpush.bf16.msrb.mxu3 %v9403_v51  ;;  %v6564_v51 = vld [vmem:[%s15600_s1 + $0x178] sm:$0xf0]  ;;  %v118_v19 = vld.sshfl [vmem:[#allocation1 + $0x30] sm:$0xff pattern:$0x73625140]  ;;  %15630 = vst [vmem:[#allocation15_spill] sm:$0xff] %v12954_v5  ;;  %v6431_v7 = vor.u32 %v9525_v38, %v6428_v42 }
 0x17c   :  { %5508 = vmatpush.bf16.msrb.mxu0 %v9203_v18  ;;  %v9507_v18 = vor.u32 %v10296_v58, %v9506_v45  ;;  %v12941_v62 = vpack.c.bf16 %v118_v19, %v118_v19  ;;  %v6492_v45 = vld [vmem:[%s15600_s1 + $0xe8] sm:$0xf0]  ;;  %v6567_v58 = vor.u32 %v9559_v50, %v6564_v51  ;;  %v6484_v50 = vld [vmem:[%s15600_s1 + $0xd8] sm:$0xf0]  ;;  %v9537_v42 = vld [vmem:[%s15600_s1 + $0xc4] sm:$0xf] }
 0x17d   :  { %5521 = vmatpush.bf16.msrb.mxu1 %v9267_v44  ;;  %v10294_v44 = vld [vmem:[%s15600_s1 + $0x1864] sm:$0xf0]  ;;  %v6548_v47 = vld [vmem:[%s15600_s1 + $0x158] sm:$0xf0]  ;;  %v6412_v38 = vld [vmem:[%s15600_s1 + $0x48] sm:$0xf0] }
 0x17e   :  { %5534 = vmatpush.bf16.msrb.mxu2 %v9331_v13  ;;  %v9541_v13 = vld [vmem:[%s15600_s1 + $0xe4] sm:$0xf]  ;;  %v9499_v55 = vor.u32 %v10294_v44, %v9498_v29  ;;  %v10292_v29 = vld [vmem:[%s15600_s1 + $0x1854] sm:$0xf0] }
 0x17f   :  { %5547 = vmatpush.bf16.msrb.mxu3 %v9395_v57  ;;  %v9557_v57 = vld [vmem:[%s15600_s1 + $0x164] sm:$0xf] }
 0x180   :  { %5509 = vmatpush.bf16.msrb.mxu0 %v9195_v40  ;;  %v6495_v40 = vor.u32 %v9541_v13, %v6492_v45  ;;  %v6559_v51 = vor.u32 %v9557_v57, %v6556_v54  ;;  %v9521_v44 = vld [vmem:[%s15600_s1 + $0x44] sm:$0xf]  ;;  %v6476_v13 = vld [vmem:[%s15600_s1 + $0xc8] sm:$0xf0] }
 0x181   :  { %5522 = vmatpush.bf16.msrb.mxu1 %v9259_v23  ;;  %v9491_v23 = vor.u32 %v10292_v29, %v9490_v56  ;;  %v5316_v54 = vpop.f32.mrf.mxu1  ;;  %v6415_v56 = vor.u32 %v9521_v44, %v6412_v38  ;;  %v6479_v29 = vor.u32 %v9537_v42, %v6476_v13  ;;  %v9466_v38 = vld [vmem:[%s15600_s1 + $0x1820] sm:$0xf]  ;;  %v10286_v42 = vld [vmem:[%s15600_s1 + $0x1824] sm:$0xf0]  ;;  %v9517_v13 = vld [vmem:[%s15600_s1 + $0x24] sm:$0xf] }
 0x182   :  { %5535 = vmatpush.bf16.msrb.mxu2 %v9323_v48  ;;  %v9555_v48 = vld [vmem:[%s15600_s1 + $0x154] sm:$0xf] }
 0x183   :  { %5548 = vmatpush.bf16.msrb.mxu3 %v9387_v61  ;;  %5510 = vmatmul.bf16.vlgmr.msrb.gmra.mxu0 %v12939_v53  ;;  %v6420_v61 = vld [vmem:[%s15600_s1 + $0x58] sm:$0xf0]  ;;  %v6551_v45 = vor.u32 %v9555_v48, %v6548_v47 }
 0x184   :  { %5554 = vmatpush.bf16.msra.mxu0 %v9507_v18  ;;  %5523 = vmatmul.bf16.vlgmr.msrb.gmra.mxu1 %v12952_v14  ;;  %v6423_v19 = vor.u32 %v9523_v6, %v6420_v61  ;;  %v9474_v6 = vld [vmem:[%s15600_s1 + $0x1830] sm:$0xf]  ;;  %v9519_v61 = vld [vmem:[%s15600_s1 + $0x34] sm:$0xf] }
 0x185   :  { %5567 = vmatpush.bf16.msra.mxu1 %v6439_v60  ;;  %5536 = vmatmul.bf16.vlgmr.msrb.gmra.mxu2 %v12941_v62  ;;  %v9482_v60 = vld [vmem:[%s15600_s1 + $0x1840] sm:$0xf] }
 0x186   :  { %5580 = vmatpush.bf16.msra.mxu2 %v6503_v17  ;;  %v9539_v17 = vld [vmem:[%s15600_s1 + $0xd4] sm:$0xf]  ;;  %5549 = vmatmul.bf16.vlgmr.msrb.gmra.mxu3 %v12954_v5  ;;  %v9483_v57 = vor.u32 %v10290_v8, %v9482_v60 }
 0x187   :  { %5593 = vmatpush.bf16.msra.mxu3 %v6567_v58  ;;  %v6487_v18 = vor.u32 %v9539_v17, %v6484_v50  ;;  %v5303_v58 = vpop.f32.mrf.mxu0  ;;  %v6404_v50 = vld [vmem:[%s15600_s1 + $0x38] sm:$0xf0] }
 0x188   :  { %5555 = vmatpush.bf16.msra.mxu0 %v9499_v55  ;;  %v5304_v55 = vadd.f32 %v5303_v58, %v12847_v46  ;;  %v10288_v46 = vld [vmem:[%s15600_s1 + $0x1834] sm:$0xf0]  ;;  %v6407_v60 = vor.u32 %v9519_v61, %v6404_v50  ;;  %v5329_v44 = vpop.f32.mrf.mxu2  ;;  %v6396_v58 = vld [vmem:[%s15600_s1 + $0x28] sm:$0xf0] }
 0x189   :  { %5568 = vmatpush.bf16.msra.mxu1 %v6431_v7  ;;  %v9553_v7 = vld [vmem:[%s15600_s1 + $0x144] sm:$0xf]  ;;  %v9475_v47 = vor.u32 %v10288_v46, %v9474_v6  ;;  %v6524_v46 = vld [vmem:[%s15600_s1 + $0x128] sm:$0xf0]  ;;  %v5318_v61 = vpop.f32.mrf.mxu1 }
 0x18a   :  { %5581 = vmatpush.bf16.msra.mxu2 %v6495_v40  ;;  %v6540_v40 = vld [vmem:[%s15600_s1 + $0x148] sm:$0xf0]  ;;  %v5317_v17 = vadd.f32 %v5316_v54, %v5304_v55  ;;  %v9533_v55 = vld [vmem:[%s15600_s1 + $0xa4] sm:$0xf] }
 0x18b   :  { %5594 = vmatpush.bf16.msra.mxu3 %v6559_v51  ;;  %v9535_v51 = vld [vmem:[%s15600_s1 + $0xb4] sm:$0xf]  ;;  %v6543_v48 = vor.u32 %v9553_v7, %v6540_v40  ;;  %v5342_v7 = vpop.f32.mrf.mxu3  ;;  %v9549_v6 = vld [vmem:[%s15600_s1 + $0x124] sm:$0xf] }
 0x18c   :  { %5556 = vmatpush.bf16.msra.mxu0 %v9491_v23  ;;  %v6468_v23 = vld [vmem:[%s15600_s1 + $0xb8] sm:$0xf0] }
 0x18d   :  { %5569 = vmatpush.bf16.msra.mxu1 %v6423_v19  ;;  %v9551_v19 = vld [vmem:[%s15600_s1 + $0x134] sm:$0xf]  ;;  %v6471_v8 = vor.u32 %v9535_v51, %v6468_v23  ;;  %v9458_v51 = vld [vmem:[%s15600_s1 + $0x1810] sm:$0xf]  ;;  %v10284_v23 = vld [vmem:[%s15600_s1 + $0x1814] sm:$0xf0] }
 0x18e   :  { %5582 = vmatpush.bf16.msra.mxu2 %v6487_v18  ;;  %v6532_v18 = vld [vmem:[%s15600_s1 + $0x138] sm:$0xf0] }
 0x18f   :  { %5595 = vmatpush.bf16.msra.mxu3 %v6551_v45  ;;  %v5330_v45 = vadd.f32 %v5329_v44, %v5317_v17  ;;  %v6535_v54 = vor.u32 %v9551_v19, %v6532_v18  ;;  %v5305_v40 = vpop.f32.mrf.mxu0  ;;  %v6399_v17 = vor.u32 %v9517_v13, %v6396_v58  ;;  %v9531_v19 = vld [vmem:[%s15600_s1 + $0x94] sm:$0xf]  ;;  %v6452_v18 = vld [vmem:[%s15600_s1 + $0x98] sm:$0xf0]  ;;  %v10282_v13 = vld [vmem:[%s15600_s1 + $0x1804] sm:$0xf0] }
 0x190   :  { %5557 = vmatpush.bf16.msra.mxu0 %v9483_v57  ;;  %v6460_v57 = vld [vmem:[%s15600_s1 + $0xa8] sm:$0xf0]  ;;  %v6516_v44 = vld [vmem:[%s15600_s1 + $0x118] sm:$0xf0]  ;;  %v5331_v40 = vpop.f32.mrf.mxu2 }
 0x191   :  { %5570 = vmatpush.bf16.msra.mxu1 %v6415_v56  ;;  %v13057_v56 = vadd.f32 %v5342_v7, %v5330_v45  ;;  %v6463_v50 = vor.u32 %v9533_v55, %v6460_v57  ;;  %v9513_v45 = vld [vmem:[%s15600_s1 + $0x4] sm:$0xf]  ;;  %v6455_v55 = vor.u32 %v9531_v19, %v6452_v18  ;;  %v6380_v57 = vld [vmem:[%s15600_s1 + $0x8] sm:$0xf0]  ;;  %v9623_v18 = vld [vmem:[%s15600_s1 + $0x374] sm:$0xf] }
 0x192   :  { %5583 = vmatpush.bf16.msra.mxu2 %v6479_v29  ;;  %v9467_v29 = vor.u32 %v10286_v42, %v9466_v38  ;;  %v9459_v38 = vor.u32 %v10284_v23, %v9458_v51  ;;  %v9450_v42 = vld [vmem:[%s15600_s1 + $0x1800] sm:$0xf]  ;;  %v6444_v7 = vld [vmem:[%s15600_s1 + $0x88] sm:$0xf0]  ;;  %v6756_v51 = vld [vmem:[%s15600_s1 + $0x2f8] sm:$0xf0] }
 0x193   :  { %5596 = vmatpush.bf16.msra.mxu3 %v6543_v48  ;;  %v9515_v48 = vld [vmem:[%s15600_s1 + $0x14] sm:$0xf]  ;;  %v5344_v23 = vpop.f32.mrf.mxu3  ;;  %v6508_v19 = vld [vmem:[%s15600_s1 + $0x108] sm:$0xf0]  ;;  %v9573_v40 = vld [vmem:[%s15600_s1 + $0x1e4] sm:$0xf] }
 0x194   :  { %5558 = vmatpush.bf16.msra.mxu0 %v9475_v47  ;;  %v6388_v47 = vld [vmem:[%s15600_s1 + $0x18] sm:$0xf0] }
 0x195   :  { %5571 = vmatpush.bf16.msra.mxu1 %v6407_v60  ;;  %v6527_v60 = vor.u32 %v9549_v6, %v6524_v46  ;;  %v6391_v58 = vor.u32 %v9515_v48, %v6388_v47  ;;  %v6628_v6 = vld [vmem:[%s15600_s1 + $0x1f8] sm:$0xf0]  ;;  %v9591_v46 = vld [vmem:[%s15600_s1 + $0x274] sm:$0xf]  ;;  %v9451_v48 = vor.u32 %v10282_v13, %v9450_v42  ;;  %v9545_v47 = vld [vmem:[%s15600_s1 + $0x104] sm:$0xf] }
 0x196   :  { %5584 = vmatpush.bf16.msra.mxu2 %v6471_v8  ;;  %v9547_v8 = vld [vmem:[%s15600_s1 + $0x114] sm:$0xf]  ;;  %v6511_v5 = vor.u32 %v9545_v47, %v6508_v19  ;;  %v6676_v19 = vld [vmem:[%s15600_s1 + $0x258] sm:$0xf0] }
 0x197   :  { %5597 = vmatpush.bf16.msra.mxu3 %v6535_v54  ;;  %v9529_v54 = vld [vmem:[%s15600_s1 + $0x84] sm:$0xf]  ;;  %v6519_v61 = vor.u32 %v9547_v8, %v6516_v44  ;;  %v9587_v47 = vld [vmem:[%s15600_s1 + $0x254] sm:$0xf] }
 0x198   :  { %5559 = vmatpush.bf16.msra.mxu0 %v9467_v29  ;;  %v9575_v29 = vld [vmem:[%s15600_s1 + $0x1f4] sm:$0xf]  ;;  %v6447_v8 = vor.u32 %v9529_v54, %v6444_v7  ;;  %v121_v44 = vld.sshfl [vmem:[#allocation1] sm:$0xff pattern:$0x73625140] }
 0x199   :  { %5572 = vmatpush.bf16.msra.mxu1 %v6399_v17  ;;  %v6692_v17 = vld [vmem:[%s15600_s1 + $0x278] sm:$0xf0]  ;;  %v6631_v42 = vor.u32 %v9575_v29, %v6628_v6  ;;  %v9605_v7 = vld [vmem:[%s15600_s1 + $0x2e4] sm:$0xf]  ;;  %v6748_v29 = vld [vmem:[%s15600_s1 + $0x2e8] sm:$0xf0] }
 0x19a   :  { %5585 = vmatpush.bf16.msra.mxu2 %v6463_v50  ;;  %v9607_v50 = vld [vmem:[%s15600_s1 + $0x2f4] sm:$0xf]  ;;  %v6695_v13 = vor.u32 %v9591_v46, %v6692_v17  ;;  %v9621_v6 = vld [vmem:[%s15600_s1 + $0x364] sm:$0xf]  ;;  %v6812_v46 = vld [vmem:[%s15600_s1 + $0x368] sm:$0xf0] }
 0x19b   :  { %5598 = vmatpush.bf16.msra.mxu3 %v6527_v60  ;;  %v6383_v60 = vor.u32 %v9513_v45, %v6380_v57  ;;  %v6759_v23 = vor.u32 %v9607_v50, %v6756_v51  ;;  %v9589_v45 = vld [vmem:[%s15600_s1 + $0x264] sm:$0xf]  ;;  %v13149_v57 = vpack.c.bf16 %v121_v44, %v121_v44  ;;  %v9571_v50 = vld [vmem:[%s15600_s1 + $0x1d4] sm:$0xf]  ;;  %v6751_v51 = vor.u32 %v9605_v7, %v6748_v29  ;;  %v6804_v44 = vld [vmem:[%s15600_s1 + $0x358] sm:$0xf0] }
 0x19c   :  { %5560 = vmatpush.bf16.msra.mxu0 %v9459_v38  ;;  %v6820_v38 = vld [vmem:[%s15600_s1 + $0x378] sm:$0xf0]  ;;  %v9617_v7 = vld [vmem:[%s15600_s1 + $0x344] sm:$0xf]  ;;  %v6796_v29 = vld [vmem:[%s15600_s1 + $0x348] sm:$0xf0] }
 0x19d   :  { %5573 = vmatpush.bf16.msra.mxu1 %v6391_v58  ;;  %v6620_v58 = vld [vmem:[%s15600_s1 + $0x1e8] sm:$0xf0]  ;;  %v6823_v54 = vor.u32 %v9623_v18, %v6820_v38  ;;  %v6815_v18 = vor.u32 %v9621_v6, %v6812_v46 }
 0x19e   :  { %5586 = vmatpush.bf16.msra.mxu2 %v6455_v55  ;;  %v6684_v55 = vld [vmem:[%s15600_s1 + $0x268] sm:$0xf0] }
 0x19f   :  { %5599 = vmatpush.bf16.msra.mxu3 %v6519_v61  ;;  %v6623_v61 = vor.u32 %v9573_v40, %v6620_v58  ;;  %v6687_v17 = vor.u32 %v9589_v45, %v6684_v55  ;;  %v9601_v45 = vld [vmem:[%s15600_s1 + $0x2c4] sm:$0xf]  ;;  %v6732_v55 = vld [vmem:[%s15600_s1 + $0x2c8] sm:$0xf0] }
 0x1a0   :  { %5561 = vmatpush.bf16.msra.mxu0 %v9451_v48  ;;  %v6612_v48 = vld [vmem:[%s15600_s1 + $0x1d8] sm:$0xf0] }
 0x1a1   :  { %5574 = vmatpush.bf16.msra.mxu1 %v6383_v60  ;;  %v6740_v60 = vld [vmem:[%s15600_s1 + $0x2d8] sm:$0xf0]  ;;  %v6615_v38 = vor.u32 %v9571_v50, %v6612_v48  ;;  %v6735_v50 = vor.u32 %v9601_v45, %v6732_v55  ;;  %v9583_v48 = vld [vmem:[%s15600_s1 + $0x234] sm:$0xf]  ;;  %v9597_v55 = vld [vmem:[%s15600_s1 + $0x2a4] sm:$0xf] }
 0x1a2   :  { %5587 = vmatpush.bf16.msra.mxu2 %v6447_v8  ;;  %v9619_v8 = vld [vmem:[%s15600_s1 + $0x354] sm:$0xf] }
 0x1a3   :  { %5600 = vmatpush.bf16.msra.mxu3 %v6511_v5  ;;  %5562 = vmatmul.bf16.vlgmr.msra.gmra.mxu0 %v13149_v57  ;;  %v9603_v5 = vld [vmem:[%s15600_s1 + $0x2d4] sm:$0xf]  ;;  %v6807_v58 = vor.u32 %v9619_v8, %v6804_v44  ;;  %v6788_v8 = vld [vmem:[%s15600_s1 + $0x338] sm:$0xf0] }
 0x1a4   :  { %5606 = vmatpush.bf16.msrb.mxu0 %v6631_v42  ;;  %5575 = vmatmul.bf16.vlgmr.msra.gmra.mxu1 %v10693_v27  ;;  %v6679_v42 = vor.u32 %v9587_v47, %v6676_v19  ;;  %v6743_v40 = vor.u32 %v9603_v5, %v6740_v60  ;;  %v6668_v27 = vld [vmem:[%s15600_s1 + $0x248] sm:$0xf0]  ;;  %v6799_v19 = vor.u32 %v9617_v7, %v6796_v29  ;;  %v6724_v5 = vld [vmem:[%s15600_s1 + $0x2b8] sm:$0xf0]  ;;  %v9615_v60 = vld [vmem:[%s15600_s1 + $0x334] sm:$0xf] }
 0x1a5   :  { %5619 = vmatpush.bf16.msrb.mxu1 %v6695_v13  ;;  %5588 = vmatmul.bf16.vlgmr.msra.gmra.mxu2 %v10703_v33  ;;  %v9569_v13 = vld [vmem:[%s15600_s1 + $0x1c4] sm:$0xf]  ;;  %v6791_v45 = vor.u32 %v9615_v60, %v6788_v8  ;;  %v6708_v60 = vld [vmem:[%s15600_s1 + $0x298] sm:$0xf0]  ;;  %v9611_v8 = vld [vmem:[%s15600_s1 + $0x314] sm:$0xf] }
 0x1a6   :  { %5632 = vmatpush.bf16.msrb.mxu2 %v6759_v23  ;;  %v6604_v23 = vld [vmem:[%s15600_s1 + $0x1c8] sm:$0xf0]  ;;  %v9585_v33 = vld [vmem:[%s15600_s1 + $0x244] sm:$0xf]  ;;  %5601 = vmatmul.bf16.vlgmr.msra.gmra.mxu3 %v10691_v26 }
 0x1a7   :  { %5645 = vmatpush.bf16.msrb.mxu3 %v6823_v54  ;;  %v5355_v54 = vpop.f32.mrf.mxu0  ;;  %v6607_v6 = vor.u32 %v9569_v13, %v6604_v23  ;;  %v6671_v46 = vor.u32 %v9585_v33, %v6668_v27  ;;  %v6588_v23 = vld [vmem:[%s15600_s1 + $0x1a8] sm:$0xf0]  ;;  %v9581_v33 = vld [vmem:[%s15600_s1 + $0x224] sm:$0xf] }
 0x1a8   :  { %5607 = vmatpush.bf16.msrb.mxu0 %v6623_v61  ;;  %v5356_v26 = vadd.f32 %v5355_v54, %v13057_v56  ;;  %v5368_v61 = vpop.f32.mrf.mxu1  ;;  %v6660_v56 = vld [vmem:[%s15600_s1 + $0x238] sm:$0xf0]  ;;  %v6652_v27 = vld [vmem:[%s15600_s1 + $0x228] sm:$0xf0]  ;;  %v9613_v29 = vld [vmem:[%s15600_s1 + $0x324] sm:$0xf] }
 0x1a9   :  { %5620 = vmatpush.bf16.msrb.mxu1 %v6687_v17  ;;  %v9567_v17 = vld [vmem:[%s15600_s1 + $0x1b4] sm:$0xf]  ;;  %v6716_v54 = vld [vmem:[%s15600_s1 + $0x2a8] sm:$0xf0]  ;;  %v5394_v7 = vpop.f32.mrf.mxu3 }
 0x1aa   :  { %5633 = vmatpush.bf16.msrb.mxu2 %v6751_v51  ;;  %v6596_v51 = vld [vmem:[%s15600_s1 + $0x1b8] sm:$0xf0]  ;;  %v5369_v47 = vadd.f32 %v5368_v61, %v5356_v26  ;;  %v6780_v26 = vld [vmem:[%s15600_s1 + $0x328] sm:$0xf0] }
 0x1ab   :  { %5646 = vmatpush.bf16.msrb.mxu3 %v6815_v18  ;;  %v9599_v18 = vld [vmem:[%s15600_s1 + $0x2b4] sm:$0xf]  ;;  %v6599_v44 = vor.u32 %v9567_v17, %v6596_v51  ;;  %v6655_v17 = vor.u32 %v9581_v33, %v6652_v27  ;;  %v6636_v27 = vld [vmem:[%s15600_s1 + $0x208] sm:$0xf0] }
 0x1ac   :  { %5608 = vmatpush.bf16.msrb.mxu0 %v6615_v38  ;;  %v6663_v38 = vor.u32 %v9583_v48, %v6660_v56  ;;  %v6727_v13 = vor.u32 %v9599_v18, %v6724_v5  ;;  %v6719_v48 = vor.u32 %v9597_v55, %v6716_v54  ;;  %v6580_v56 = vld [vmem:[%s15600_s1 + $0x198] sm:$0xf0]  ;;  %v6783_v18 = vor.u32 %v9613_v29, %v6780_v26  ;;  %v9595_v5 = vld [vmem:[%s15600_s1 + $0x294] sm:$0xf] }
 0x1ad   :  { %5621 = vmatpush.bf16.msrb.mxu1 %v6679_v42  ;;  %v9565_v42 = vld [vmem:[%s15600_s1 + $0x1a4] sm:$0xf]  ;;  %v6711_v33 = vor.u32 %v9595_v5, %v6708_v60  ;;  %v6884_v29 = vld [vmem:[%s15600_s1 + $0x3f8] sm:$0xf0]  ;;  %v9655_v26 = vld [vmem:[%s15600_s1 + $0x474] sm:$0xf] }
 0x1ae   :  { %5634 = vmatpush.bf16.msrb.mxu2 %v6743_v40  ;;  %v5381_v40 = vpop.f32.mrf.mxu2  ;;  %v6591_v61 = vor.u32 %v9565_v42, %v6588_v23  ;;  %v9577_v23 = vld [vmem:[%s15600_s1 + $0x204] sm:$0xf]  ;;  %v9687_v5 = vld [vmem:[%s15600_s1 + $0x574] sm:$0xf]  ;;  %v7076_v60 = vld [vmem:[%s15600_s1 + $0x578] sm:$0xf0] }
 0x1af   :  { %5647 = vmatpush.bf16.msrb.mxu3 %v6807_v58  ;;  %v5382_v58 = vadd.f32 %v5381_v40, %v5369_v47  ;;  %v9579_v47 = vld [vmem:[%s15600_s1 + $0x214] sm:$0xf]  ;;  %v6572_v40 = vld [vmem:[%s15600_s1 + $0x188] sm:$0xf0] }
 0x1b0   :  { %5609 = vmatpush.bf16.msrb.mxu0 %v6607_v6  ;;  %v5357_v6 = vpop.f32.mrf.mxu0  ;;  %v5370_v51 = vpop.f32.mrf.mxu1 }
 0x1b1   :  { %5622 = vmatpush.bf16.msrb.mxu1 %v6671_v46  ;;  %v13264_v46 = vadd.f32 %v5394_v7, %v5382_v58  ;;  %v9593_v58 = vld [vmem:[%s15600_s1 + $0x284] sm:$0xf]  ;;  %v9639_v7 = vld [vmem:[%s15600_s1 + $0x3f4] sm:$0xf]  ;;  %v6948_v6 = vld [vmem:[%s15600_s1 + $0x478] sm:$0xf0] }
 0x1b2   :  { %5635 = vmatpush.bf16.msrb.mxu2 %v6735_v50  ;;  %v9563_v50 = vld [vmem:[%s15600_s1 + $0x194] sm:$0xf] }
 0x1b3   :  { %5648 = vmatpush.bf16.msrb.mxu3 %v6799_v19  ;;  %v6644_v19 = vld [vmem:[%s15600_s1 + $0x218] sm:$0xf0] }
 0x1b4   :  { %5610 = vmatpush.bf16.msrb.mxu0 %v6599_v44  ;;  %v6772_v44 = vld [vmem:[%s15600_s1 + $0x318] sm:$0xf0]  ;;  %v6647_v42 = vor.u32 %v9579_v47, %v6644_v19  ;;  %v6764_v47 = vld [vmem:[%s15600_s1 + $0x308] sm:$0xf0] }
 0x1b5   :  { %5623 = vmatpush.bf16.msrb.mxu1 %v6663_v38  ;;  %v6583_v38 = vor.u32 %v9563_v50, %v6580_v56  ;;  %v6775_v54 = vor.u32 %v9611_v8, %v6772_v44  ;;  %v5396_v50 = vpop.f32.mrf.mxu3  ;;  %v9609_v56 = vld [vmem:[%s15600_s1 + $0x304] sm:$0xf]  ;;  %v6951_v8 = vor.u32 %v9655_v26, %v6948_v6  ;;  %v9635_v26 = vld [vmem:[%s15600_s1 + $0x3d4] sm:$0xf]  ;;  %v6868_v6 = vld [vmem:[%s15600_s1 + $0x3d8] sm:$0xf0] }
 0x1b6   :  { %5636 = vmatpush.bf16.msrb.mxu2 %v6727_v13  ;;  %v9561_v13 = vld [vmem:[%s15600_s1 + $0x184] sm:$0xf]  ;;  %v5383_v55 = vpop.f32.mrf.mxu2  ;;  %v9667_v50 = vld [vmem:[%s15600_s1 + $0x4d4] sm:$0xf] }
 0x1b7   :  { %5649 = vmatpush.bf16.msrb.mxu3 %v6791_v45  ;;  %v6700_v45 = vld [vmem:[%s15600_s1 + $0x288] sm:$0xf0]  ;;  %v6575_v51 = vor.u32 %v9561_v13, %v6572_v40  ;;  %v9653_v13 = vld [vmem:[%s15600_s1 + $0x464] sm:$0xf]  ;;  %v6767_v40 = vor.u32 %v9609_v56, %v6764_v47  ;;  %v6871_v56 = vor.u32 %v9635_v26, %v6868_v6  ;;  %v7060_v47 = vld [vmem:[%s15600_s1 + $0x558] sm:$0xf0] }
 0x1b8   :  { %5611 = vmatpush.bf16.msrb.mxu0 %v6591_v61  ;;  %v9671_v61 = vld [vmem:[%s15600_s1 + $0x4f4] sm:$0xf]  ;;  %v6703_v19 = vor.u32 %v9593_v58, %v6700_v45  ;;  %v7079_v58 = vor.u32 %v9687_v5, %v7076_v60  ;;  %v9685_v55 = vld [vmem:[%s15600_s1 + $0x564] sm:$0xf]  ;;  %v6924_v60 = vld [vmem:[%s15600_s1 + $0x448] sm:$0xf0] }
 0x1b9   :  { %5624 = vmatpush.bf16.msrb.mxu1 %v6655_v17  ;;  %v7012_v17 = vld [vmem:[%s15600_s1 + $0x4f8] sm:$0xf0]  ;;  %v9649_v5 = vld [vmem:[%s15600_s1 + $0x444] sm:$0xf] }
 0x1ba   :  { %5637 = vmatpush.bf16.msrb.mxu2 %v6719_v48  ;;  %v6639_v48 = vor.u32 %v9577_v23, %v6636_v27  ;;  %v7015_v44 = vor.u32 %v9671_v61, %v7012_v17  ;;  %v6940_v23 = vld [vmem:[%s15600_s1 + $0x468] sm:$0xf0]  ;;  %v9651_v61 = vld [vmem:[%s15600_s1 + $0x454] sm:$0xf]  ;;  %v6932_v17 = vld [vmem:[%s15600_s1 + $0x458] sm:$0xf0] }
 0x1bb   :  { %5650 = vmatpush.bf16.msrb.mxu3 %v6783_v18  ;;  %v6887_v18 = vor.u32 %v9639_v7, %v6884_v29  ;;  %v7004_v27 = vld [vmem:[%s15600_s1 + $0x4e8] sm:$0xf0]  ;;  %v6943_v7 = vor.u32 %v9653_v13, %v6940_v23 }
 0x1bc   :  { %5612 = vmatpush.bf16.msrb.mxu0 %v6583_v38  ;;  %v9637_v38 = vld [vmem:[%s15600_s1 + $0x3e4] sm:$0xf] }
 0x1bd   :  { %5625 = vmatpush.bf16.msrb.mxu1 %v6647_v42  ;;  %v6876_v42 = vld [vmem:[%s15600_s1 + $0x3e8] sm:$0xf0] }
 0x1be   :  { %5638 = vmatpush.bf16.msrb.mxu2 %v6711_v33  ;;  %v9669_v33 = vld [vmem:[%s15600_s1 + $0x4e4] sm:$0xf]  ;;  %v6879_v45 = vor.u32 %v9637_v38, %v6876_v42 }
 0x1bf   :  { %5651 = vmatpush.bf16.msrb.mxu3 %v6775_v54  ;;  %v7068_v54 = vld [vmem:[%s15600_s1 + $0x568] sm:$0xf0]  ;;  %v7007_v29 = vor.u32 %v9669_v33, %v7004_v27  ;;  %v6927_v33 = vor.u32 %v9649_v5, %v6924_v60 }
 0x1c0   :  { %5613 = vmatpush.bf16.msrb.mxu0 %v6575_v51  ;;  %v6996_v51 = vld [vmem:[%s15600_s1 + $0x4d8] sm:$0xf0]  ;;  %v5407_v42 = vpop.f32.mrf.mxu0 }
 0x1c1   :  { %5626 = vmatpush.bf16.msrb.mxu1 %v6639_v48  ;;  %v7071_v48 = vor.u32 %v9685_v55, %v7068_v54  ;;  %v5408_v23 = vadd.f32 %v5407_v42, %v13264_v46  ;;  %v6852_v55 = vld [vmem:[%s15600_s1 + $0x3b8] sm:$0xf0]  ;;  %v9647_v54 = vld [vmem:[%s15600_s1 + $0x434] sm:$0xf]  ;;  %v7036_v42 = vld [vmem:[%s15600_s1 + $0x528] sm:$0xf0] }
 0x1c2   :  { %5639 = vmatpush.bf16.msrb.mxu2 %v6703_v19  ;;  %v6935_v19 = vor.u32 %v9651_v61, %v6932_v17  ;;  %v9663_v46 = vld [vmem:[%s15600_s1 + $0x4b4] sm:$0xf] }
 0x1c3   :  { %5652 = vmatpush.bf16.msrb.mxu3 %v6767_v40  ;;  %5614 = vmatmul.bf16.vlgmr.msrb.gmra.mxu0 %v10701_v32  ;;  %v9683_v32 = vld [vmem:[%s15600_s1 + $0x554] sm:$0xf]  ;;  %v7052_v40 = vld [vmem:[%s15600_s1 + $0x548] sm:$0xf0] }
 0x1c4   :  { %5658 = vmatpush.bf16.msra.mxu0 %v6887_v18  ;;  %5627 = vmatmul.bf16.vlgmr.msrb.gmra.mxu1 %v10829_v37  ;;  %v6999_v18 = vor.u32 %v9667_v50, %v6996_v51  ;;  %v6860_v37 = vld [vmem:[%s15600_s1 + $0x3c8] sm:$0xf0]  ;;  %v7063_v38 = vor.u32 %v9683_v32, %v7060_v47  ;;  %v9679_v17 = vld [vmem:[%s15600_s1 + $0x534] sm:$0xf]  ;;  %v7044_v50 = vld [vmem:[%s15600_s1 + $0x538] sm:$0xf0] }
 0x1c5   :  { %5671 = vmatpush.bf16.msra.mxu1 %v6951_v8  ;;  %5640 = vmatmul.bf16.vlgmr.msrb.gmra.mxu2 %v10839_v43  ;;  %v9633_v43 = vld [vmem:[%s15600_s1 + $0x3c4] sm:$0xf]  ;;  %v6844_v32 = vld [vmem:[%s15600_s1 + $0x3a8] sm:$0xf0]  ;;  %v7047_v60 = vor.u32 %v9679_v17, %v7044_v50 }
 0x1c6   :  { %5684 = vmatpush.bf16.msra.mxu2 %v7015_v44  ;;  %5653 = vmatmul.bf16.vlgmr.msrb.gmra.mxu3 %v10831_v39  ;;  %v9665_v8 = vld [vmem:[%s15600_s1 + $0x4c4] sm:$0xf]  ;;  %v6988_v44 = vld [vmem:[%s15600_s1 + $0x4c8] sm:$0xf0]  ;;  %v6863_v13 = vor.u32 %v9633_v43, %v6860_v37 }
 0x1c7   :  { %5697 = vmatpush.bf16.msra.mxu3 %v7079_v58  ;;  %v9681_v39 = vld [vmem:[%s15600_s1 + $0x544] sm:$0xf]  ;;  %v6991_v27 = vor.u32 %v9665_v8, %v6988_v44  ;;  %v5420_v58 = vpop.f32.mrf.mxu1  ;;  %v6972_v37 = vld [vmem:[%s15600_s1 + $0x4a8] sm:$0xf0] }
 0x1c8   :  { %5659 = vmatpush.bf16.msra.mxu0 %v6879_v45  ;;  %v9631_v45 = vld [vmem:[%s15600_s1 + $0x3b4] sm:$0xf]  ;;  %v5421_v26 = vadd.f32 %v5420_v58, %v5408_v23  ;;  %v7055_v6 = vor.u32 %v9681_v39, %v7052_v40  ;;  %v9645_v47 = vld [vmem:[%s15600_s1 + $0x424] sm:$0xf]  ;;  %v6828_v17 = vld [vmem:[%s15600_s1 + $0x388] sm:$0xf0] }
 0x1c9   :  { %5672 = vmatpush.bf16.msra.mxu1 %v6943_v7  ;;  %v6916_v7 = vld [vmem:[%s15600_s1 + $0x438] sm:$0xf0]  ;;  %v6855_v61 = vor.u32 %v9631_v45, %v6852_v55  ;;  %v9661_v43 = vld [vmem:[%s15600_s1 + $0x4a4] sm:$0xf]  ;;  %v5446_v8 = vpop.f32.mrf.mxu3  ;;  %v9643_v58 = vld [vmem:[%s15600_s1 + $0x414] sm:$0xf] }
 0x1ca   :  { %5685 = vmatpush.bf16.msra.mxu2 %v7007_v29  ;;  %v6980_v29 = vld [vmem:[%s15600_s1 + $0x4b8] sm:$0xf0]  ;;  %v6919_v51 = vor.u32 %v9647_v54, %v6916_v7  ;;  %v6975_v23 = vor.u32 %v9661_v43, %v6972_v37  ;;  %v9659_v54 = vld [vmem:[%s15600_s1 + $0x494] sm:$0xf] }
 0x1cb   :  { %5698 = vmatpush.bf16.msra.mxu3 %v7071_v48  ;;  %v6983_v48 = vor.u32 %v9663_v46, %v6980_v29  ;;  %v6900_v55 = vld [vmem:[%s15600_s1 + $0x418] sm:$0xf0]  ;;  %v9675_v29 = vld [vmem:[%s15600_s1 + $0x514] sm:$0xf] }
 0x1cc   :  { %5660 = vmatpush.bf16.msra.mxu0 %v6871_v56  ;;  %v9629_v56 = vld [vmem:[%s15600_s1 + $0x3a4] sm:$0xf]  ;;  %v6964_v7 = vld [vmem:[%s15600_s1 + $0x498] sm:$0xf0]  ;;  %v6903_v50 = vor.u32 %v9643_v58, %v6900_v55 }
 0x1cd   :  { %5673 = vmatpush.bf16.msra.mxu1 %v6935_v19  ;;  %v5433_v19 = vpop.f32.mrf.mxu2  ;;  %v6847_v44 = vor.u32 %v9629_v56, %v6844_v32  ;;  %v6892_v56 = vld [vmem:[%s15600_s1 + $0x408] sm:$0xf0]  ;;  %v9657_v32 = vld [vmem:[%s15600_s1 + $0x484] sm:$0xf]  ;;  %v7332_v55 = vld [vmem:[%s15600_s1 + $0x778] sm:$0xf0] }
 0x1ce   :  { %5686 = vmatpush.bf16.msra.mxu2 %v6999_v18  ;;  %v6908_v18 = vld [vmem:[%s15600_s1 + $0x428] sm:$0xf0]  ;;  %v5434_v5 = vadd.f32 %v5433_v19, %v5421_v26  ;;  %v9703_v19 = vld [vmem:[%s15600_s1 + $0x5f4] sm:$0xf] }
 0x1cf   :  { %5699 = vmatpush.bf16.msra.mxu3 %v7063_v38  ;;  %v9677_v38 = vld [vmem:[%s15600_s1 + $0x524] sm:$0xf]  ;;  %v6911_v40 = vor.u32 %v9645_v47, %v6908_v18  ;;  %v5422_v45 = vpop.f32.mrf.mxu1  ;;  %v6956_v47 = vld [vmem:[%s15600_s1 + $0x488] sm:$0xf0]  ;;  %v7140_v18 = vld [vmem:[%s15600_s1 + $0x5f8] sm:$0xf0] }
 0x1d0   :  { %5661 = vmatpush.bf16.msra.mxu0 %v6863_v13  ;;  %v5409_v13 = vpop.f32.mrf.mxu0  ;;  %v13463_v39 = vadd.f32 %v5446_v8, %v5434_v5  ;;  %v7039_v46 = vor.u32 %v9677_v38, %v7036_v42  ;;  %v9719_v5 = vld [vmem:[%s15600_s1 + $0x674] sm:$0xf]  ;;  %v7268_v38 = vld [vmem:[%s15600_s1 + $0x6f8] sm:$0xf0]  ;;  %v9673_v42 = vld [vmem:[%s15600_s1 + $0x504] sm:$0xf] }
 0x1d1   :  { %5674 = vmatpush.bf16.msra.mxu1 %v6927_v33  ;;  %v9627_v33 = vld [vmem:[%s15600_s1 + $0x394] sm:$0xf]  ;;  %v7020_v13 = vld [vmem:[%s15600_s1 + $0x508] sm:$0xf0] }
 0x1d2   :  { %5687 = vmatpush.bf16.msra.mxu2 %v6991_v27  ;;  %v6836_v27 = vld [vmem:[%s15600_s1 + $0x398] sm:$0xf0]  ;;  %v9735_v8 = vld [vmem:[%s15600_s1 + $0x6f4] sm:$0xf] }
 0x1d3   :  { %5700 = vmatpush.bf16.msra.mxu3 %v7055_v6  ;;  %v6839_v26 = vor.u32 %v9627_v33, %v6836_v27  ;;  %v7028_v6 = vld [vmem:[%s15600_s1 + $0x518] sm:$0xf0]  ;;  %v6959_v33 = vor.u32 %v9657_v32, %v6956_v47  ;;  %v7143_v27 = vor.u32 %v9703_v19, %v7140_v18  ;;  %v9751_v45 = vld [vmem:[%s15600_s1 + $0x774] sm:$0xf] }
 0x1d4   :  { %5662 = vmatpush.bf16.msra.mxu0 %v6855_v61  ;;  %v9625_v61 = vld [vmem:[%s15600_s1 + $0x384] sm:$0xf]  ;;  %v7031_v37 = vor.u32 %v9675_v29, %v7028_v6  ;;  %v7132_v29 = vld [vmem:[%s15600_s1 + $0x5e8] sm:$0xf0]  ;;  %v9699_v19 = vld [vmem:[%s15600_s1 + $0x5d4] sm:$0xf] }
 0x1d5   :  { %5675 = vmatpush.bf16.msra.mxu1 %v6919_v51  ;;  %v6967_v51 = vor.u32 %v9659_v54, %v6964_v7  ;;  %v5435_v43 = vpop.f32.mrf.mxu2  ;;  %v7271_v54 = vor.u32 %v9735_v8, %v7268_v38  ;;  %v7023_v7 = vor.u32 %v9673_v42, %v7020_v13  ;;  %v7196_v6 = vld [vmem:[%s15600_s1 + $0x668] sm:$0xf0]  ;;  %v7124_v18 = vld [vmem:[%s15600_s1 + $0x5d8] sm:$0xf0]  ;;  %v9713_v13 = vld [vmem:[%s15600_s1 + $0x644] sm:$0xf] }
 0x1d6   :  { %5688 = vmatpush.bf16.msra.mxu2 %v6983_v48  ;;  %v9641_v48 = vld [vmem:[%s15600_s1 + $0x404] sm:$0xf]  ;;  %v9715_v43 = vld [vmem:[%s15600_s1 + $0x654] sm:$0xf] }
 0x1d7   :  { %5701 = vmatpush.bf16.msra.mxu3 %v7047_v60  ;;  %v7204_v60 = vld [vmem:[%s15600_s1 + $0x678] sm:$0xf0] }
 0x1d8   :  { %5663 = vmatpush.bf16.msra.mxu0 %v6847_v44  ;;  %v6831_v44 = vor.u32 %v9625_v61, %v6828_v17  ;;  %v7207_v58 = vor.u32 %v9719_v5, %v7204_v60  ;;  %v9733_v61 = vld [vmem:[%s15600_s1 + $0x6e4] sm:$0xf]  ;;  %v7260_v17 = vld [vmem:[%s15600_s1 + $0x6e8] sm:$0xf0]  ;;  %v9731_v5 = vld [vmem:[%s15600_s1 + $0x6d4] sm:$0xf] }
 0x1d9   :  { %5676 = vmatpush.bf16.msra.mxu1 %v6911_v40  ;;  %v5448_v40 = vpop.f32.mrf.mxu3  ;;  %v7263_v47 = vor.u32 %v9733_v61, %v7260_v17  ;;  %v7252_v60 = vld [vmem:[%s15600_s1 + $0x6d8] sm:$0xf0]  ;;  %v9711_v17 = vld [vmem:[%s15600_s1 + $0x634] sm:$0xf] }
 0x1da   :  { %5689 = vmatpush.bf16.msra.mxu2 %v6975_v23  ;;  %v6895_v23 = vor.u32 %v9641_v48, %v6892_v56  ;;  %v9749_v48 = vld [vmem:[%s15600_s1 + $0x764] sm:$0xf]  ;;  %v7324_v56 = vld [vmem:[%s15600_s1 + $0x768] sm:$0xf0]  ;;  %v7255_v42 = vor.u32 %v9731_v5, %v7252_v60  ;;  %v7108_v61 = vld [vmem:[%s15600_s1 + $0x5b8] sm:$0xf0] }
 0x1db   :  { %5702 = vmatpush.bf16.msra.mxu3 %v7039_v46  ;;  %v9701_v46 = vld [vmem:[%s15600_s1 + $0x5e4] sm:$0xf]  ;;  %v7327_v8 = vor.u32 %v9749_v48, %v7324_v56  ;;  %v7180_v40 = vld [vmem:[%s15600_s1 + $0x648] sm:$0xf0] }
 0x1dc   :  { %5664 = vmatpush.bf16.msra.mxu0 %v6839_v26  ;;  %v9717_v26 = vld [vmem:[%s15600_s1 + $0x664] sm:$0xf]  ;;  %v7100_v5 = vld [vmem:[%s15600_s1 + $0x5a8] sm:$0xf0] }
 0x1dd   :  { %5677 = vmatpush.bf16.msra.mxu1 %v6903_v50  ;;  %v7335_v50 = vor.u32 %v9751_v45, %v7332_v55  ;;  %v7199_v32 = vor.u32 %v9717_v26, %v7196_v6  ;;  %v9745_v55 = vld [vmem:[%s15600_s1 + $0x744] sm:$0xf]  ;;  %v9695_v6 = vld [vmem:[%s15600_s1 + $0x5b4] sm:$0xf] }
 0x1de   :  { %5690 = vmatpush.bf16.msra.mxu2 %v6967_v51  ;;  %v7135_v51 = vor.u32 %v9701_v46, %v7132_v29  ;;  %v7183_v46 = vor.u32 %v9713_v13, %v7180_v40  ;;  %v9709_v60 = vld [vmem:[%s15600_s1 + $0x624] sm:$0xf]  ;;  %v7292_v40 = vld [vmem:[%s15600_s1 + $0x728] sm:$0xf0] }
 0x1df   :  { %5703 = vmatpush.bf16.msra.mxu3 %v7031_v37  ;;  %v7188_v37 = vld [vmem:[%s15600_s1 + $0x658] sm:$0xf0]  ;;  %v9741_v13 = vld [vmem:[%s15600_s1 + $0x724] sm:$0xf] }
 0x1e0   :  { %5665 = vmatpush.bf16.msra.mxu0 %v6831_v44  ;;  %v7316_v44 = vld [vmem:[%s15600_s1 + $0x758] sm:$0xf0]  ;;  %v7191_v38 = vor.u32 %v9715_v43, %v7188_v37  ;;  %v9693_v37 = vld [vmem:[%s15600_s1 + $0x5a4] sm:$0xf] }
 0x1e1   :  { %5678 = vmatpush.bf16.msra.mxu1 %v6895_v23  ;;  %v9729_v23 = vld [vmem:[%s15600_s1 + $0x6c4] sm:$0xf]  ;;  %v5472_v26 = vpop.f32.mrf.mxu1 }
 0x1e2   :  { %5691 = vmatpush.bf16.msra.mxu2 %v6959_v33  ;;  %v7244_v33 = vld [vmem:[%s15600_s1 + $0x6c8] sm:$0xf0] }
 0x1e3   :  { %5704 = vmatpush.bf16.msra.mxu3 %v7023_v7  ;;  %5666 = vmatmul.bf16.vlgmr.msra.gmra.mxu0 %v10851_v49  ;;  %v7127_v49 = vor.u32 %v9699_v19, %v7124_v18  ;;  %v7247_v29 = vor.u32 %v9729_v23, %v7244_v33  ;;  %v7300_v19 = vld [vmem:[%s15600_s1 + $0x738] sm:$0xf0] }
 0x1e4   :  { %5710 = vmatpush.bf16.msrb.mxu0 %v7143_v27  ;;  %5679 = vmatmul.bf16.vlgmr.msra.gmra.mxu1 %v11037_v20  ;;  %v9697_v20 = vld [vmem:[%s15600_s1 + $0x5c4] sm:$0xf] }
 0x1e5   :  { %5723 = vmatpush.bf16.msrb.mxu1 %v7207_v58  ;;  %5692 = vmatmul.bf16.vlgmr.msra.gmra.mxu2 %v11054_v30  ;;  %v9747_v30 = vld [vmem:[%s15600_s1 + $0x754] sm:$0xf]  ;;  %v5459_v58 = vpop.f32.mrf.mxu0 }
 0x1e6   :  { %5736 = vmatpush.bf16.msrb.mxu2 %v7271_v54  ;;  %5705 = vmatmul.bf16.vlgmr.msra.gmra.mxu3 %v11041_v21  ;;  %v7116_v21 = vld [vmem:[%s15600_s1 + $0x5c8] sm:$0xf0]  ;;  %v7319_v27 = vor.u32 %v9747_v30, %v7316_v44  ;;  %v5460_v7 = vadd.f32 %v5459_v58, %v13463_v39  ;;  %v9727_v39 = vld [vmem:[%s15600_s1 + $0x6b4] sm:$0xf]  ;;  %v9725_v30 = vld [vmem:[%s15600_s1 + $0x6a4] sm:$0xf] }
 0x1e7   :  { %5749 = vmatpush.bf16.msrb.mxu3 %v7335_v50  ;;  %v7119_v45 = vor.u32 %v9697_v20, %v7116_v21  ;;  %v7308_v54 = vld [vmem:[%s15600_s1 + $0x748] sm:$0xf0]  ;;  %v7172_v50 = vld [vmem:[%s15600_s1 + $0x638] sm:$0xf0]  ;;  %v7103_v21 = vor.u32 %v9693_v37, %v7100_v5 }
 0x1e8   :  { %5711 = vmatpush.bf16.msrb.mxu0 %v7135_v51  ;;  %v7236_v51 = vld [vmem:[%s15600_s1 + $0x6b8] sm:$0xf0]  ;;  %v5473_v48 = vadd.f32 %v5472_v26, %v5460_v7  ;;  %v7311_v56 = vor.u32 %v9745_v55, %v7308_v54  ;;  %v7175_v18 = vor.u32 %v9711_v17, %v7172_v50  ;;  %v7228_v44 = vld [vmem:[%s15600_s1 + $0x6a8] sm:$0xf0]  ;;  %v9707_v54 = vld [vmem:[%s15600_s1 + $0x614] sm:$0xf] }
 0x1e9   :  { %5724 = vmatpush.bf16.msrb.mxu1 %v7199_v32  ;;  %v7111_v32 = vor.u32 %v9695_v6, %v7108_v61  ;;  %v7239_v43 = vor.u32 %v9727_v39, %v7236_v51  ;;  %v5498_v20 = vpop.f32.mrf.mxu3  ;;  %v7231_v58 = vor.u32 %v9725_v30, %v7228_v44  ;;  %v7092_v55 = vld [vmem:[%s15600_s1 + $0x598] sm:$0xf0]  ;;  %v5474_v7 = vpop.f32.mrf.mxu1  ;;  %v7295_v6 = vor.u32 %v9741_v13, %v7292_v40  ;;  %v9739_v61 = vld [vmem:[%s15600_s1 + $0x714] sm:$0xf]  ;;  %v9689_v39 = vld [vmem:[%s15600_s1 + $0x584] sm:$0xf] }
 0x1ea   :  { %5737 = vmatpush.bf16.msrb.mxu2 %v7263_v47  ;;  %v9743_v47 = vld [vmem:[%s15600_s1 + $0x734] sm:$0xf]  ;;  %v7220_v26 = vld [vmem:[%s15600_s1 + $0x698] sm:$0xf0]  ;;  %v7084_v51 = vld [vmem:[%s15600_s1 + $0x588] sm:$0xf0] }
 0x1eb   :  { %5750 = vmatpush.bf16.msrb.mxu3 %v7327_v8  ;;  %v5485_v8 = vpop.f32.mrf.mxu2  ;;  %v7284_v50 = vld [vmem:[%s15600_s1 + $0x718] sm:$0xf0]  ;;  %v9799_v30 = vld [vmem:[%s15600_s1 + $0x8f4] sm:$0xf]  ;;  %v7087_v44 = vor.u32 %v9689_v39, %v7084_v51  ;;  %v9765_v7 = vld [vmem:[%s15600_s1 + $0x7e4] sm:$0xf] }
 0x1ec   :  { %5712 = vmatpush.bf16.msrb.mxu0 %v7127_v49  ;;  %v7164_v49 = vld [vmem:[%s15600_s1 + $0x628] sm:$0xf0]  ;;  %v7396_v37 = vld [vmem:[%s15600_s1 + $0x7f8] sm:$0xf0]  ;;  %v9813_v39 = vld [vmem:[%s15600_s1 + $0x964] sm:$0xf] }
 0x1ed   :  { %5725 = vmatpush.bf16.msrb.mxu1 %v7191_v38  ;;  %v5486_v38 = vadd.f32 %v5485_v8, %v5473_v48  ;;  %v5461_v23 = vpop.f32.mrf.mxu0  ;;  %v9783_v8 = vld [vmem:[%s15600_s1 + $0x874] sm:$0xf]  ;;  %v7580_v51 = vld [vmem:[%s15600_s1 + $0x968] sm:$0xf0] }
 0x1ee   :  { %5738 = vmatpush.bf16.msrb.mxu2 %v7255_v42  ;;  %v7303_v42 = vor.u32 %v9743_v47, %v7300_v19  ;;  %v7148_v47 = vld [vmem:[%s15600_s1 + $0x608] sm:$0xf0]  ;;  %v9721_v19 = vld [vmem:[%s15600_s1 + $0x684] sm:$0xf] }
 0x1ef   :  { %5751 = vmatpush.bf16.msrb.mxu3 %v7319_v27  ;;  %v13662_v33 = vadd.f32 %v5498_v20, %v5486_v38  ;;  %v7167_v27 = vor.u32 %v9709_v60, %v7164_v49  ;;  %v7287_v60 = vor.u32 %v9739_v61, %v7284_v50  ;;  %v7460_v49 = vld [vmem:[%s15600_s1 + $0x878] sm:$0xf0]  ;;  %v7276_v20 = vld [vmem:[%s15600_s1 + $0x708] sm:$0xf0] }
 0x1f0   :  { %5713 = vmatpush.bf16.msrb.mxu0 %v7119_v45  ;;  %v9691_v45 = vld [vmem:[%s15600_s1 + $0x594] sm:$0xf]  ;;  %v7524_v38 = vld [vmem:[%s15600_s1 + $0x8f8] sm:$0xf0]  ;;  %v7516_v61 = vld [vmem:[%s15600_s1 + $0x8e8] sm:$0xf0] }
 0x1f1   :  { %5726 = vmatpush.bf16.msrb.mxu1 %v7183_v46  ;;  %v7156_v46 = vld [vmem:[%s15600_s1 + $0x618] sm:$0xf0]  ;;  %v7095_v17 = vor.u32 %v9691_v45, %v7092_v55  ;;  %v7527_v55 = vor.u32 %v9799_v30, %v7524_v38  ;;  %v9777_v30 = vld [vmem:[%s15600_s1 + $0x844] sm:$0xf] }
 0x1f2   :  { %5739 = vmatpush.bf16.msrb.mxu2 %v7247_v29  ;;  %v9723_v29 = vld [vmem:[%s15600_s1 + $0x694] sm:$0xf]  ;;  %v7159_v48 = vor.u32 %v9707_v54, %v7156_v46  ;;  %v7588_v45 = vld [vmem:[%s15600_s1 + $0x978] sm:$0xf0]  ;;  %v7388_v46 = vld [vmem:[%s15600_s1 + $0x7e8] sm:$0xf0] }
 0x1f3   :  { %5752 = vmatpush.bf16.msrb.mxu3 %v7311_v56  ;;  %v7223_v56 = vor.u32 %v9723_v29, %v7220_v26  ;;  %v5487_v5 = vpop.f32.mrf.mxu2  ;;  %v9781_v29 = vld [vmem:[%s15600_s1 + $0x864] sm:$0xf]  ;;  %v7452_v26 = vld [vmem:[%s15600_s1 + $0x868] sm:$0xf0]  ;;  %v7391_v50 = vor.u32 %v9765_v7, %v7388_v46  ;;  %v7364_v7 = vld [vmem:[%s15600_s1 + $0x7b8] sm:$0xf0] }
 0x1f4   :  { %5714 = vmatpush.bf16.msrb.mxu0 %v7111_v32  ;;  %v9705_v32 = vld [vmem:[%s15600_s1 + $0x604] sm:$0xf]  ;;  %v7583_v5 = vor.u32 %v9813_v39, %v7580_v51  ;;  %v9775_v46 = vld [vmem:[%s15600_s1 + $0x834] sm:$0xf]  ;;  %v7556_v39 = vld [vmem:[%s15600_s1 + $0x938] sm:$0xf0] }
 0x1f5   :  { %5727 = vmatpush.bf16.msrb.mxu1 %v7175_v18  ;;  %v7212_v18 = vld [vmem:[%s15600_s1 + $0x688] sm:$0xf0]  ;;  %v7151_v13 = vor.u32 %v9705_v32, %v7148_v47  ;;  %v9763_v32 = vld [vmem:[%s15600_s1 + $0x7d4] sm:$0xf]  ;;  %v7380_v47 = vld [vmem:[%s15600_s1 + $0x7d8] sm:$0xf0] }
 0x1f6   :  { %5740 = vmatpush.bf16.msrb.mxu2 %v7239_v43  ;;  %v9767_v43 = vld [vmem:[%s15600_s1 + $0x7f4] sm:$0xf]  ;;  %v7215_v40 = vor.u32 %v9721_v19, %v7212_v18  ;;  %v7444_v18 = vld [vmem:[%s15600_s1 + $0x858] sm:$0xf0]  ;;  %v9793_v38 = vld [vmem:[%s15600_s1 + $0x8c4] sm:$0xf] }
 0x1f7   :  { %5753 = vmatpush.bf16.msrb.mxu3 %v7303_v42  ;;  %v9737_v42 = vld [vmem:[%s15600_s1 + $0x704] sm:$0xf]  ;;  %v7399_v23 = vor.u32 %v9767_v43, %v7396_v37  ;;  %v9779_v19 = vld [vmem:[%s15600_s1 + $0x854] sm:$0xf]  ;;  %v7508_v37 = vld [vmem:[%s15600_s1 + $0x8d8] sm:$0xf0] }
 0x1f8   :  { %5715 = vmatpush.bf16.msrb.mxu0 %v7103_v21  ;;  %v5500_v21 = vpop.f32.mrf.mxu3  ;;  %v7279_v54 = vor.u32 %v9737_v42, %v7276_v20  ;;  %v9795_v43 = vld [vmem:[%s15600_s1 + $0x8d4] sm:$0xf]  ;;  %v7500_v42 = vld [vmem:[%s15600_s1 + $0x8c8] sm:$0xf0] }
 0x1f9   :  { %5728 = vmatpush.bf16.msrb.mxu1 %v7167_v27  ;;  %v7463_v27 = vor.u32 %v9783_v8, %v7460_v49  ;;  %v7447_v8 = vor.u32 %v9779_v19, %v7444_v18  ;;  %v7511_v49 = vor.u32 %v9795_v43, %v7508_v37  ;;  %v7420_v18 = vld [vmem:[%s15600_s1 + $0x828] sm:$0xf0]  ;;  %v9789_v43 = vld [vmem:[%s15600_s1 + $0x8a4] sm:$0xf] }
 0x1fa   :  { %5741 = vmatpush.bf16.msrb.mxu2 %v7231_v58  ;;  %v9815_v58 = vld [vmem:[%s15600_s1 + $0x974] sm:$0xf]  ;;  %v7484_v37 = vld [vmem:[%s15600_s1 + $0x8a8] sm:$0xf0] }
 0x1fb   :  { %5754 = vmatpush.bf16.msrb.mxu3 %v7295_v6  ;;  %v9797_v6 = vld [vmem:[%s15600_s1 + $0x8e4] sm:$0xf] }
 0x1fc   :  { %5716 = vmatpush.bf16.msrb.mxu0 %v7095_v17  ;;  %v7591_v17 = vor.u32 %v9815_v58, %v7588_v45  ;;  %v7503_v45 = vor.u32 %v9793_v38, %v7500_v42  ;;  %v9755_v38 = vld [vmem:[%s15600_s1 + $0x794] sm:$0xf]  ;;  %v7348_v42 = vld [vmem:[%s15600_s1 + $0x798] sm:$0xf0] }
 0x1fd   :  { %5729 = vmatpush.bf16.msrb.mxu1 %v7159_v48  ;;  %v7455_v48 = vor.u32 %v9781_v29, %v7452_v26  ;;  %v7428_v29 = vld [vmem:[%s15600_s1 + $0x838] sm:$0xf0] }
 0x1fe   :  { %5742 = vmatpush.bf16.msrb.mxu2 %v7223_v56  ;;  %v7519_v56 = vor.u32 %v9797_v6, %v7516_v61  ;;  %v7492_v26 = vld [vmem:[%s15600_s1 + $0x8b8] sm:$0xf0]  ;;  %v7431_v51 = vor.u32 %v9775_v46, %v7428_v29 }
 0x1ff   :  { %5755 = vmatpush.bf16.msrb.mxu3 %v7287_v60  ;;  %v7572_v60 = vld [vmem:[%s15600_s1 + $0x958] sm:$0xf0] }
 0x200   :  { %5717 = vmatpush.bf16.msrb.mxu0 %v7087_v44  ;;  %v7436_v44 = vld [vmem:[%s15600_s1 + $0x848] sm:$0xf0]  ;;  %v5511_v21 = vpop.f32.mrf.mxu0 }
 0x201   :  { %5730 = vmatpush.bf16.msrb.mxu1 %v7151_v13  ;;  %v7439_v58 = vor.u32 %v9777_v30, %v7436_v44  ;;  %v7487_v44 = vor.u32 %v9789_v43, %v7484_v37  ;;  %v7532_v43 = vld [vmem:[%s15600_s1 + $0x908] sm:$0xf0] }
 0x202   :  { %5743 = vmatpush.bf16.msrb.mxu2 %v7215_v40  ;;  %v9809_v40 = vld [vmem:[%s15600_s1 + $0x944] sm:$0xf] }
 0x203   :  { %5756 = vmatpush.bf16.msrb.mxu3 %v7279_v54  ;;  %5718 = vmatmul.bf16.vlgmr.msrb.gmra.mxu0 %v11058_v22  ;;  %v7383_v22 = vor.u32 %v9763_v32, %v7380_v47  ;;  %v9759_v54 = vld [vmem:[%s15600_s1 + $0x7b4] sm:$0xf]  ;;  %v7356_v32 = vld [vmem:[%s15600_s1 + $0x7a8] sm:$0xf0]  ;;  %v9773_v47 = vld [vmem:[%s15600_s1 + $0x824] sm:$0xf] }
 0x204   :  { %5762 = vmatpush.bf16.msra.mxu0 %v7399_v23  ;;  %5731 = vmatmul.bf16.vlgmr.msrb.gmra.mxu1 %v11260_v24  ;;  %v9761_v24 = vld [vmem:[%s15600_s1 + $0x7c4] sm:$0xf]  ;;  %v7564_v23 = vld [vmem:[%s15600_s1 + $0x948] sm:$0xf0]  ;;  %v7423_v30 = vor.u32 %v9773_v47, %v7420_v18 }
 0x205   :  { %5775 = vmatpush.bf16.msra.mxu1 %v7463_v27  ;;  %5744 = vmatmul.bf16.vlgmr.msrb.gmra.mxu2 %v11277_v35  ;;  %v9811_v35 = vld [vmem:[%s15600_s1 + $0x954] sm:$0xf]  ;;  %v5512_v27 = vadd.f32 %v5511_v21, %v13662_v33  ;;  %v7567_v61 = vor.u32 %v9809_v40, %v7564_v23  ;;  %v7476_v23 = vld [vmem:[%s15600_s1 + $0x898] sm:$0xf0]  ;;  %v9801_v18 = vld [vmem:[%s15600_s1 + $0x904] sm:$0xf] }
 0x206   :  { %5788 = vmatpush.bf16.msra.mxu2 %v7527_v55  ;;  %5757 = vmatmul.bf16.vlgmr.msrb.gmra.mxu3 %v11264_v25  ;;  %v7372_v25 = vld [vmem:[%s15600_s1 + $0x7c8] sm:$0xf0]  ;;  %v7575_v20 = vor.u32 %v9811_v35, %v7572_v60  ;;  %v5524_v55 = vpop.f32.mrf.mxu1  ;;  %v9791_v33 = vld [vmem:[%s15600_s1 + $0x8b4] sm:$0xf] }
 0x207   :  { %5801 = vmatpush.bf16.msra.mxu3 %v7591_v17  ;;  %v7375_v13 = vor.u32 %v9761_v24, %v7372_v25  ;;  %v5525_v6 = vadd.f32 %v5524_v55, %v5512_v27  ;;  %v7367_v17 = vor.u32 %v9759_v54, %v7364_v7  ;;  %v9787_v40 = vld [vmem:[%s15600_s1 + $0x894] sm:$0xf]  ;;  %v7540_v55 = vld [vmem:[%s15600_s1 + $0x918] sm:$0xf0]  ;;  %v9753_v54 = vld [vmem:[%s15600_s1 + $0x784] sm:$0xf] }
 0x208   :  { %5763 = vmatpush.bf16.msra.mxu0 %v7391_v50  ;;  %v9807_v50 = vld [vmem:[%s15600_s1 + $0x934] sm:$0xf]  ;;  %v5537_v19 = vpop.f32.mrf.mxu2  ;;  %v5513_v24 = vpop.f32.mrf.mxu0  ;;  %v7340_v7 = vld [vmem:[%s15600_s1 + $0x788] sm:$0xf0]  ;;  %v7479_v29 = vor.u32 %v9787_v40, %v7476_v23 }
 0x209   :  { %5776 = vmatpush.bf16.msra.mxu1 %v7455_v48  ;;  %v7495_v48 = vor.u32 %v9791_v33, %v7492_v26  ;;  %v5550_v35 = vpop.f32.mrf.mxu3  ;;  %v9769_v33 = vld [vmem:[%s15600_s1 + $0x804] sm:$0xf]  ;;  %v7404_v26 = vld [vmem:[%s15600_s1 + $0x808] sm:$0xf0]  ;;  %v7343_v47 = vor.u32 %v9753_v54, %v7340_v7  ;;  %v9827_v54 = vld [vmem:[%s15600_s1 + $0x9d4] sm:$0xf] }
 0x20a   :  { %5789 = vmatpush.bf16.msra.mxu2 %v7519_v56  ;;  %v9757_v56 = vld [vmem:[%s15600_s1 + $0x7a4] sm:$0xf]  ;;  %v7636_v7 = vld [vmem:[%s15600_s1 + $0x9d8] sm:$0xf0] }
 0x20b   :  { %5802 = vmatpush.bf16.msra.mxu3 %v7583_v5  ;;  %v5538_v5 = vadd.f32 %v5537_v19, %v5525_v6  ;;  %v7359_v60 = vor.u32 %v9757_v56, %v7356_v32  ;;  %v9785_v6 = vld [vmem:[%s15600_s1 + $0x884] sm:$0xf]  ;;  %v7716_v56 = vld [vmem:[%s15600_s1 + $0xa78] sm:$0xf0]  ;;  %v9863_v32 = vld [vmem:[%s15600_s1 + $0xaf4] sm:$0xf] }
 0x20c   :  { %5764 = vmatpush.bf16.msra.mxu0 %v7383_v22  ;;  %v7559_v22 = vor.u32 %v9807_v50, %v7556_v39  ;;  %v7652_v50 = vld [vmem:[%s15600_s1 + $0x9f8] sm:$0xf0] }
 0x20d   :  { %5777 = vmatpush.bf16.msra.mxu1 %v7447_v8  ;;  %v9805_v8 = vld [vmem:[%s15600_s1 + $0x924] sm:$0xf]  ;;  %v13861_v25 = vadd.f32 %v5550_v35, %v5538_v5  ;;  %v7780_v19 = vld [vmem:[%s15600_s1 + $0xaf8] sm:$0xf0]  ;;  %v7407_v5 = vor.u32 %v9769_v33, %v7404_v26  ;;  %v9859_v33 = vld [vmem:[%s15600_s1 + $0xad4] sm:$0xf] }
 0x20e   :  { %5790 = vmatpush.bf16.msra.mxu2 %v7511_v49  ;;  %v7548_v49 = vld [vmem:[%s15600_s1 + $0x928] sm:$0xf0]  ;;  %v5526_v21 = vpop.f32.mrf.mxu1  ;;  %v7783_v24 = vor.u32 %v9863_v32, %v7780_v19  ;;  %v7764_v26 = vld [vmem:[%s15600_s1 + $0xad8] sm:$0xf0] }
 0x20f   :  { %5803 = vmatpush.bf16.msra.mxu3 %v7575_v20  ;;  %v9771_v20 = vld [vmem:[%s15600_s1 + $0x814] sm:$0xf]  ;;  %v7551_v27 = vor.u32 %v9805_v8, %v7548_v49  ;;  %v7844_v49 = vld [vmem:[%s15600_s1 + $0xb78] sm:$0xf0]  ;;  %v9861_v21 = vld [vmem:[%s15600_s1 + $0xae4] sm:$0xf] }
 0x210   :  { %5765 = vmatpush.bf16.msra.mxu0 %v7375_v13  ;;  %v7412_v13 = vld [vmem:[%s15600_s1 + $0x818] sm:$0xf0]  ;;  %v5539_v39 = vpop.f32.mrf.mxu2  ;;  %v9879_v8 = vld [vmem:[%s15600_s1 + $0xb74] sm:$0xf] }
 0x211   :  { %5778 = vmatpush.bf16.msra.mxu1 %v7439_v58  ;;  %v9803_v58 = vld [vmem:[%s15600_s1 + $0x914] sm:$0xf]  ;;  %v7415_v46 = vor.u32 %v9771_v20, %v7412_v13  ;;  %v5552_v37 = vpop.f32.mrf.mxu3  ;;  %v7708_v20 = vld [vmem:[%s15600_s1 + $0xa68] sm:$0xf0]  ;;  %v7847_v40 = vor.u32 %v9879_v8, %v7844_v49  ;;  %v9841_v39 = vld [vmem:[%s15600_s1 + $0xa44] sm:$0xf] }
 0x212   :  { %5791 = vmatpush.bf16.msra.mxu2 %v7503_v45  ;;  %v7351_v45 = vor.u32 %v9755_v38, %v7348_v42  ;;  %v7644_v38 = vld [vmem:[%s15600_s1 + $0x9e8] sm:$0xf0]  ;;  %v9845_v42 = vld [vmem:[%s15600_s1 + $0xa64] sm:$0xf]  ;;  %v9839_v8 = vld [vmem:[%s15600_s1 + $0xa34] sm:$0xf] }
 0x213   :  { %5804 = vmatpush.bf16.msra.mxu3 %v7567_v61  ;;  %v7468_v61 = vld [vmem:[%s15600_s1 + $0x888] sm:$0xf0] }
 0x214   :  { %5766 = vmatpush.bf16.msra.mxu0 %v7367_v17  ;;  %v9831_v17 = vld [vmem:[%s15600_s1 + $0x9f4] sm:$0xf]  ;;  %v7772_v13 = vld [vmem:[%s15600_s1 + $0xae8] sm:$0xf0] }
 0x215   :  { %5779 = vmatpush.bf16.msra.mxu1 %v7431_v51  ;;  %v7543_v51 = vor.u32 %v9803_v58, %v7540_v55  ;;  %v7655_v35 = vor.u32 %v9831_v17, %v7652_v50  ;;  %v7836_v58 = vld [vmem:[%s15600_s1 + $0xb68] sm:$0xf0]  ;;  %v7775_v55 = vor.u32 %v9861_v21, %v7772_v13  ;;  %v7767_v50 = vor.u32 %v9859_v33, %v7764_v26 }
 0x216   :  { %5792 = vmatpush.bf16.msra.mxu2 %v7495_v48  ;;  %v9847_v48 = vld [vmem:[%s15600_s1 + $0xa74] sm:$0xf]  ;;  %v7804_v33 = vld [vmem:[%s15600_s1 + $0xb28] sm:$0xf0] }
 0x217   :  { %5805 = vmatpush.bf16.msra.mxu3 %v7559_v22  ;;  %v7471_v22 = vor.u32 %v9785_v6, %v7468_v61  ;;  %v7828_v61 = vld [vmem:[%s15600_s1 + $0xb58] sm:$0xf0] }
 0x218   :  { %5767 = vmatpush.bf16.msra.mxu0 %v7359_v60  ;;  %v7719_v60 = vor.u32 %v9847_v48, %v7716_v56  ;;  %v9857_v48 = vld [vmem:[%s15600_s1 + $0xac4] sm:$0xf]  ;;  %v7756_v56 = vld [vmem:[%s15600_s1 + $0xac8] sm:$0xf0] }
 0x219   :  { %5780 = vmatpush.bf16.msra.mxu1 %v7423_v30  ;;  %v7535_v30 = vor.u32 %v9801_v18, %v7532_v43  ;;  %v9873_v18 = vld [vmem:[%s15600_s1 + $0xb44] sm:$0xf]  ;;  %v7820_v43 = vld [vmem:[%s15600_s1 + $0xb48] sm:$0xf0] }
 0x21a   :  { %5793 = vmatpush.bf16.msra.mxu2 %v7487_v44  ;;  %v9829_v44 = vld [vmem:[%s15600_s1 + $0x9e4] sm:$0xf] }
 0x21b   :  { %5806 = vmatpush.bf16.msra.mxu3 %v7551_v27  ;;  %v7647_v23 = vor.u32 %v9829_v44, %v7644_v38  ;;  %v9877_v27 = vld [vmem:[%s15600_s1 + $0xb64] sm:$0xf]  ;;  %v7823_v44 = vor.u32 %v9873_v18, %v7820_v43  ;;  %v7596_v18 = vld [vmem:[%s15600_s1 + $0x988] sm:$0xf0] }
 0x21c   :  { %5768 = vmatpush.bf16.msra.mxu0 %v7351_v45  ;;  %v7711_v45 = vor.u32 %v9845_v42, %v7708_v20  ;;  %v7839_v6 = vor.u32 %v9877_v27, %v7836_v58  ;;  %v9871_v42 = vld [vmem:[%s15600_s1 + $0xb34] sm:$0xf]  ;;  %v7812_v20 = vld [vmem:[%s15600_s1 + $0xb38] sm:$0xf0]  ;;  %v9837_v27 = vld [vmem:[%s15600_s1 + $0xa24] sm:$0xf] }
 0x21d   :  { %5781 = vmatpush.bf16.msra.mxu1 %v7415_v46  ;;  %v9843_v46 = vld [vmem:[%s15600_s1 + $0xa54] sm:$0xf]  ;;  %v7676_v58 = vld [vmem:[%s15600_s1 + $0xa28] sm:$0xf0]  ;;  %v9833_v43 = vld [vmem:[%s15600_s1 + $0xa04] sm:$0xf] }
 0x21e   :  { %5794 = vmatpush.bf16.msra.mxu2 %v7479_v29  ;;  %v7700_v29 = vld [vmem:[%s15600_s1 + $0xa58] sm:$0xf0] }
 0x21f   :  { %5807 = vmatpush.bf16.msra.mxu3 %v7543_v51  ;;  %v7703_v17 = vor.u32 %v9843_v46, %v7700_v29  ;;  %v7692_v51 = vld [vmem:[%s15600_s1 + $0xa48] sm:$0xf0]  ;;  %v9869_v29 = vld [vmem:[%s15600_s1 + $0xb24] sm:$0xf] }
 0x220   :  { %5769 = vmatpush.bf16.msra.mxu0 %v7343_v47  ;;  %v5563_v47 = vpop.f32.mrf.mxu0 }
 0x221   :  { %5782 = vmatpush.bf16.msra.mxu1 %v7407_v5  ;;  %v14012_v37 = vadd.f32 %v5563_v47, %v13861_v25  ;;  %v7695_v5 = vor.u32 %v9841_v39, %v7692_v51  ;;  %v14023_v49 = vpop.f32.mrf.mxu1  ;;  %v7684_v25 = vld [vmem:[%s15600_s1 + $0xa38] sm:$0xf0]  ;;  %v9851_v39 = vld [vmem:[%s15600_s1 + $0xa94] sm:$0xf] }
 0x222   :  { %5795 = vmatpush.bf16.msra.mxu2 %v7471_v22  ;;  %v7759_v22 = vor.u32 %v9857_v48, %v7756_v56  ;;  %v7687_v21 = vor.u32 %v9839_v8, %v7684_v25  ;;  %v7732_v51 = vld [vmem:[%s15600_s1 + $0xa98] sm:$0xf0]  ;;  %v7807_v48 = vor.u32 %v9869_v29, %v7804_v33  ;;  %v9867_v56 = vld [vmem:[%s15600_s1 + $0xb14] sm:$0xf]  ;;  %v7724_v8 = vld [vmem:[%s15600_s1 + $0xa88] sm:$0xf0] }
 0x223   :  { %5808 = vmatpush.bf16.msra.mxu3 %v7535_v30  ;;  %5770 = vmatmul.bf16.vlgmr.msra.gmra.mxu0 %v11281_v59  ;;  %v7639_v59 = vor.u32 %v9827_v54, %v7636_v7  ;;  %v7748_v30 = vld [vmem:[%s15600_s1 + $0xab8] sm:$0xf0]  ;;  %v7815_v54 = vor.u32 %v9871_v42, %v7812_v20  ;;  %v9895_v25 = vld [vmem:[%s15600_s1 + $0xbf4] sm:$0xf] }
 0x224   :  { %5814 = vmatpush.bf16.msrb.mxu0 %v7655_v35  ;;  %5783 = vmatmul.bf16.vlgmr.msra.gmra.mxu1 %v11470_v36  ;;  %v9825_v36 = vld [vmem:[%s15600_s1 + $0x9c4] sm:$0xf]  ;;  %v9823_v35 = vld [vmem:[%s15600_s1 + $0x9b4] sm:$0xf]  ;;  %v7972_v20 = vld [vmem:[%s15600_s1 + $0xc78] sm:$0xf0] }
 0x225   :  { %5827 = vmatpush.bf16.msrb.mxu1 %v7719_v60  ;;  %5796 = vmatmul.bf16.vlgmr.msra.gmra.mxu2 %v11483_v63  ;;  %v9875_v63 = vld [vmem:[%s15600_s1 + $0xb54] sm:$0xf]  ;;  %v7620_v60 = vld [vmem:[%s15600_s1 + $0x9b8] sm:$0xf0] }
 0x226   :  { %5840 = vmatpush.bf16.msrb.mxu2 %v7783_v24  ;;  %5809 = vmatmul.bf16.vlgmr.msra.gmra.mxu3 %v11472_v28  ;;  %v7628_v28 = vld [vmem:[%s15600_s1 + $0x9c8] sm:$0xf0]  ;;  %v7831_v32 = vor.u32 %v9875_v63, %v7828_v61  ;;  %v9855_v24 = vld [vmem:[%s15600_s1 + $0xab4] sm:$0xf]  ;;  %v7623_v38 = vor.u32 %v9823_v35, %v7620_v60  ;;  %v7604_v61 = vld [vmem:[%s15600_s1 + $0x998] sm:$0xf0] }
 0x227   :  { %5853 = vmatpush.bf16.msrb.mxu3 %v7847_v40  ;;  %v7631_v19 = vor.u32 %v9825_v36, %v7628_v28  ;;  %v7751_v13 = vor.u32 %v9855_v24, %v7748_v30  ;;  %v9821_v40 = vld [vmem:[%s15600_s1 + $0x9a4] sm:$0xf]  ;;  %v9819_v63 = vld [vmem:[%s15600_s1 + $0x994] sm:$0xf]  ;;  %v7668_v28 = vld [vmem:[%s15600_s1 + $0xa18] sm:$0xf0] }
 0x228   :  { %5815 = vmatpush.bf16.msrb.mxu0 %v7647_v23  ;;  %v7612_v23 = vld [vmem:[%s15600_s1 + $0x9a8] sm:$0xf0]  ;;  %v14058_v7 = vpop.f32.mrf.mxu2  ;;  %v5565_v26 = vpop.f32.mrf.mxu0  ;;  %v7607_v47 = vor.u32 %v9819_v63, %v7604_v61  ;;  %v9849_v60 = vld [vmem:[%s15600_s1 + $0xa84] sm:$0xf]  ;;  %v7908_v24 = vld [vmem:[%s15600_s1 + $0xbf8] sm:$0xf0] }
 0x229   :  { %5828 = vmatpush.bf16.msrb.mxu1 %v7711_v45  ;;  %v9853_v45 = vld [vmem:[%s15600_s1 + $0xaa4] sm:$0xf]  ;;  %v7615_v46 = vor.u32 %v9821_v40, %v7612_v23  ;;  %v5578_v36 = vpop.f32.mrf.mxu1  ;;  %v7660_v35 = vld [vmem:[%s15600_s1 + $0xa08] sm:$0xf0]  ;;  %v10301_v30 = vld [vmem:[%s15601_s2] sm:$0x3] }
 0x22a   :  { %5841 = vmatpush.bf16.msrb.mxu2 %v7775_v55  ;;  %v7740_v55 = vld [vmem:[%s15600_s1 + $0xaa8] sm:$0xf0]  ;;  %v9911_v42 = vld [vmem:[%s15600_s1 + $0xc74] sm:$0xf]  ;;  %v8036_v23 = vld [vmem:[%s15600_s1 + $0xcf8] sm:$0xf0] }
 0x22b   :  { %5854 = vmatpush.bf16.msrb.mxu3 %v7839_v6  ;;  %v7679_v6 = vor.u32 %v9837_v27, %v7676_v58  ;;  %v9865_v27 = vld [vmem:[%s15600_s1 + $0xb04] sm:$0xf]  ;;  %v7788_v58 = vld [vmem:[%s15600_s1 + $0xb08] sm:$0xf0]  ;;  %v7975_v29 = vor.u32 %v9911_v42, %v7972_v20  ;;  %v9943_v33 = vld [vmem:[%s15600_s1 + $0xd74] sm:$0xf] }
 0x22c   :  { %5816 = vmatpush.bf16.msrb.mxu0 %v7639_v59  ;;  %v7743_v59 = vor.u32 %v9853_v45, %v7740_v55  ;;  %v7663_v45 = vor.u32 %v9833_v43, %v7660_v35  ;;  %v7727_v55 = vor.u32 %v9849_v60, %v7724_v8  ;;  %v8100_v26 = vld [vmem:[%s15600_s1 + $0xd78] sm:$0xf0]  ;;  %v7791_v63 = vor.u32 %v9865_v27, %v7788_v58  ;;  %v9893_v61 = vld [vmem:[%s15600_s1 + $0xbe4] sm:$0xf]  ;;  %v9891_v43 = vld [vmem:[%s15600_s1 + $0xbd4] sm:$0xf] }
 0x22d   :  { %5829 = vmatpush.bf16.msrb.mxu1 %v7703_v17  ;;  %v9835_v17 = vld [vmem:[%s15600_s1 + $0xa14] sm:$0xf]  ;;  %v9909_v36 = vld [vmem:[%s15600_s1 + $0xc64] sm:$0xf]  ;;  %v8020_v60 = vld [vmem:[%s15600_s1 + $0xcd8] sm:$0xf0] }
 0x22e   :  { %5842 = vmatpush.bf16.msrb.mxu2 %v7767_v50  ;;  %v14075_v50 = vpop.f32.mrf.mxu3  ;;  %v9923_v35 = vld [vmem:[%s15600_s1 + $0xcd4] sm:$0xf]  ;;  %v9921_v42 = vld [vmem:[%s15600_s1 + $0xcc4] sm:$0xf]  ;;  %v8012_v20 = vld [vmem:[%s15600_s1 + $0xcc8] sm:$0xf0] }
 0x22f   :  { %5855 = vmatpush.bf16.msrb.mxu3 %v7831_v32  ;;  %v7796_v32 = vld [vmem:[%s15600_s1 + $0xb18] sm:$0xf0]  ;;  %v8076_v27 = vld [vmem:[%s15600_s1 + $0xd48] sm:$0xf0] }
 0x230   :  { %5817 = vmatpush.bf16.msrb.mxu0 %v7631_v19  ;;  %v9817_v19 = vld [vmem:[%s15600_s1 + $0x984] sm:$0xf] }
 0x231   :  { %5830 = vmatpush.bf16.msrb.mxu1 %v7695_v5  ;;  %v7671_v5 = vor.u32 %v9835_v17, %v7668_v28  ;;  %v7599_v40 = vor.u32 %v9817_v19, %v7596_v18  ;;  %v7900_v17 = vld [vmem:[%s15600_s1 + $0xbe8] sm:$0xf0]  ;;  %v9925_v28 = vld [vmem:[%s15600_s1 + $0xce4] sm:$0xf] }
 0x232   :  { %5843 = vmatpush.bf16.msrb.mxu2 %v7759_v22  ;;  %v7735_v22 = vor.u32 %v9851_v39, %v7732_v51  ;;  %v8028_v39 = vld [vmem:[%s15600_s1 + $0xce8] sm:$0xf0]  ;;  %v8103_v51 = vor.u32 %v9943_v33, %v8100_v26  ;;  %v7940_v26 = vld [vmem:[%s15600_s1 + $0xc38] sm:$0xf0] }
 0x233   :  { %5856 = vmatpush.bf16.msrb.mxu3 %v7823_v44  ;;  %v1007_v44 = vperm.slane %v10301_v30, 1  ;;  %v8031_v18 = vor.u32 %v9925_v28, %v8028_v39 }
 0x234   :  { %5818 = vmatpush.bf16.msrb.mxu0 %v7623_v38  ;;  %v7799_v38 = vor.u32 %v9867_v56, %v7796_v32  ;;  %v9941_v32 = vld [vmem:[%s15600_s1 + $0xd64] sm:$0xf] }
 0x235   :  { %5831 = vmatpush.bf16.msrb.mxu1 %v7687_v21  ;;  %v9927_v21 = vld [vmem:[%s15600_s1 + $0xcf4] sm:$0xf] }
 0x236   :  { %5844 = vmatpush.bf16.msrb.mxu2 %v7751_v13  ;;  %v5591_v13 = vpop.f32.mrf.mxu2 }
 0x237   :  { %5857 = vmatpush.bf16.msrb.mxu3 %v7815_v54  ;;  %v5604_v54 = vpop.f32.mrf.mxu3 }
 0x238   :  { %5819 = vmatpush.bf16.msrb.mxu0 %v7615_v46  ;;  %v7911_v46 = vor.u32 %v9895_v25, %v7908_v24  ;;  %v9939_v25 = vld [vmem:[%s15600_s1 + $0xd54] sm:$0xf]  ;;  %v8084_v24 = vld [vmem:[%s15600_s1 + $0xd58] sm:$0xf0] }
 0x239   :  { %5832 = vmatpush.bf16.msrb.mxu1 %v7679_v6  ;;  %v5577_v6 = vadd.f32 %v14023_v49, %v1007_v44  ;;  %v7964_v49 = vld [vmem:[%s15600_s1 + $0xc68] sm:$0xf0]  ;;  %v8023_v44 = vor.u32 %v9923_v35, %v8020_v60  ;;  %v9887_v54 = vld [vmem:[%s15600_s1 + $0xbb4] sm:$0xf]  ;;  %v9933_v35 = vld [vmem:[%s15600_s1 + $0xd24] sm:$0xf] }
 0x23a   :  { %5845 = vmatpush.bf16.msrb.mxu2 %v7743_v59  ;;  %v8039_v59 = vor.u32 %v9927_v21, %v8036_v23  ;;  %v7967_v19 = vor.u32 %v9909_v36, %v7964_v49  ;;  %v8087_v21 = vor.u32 %v9939_v25, %v8084_v24  ;;  %v9937_v23 = vld [vmem:[%s15600_s1 + $0xd44] sm:$0xf]  ;;  %v9935_v36 = vld [vmem:[%s15600_s1 + $0xd34] sm:$0xf]  ;;  %v8068_v49 = vld [vmem:[%s15600_s1 + $0xd38] sm:$0xf0] }
 0x23b   :  { %5858 = vmatpush.bf16.msrb.mxu3 %v7807_v48  ;;  %v7903_v48 = vor.u32 %v9893_v61, %v7900_v17  ;;  %v5590_v56 = vadd.f32 %v14058_v7, %v5577_v6  ;;  %v7892_v7 = vld [vmem:[%s15600_s1 + $0xbd8] sm:$0xf0]  ;;  %v9919_v6 = vld [vmem:[%s15600_s1 + $0xcb4] sm:$0xf]  ;;  %v8060_v60 = vld [vmem:[%s15600_s1 + $0xd28] sm:$0xf0] }
 0x23c   :  { %5820 = vmatpush.bf16.msrb.mxu0 %v7607_v47  ;;  %v8092_v47 = vld [vmem:[%s15600_s1 + $0xd68] sm:$0xf0]  ;;  %v9883_v25 = vld [vmem:[%s15600_s1 + $0xb94] sm:$0xf]  ;;  %v7860_v24 = vld [vmem:[%s15600_s1 + $0xb98] sm:$0xf0] }
 0x23d   :  { %5833 = vmatpush.bf16.msrb.mxu1 %v7671_v5  ;;  %v9907_v5 = vld [vmem:[%s15600_s1 + $0xc54] sm:$0xf]  ;;  %v8095_v8 = vor.u32 %v9941_v32, %v8092_v47  ;;  %v7932_v32 = vld [vmem:[%s15600_s1 + $0xc28] sm:$0xf0]  ;;  %v9917_v47 = vld [vmem:[%s15600_s1 + $0xca4] sm:$0xf] }
 0x23e   :  { %5846 = vmatpush.bf16.msrb.mxu2 %v7735_v22  ;;  %v7956_v22 = vld [vmem:[%s15600_s1 + $0xc58] sm:$0xf0] }
 0x23f   :  { %5859 = vmatpush.bf16.msrb.mxu3 %v7799_v38  ;;  %v7959_v30 = vor.u32 %v9907_v5, %v7956_v22  ;;  %v7948_v38 = vld [vmem:[%s15600_s1 + $0xc48] sm:$0xf0] }
 0x240   :  { %5821 = vmatpush.bf16.msrb.mxu0 %v7599_v40  ;;  %v5615_v13 = vpop.f32.mrf.mxu0 }
 0x241   :  { %5834 = vmatpush.bf16.msrb.mxu1 %v7663_v45  ;;  %v5628_v33 = vpop.f32.mrf.mxu1 }
 0x242   :  { %5847 = vmatpush.bf16.msrb.mxu2 %v7727_v55  ;;  %v8015_v55 = vor.u32 %v9921_v42, %v8012_v20  ;;  %v8063_v42 = vor.u32 %v9933_v35, %v8060_v60  ;;  %v9931_v20 = vld [vmem:[%s15600_s1 + $0xd14] sm:$0xf]  ;;  %v8220_v35 = vld [vmem:[%s15600_s1 + $0xe68] sm:$0xf0]  ;;  %v9989_v60 = vld [vmem:[%s15600_s1 + $0xee4] sm:$0xf] }
 0x243   :  { %5860 = vmatpush.bf16.msrb.mxu3 %v7791_v63  ;;  %5822 = vmatmul.bf16.vlgmr.msrb.gmra.mxu0 %v11485_v41  ;;  %v5603_v41 = vadd.f32 %v14075_v50, %v5590_v56  ;;  %v9905_v50 = vld [vmem:[%s15600_s1 + $0xc44] sm:$0xf]  ;;  %v8079_v63 = vor.u32 %v9937_v23, %v8076_v27  ;;  %v7852_v23 = vld [vmem:[%s15600_s1 + $0xb88] sm:$0xf0] }
 0x244   :  { %5866 = vmatpush.bf16.msra.mxu0 %v7911_v46  ;;  %5835 = vmatmul.bf16.vlgmr.msrb.gmra.mxu1 %v11680_v3  ;;  %v9889_v3 = vld [vmem:[%s15600_s1 + $0xbc4] sm:$0xf]  ;;  %v7951_v45 = vor.u32 %v9905_v50, %v7948_v38  ;;  %v7876_v46 = vld [vmem:[%s15600_s1 + $0xbb8] sm:$0xf0]  ;;  %v9915_v50 = vld [vmem:[%s15600_s1 + $0xc94] sm:$0xf] }
 0x245   :  { %5879 = vmatpush.bf16.msra.mxu1 %v7975_v29  ;;  %5848 = vmatmul.bf16.vlgmr.msrb.gmra.mxu2 %v11693_v9  ;;  %v7895_v9 = vor.u32 %v9891_v43, %v7892_v7  ;;  %v5616_v58 = vadd.f32 %v5615_v13, %v5603_v41  ;;  %v9903_v29 = vld [vmem:[%s15600_s1 + $0xc34] sm:$0xf]  ;;  %v7879_v17 = vor.u32 %v9887_v54, %v7876_v46  ;;  %v9901_v56 = vld [vmem:[%s15600_s1 + $0xc24] sm:$0xf]  ;;  %v7988_v38 = vld [vmem:[%s15600_s1 + $0xc98] sm:$0xf0] }
 0x246   :  { %5892 = vmatpush.bf16.msra.mxu2 %v8039_v59  ;;  %5861 = vmatmul.bf16.vlgmr.msrb.gmra.mxu3 %v11682_v4  ;;  %v7884_v4 = vld [vmem:[%s15600_s1 + $0xbc8] sm:$0xf0]  ;;  %v8004_v59 = vld [vmem:[%s15600_s1 + $0xcb8] sm:$0xf0]  ;;  %v7943_v28 = vor.u32 %v9903_v29, %v7940_v26  ;;  %v8071_v43 = vor.u32 %v9935_v36, %v8068_v49  ;;  %v9913_v54 = vld [vmem:[%s15600_s1 + $0xc84] sm:$0xf] }
 0x247   :  { %5905 = vmatpush.bf16.msra.mxu3 %v8103_v51  ;;  %v7887_v40 = vor.u32 %v9889_v3, %v7884_v4  ;;  %v5629_v61 = vadd.f32 %v5628_v33, %v5616_v58  ;;  %v8007_v39 = vor.u32 %v9919_v6, %v8004_v59  ;;  %v9885_v51 = vld [vmem:[%s15600_s1 + $0xba4] sm:$0xf]  ;;  %v7924_v4 = vld [vmem:[%s15600_s1 + $0xc18] sm:$0xf0]  ;;  %v7991_v58 = vor.u32 %v9915_v50, %v7988_v38  ;;  %v7980_v46 = vld [vmem:[%s15600_s1 + $0xc88] sm:$0xf0] }
 0x248   :  { %5867 = vmatpush.bf16.msra.mxu0 %v7903_v48  ;;  %v7868_v48 = vld [vmem:[%s15600_s1 + $0xba8] sm:$0xf0]  ;;  %v5617_v5 = vpop.f32.mrf.mxu0  ;;  %v8052_v13 = vld [vmem:[%s15600_s1 + $0xd18] sm:$0xf0]  ;;  %v9959_v29 = vld [vmem:[%s15600_s1 + $0xdf4] sm:$0xf] }
 0x249   :  { %5880 = vmatpush.bf16.msra.mxu1 %v7967_v19  ;;  %v7996_v19 = vld [vmem:[%s15600_s1 + $0xca8] sm:$0xf0]  ;;  %v7871_v22 = vor.u32 %v9885_v51, %v7868_v48  ;;  %v8164_v33 = vld [vmem:[%s15600_s1 + $0xdf8] sm:$0xf0]  ;;  %v8055_v6 = vor.u32 %v9931_v20, %v8052_v13  ;;  %v9975_v59 = vld [vmem:[%s15600_s1 + $0xe74] sm:$0xf]  ;;  %v7983_v51 = vor.u32 %v9913_v54, %v7980_v46 }
 0x24a   :  { %5893 = vmatpush.bf16.msra.mxu2 %v8031_v18  ;;  %v5641_v18 = vpop.f32.mrf.mxu2  ;;  %v7999_v41 = vor.u32 %v9917_v47, %v7996_v19  ;;  %v8292_v36 = vld [vmem:[%s15600_s1 + $0xef8] sm:$0xf0]  ;;  %v9929_v49 = vld [vmem:[%s15600_s1 + $0xd04] sm:$0xf]  ;;  %v10007_v47 = vld [vmem:[%s15600_s1 + $0xf74] sm:$0xf] }
 0x24b   :  { %5906 = vmatpush.bf16.msra.mxu3 %v8095_v8  ;;  %v5642_v7 = vadd.f32 %v5641_v18, %v5629_v61  ;;  %v7935_v8 = vor.u32 %v9901_v56, %v7932_v32  ;;  %v9991_v61 = vld [vmem:[%s15600_s1 + $0xef4] sm:$0xf]  ;;  %v8167_v56 = vor.u32 %v9959_v29, %v8164_v33  ;;  %v8356_v19 = vld [vmem:[%s15600_s1 + $0xf78] sm:$0xf0]  ;;  %v8156_v5 = vld [vmem:[%s15600_s1 + $0xde8] sm:$0xf0] }
 0x24c   :  { %5868 = vmatpush.bf16.msra.mxu0 %v7895_v9  ;;  %v5654_v9 = vpop.f32.mrf.mxu3  ;;  %v8295_v18 = vor.u32 %v9991_v61, %v8292_v36  ;;  %v8148_v50 = vld [vmem:[%s15600_s1 + $0xdd8] sm:$0xf0]  ;;  %v9971_v38 = vld [vmem:[%s15600_s1 + $0xe54] sm:$0xf]  ;;  %v8268_v54 = vld [vmem:[%s15600_s1 + $0xec8] sm:$0xf0] }
 0x24d   :  { %5881 = vmatpush.bf16.msra.mxu1 %v7959_v30  ;;  %v9899_v30 = vld [vmem:[%s15600_s1 + $0xc14] sm:$0xf]  ;;  %v14279_v3 = vadd.f32 %v5654_v9, %v5642_v7  ;;  %v9957_v7 = vld [vmem:[%s15600_s1 + $0xde4] sm:$0xf] }
 0x24e   :  { %5894 = vmatpush.bf16.msra.mxu2 %v8023_v44  ;;  %v5630_v44 = vpop.f32.mrf.mxu1  ;;  %v7927_v27 = vor.u32 %v9899_v30, %v7924_v4  ;;  %v8159_v9 = vor.u32 %v9957_v7, %v8156_v5  ;;  %v9955_v4 = vld [vmem:[%s15600_s1 + $0xdd4] sm:$0xf]  ;;  %v9949_v5 = vld [vmem:[%s15600_s1 + $0xda4] sm:$0xf] }
 0x24f   :  { %5907 = vmatpush.bf16.msra.mxu3 %v8087_v21  ;;  %v7863_v21 = vor.u32 %v9883_v25, %v7860_v24  ;;  %v10005_v25 = vld [vmem:[%s15600_s1 + $0xf64] sm:$0xf]  ;;  %v8348_v24 = vld [vmem:[%s15600_s1 + $0xf68] sm:$0xf0]  ;;  %v9987_v20 = vld [vmem:[%s15600_s1 + $0xed4] sm:$0xf] }
 0x250   :  { %5869 = vmatpush.bf16.msra.mxu0 %v7887_v40  ;;  %v9881_v40 = vld [vmem:[%s15600_s1 + $0xb84] sm:$0xf]  ;;  %v8351_v13 = vor.u32 %v10005_v25, %v8348_v24  ;;  %v9951_v36 = vld [vmem:[%s15600_s1 + $0xdb4] sm:$0xf] }
 0x251   :  { %5882 = vmatpush.bf16.msra.mxu1 %v7951_v45  ;;  %v9897_v45 = vld [vmem:[%s15600_s1 + $0xc04] sm:$0xf] }
 0x252   :  { %5895 = vmatpush.bf16.msra.mxu2 %v8015_v55  ;;  %v7916_v55 = vld [vmem:[%s15600_s1 + $0xc08] sm:$0xf0]  ;;  %v5643_v26 = vpop.f32.mrf.mxu2 }
 0x253   :  { %5908 = vmatpush.bf16.msra.mxu3 %v8079_v63  ;;  %v8228_v63 = vld [vmem:[%s15600_s1 + $0xe78] sm:$0xf0] }
 0x254   :  { %5870 = vmatpush.bf16.msra.mxu0 %v7879_v17  ;;  %v7855_v17 = vor.u32 %v9881_v40, %v7852_v23  ;;  %v5656_v48 = vpop.f32.mrf.mxu3  ;;  %v8231_v32 = vor.u32 %v9975_v59, %v8228_v63  ;;  %v8340_v40 = vld [vmem:[%s15600_s1 + $0xf58] sm:$0xf0]  ;;  %v10001_v59 = vld [vmem:[%s15600_s1 + $0xf44] sm:$0xf]  ;;  %v8332_v63 = vld [vmem:[%s15600_s1 + $0xf48] sm:$0xf0] }
 0x255   :  { %5883 = vmatpush.bf16.msra.mxu1 %v7943_v28  ;;  %v8044_v28 = vld [vmem:[%s15600_s1 + $0xd08] sm:$0xf0]  ;;  %v8260_v48 = vld [vmem:[%s15600_s1 + $0xeb8] sm:$0xf0] }
 0x256   :  { %5896 = vmatpush.bf16.msra.mxu2 %v8007_v39  ;;  %v7919_v39 = vor.u32 %v9897_v45, %v7916_v55  ;;  %v8204_v45 = vld [vmem:[%s15600_s1 + $0xe48] sm:$0xf0]  ;;  %v9985_v55 = vld [vmem:[%s15600_s1 + $0xec4] sm:$0xf] }
 0x257   :  { %5909 = vmatpush.bf16.msra.mxu3 %v8071_v43  ;;  %v8047_v43 = vor.u32 %v9929_v49, %v8044_v28  ;;  %v9967_v49 = vld [vmem:[%s15600_s1 + $0xe34] sm:$0xf] }
 0x258   :  { %5871 = vmatpush.bf16.msra.mxu0 %v7871_v22  ;;  %v9973_v22 = vld [vmem:[%s15600_s1 + $0xe64] sm:$0xf] }
 0x259   :  { %5884 = vmatpush.bf16.msra.mxu1 %v7935_v8  ;;  %v8284_v8 = vld [vmem:[%s15600_s1 + $0xee8] sm:$0xf0]  ;;  %v8223_v30 = vor.u32 %v9973_v22, %v8220_v35  ;;  %v9965_v35 = vld [vmem:[%s15600_s1 + $0xe24] sm:$0xf] }
 0x25a   :  { %5897 = vmatpush.bf16.msra.mxu2 %v7999_v41  ;;  %v8359_v41 = vor.u32 %v10007_v47, %v8356_v19  ;;  %v8287_v44 = vor.u32 %v9989_v60, %v8284_v8  ;;  %v9999_v47 = vld [vmem:[%s15600_s1 + $0xf34] sm:$0xf]  ;;  %v8324_v19 = vld [vmem:[%s15600_s1 + $0xf38] sm:$0xf0]  ;;  %v8124_v22 = vld [vmem:[%s15600_s1 + $0xda8] sm:$0xf0] }
 0x25b   :  { %5910 = vmatpush.bf16.msra.mxu3 %v8063_v42  ;;  %v8212_v42 = vld [vmem:[%s15600_s1 + $0xe58] sm:$0xf0]  ;;  %v8188_v8 = vld [vmem:[%s15600_s1 + $0xe28] sm:$0xf0]  ;;  %v8327_v25 = vor.u32 %v9999_v47, %v8324_v19 }
 0x25c   :  { %5872 = vmatpush.bf16.msra.mxu0 %v7863_v21  ;;  %v8276_v21 = vld [vmem:[%s15600_s1 + $0xed8] sm:$0xf0]  ;;  %v8215_v23 = vor.u32 %v9971_v38, %v8212_v42  ;;  %v8316_v38 = vld [vmem:[%s15600_s1 + $0xf28] sm:$0xf0] }
 0x25d   :  { %5885 = vmatpush.bf16.msra.mxu1 %v7927_v27  ;;  %v8279_v27 = vor.u32 %v9987_v20, %v8276_v21  ;;  %v8191_v20 = vor.u32 %v9965_v35, %v8188_v8  ;;  %v8412_v8 = vld [vmem:[%s15600_s1 + $0xfe8] sm:$0xf0] }
 0x25e   :  { %5898 = vmatpush.bf16.msra.mxu2 %v7991_v58  ;;  %v9969_v58 = vld [vmem:[%s15600_s1 + $0xe44] sm:$0xf] }
 0x25f   :  { %5911 = vmatpush.bf16.msra.mxu3 %v8055_v6  ;;  %v8207_v61 = vor.u32 %v9969_v58, %v8204_v45  ;;  %v8308_v45 = vld [vmem:[%s15600_s1 + $0xf18] sm:$0xf0] }
 0x260   :  { %5873 = vmatpush.bf16.msra.mxu0 %v7855_v17  ;;  %v5667_v29 = vpop.f32.mrf.mxu0  ;;  %v8271_v17 = vor.u32 %v9985_v55, %v8268_v54  ;;  %v9945_v55 = vld [vmem:[%s15600_s1 + $0xd84] sm:$0xf]  ;;  %v8108_v54 = vld [vmem:[%s15600_s1 + $0xd88] sm:$0xf0] }
 0x261   :  { %5886 = vmatpush.bf16.msra.mxu1 %v7919_v39  ;;  %v5668_v33 = vadd.f32 %v5667_v29, %v14279_v3  ;;  %v5680_v6 = vpop.f32.mrf.mxu1  ;;  %v8132_v3 = vld [vmem:[%s15600_s1 + $0xdb8] sm:$0xf0] }
 0x262   :  { %5899 = vmatpush.bf16.msra.mxu2 %v7983_v51  ;;  %v8196_v39 = vld [vmem:[%s15600_s1 + $0xe38] sm:$0xf0]  ;;  %v9983_v51 = vld [vmem:[%s15600_s1 + $0xeb4] sm:$0xf] }
 0x263   :  { %5912 = vmatpush.bf16.msra.mxu3 %v8047_v43  ;;  %5874 = vmatmul.bf16.vlgmr.msra.gmra.mxu0 %v11695_v12  ;;  %v8151_v12 = vor.u32 %v9955_v4, %v8148_v50  ;;  %v5681_v28 = vadd.f32 %v5680_v6, %v5668_v33  ;;  %v8263_v43 = vor.u32 %v9983_v51, %v8260_v48  ;;  %v9997_v50 = vld [vmem:[%s15600_s1 + $0xf24] sm:$0xf]  ;;  %v8548_v48 = vld [vmem:[%s15600_s1 + $0x10f8] sm:$0xf0] }
 0x264   :  { %5918 = vmatpush.bf16.msrb.mxu0 %v8167_v56  ;;  %5887 = vmatmul.bf16.vlgmr.msra.gmra.mxu1 %v11889_v1  ;;  %v9953_v1 = vld [vmem:[%s15600_s1 + $0xdc4] sm:$0xf]  ;;  %v8335_v56 = vor.u32 %v10001_v59, %v8332_v63  ;;  %v8127_v4 = vor.u32 %v9949_v5, %v8124_v22  ;;  %v8236_v63 = vld [vmem:[%s15600_s1 + $0xe88] sm:$0xf0]  ;;  %v8111_v51 = vor.u32 %v9945_v55, %v8108_v54  ;;  %v8612_v5 = vld [vmem:[%s15600_s1 + $0x1178] sm:$0xf0] }
 0x265   :  { %5931 = vmatpush.bf16.msrb.mxu1 %v8231_v32  ;;  %5900 = vmatmul.bf16.vlgmr.msra.gmra.mxu2 %v11902_v10  ;;  %v10003_v10 = vld [vmem:[%s15600_s1 + $0xf54] sm:$0xf]  ;;  %v8135_v32 = vor.u32 %v9951_v36, %v8132_v3  ;;  %v9961_v33 = vld [vmem:[%s15600_s1 + $0xe04] sm:$0xf]  ;;  %v8460_v55 = vld [vmem:[%s15600_s1 + $0x1048] sm:$0xf0] }
 0x266   :  { %5944 = vmatpush.bf16.msrb.mxu2 %v8295_v18  ;;  %5913 = vmatmul.bf16.vlgmr.msra.gmra.mxu3 %v11891_v2  ;;  %v8140_v2 = vld [vmem:[%s15600_s1 + $0xdc8] sm:$0xf0]  ;;  %v8343_v46 = vor.u32 %v10003_v10, %v8340_v40  ;;  %v8199_v18 = vor.u32 %v9967_v49, %v8196_v39  ;;  %v9963_v10 = vld [vmem:[%s15600_s1 + $0xe14] sm:$0xf]  ;;  %v8180_v40 = vld [vmem:[%s15600_s1 + $0xe18] sm:$0xf0] }
 0x267   :  { %5957 = vmatpush.bf16.msrb.mxu3 %v8359_v41  ;;  %v8143_v26 = vor.u32 %v9953_v1, %v8140_v2  ;;  %v9981_v41 = vld [vmem:[%s15600_s1 + $0xea4] sm:$0xf]  ;;  %v8319_v1 = vor.u32 %v9997_v50, %v8316_v38  ;;  %v9995_v2 = vld [vmem:[%s15600_s1 + $0xf14] sm:$0xf]  ;;  %v8484_v49 = vld [vmem:[%s15600_s1 + $0x1078] sm:$0xf0] }
 0x268   :  { %5919 = vmatpush.bf16.msrb.mxu0 %v8159_v9  ;;  %v5693_v7 = vpop.f32.mrf.mxu2  ;;  %v8252_v9 = vld [vmem:[%s15600_s1 + $0xea8] sm:$0xf0]  ;;  %v9977_v6 = vld [vmem:[%s15600_s1 + $0xe84] sm:$0xf]  ;;  %v8311_v36 = vor.u32 %v9995_v2, %v8308_v45  ;;  %v10039_v3 = vld [vmem:[%s15600_s1 + $0x1074] sm:$0xf] }
 0x269   :  { %5932 = vmatpush.bf16.msrb.mxu1 %v8223_v30  ;;  %v5694_v60 = vadd.f32 %v5693_v7, %v5681_v28  ;;  %v5706_v24 = vpop.f32.mrf.mxu3  ;;  %v5669_v30 = vpop.f32.mrf.mxu0  ;;  %v8255_v21 = vor.u32 %v9981_v41, %v8252_v9  ;;  %v10055_v28 = vld [vmem:[%s15600_s1 + $0x10f4] sm:$0xf]  ;;  %v8239_v19 = vor.u32 %v9977_v6, %v8236_v63  ;;  %v10037_v41 = vld [vmem:[%s15600_s1 + $0x1064] sm:$0xf]  ;;  %v8476_v9 = vld [vmem:[%s15600_s1 + $0x1068] sm:$0xf0] }
 0x26a   :  { %5945 = vmatpush.bf16.msrb.mxu2 %v8287_v44  ;;  %v5682_v42 = vpop.f32.mrf.mxu1  ;;  %v10071_v7 = vld [vmem:[%s15600_s1 + $0x1174] sm:$0xf]  ;;  %v8551_v22 = vor.u32 %v10055_v28, %v8548_v48  ;;  %v10069_v50 = vld [vmem:[%s15600_s1 + $0x1164] sm:$0xf]  ;;  %v8604_v38 = vld [vmem:[%s15600_s1 + $0x1168] sm:$0xf0] }
 0x26b   :  { %5958 = vmatpush.bf16.msrb.mxu3 %v8351_v13  ;;  %v14463_v44 = vadd.f32 %v5706_v24, %v5694_v60  ;;  %v9947_v13 = vld [vmem:[%s15600_s1 + $0xd94] sm:$0xf]  ;;  %v10021_v60 = vld [vmem:[%s15600_s1 + $0xfe4] sm:$0xf]  ;;  %v8540_v24 = vld [vmem:[%s15600_s1 + $0x10e8] sm:$0xf0]  ;;  %v8615_v30 = vor.u32 %v10071_v7, %v8612_v5  ;;  %v8479_v42 = vor.u32 %v10037_v41, %v8476_v9 }
 0x26c   :  { %5920 = vmatpush.bf16.msrb.mxu0 %v8151_v12  ;;  %v8116_v12 = vld [vmem:[%s15600_s1 + $0xd98] sm:$0xf0]  ;;  %v10033_v45 = vld [vmem:[%s15600_s1 + $0x1044] sm:$0xf]  ;;  %v8508_v9 = vld [vmem:[%s15600_s1 + $0x10a8] sm:$0xf0] }
 0x26d   :  { %5933 = vmatpush.bf16.msrb.mxu1 %v8215_v23  ;;  %v9979_v23 = vld [vmem:[%s15600_s1 + $0xe94] sm:$0xf]  ;;  %v8119_v58 = vor.u32 %v9947_v13, %v8116_v12  ;;  %v8404_v13 = vld [vmem:[%s15600_s1 + $0xfd8] sm:$0xf0]  ;;  %v10049_v54 = vld [vmem:[%s15600_s1 + $0x10c4] sm:$0xf] }
 0x26e   :  { %5946 = vmatpush.bf16.msrb.mxu2 %v8279_v27  ;;  %v8244_v27 = vld [vmem:[%s15600_s1 + $0xe98] sm:$0xf0]  ;;  %v10035_v12 = vld [vmem:[%s15600_s1 + $0x1054] sm:$0xf]  ;;  %v10065_v63 = vld [vmem:[%s15600_s1 + $0x1144] sm:$0xf] }
 0x26f   :  { %5959 = vmatpush.bf16.msrb.mxu3 %v8343_v46  ;;  %v8183_v46 = vor.u32 %v9963_v10, %v8180_v40  ;;  %v8247_v29 = vor.u32 %v9979_v23, %v8244_v27  ;;  %v8468_v10 = vld [vmem:[%s15600_s1 + $0x1058] sm:$0xf0]  ;;  %v10051_v40 = vld [vmem:[%s15600_s1 + $0x10d4] sm:$0xf]  ;;  %v8607_v27 = vor.u32 %v10069_v50, %v8604_v38  ;;  %v10013_v5 = vld [vmem:[%s15600_s1 + $0xfa4] sm:$0xf] }
 0x270   :  { %5921 = vmatpush.bf16.msrb.mxu0 %v8143_v26  ;;  %v8172_v26 = vld [vmem:[%s15600_s1 + $0xe08] sm:$0xf0]  ;;  %v5695_v59 = vpop.f32.mrf.mxu2  ;;  %v8532_v23 = vld [vmem:[%s15600_s1 + $0x10d8] sm:$0xf0]  ;;  %v8471_v2 = vor.u32 %v10035_v12, %v8468_v10  ;;  %v10045_v41 = vld [vmem:[%s15600_s1 + $0x10a4] sm:$0xf] }
 0x271   :  { %5934 = vmatpush.bf16.msrb.mxu1 %v8207_v61  ;;  %v10023_v61 = vld [vmem:[%s15600_s1 + $0xff4] sm:$0xf]  ;;  %v5708_v39 = vpop.f32.mrf.mxu3  ;;  %v8175_v47 = vor.u32 %v9961_v33, %v8172_v26  ;;  %v8516_v48 = vld [vmem:[%s15600_s1 + $0x10b8] sm:$0xf0]  ;;  %v10061_v38 = vld [vmem:[%s15600_s1 + $0x1124] sm:$0xf] }
 0x272   :  { %5947 = vmatpush.bf16.msrb.mxu2 %v8271_v17  ;;  %v8420_v17 = vld [vmem:[%s15600_s1 + $0xff8] sm:$0xf0]  ;;  %v10011_v12 = vld [vmem:[%s15600_s1 + $0xf94] sm:$0xf] }
 0x273   :  { %5960 = vmatpush.bf16.msrb.mxu3 %v8335_v56  ;;  %v9993_v56 = vld [vmem:[%s15600_s1 + $0xf04] sm:$0xf]  ;;  %v8452_v39 = vld [vmem:[%s15600_s1 + $0x1038] sm:$0xf0] }
 0x274   :  { %5922 = vmatpush.bf16.msrb.mxu0 %v8135_v32  ;;  %v8300_v32 = vld [vmem:[%s15600_s1 + $0xf08] sm:$0xf0]  ;;  %v8372_v10 = vld [vmem:[%s15600_s1 + $0xf98] sm:$0xf0] }
 0x275   :  { %5935 = vmatpush.bf16.msrb.mxu1 %v8199_v18  ;;  %v8423_v18 = vor.u32 %v10023_v61, %v8420_v17  ;;  %v8303_v35 = vor.u32 %v9993_v56, %v8300_v32  ;;  %v8588_v61 = vld [vmem:[%s15600_s1 + $0x1148] sm:$0xf0]  ;;  %v8463_v17 = vor.u32 %v10033_v45, %v8460_v55 }
 0x276   :  { %5948 = vmatpush.bf16.msrb.mxu2 %v8263_v43  ;;  %v8487_v43 = vor.u32 %v10039_v3, %v8484_v49  ;;  %v10015_v3 = vld [vmem:[%s15600_s1 + $0xfb4] sm:$0xf]  ;;  %v8591_v56 = vor.u32 %v10065_v63, %v8588_v61 }
 0x277   :  { %5961 = vmatpush.bf16.msrb.mxu3 %v8327_v25  ;;  %v10053_v25 = vld [vmem:[%s15600_s1 + $0x10e4] sm:$0xf]  ;;  %v10031_v49 = vld [vmem:[%s15600_s1 + $0x1034] sm:$0xf] }
 0x278   :  { %5923 = vmatpush.bf16.msrb.mxu0 %v8127_v4  ;;  %v8415_v4 = vor.u32 %v10021_v60, %v8412_v8  ;;  %v8444_v8 = vld [vmem:[%s15600_s1 + $0x1028] sm:$0xf0]  ;;  %v10103_v61 = vld [vmem:[%s15600_s1 + $0x1274] sm:$0xf] }
 0x279   :  { %5936 = vmatpush.bf16.msrb.mxu1 %v8191_v20  ;;  %v8543_v20 = vor.u32 %v10053_v25, %v8540_v24 }
 0x27a   :  { %5949 = vmatpush.bf16.msrb.mxu2 %v8255_v21  ;;  %v10019_v21 = vld [vmem:[%s15600_s1 + $0xfd4] sm:$0xf] }
 0x27b   :  { %5962 = vmatpush.bf16.msrb.mxu3 %v8319_v1  ;;  %v8596_v1 = vld [vmem:[%s15600_s1 + $0x1158] sm:$0xf0] }
 0x27c   :  { %5924 = vmatpush.bf16.msrb.mxu0 %v8119_v58  ;;  %v8535_v58 = vor.u32 %v10051_v40, %v8532_v23  ;;  %v10027_v40 = vld [vmem:[%s15600_s1 + $0x1014] sm:$0xf]  ;;  %v8436_v23 = vld [vmem:[%s15600_s1 + $0x1018] sm:$0xf0] }
 0x27d   :  { %5937 = vmatpush.bf16.msrb.mxu1 %v8183_v46  ;;  %v8524_v46 = vld [vmem:[%s15600_s1 + $0x10c8] sm:$0xf0]  ;;  %v8439_v45 = vor.u32 %v10027_v40, %v8436_v23  ;;  %v8852_v23 = vld [vmem:[%s15600_s1 + $0x1358] sm:$0xf0] }
 0x27e   :  { %5950 = vmatpush.bf16.msrb.mxu2 %v8247_v29  ;;  %v15631_v40 = vld [vmem:[#allocation5_spill] sm:$0xff] }
 0x27f   :  { %5963 = vmatpush.bf16.msrb.mxu3 %v8311_v36  ;;  %v8527_v36 = vor.u32 %v10049_v54, %v8524_v46  ;;  %v10025_v54 = vld [vmem:[%s15600_s1 + $0x1004] sm:$0xf]  ;;  %v8428_v46 = vld [vmem:[%s15600_s1 + $0x1008] sm:$0xf0] }
 0x280   :  { %5925 = vmatpush.bf16.msrb.mxu0 %v8111_v51  ;;  %v5719_v33 = vpop.f32.mrf.mxu0  ;;  %v10047_v51 = vld [vmem:[%s15600_s1 + $0x10b4] sm:$0xf] }
 0x281   :  { %5938 = vmatpush.bf16.msrb.mxu1 %v8175_v47  ;;  %v5720_v26 = vadd.f32 %v5719_v33, %v14463_v44  ;;  %v5732_v59 = vpop.f32.mrf.mxu1  ;;  %v8388_v44 = vld [vmem:[%s15600_s1 + $0xfb8] sm:$0xf0]  ;;  %v10063_v47 = vld [vmem:[%s15600_s1 + $0x1134] sm:$0xf] }
 0x282   :  { %5951 = vmatpush.bf16.msrb.mxu2 %v8239_v19  ;;  %v8391_v32 = vor.u32 %v10015_v3, %v8388_v44  ;;  %v8580_v19 = vld [vmem:[%s15600_s1 + $0x1138] sm:$0xf0] }
 0x283   :  { %5964 = vmatpush.bf16.msrb.mxu3 %v8303_v35  ;;  %5926 = vmatmul.bf16.vlgmr.msrb.gmra.mxu0 %v11904_v11  ;;  %v8407_v11 = vor.u32 %v10019_v21, %v8404_v13  ;;  %v5733_v28 = vadd.f32 %v5732_v59, %v5720_v26  ;;  %v10029_v35 = vld [vmem:[%s15600_s1 + $0x1024] sm:$0xf]  ;;  %v8583_v25 = vor.u32 %v10063_v47, %v8580_v19  ;;  %v8492_v26 = vld [vmem:[%s15600_s1 + $0x1088] sm:$0xf0]  ;;  %v8676_v59 = vld [vmem:[%s15600_s1 + $0x11f8] sm:$0xf0] }
 0x284   :  { %5970 = vmatpush.bf16.msra.mxu0 %v8423_v18  ;;  %5939 = vmatmul.bf16.vlgmr.msrb.gmra.mxu1 %v12099_v15  ;;  %v10017_v15 = vld [vmem:[%s15600_s1 + $0xfc4] sm:$0xf]  ;;  %v8455_v18 = vor.u32 %v10031_v49, %v8452_v39  ;;  %v8447_v21 = vor.u32 %v10029_v35, %v8444_v8  ;;  %v8511_v13 = vor.u32 %v10045_v41, %v8508_v9  ;;  %v8804_v49 = vld [vmem:[%s15600_s1 + $0x12f8] sm:$0xf0]  ;;  %v8556_v39 = vld [vmem:[%s15600_s1 + $0x1108] sm:$0xf0] }
 0x285   :  { %5983 = vmatpush.bf16.msra.mxu1 %v8487_v43  ;;  %5952 = vmatmul.bf16.vlgmr.msrb.gmra.mxu2 %v12112_v31  ;;  %v10067_v31 = vld [vmem:[%s15600_s1 + $0x1154] sm:$0xf]  ;;  %v8519_v43 = vor.u32 %v10047_v51, %v8516_v48  ;;  %v8431_v51 = vor.u32 %v10025_v54, %v8428_v46  ;;  %v8868_v19 = vld [vmem:[%s15600_s1 + $0x1378] sm:$0xf0]  ;;  %v8732_v35 = vld [vmem:[%s15600_s1 + $0x1268] sm:$0xf0] }
 0x286   :  { %5996 = vmatpush.bf16.msra.mxu2 %v8551_v22  ;;  %5965 = vmatmul.bf16.vlgmr.msrb.gmra.mxu3 %v12101_v16  ;;  %v8396_v16 = vld [vmem:[%s15600_s1 + $0xfc8] sm:$0xf0]  ;;  %v8599_v29 = vor.u32 %v10067_v31, %v8596_v1  ;;  %v10059_v1 = vld [vmem:[%s15600_s1 + $0x1114] sm:$0xf] }
 0x287   :  { %6009 = vmatpush.bf16.msra.mxu3 %v8615_v30  ;;  %v8399_v6 = vor.u32 %v10017_v15, %v8396_v16  ;;  %v8380_v22 = vld [vmem:[%s15600_s1 + $0xfa8] sm:$0xf0]  ;;  %v10009_v15 = vld [vmem:[%s15600_s1 + $0xf84] sm:$0xf]  ;;  %v10135_v47 = vld [vmem:[%s15600_s1 + $0x1374] sm:$0xf] }
 0x288   :  { %5971 = vmatpush.bf16.msra.mxu0 %v8415_v4  ;;  %v5745_v7 = vpop.f32.mrf.mxu2  ;;  %v5721_v30 = vpop.f32.mrf.mxu0  ;;  %v8383_v50 = vor.u32 %v10013_v5, %v8380_v22  ;;  %v8364_v16 = vld [vmem:[%s15600_s1 + $0xf88] sm:$0xf0]  ;;  %v10101_v22 = vld [vmem:[%s15600_s1 + $0x1264] sm:$0xf]  ;;  %v8871_v41 = vor.u32 %v10135_v47, %v8868_v19 }
 0x289   :  { %5984 = vmatpush.bf16.msra.mxu1 %v8479_v42  ;;  %v5746_v60 = vadd.f32 %v5745_v7, %v5733_v28  ;;  %v5758_v24 = vpop.f32.mrf.mxu3  ;;  %v8572_v42 = vld [vmem:[%s15600_s1 + $0x1128] sm:$0xf0]  ;;  %v8367_v44 = vor.u32 %v10009_v15, %v8364_v16  ;;  %v10057_v28 = vld [vmem:[%s15600_s1 + $0x1104] sm:$0xf]  ;;  %v8735_v30 = vor.u32 %v10101_v22, %v8732_v35 }
 0x28a   :  { %5997 = vmatpush.bf16.msra.mxu2 %v8543_v20  ;;  %v5734_v20 = vpop.f32.mrf.mxu1  ;;  %v8575_v31 = vor.u32 %v10061_v38, %v8572_v42  ;;  %v10085_v7 = vld [vmem:[%s15600_s1 + $0x11e4] sm:$0xf]  ;;  %v8668_v5 = vld [vmem:[%s15600_s1 + $0x11e8] sm:$0xf0]  ;;  %v10083_v38 = vld [vmem:[%s15600_s1 + $0x11d4] sm:$0xf] }
 0x28b   :  { %6010 = vmatpush.bf16.msra.mxu3 %v8607_v27  ;;  %v14662_v4 = vadd.f32 %v5758_v24, %v5746_v60  ;;  %v10043_v27 = vld [vmem:[%s15600_s1 + $0x1094] sm:$0xf]  ;;  %v10117_v60 = vld [vmem:[%s15600_s1 + $0x12e4] sm:$0xf]  ;;  %v8796_v8 = vld [vmem:[%s15600_s1 + $0x12e8] sm:$0xf0]  ;;  %v8671_v9 = vor.u32 %v10085_v7, %v8668_v5 }
 0x28c   :  { %5972 = vmatpush.bf16.msra.mxu0 %v8407_v11  ;;  %v8500_v11 = vld [vmem:[%s15600_s1 + $0x1098] sm:$0xf0]  ;;  %v8860_v24 = vld [vmem:[%s15600_s1 + $0x1368] sm:$0xf0]  ;;  %v10099_v20 = vld [vmem:[%s15600_s1 + $0x1254] sm:$0xf] }
 0x28d   :  { %5985 = vmatpush.bf16.msra.mxu1 %v8471_v2  ;;  %v8375_v2 = vor.u32 %v10011_v12, %v8372_v10  ;;  %v8503_v55 = vor.u32 %v10043_v27, %v8500_v11  ;;  %v8660_v42 = vld [vmem:[%s15600_s1 + $0x11d8] sm:$0xf0]  ;;  %v8780_v15 = vld [vmem:[%s15600_s1 + $0x12c8] sm:$0xf0]  ;;  %v10093_v19 = vld [vmem:[%s15600_s1 + $0x1224] sm:$0xf] }
 0x28e   :  { %5998 = vmatpush.bf16.msra.mxu2 %v8535_v58  ;;  %v8564_v58 = vld [vmem:[%s15600_s1 + $0x1118] sm:$0xf0]  ;;  %v8636_v47 = vld [vmem:[%s15600_s1 + $0x11a8] sm:$0xf0]  ;;  %v10109_v7 = vld [vmem:[%s15600_s1 + $0x12a4] sm:$0xf] }
 0x28f   :  { %6011 = vmatpush.bf16.msra.mxu3 %v8599_v29  ;;  %v10041_v29 = vld [vmem:[%s15600_s1 + $0x1084] sm:$0xf]  ;;  %v8567_v63 = vor.u32 %v10059_v1, %v8564_v58  ;;  %v8788_v12 = vld [vmem:[%s15600_s1 + $0x12d8] sm:$0xf0]  ;;  %v8764_v5 = vld [vmem:[%s15600_s1 + $0x12a8] sm:$0xf0] }
 0x290   :  { %5973 = vmatpush.bf16.msra.mxu0 %v8399_v6  ;;  %v5747_v33 = vpop.f32.mrf.mxu2  ;;  %v10087_v6 = vld [vmem:[%s15600_s1 + $0x11f4] sm:$0xf]  ;;  %v8495_v48 = vor.u32 %v10041_v29, %v8492_v26  ;;  %v10097_v1 = vld [vmem:[%s15600_s1 + $0x1244] sm:$0xf] }
 0x291   :  { %5986 = vmatpush.bf16.msra.mxu1 %v8463_v17  ;;  %v8740_v17 = vld [vmem:[%s15600_s1 + $0x1278] sm:$0xf0]  ;;  %v5760_v3 = vpop.f32.mrf.mxu3  ;;  %v10113_v58 = vld [vmem:[%s15600_s1 + $0x12c4] sm:$0xf]  ;;  %v8844_v33 = vld [vmem:[%s15600_s1 + $0x1348] sm:$0xf0] }
 0x292   :  { %5999 = vmatpush.bf16.msra.mxu2 %v8527_v36  ;;  %v10119_v36 = vld [vmem:[%s15600_s1 + $0x12f4] sm:$0xf]  ;;  %v10129_v29 = vld [vmem:[%s15600_s1 + $0x1344] sm:$0xf]  ;;  %v8772_v3 = vld [vmem:[%s15600_s1 + $0x12b8] sm:$0xf0] }
 0x293   :  { %6012 = vmatpush.bf16.msra.mxu3 %v8591_v56  ;;  %v8679_v56 = vor.u32 %v10087_v6, %v8676_v59  ;;  %v8783_v6 = vor.u32 %v10113_v58, %v8780_v15  ;;  %v10079_v59 = vld [vmem:[%s15600_s1 + $0x11b4] sm:$0xf]  ;;  %v8748_v15 = vld [vmem:[%s15600_s1 + $0x1288] sm:$0xf0] }
 0x294   :  { %5974 = vmatpush.bf16.msra.mxu0 %v8391_v32  ;;  %v8743_v32 = vor.u32 %v10103_v61, %v8740_v17  ;;  %v8708_v17 = vld [vmem:[%s15600_s1 + $0x1238] sm:$0xf0] }
 0x295   :  { %5987 = vmatpush.bf16.msra.mxu1 %v8455_v18  ;;  %v8807_v18 = vor.u32 %v10119_v36, %v8804_v49  ;;  %v10111_v36 = vld [vmem:[%s15600_s1 + $0x12b4] sm:$0xf] }
 0x296   :  { %6000 = vmatpush.bf16.msra.mxu2 %v8519_v43  ;;  %v8559_v43 = vor.u32 %v10057_v28, %v8556_v39  ;;  %v10127_v28 = vld [vmem:[%s15600_s1 + $0x1334] sm:$0xf]  ;;  %v8836_v39 = vld [vmem:[%s15600_s1 + $0x1338] sm:$0xf0] }
 0x297   :  { %6013 = vmatpush.bf16.msra.mxu3 %v8583_v25  ;;  %v10133_v25 = vld [vmem:[%s15600_s1 + $0x1364] sm:$0xf]  ;;  %v8839_v22 = vor.u32 %v10127_v28, %v8836_v39 }
 0x298   :  { %5975 = vmatpush.bf16.msra.mxu0 %v8383_v50  ;;  %v8799_v50 = vor.u32 %v10117_v60, %v8796_v8  ;;  %v8863_v10 = vor.u32 %v10133_v25, %v8860_v24  ;;  %v8828_v25 = vld [vmem:[%s15600_s1 + $0x1328] sm:$0xf0]  ;;  %v10149_v39 = vld [vmem:[%s15600_s1 + $0x13e4] sm:$0xf] }
 0x299   :  { %5988 = vmatpush.bf16.msra.mxu1 %v8447_v21  ;;  %v8724_v21 = vld [vmem:[%s15600_s1 + $0x1258] sm:$0xf0] }
 0x29a   :  { %6001 = vmatpush.bf16.msra.mxu2 %v8511_v13  ;;  %v10115_v13 = vld [vmem:[%s15600_s1 + $0x12d4] sm:$0xf]  ;;  %v8727_v27 = vor.u32 %v10099_v20, %v8724_v21  ;;  %v8692_v21 = vld [vmem:[%s15600_s1 + $0x1218] sm:$0xf0] }
 0x29b   :  { %6014 = vmatpush.bf16.msra.mxu3 %v8575_v31  ;;  %v8791_v11 = vor.u32 %v10115_v13, %v8788_v12  ;;  %v8652_v31 = vld [vmem:[%s15600_s1 + $0x11c8] sm:$0xf0]  ;;  %v10091_v20 = vld [vmem:[%s15600_s1 + $0x1214] sm:$0xf]  ;;  %v8756_v12 = vld [vmem:[%s15600_s1 + $0x1298] sm:$0xf0] }
 0x29c   :  { %5976 = vmatpush.bf16.msra.mxu0 %v8375_v2  ;;  %v8716_v2 = vld [vmem:[%s15600_s1 + $0x1248] sm:$0xf0]  ;;  %v10107_v13 = vld [vmem:[%s15600_s1 + $0x1294] sm:$0xf] }
 0x29d   :  { %5989 = vmatpush.bf16.msra.mxu1 %v8439_v45  ;;  %v8719_v26 = vor.u32 %v10097_v1, %v8716_v2  ;;  %v8684_v1 = vld [vmem:[%s15600_s1 + $0x1208] sm:$0xf0]  ;;  %v10105_v2 = vld [vmem:[%s15600_s1 + $0x1284] sm:$0xf] }
 0x29e   :  { %6002 = vmatpush.bf16.msra.mxu2 %v8503_v55 }
 0x29f   :  { %6015 = vmatpush.bf16.msra.mxu3 %v8567_v63  ;;  %v10095_v63 = vld [vmem:[%s15600_s1 + $0x1234] sm:$0xf] }
 0x2a0   :  { %5977 = vmatpush.bf16.msra.mxu0 %v8367_v44  ;;  %v5771_v45 = vpop.f32.mrf.mxu0  ;;  %v8847_v44 = vor.u32 %v10129_v29, %v8844_v33  ;;  %v10183_v29 = vld [vmem:[%s15600_s1 + $0x14f4] sm:$0xf] }
 0x2a1   :  { %5990 = vmatpush.bf16.msra.mxu1 %v8431_v51  ;;  %v5772_v55 = vadd.f32 %v5771_v45, %v14662_v4  ;;  %v5784_v46 = vpop.f32.mrf.mxu1  ;;  %v8644_v4 = vld [vmem:[%s15600_s1 + $0x11b8] sm:$0xf0]  ;;  %v8711_v51 = vor.u32 %v10095_v63, %v8708_v17 }
 0x2a2   :  { %6003 = vmatpush.bf16.msra.mxu2 %v8495_v48  ;;  %v8647_v49 = vor.u32 %v10079_v59, %v8644_v4  ;;  %v8775_v48 = vor.u32 %v10111_v36, %v8772_v3  ;;  %v8932_v45 = vld [vmem:[%s15600_s1 + $0x13f8] sm:$0xf0]  ;;  %v10121_v59 = vld [vmem:[%s15600_s1 + $0x1304] sm:$0xf]  ;;  %v8812_v4 = vld [vmem:[%s15600_s1 + $0x1308] sm:$0xf0] }
 0x2a3   :  { %6016 = vmatpush.bf16.msra.mxu3 %v8559_v43  ;;  %5978 = vmatmul.bf16.vlgmr.msra.gmra.mxu0 %v12114_v34  ;;  %v8663_v34 = vor.u32 %v10083_v38, %v8660_v42  ;;  %v5785_v61 = vadd.f32 %v5784_v46, %v5772_v55  ;;  %v8700_v43 = vld [vmem:[%s15600_s1 + $0x1228] sm:$0xf0]  ;;  %v10075_v38 = vld [vmem:[%s15600_s1 + $0x1194] sm:$0xf]  ;;  %v8628_v42 = vld [vmem:[%s15600_s1 + $0x1198] sm:$0xf0]  ;;  %v8815_v28 = vor.u32 %v10121_v59, %v8812_v4 }
 0x2a4   :  { %6022 = vmatpush.bf16.msrb.mxu0 %v8679_v56  ;;  %5991 = vmatmul.bf16.vlgmr.msra.gmra.mxu1 %v12309_v52  ;;  %v10081_v52 = vld [vmem:[%s15600_s1 + $0x11c4] sm:$0xf]  ;;  %v8996_v46 = vld [vmem:[%s15600_s1 + $0x1478] sm:$0xf0]  ;;  %v10199_v3 = vld [vmem:[%s15600_s1 + $0x1574] sm:$0xf] }
 0x2a5   :  { %6035 = vmatpush.bf16.msrb.mxu1 %v8743_v32  ;;  %6004 = vmatmul.bf16.vlgmr.msra.gmra.mxu2 %v12322_v0  ;;  %v10131_v0 = vld [vmem:[%s15600_s1 + $0x1354] sm:$0xf]  ;;  %v8655_v54 = vor.u32 %v10081_v52, %v8652_v31  ;;  %v10077_v32 = vld [vmem:[%s15600_s1 + $0x11a4] sm:$0xf]  ;;  %v8759_v52 = vor.u32 %v10107_v13, %v8756_v12  ;;  %v9108_v12 = vld [vmem:[%s15600_s1 + $0x1558] sm:$0xf0] }
 0x2a6   :  { %6048 = vmatpush.bf16.msrb.mxu2 %v8807_v18  ;;  %6017 = vmatmul.bf16.vlgmr.msra.gmra.mxu3 %v15631_v40  ;;  %v8855_v16 = vor.u32 %v10131_v0, %v8852_v23  ;;  %v10123_v40 = vld [vmem:[%s15600_s1 + $0x1314] sm:$0xf]  ;;  %v8820_v0 = vld [vmem:[%s15600_s1 + $0x1318] sm:$0xf0]  ;;  %v10073_v23 = vld [vmem:[%s15600_s1 + $0x1184] sm:$0xf] }
 0x2a7   :  { %6061 = vmatpush.bf16.msrb.mxu3 %v8871_v41  ;;  %v8639_v41 = vor.u32 %v10077_v32, %v8636_v47  ;;  %v10089_v31 = vld [vmem:[%s15600_s1 + $0x1204] sm:$0xf]  ;;  %v8823_v55 = vor.u32 %v10123_v40, %v8820_v0  ;;  %v9052_v47 = vld [vmem:[%s15600_s1 + $0x14e8] sm:$0xf0]  ;;  %v10195_v13 = vld [vmem:[%s15600_s1 + $0x1554] sm:$0xf] }
 0x2a8   :  { %6023 = vmatpush.bf16.msrb.mxu0 %v8671_v9  ;;  %v5797_v56 = vpop.f32.mrf.mxu2  ;;  %v5773_v60 = vpop.f32.mrf.mxu0  ;;  %v10125_v9 = vld [vmem:[%s15600_s1 + $0x1324] sm:$0xf]  ;;  %v8687_v63 = vor.u32 %v10089_v31, %v8684_v1  ;;  %v8908_v0 = vld [vmem:[%s15600_s1 + $0x13c8] sm:$0xf0]  ;;  %v9111_v31 = vor.u32 %v10195_v13, %v9108_v12  ;;  %v9028_v59 = vld [vmem:[%s15600_s1 + $0x14b8] sm:$0xf0] }
 0x2a9   :  { %6036 = vmatpush.bf16.msrb.mxu1 %v8735_v30  ;;  %v5798_v18 = vadd.f32 %v5797_v56, %v5785_v61  ;;  %v5810_v35 = vpop.f32.mrf.mxu3  ;;  %v5786_v24 = vpop.f32.mrf.mxu1  ;;  %v8703_v30 = vor.u32 %v10093_v19, %v8700_v43  ;;  %v8751_v61 = vor.u32 %v10105_v2, %v8748_v15  ;;  %v8988_v56 = vld [vmem:[%s15600_s1 + $0x1468] sm:$0xf0]  ;;  %v10181_v32 = vld [vmem:[%s15600_s1 + $0x14e4] sm:$0xf]  ;;  %v8916_v60 = vld [vmem:[%s15600_s1 + $0x13d8] sm:$0xf0] }
 0x2aa   :  { %6049 = vmatpush.bf16.msrb.mxu2 %v8799_v50  ;;  %v8767_v50 = vor.u32 %v10109_v7, %v8764_v5  ;;  %v10197_v43 = vld [vmem:[%s15600_s1 + $0x1564] sm:$0xf]  ;;  %v9116_v7 = vld [vmem:[%s15600_s1 + $0x1568] sm:$0xf0]  ;;  %v8980_v24 = vld [vmem:[%s15600_s1 + $0x1458] sm:$0xf0] }
 0x2ab   :  { %6062 = vmatpush.bf16.msrb.mxu3 %v8863_v10  ;;  %v14861_v8 = vadd.f32 %v5810_v35, %v5798_v18  ;;  %v8831_v10 = vor.u32 %v10125_v9, %v8828_v25  ;;  %v10147_v35 = vld [vmem:[%s15600_s1 + $0x13d4] sm:$0xf]  ;;  %v15633_v25 = vld [vmem:[#allocation9_spill] sm:$0xff]  ;;  %v9076_v13 = vld [vmem:[%s15600_s1 + $0x1518] sm:$0xf0] }
 0x2ac   :  { %6024 = vmatpush.bf16.msrb.mxu0 %v8663_v34  ;;  %v8631_v34 = vor.u32 %v10075_v38, %v8628_v42  ;;  %v15632_v9 = vld [vmem:[#allocation6_spill] sm:$0xff]  ;;  %v15634_v38 = vld [vmem:[#allocation7_spill] sm:$0xff]  ;;  %v9119_v42 = vor.u32 %v10197_v43, %v9116_v7  ;;  %v10137_v12 = vld [vmem:[%s15600_s1 + $0x1384] sm:$0xf] }
 0x2ad   :  { %6037 = vmatpush.bf16.msrb.mxu1 %v8727_v27  ;;  %v8620_v27 = vld [vmem:[%s15600_s1 + $0x1188] sm:$0xf0] }
 0x2ae   :  { %6050 = vmatpush.bf16.msrb.mxu2 %v8791_v11  ;;  %v8695_v11 = vor.u32 %v10091_v20, %v8692_v21  ;;  %v15635_v20 = vld [vmem:[#allocation8_spill] sm:$0xff]  ;;  %v8919_v21 = vor.u32 %v10147_v35, %v8916_v60 }
 0x2af   :  { %6063 = vmatpush.bf16.msrb.mxu3 %v8855_v16  ;;  %v10151_v16 = vld [vmem:[%s15600_s1 + $0x13f4] sm:$0xf] }
 0x2b0   :  { %6025 = vmatpush.bf16.msrb.mxu0 %v8655_v54  ;;  %v5799_v58 = vpop.f32.mrf.mxu2  ;;  %v10167_v54 = vld [vmem:[%s15600_s1 + $0x1474] sm:$0xf]  ;;  %v8935_v17 = vor.u32 %v10151_v16, %v8932_v45  ;;  %v10193_v16 = vld [vmem:[%s15600_s1 + $0x1544] sm:$0xf]  ;;  %v9100_v45 = vld [vmem:[%s15600_s1 + $0x1548] sm:$0xf0] }
 0x2b1   :  { %6038 = vmatpush.bf16.msrb.mxu1 %v8719_v26  ;;  %v5812_v33 = vpop.f32.mrf.mxu3  ;;  %v8623_v26 = vor.u32 %v10073_v23, %v8620_v27  ;;  %v8999_v36 = vor.u32 %v10167_v54, %v8996_v46  ;;  %v10161_v23 = vld [vmem:[%s15600_s1 + $0x1444] sm:$0xf]  ;;  %v8972_v27 = vld [vmem:[%s15600_s1 + $0x1448] sm:$0xf0]  ;;  %v10143_v46 = vld [vmem:[%s15600_s1 + $0x13b4] sm:$0xf]  ;;  %v9103_v4 = vor.u32 %v10193_v16, %v9100_v45 }
 0x2b2   :  { %6051 = vmatpush.bf16.msrb.mxu2 %v8783_v6  ;;  %v9060_v6 = vld [vmem:[%s15600_s1 + $0x14f8] sm:$0xf0]  ;;  %v10247_v16 = vld [vmem:[%s15600_s1 + $0x16f4] sm:$0xf] }
 0x2b3   :  { %6064 = vmatpush.bf16.msrb.mxu3 %v8847_v44  ;;  %v9124_v44 = vld [vmem:[%s15600_s1 + $0x1578] sm:$0xf0] }
 0x2b4   :  { %6026 = vmatpush.bf16.msrb.mxu0 %v8647_v49  ;;  %v9063_v49 = vor.u32 %v10183_v29, %v9060_v6  ;;  %v9127_v19 = vor.u32 %v10199_v3, %v9124_v44  ;;  %v10159_v29 = vld [vmem:[%s15600_s1 + $0x1434] sm:$0xf] }
 0x2b5   :  { %6039 = vmatpush.bf16.msrb.mxu1 %v8711_v51  ;;  %v8924_v51 = vld [vmem:[%s15600_s1 + $0x13e8] sm:$0xf0]  ;;  %v10175_v6 = vld [vmem:[%s15600_s1 + $0x14b4] sm:$0xf] }
 0x2b6   :  { %6052 = vmatpush.bf16.msrb.mxu2 %v8775_v48  ;;  %v10165_v48 = vld [vmem:[%s15600_s1 + $0x1464] sm:$0xf]  ;;  %v8927_v18 = vor.u32 %v10149_v39, %v8924_v51  ;;  %v9031_v3 = vor.u32 %v10175_v6, %v9028_v59  ;;  %v10263_v59 = vld [vmem:[%s15600_s1 + $0x1774] sm:$0xf] }
 0x2b7   :  { %6065 = vmatpush.bf16.msrb.mxu3 %v8839_v22  ;;  %v8991_v5 = vor.u32 %v10165_v48, %v8988_v56  ;;  %v9055_v22 = vor.u32 %v10181_v32, %v9052_v47  ;;  %v10157_v39 = vld [vmem:[%s15600_s1 + $0x1424] sm:$0xf]  ;;  %v8956_v48 = vld [vmem:[%s15600_s1 + $0x1428] sm:$0xf0] }
 0x2b8   :  { %6027 = vmatpush.bf16.msrb.mxu0 %v8639_v41  ;;  %v10163_v41 = vld [vmem:[%s15600_s1 + $0x1454] sm:$0xf]  ;;  %v10173_v56 = vld [vmem:[%s15600_s1 + $0x14a4] sm:$0xf]  ;;  %v9020_v32 = vld [vmem:[%s15600_s1 + $0x14a8] sm:$0xf0]  ;;  %v8959_v60 = vor.u32 %v10157_v39, %v8956_v48 }
 0x2b9   :  { %6040 = vmatpush.bf16.msrb.mxu1 %v8703_v30  ;;  %v10179_v30 = vld [vmem:[%s15600_s1 + $0x14d4] sm:$0xf]  ;;  %v10261_v48 = vld [vmem:[%s15600_s1 + $0x1764] sm:$0xf] }
 0x2ba   :  { %6053 = vmatpush.bf16.msrb.mxu2 %v8767_v50  ;;  %v9044_v50 = vld [vmem:[%s15600_s1 + $0x14d8] sm:$0xf0] }
 0x2bb   :  { %6066 = vmatpush.bf16.msrb.mxu3 %v8831_v10  ;;  %v8983_v10 = vor.u32 %v10163_v41, %v8980_v24  ;;  %v9047_v40 = vor.u32 %v10179_v30, %v9044_v50  ;;  %v9023_v41 = vor.u32 %v10173_v56, %v9020_v32  ;;  %v10155_v24 = vld [vmem:[%s15600_s1 + $0x1414] sm:$0xf]  ;;  %v8948_v30 = vld [vmem:[%s15600_s1 + $0x1418] sm:$0xf0]  ;;  %v9372_v56 = vld [vmem:[%s15600_s1 + $0x1768] sm:$0xf0] }
 0x2bc   :  { %6028 = vmatpush.bf16.msrb.mxu0 %v8631_v34  ;;  %v10145_v34 = vld [vmem:[%s15600_s1 + $0x13c4] sm:$0xf]  ;;  %v10171_v50 = vld [vmem:[%s15600_s1 + $0x1494] sm:$0xf] }
 0x2bd   :  { %6041 = vmatpush.bf16.msrb.mxu1 %v8695_v11  ;;  %v10177_v11 = vld [vmem:[%s15600_s1 + $0x14c4] sm:$0xf]  ;;  %v8911_v58 = vor.u32 %v10145_v34, %v8908_v0 }
 0x2be   :  { %6054 = vmatpush.bf16.msrb.mxu2 %v8759_v52  ;;  %v9036_v52 = vld [vmem:[%s15600_s1 + $0x14c8] sm:$0xf0]  ;;  %v10153_v0 = vld [vmem:[%s15600_s1 + $0x1404] sm:$0xf] }
 0x2bf   :  { %6067 = vmatpush.bf16.msrb.mxu3 %v8823_v55  ;;  %v8975_v55 = vor.u32 %v10161_v23, %v8972_v27  ;;  %v9039_v54 = vor.u32 %v10177_v11, %v9036_v52  ;;  %v8940_v23 = vld [vmem:[%s15600_s1 + $0x1408] sm:$0xf0]  ;;  %v10169_v27 = vld [vmem:[%s15600_s1 + $0x1484] sm:$0xf] }
 0x2c0   :  { %6029 = vmatpush.bf16.msrb.mxu0 %v8623_v26  ;;  %v5823_v1 = vpop.f32.mrf.mxu0  ;;  %v8964_v26 = vld [vmem:[%s15600_s1 + $0x1438] sm:$0xf0]  ;;  %v9004_v52 = vld [vmem:[%s15600_s1 + $0x1488] sm:$0xf0] }
 0x2c1   :  { %6042 = vmatpush.bf16.msrb.mxu1 %v8687_v63  ;;  %v5824_v2 = vadd.f32 %v5823_v1, %v14861_v8  ;;  %v5836_v15 = vpop.f32.mrf.mxu1  ;;  %v8900_v8 = vld [vmem:[%s15600_s1 + $0x13b8] sm:$0xf0] }
 0x2c2   :  { %6055 = vmatpush.bf16.msrb.mxu2 %v8751_v61  ;;  %v8903_v63 = vor.u32 %v10143_v46, %v8900_v8  ;;  %v10191_v61 = vld [vmem:[%s15600_s1 + $0x1534] sm:$0xf]  ;;  %v9188_v1 = vld [vmem:[%s15600_s1 + $0x15f8] sm:$0xf0]  ;;  %v10185_v46 = vld [vmem:[%s15600_s1 + $0x1504] sm:$0xf] }
 0x2c3   :  { %6068 = vmatpush.bf16.msrb.mxu3 %v8815_v28  ;;  %6030 = vmatmul.bf16.vlgmr.msrb.gmra.mxu0 %v15632_v9  ;;  %v5837_v33 = vadd.f32 %v5836_v15, %v5824_v2  ;;  %v8892_v28 = vld [vmem:[%s15600_s1 + $0x13a8] sm:$0xf0]  ;;  %v10139_v9 = vld [vmem:[%s15600_s1 + $0x1394] sm:$0xf]  ;;  %v9252_v15 = vld [vmem:[%s15600_s1 + $0x1678] sm:$0xf0] }
 0x2c4   :  { %6074 = vmatpush.bf16.msra.mxu0 %v8935_v17  ;;  %6043 = vmatmul.bf16.vlgmr.msrb.gmra.mxu1 %v15634_v38  ;;  %v9092_v17 = vld [vmem:[%s15600_s1 + $0x1538] sm:$0xf0]  ;;  %v9068_v8 = vld [vmem:[%s15600_s1 + $0x1508] sm:$0xf0] }
 0x2c5   :  { %6087 = vmatpush.bf16.msra.mxu1 %v8999_v36  ;;  %6056 = vmatmul.bf16.vlgmr.msrb.gmra.mxu2 %v15633_v25  ;;  %v8967_v36 = vor.u32 %v10159_v29, %v8964_v26  ;;  %v9095_v47 = vor.u32 %v10191_v61, %v9092_v17  ;;  %v8884_v25 = vld [vmem:[%s15600_s1 + $0x1398] sm:$0xf0]  ;;  %v8943_v29 = vor.u32 %v10153_v0, %v8940_v23  ;;  %v10213_v17 = vld [vmem:[%s15600_s1 + $0x15e4] sm:$0xf] }
 0x2c6   :  { %6100 = vmatpush.bf16.msra.mxu2 %v9063_v49  ;;  %6069 = vmatmul.bf16.vlgmr.msrb.gmra.mxu3 %v15635_v20  ;;  %v10141_v49 = vld [vmem:[%s15600_s1 + $0x13a4] sm:$0xf]  ;;  %v9012_v38 = vld [vmem:[%s15600_s1 + $0x1498] sm:$0xf0]  ;;  %v10187_v20 = vld [vmem:[%s15600_s1 + $0x1514] sm:$0xf]  ;;  %v9071_v61 = vor.u32 %v10185_v46, %v9068_v8 }
 0x2c7   :  { %6113 = vmatpush.bf16.msra.mxu3 %v9127_v19  ;;  %v8895_v7 = vor.u32 %v10141_v49, %v8892_v28  ;;  %v9015_v34 = vor.u32 %v10171_v50, %v9012_v38  ;;  %v9079_v2 = vor.u32 %v10187_v20, %v9076_v13  ;;  %v10245_v49 = vld [vmem:[%s15600_s1 + $0x16e4] sm:$0xf]  ;;  %v9308_v28 = vld [vmem:[%s15600_s1 + $0x16e8] sm:$0xf0]  ;;  %v10259_v50 = vld [vmem:[%s15600_s1 + $0x1754] sm:$0xf] }
 0x2c8   :  { %6075 = vmatpush.bf16.msra.mxu0 %v8927_v18  ;;  %v5849_v44 = vpop.f32.mrf.mxu2  ;;  %v5825_v18 = vpop.f32.mrf.mxu0  ;;  %v9364_v38 = vld [vmem:[%s15600_s1 + $0x1758] sm:$0xf0]  ;;  %v9164_v13 = vld [vmem:[%s15600_s1 + $0x15c8] sm:$0xf0] }
 0x2c9   :  { %6088 = vmatpush.bf16.msra.mxu1 %v8991_v5  ;;  %v5850_v51 = vadd.f32 %v5849_v44, %v5837_v33  ;;  %v5862_v19 = vpop.f32.mrf.mxu3  ;;  %v10189_v5 = vld [vmem:[%s15600_s1 + $0x1524] sm:$0xf]  ;;  %v5838_v35 = vpop.f32.mrf.mxu1  ;;  %v9007_v33 = vor.u32 %v10169_v27, %v9004_v52  ;;  %v9244_v44 = vld [vmem:[%s15600_s1 + $0x1668] sm:$0xf0]  ;;  %v9172_v18 = vld [vmem:[%s15600_s1 + $0x15d8] sm:$0xf0]  ;;  %v9367_v0 = vor.u32 %v10259_v50, %v9364_v38 }
 0x2ca   :  { %6101 = vmatpush.bf16.msra.mxu2 %v9055_v22  ;;  %v9084_v22 = vld [vmem:[%s15600_s1 + $0x1528] sm:$0xf0]  ;;  %v9236_v35 = vld [vmem:[%s15600_s1 + $0x1658] sm:$0xf0]  ;;  %v10201_v38 = vld [vmem:[%s15600_s1 + $0x1584] sm:$0xf] }
 0x2cb   :  { %6114 = vmatpush.bf16.msra.mxu3 %v9119_v42  ;;  %v15060_v43 = vadd.f32 %v5862_v19, %v5850_v51  ;;  %v9087_v42 = vor.u32 %v10189_v5, %v9084_v22  ;;  %v10211_v19 = vld [vmem:[%s15600_s1 + $0x15d4] sm:$0xf]  ;;  %v15637_v22 = vld [vmem:[#allocation13_spill] sm:$0xff]  ;;  %v9284_v46 = vld [vmem:[%s15600_s1 + $0x16b8] sm:$0xf0] }
 0x2cc   :  { %6076 = vmatpush.bf16.msra.mxu0 %v8919_v21  ;;  %v8887_v21 = vor.u32 %v10139_v9, %v8884_v25  ;;  %v15636_v5 = vld [vmem:[#allocation10_spill] sm:$0xff]  ;;  %v15638_v9 = vld [vmem:[#allocation11_spill] sm:$0xff]  ;;  %v9375_v25 = vor.u32 %v10261_v48, %v9372_v56 }
 0x2cd   :  { %6089 = vmatpush.bf16.msra.mxu1 %v8983_v10  ;;  %v8876_v10 = vld [vmem:[%s15600_s1 + $0x1388] sm:$0xf0]  ;;  %v9332_v50 = vld [vmem:[%s15600_s1 + $0x1718] sm:$0xf0] }
 0x2ce   :  { %6102 = vmatpush.bf16.msra.mxu2 %v9047_v40  ;;  %v8951_v40 = vor.u32 %v10155_v24, %v8948_v30  ;;  %v15639_v24 = vld [vmem:[#allocation12_spill] sm:$0xff]  ;;  %v9175_v30 = vor.u32 %v10211_v19, %v9172_v18 }
 0x2cf   :  { %6115 = vmatpush.bf16.msra.mxu3 %v9111_v31  ;;  %v10215_v31 = vld [vmem:[%s15600_s1 + $0x15f4] sm:$0xf] }
 0x2d0   :  { %6077 = vmatpush.bf16.msra.mxu0 %v8911_v58  ;;  %v5851_v11 = vpop.f32.mrf.mxu2  ;;  %v10231_v58 = vld [vmem:[%s15600_s1 + $0x1674] sm:$0xf]  ;;  %v9191_v26 = vor.u32 %v10215_v31, %v9188_v1  ;;  %v10257_v31 = vld [vmem:[%s15600_s1 + $0x1744] sm:$0xf]  ;;  %v9356_v1 = vld [vmem:[%s15600_s1 + $0x1748] sm:$0xf0] }
 0x2d1   :  { %6090 = vmatpush.bf16.msra.mxu1 %v8975_v55  ;;  %v5864_v45 = vpop.f32.mrf.mxu3  ;;  %v8879_v55 = vor.u32 %v10137_v12, %v8876_v10  ;;  %v9255_v6 = vor.u32 %v10231_v58, %v9252_v15  ;;  %v10225_v12 = vld [vmem:[%s15600_s1 + $0x1644] sm:$0xf]  ;;  %v9228_v10 = vld [vmem:[%s15600_s1 + $0x1648] sm:$0xf0]  ;;  %v10207_v15 = vld [vmem:[%s15600_s1 + $0x15b4] sm:$0xf]  ;;  %v9359_v8 = vor.u32 %v10257_v31, %v9356_v1 }
 0x2d2   :  { %6103 = vmatpush.bf16.msra.mxu2 %v9039_v54  ;;  %v9316_v54 = vld [vmem:[%s15600_s1 + $0x16f8] sm:$0xf0] }
 0x2d3   :  { %6116 = vmatpush.bf16.msra.mxu3 %v9103_v4  ;;  %v9380_v4 = vld [vmem:[%s15600_s1 + $0x1778] sm:$0xf0] }
 0x2d4   :  { %6078 = vmatpush.bf16.msra.mxu0 %v8903_v63  ;;  %v9319_v63 = vor.u32 %v10247_v16, %v9316_v54  ;;  %v9383_v39 = vor.u32 %v10263_v59, %v9380_v4  ;;  %v10223_v16 = vld [vmem:[%s15600_s1 + $0x1634] sm:$0xf] }
 0x2d5   :  { %6091 = vmatpush.bf16.msra.mxu1 %v8967_v36  ;;  %v9180_v36 = vld [vmem:[%s15600_s1 + $0x15e8] sm:$0xf0]  ;;  %v10239_v54 = vld [vmem:[%s15600_s1 + $0x16b4] sm:$0xf] }
 0x2d6   :  { %6104 = vmatpush.bf16.msra.mxu2 %v9031_v3  ;;  %v10229_v3 = vld [vmem:[%s15600_s1 + $0x1664] sm:$0xf]  ;;  %v9183_v51 = vor.u32 %v10213_v17, %v9180_v36  ;;  %v9287_v59 = vor.u32 %v10239_v54, %v9284_v46  ;;  %v9436_v46 = vld [vmem:[%s15600_s1 + $0x17e8] sm:$0xf0] }
 0x2d7   :  { %6117 = vmatpush.bf16.msra.mxu3 %v9095_v47  ;;  %v9247_v32 = vor.u32 %v10229_v3, %v9244_v44  ;;  %v9311_v47 = vor.u32 %v10245_v49, %v9308_v28  ;;  %v10221_v17 = vld [vmem:[%s15600_s1 + $0x1624] sm:$0xf]  ;;  %v9212_v3 = vld [vmem:[%s15600_s1 + $0x1628] sm:$0xf0] }
 0x2d8   :  { %6079 = vmatpush.bf16.msra.mxu0 %v8895_v7  ;;  %v10227_v7 = vld [vmem:[%s15600_s1 + $0x1654] sm:$0xf]  ;;  %v10237_v44 = vld [vmem:[%s15600_s1 + $0x16a4] sm:$0xf]  ;;  %v9276_v49 = vld [vmem:[%s15600_s1 + $0x16a8] sm:$0xf0]  ;;  %v9215_v18 = vor.u32 %v10221_v17, %v9212_v3 }
 0x2d9   :  { %6092 = vmatpush.bf16.msra.mxu1 %v8959_v60  ;;  %v10243_v60 = vld [vmem:[%s15600_s1 + $0x16d4] sm:$0xf]  ;;  %v10277_v54 = vld [vmem:[%s15600_s1 + $0x17e4] sm:$0xf]  ;;  %v6217_v17 = vld [vmem:[%s15602_s3 + $0x68] sm:$0xff] }
 0x2da   :  { %6105 = vmatpush.bf16.msra.mxu2 %v9023_v41  ;;  %v9300_v41 = vld [vmem:[%s15600_s1 + $0x16d8] sm:$0xf0] }
 0x2db   :  { %6118 = vmatpush.bf16.msra.mxu3 %v9087_v42  ;;  %v9239_v42 = vor.u32 %v10227_v7, %v9236_v35  ;;  %v9303_v20 = vor.u32 %v10243_v60, %v9300_v41  ;;  %v9279_v7 = vor.u32 %v10237_v44, %v9276_v49  ;;  %v10219_v35 = vld [vmem:[%s15600_s1 + $0x1614] sm:$0xf]  ;;  %v9204_v60 = vld [vmem:[%s15600_s1 + $0x1618] sm:$0xf0] }
 0x2dc   :  { %6080 = vmatpush.bf16.msra.mxu0 %v8887_v21  ;;  %v10209_v21 = vld [vmem:[%s15600_s1 + $0x15c4] sm:$0xf]  ;;  %v10235_v41 = vld [vmem:[%s15600_s1 + $0x1694] sm:$0xf]  ;;  %v9492_v3 = vld [vmem:[%s15600_s1 + $0x1858] sm:$0xf0] }
 0x2dd   :  { %6093 = vmatpush.bf16.msra.mxu1 %v8951_v40  ;;  %v10241_v40 = vld [vmem:[%s15600_s1 + $0x16c4] sm:$0xf]  ;;  %v9167_v11 = vor.u32 %v10209_v21, %v9164_v13  ;;  %v9132_v21 = vld [vmem:[%s15600_s1 + $0x1588] sm:$0xf0] }
 0x2de   :  { %6106 = vmatpush.bf16.msra.mxu2 %v9015_v34  ;;  %v9292_v34 = vld [vmem:[%s15600_s1 + $0x16c8] sm:$0xf0]  ;;  %v10217_v13 = vld [vmem:[%s15600_s1 + $0x1604] sm:$0xf]  ;;  %v9135_v1 = vor.u32 %v10201_v38, %v9132_v21 }
 0x2df   :  { %6119 = vmatpush.bf16.msra.mxu3 %v9079_v2  ;;  %v9231_v2 = vor.u32 %v10225_v12, %v9228_v10  ;;  %v9295_v58 = vor.u32 %v10241_v40, %v9292_v34  ;;  %v9196_v12 = vld [vmem:[%s15600_s1 + $0x1608] sm:$0xf0]  ;;  %v10233_v40 = vld [vmem:[%s15600_s1 + $0x1684] sm:$0xf] }
 0x2e0   :  { %6081 = vmatpush.bf16.msra.mxu0 %v8879_v55  ;;  %v5875_v23 = vpop.f32.mrf.mxu0  ;;  %v9220_v55 = vld [vmem:[%s15600_s1 + $0x1638] sm:$0xf0]  ;;  %v9260_v34 = vld [vmem:[%s15600_s1 + $0x1688] sm:$0xf0]  ;;  %v10285_v21 = vld [vmem:[%s15600_s1 + $0x1824] sm:$0xf] }
 0x2e1   :  { %6094 = vmatpush.bf16.msra.mxu1 %v8943_v29  ;;  %v5876_v27 = vadd.f32 %v5875_v23, %v15060_v43  ;;  %v5888_v52 = vpop.f32.mrf.mxu1  ;;  %v9156_v43 = vld [vmem:[%s15600_s1 + $0x15b8] sm:$0xf0]  ;;  %v9404_v38 = vld [vmem:[%s15600_s1 + $0x17a8] sm:$0xf0] }
 0x2e2   :  { %6107 = vmatpush.bf16.msra.mxu2 %v9007_v33  ;;  %v9159_v29 = vor.u32 %v10207_v15, %v9156_v43  ;;  %v10255_v33 = vld [vmem:[%s15600_s1 + $0x1734] sm:$0xf]  ;;  %v9199_v15 = vor.u32 %v10217_v13, %v9196_v12  ;;  %v9263_v43 = vor.u32 %v10233_v40, %v9260_v34  ;;  %v9468_v13 = vld [vmem:[%s15600_s1 + $0x1828] sm:$0xf0] }
 0x2e3   :  { %6120 = vmatpush.bf16.msra.mxu3 %v9071_v61  ;;  %6082 = vmatmul.bf16.vlgmr.msra.gmra.mxu0 %v15636_v5  ;;  %v5889_v45 = vadd.f32 %v5888_v52, %v5876_v27  ;;  %v9148_v61 = vld [vmem:[%s15600_s1 + $0x15a8] sm:$0xf0]  ;;  %v10203_v5 = vld [vmem:[%s15600_s1 + $0x1594] sm:$0xf]  ;;  %v9444_v27 = vld [vmem:[%s15600_s1 + $0x17f8] sm:$0xf0] }
 0x2e4   :  { %6126 = vmatpush.bf16.msrb.mxu0 %v9191_v26  ;;  %6095 = vmatmul.bf16.vlgmr.msra.gmra.mxu1 %v15638_v9  ;;  %v9348_v26 = vld [vmem:[%s15600_s1 + $0x1738] sm:$0xf0]  ;;  %v6210_v40 = vld [vmem:[%s15602_s3 + $0x30] sm:$0xff] }
 0x2e5   :  { %6139 = vmatpush.bf16.msrb.mxu1 %v9255_v6  ;;  %6108 = vmatmul.bf16.vlgmr.msra.gmra.mxu2 %v15637_v22  ;;  %v9223_v6 = vor.u32 %v10223_v16, %v9220_v55  ;;  %v9351_v28 = vor.u32 %v10255_v33, %v9348_v26  ;;  %v9140_v22 = vld [vmem:[%s15600_s1 + $0x1598] sm:$0xf0]  ;;  %v9500_v33 = vld [vmem:[%s15600_s1 + $0x1868] sm:$0xf0]  ;;  %v6218_v26 = vld [vmem:[%s15602_s3 + $0x70] sm:$0xff] }
 0x2e6   :  { %6152 = vmatpush.bf16.msrb.mxu2 %v9319_v63  ;;  %6121 = vmatmul.bf16.vlgmr.msra.gmra.mxu3 %v15639_v24  ;;  %v10205_v63 = vld [vmem:[%s15600_s1 + $0x15a4] sm:$0xf]  ;;  %v9268_v9 = vld [vmem:[%s15600_s1 + $0x1698] sm:$0xf0]  ;;  %v9143_v24 = vor.u32 %v10203_v5, %v9140_v22  ;;  %v10271_v5 = vld [vmem:[%s15600_s1 + $0x17b4] sm:$0xf] }
 0x2e7   :  { %6165 = vmatpush.bf16.msrb.mxu3 %v9383_v39  ;;  %v9151_v56 = vor.u32 %v10205_v63, %v9148_v61  ;;  %v9508_v52 = vld [vmem:[%s15600_s1 + $0x1878] sm:$0xf0]  ;;  %v15640_v61 = vld [vmem:[#allocation14_spill] sm:$0xff] }
 0x2e8   :  { %6127 = vmatpush.bf16.msrb.mxu0 %v9183_v51  ;;  %v5901_v4 = vpop.f32.mrf.mxu2  ;;  %v5877_v51 = vpop.f32.mrf.mxu0  ;;  %v9428_v63 = vld [vmem:[%s15600_s1 + $0x17d8] sm:$0xf0] }
 0x2e9   :  { %6140 = vmatpush.bf16.msrb.mxu1 %v9247_v32  ;;  %v5902_v36 = vadd.f32 %v5901_v4, %v5889_v45  ;;  %v5914_v39 = vpop.f32.mrf.mxu3  ;;  %v10253_v32 = vld [vmem:[%s15600_s1 + $0x1724] sm:$0xf]  ;;  %v5890_v19 = vpop.f32.mrf.mxu1  ;;  %v10275_v4 = vld [vmem:[%s15600_s1 + $0x17d4] sm:$0xf]  ;;  %v9484_v51 = vld [vmem:[%s15600_s1 + $0x1848] sm:$0xf0] }
 0x2ea   :  { %6153 = vmatpush.bf16.msrb.mxu2 %v9311_v47  ;;  %v9340_v47 = vld [vmem:[%s15600_s1 + $0x1728] sm:$0xf0]  ;;  %v9431_v44 = vor.u32 %v10275_v4, %v9428_v63  ;;  %v9412_v22 = vld [vmem:[%s15600_s1 + $0x17b8] sm:$0xf0]  ;;  %v6204_v4 = vld [vmem:[%s15602_s3] sm:$0xff] }
 0x2eb   :  { %6166 = vmatpush.bf16.msrb.mxu3 %v9375_v25  ;;  %v15259_v48 = vadd.f32 %v5914_v39, %v5902_v36  ;;  %v9343_v25 = vor.u32 %v10253_v32, %v9340_v47  ;;  %v10291_v36 = vld [vmem:[%s15600_s1 + $0x1854] sm:$0xf]  ;;  %v9420_v39 = vld [vmem:[%s15600_s1 + $0x17c8] sm:$0xf0]  ;;  %v15641_v63 = vld [vmem:[#allocation15_spill] sm:$0xff] }
 0x2ec   :  { %6128 = vmatpush.bf16.msrb.mxu0 %v9175_v30  ;;  %v10251_v30 = vld [vmem:[%s15600_s1 + $0x1714] sm:$0xf]  ;;  %v9495_v49 = vor.u32 %v10291_v36, %v9492_v3 }
 0x2ed   :  { %6141 = vmatpush.bf16.msrb.mxu1 %v9239_v42  ;;  %v9207_v42 = vor.u32 %v10219_v35, %v9204_v60  ;;  %v9335_v23 = vor.u32 %v10251_v30, %v9332_v50  ;;  %v6214_v32 = vld [vmem:[%s15602_s3 + $0x50] sm:$0xff]  ;;  %v6213_v35 = vld [vmem:[%s15602_s3 + $0x48] sm:$0xff]  ;;  %v10269_v50 = vld [vmem:[%s15600_s1 + $0x17a4] sm:$0xf] }
 0x2ee   :  { %6154 = vmatpush.bf16.msrb.mxu2 %v9303_v20  ;;  %v9271_v20 = vor.u32 %v10235_v41, %v9268_v9  ;;  %v9476_v41 = vld [vmem:[%s15600_s1 + $0x1838] sm:$0xf0]  ;;  %v6212_v9 = vld [vmem:[%s15602_s3 + $0x40] sm:$0xff] }
 0x2ef   :  { %6167 = vmatpush.bf16.msrb.mxu3 %v9367_v0  ;;  %v10279_v0 = vld [vmem:[%s15600_s1 + $0x17f4] sm:$0xf] }
 0x2f0   :  { %6129 = vmatpush.bf16.msrb.mxu0 %v9167_v11  ;;  %v5903_v10 = vpop.f32.mrf.mxu2  ;;  %v10295_v11 = vld [vmem:[%s15600_s1 + $0x1874] sm:$0xf]  ;;  %v9447_v16 = vor.u32 %v10279_v0, %v9444_v27  ;;  %v9407_v0 = vor.u32 %v10269_v50, %v9404_v38  ;;  %v9471_v27 = vor.u32 %v10285_v21, %v9468_v13  ;;  %v6229_v21 = vld [vmem:[%s15602_s3 + $0xc8] sm:$0xff]  ;;  %v6228_v13 = vld [vmem:[%s15602_s3 + $0xc0] sm:$0xff] }
 0x2f1   :  { %6142 = vmatpush.bf16.msrb.mxu1 %v9231_v2  ;;  %v5916_v31 = vpop.f32.mrf.mxu3  ;;  %v10249_v2 = vld [vmem:[%s15600_s1 + $0x1704] sm:$0xf]  ;;  %v9511_v45 = vor.u32 %v10295_v11, %v9508_v52  ;;  %v10267_v11 = vld [vmem:[%s15600_s1 + $0x1794] sm:$0xf]  ;;  %v9396_v52 = vld [vmem:[%s15600_s1 + $0x1798] sm:$0xf0] }
 0x2f2   :  { %6155 = vmatpush.bf16.msrb.mxu2 %v9295_v58  ;;  %v9324_v58 = vld [vmem:[%s15600_s1 + $0x1708] sm:$0xf0] }
 0x2f3   :  { %6168 = vmatpush.bf16.msrb.mxu3 %v9359_v8  ;;  %v9327_v55 = vor.u32 %v10249_v2, %v9324_v58  ;;  %v6219_v8 = vld [vmem:[%s15602_s3 + $0x78] sm:$0xff]  ;;  %v6209_v31 = vld [vmem:[%s15602_s3 + $0x28] sm:$0xff]  ;;  %v6208_v58 = vld [vmem:[%s15602_s3 + $0x20] sm:$0xff] }
 0x2f4   :  { %6130 = vmatpush.bf16.msrb.mxu0 %v9159_v29  ;;  %v10293_v29 = vld [vmem:[%s15600_s1 + $0x1864] sm:$0xf]  ;;  %v9460_v2 = vld [vmem:[%s15600_s1 + $0x1818] sm:$0xf0] }
 0x2f5   :  { %6143 = vmatpush.bf16.msrb.mxu1 %v9223_v6  ;;  %v9439_v6 = vor.u32 %v10277_v54, %v9436_v46  ;;  %v6207_v54 = vld [vmem:[%s15602_s3 + $0x18] sm:$0xff]  ;;  %v10281_v46 = vld [vmem:[%s15600_s1 + $0x1804] sm:$0xf] }
 0x2f6   :  { %6156 = vmatpush.bf16.msrb.mxu2 %v9287_v59  ;;  %v9503_v59 = vor.u32 %v10293_v29, %v9500_v33  ;;  %v6206_v33 = vld [vmem:[%s15602_s3 + $0x10] sm:$0xff] }
 0x2f7   :  { %6169 = vmatpush.bf16.msrb.mxu3 %v9351_v28  ;;  %v10273_v28 = vld [vmem:[%s15600_s1 + $0x17c4] sm:$0xf] }
 0x2f8   :  { %6131 = vmatpush.bf16.msrb.mxu0 %v9151_v56  ;;  %v9423_v19 = vor.u32 %v10273_v28, %v9420_v39 }
 0x2f9   :  { %6144 = vmatpush.bf16.msrb.mxu1 %v9215_v18 }
 0x2fa   :  { %6157 = vmatpush.bf16.msrb.mxu2 %v9279_v7 }
 0x2fb   :  { %6170 = vmatpush.bf16.msrb.mxu3 %v9343_v25  ;;  %v9415_v25 = vor.u32 %v10271_v5, %v9412_v22 }
 0x2fc   :  { %6132 = vmatpush.bf16.msrb.mxu0 %v9143_v24 }
 0x2fd   :  { %6145 = vmatpush.bf16.msrb.mxu1 %v9207_v42  ;;  %v6211_v42 = vld [vmem:[%s15602_s3 + $0x38] sm:$0xff] }
 0x2fe   :  { %6158 = vmatpush.bf16.msrb.mxu2 %v9271_v20 }
 0x2ff   :  { %6171 = vmatpush.bf16.msrb.mxu3 %v9335_v23 }
 0x300   :  { %6133 = vmatpush.bf16.msrb.mxu0 %v9135_v1  ;;  %v5927_v56 = vpop.f32.mrf.mxu0  ;;  %v10283_v1 = vld [vmem:[%s15600_s1 + $0x1814] sm:$0xf] }
 0x301   :  { %6146 = vmatpush.bf16.msrb.mxu1 %v9199_v15  ;;  %v5928_v47 = vadd.f32 %v5927_v56, %v15259_v48  ;;  %v5940_v18 = vpop.f32.mrf.mxu1  ;;  %v10287_v48 = vld [vmem:[%s15600_s1 + $0x1834] sm:$0xf]  ;;  %v9399_v15 = vor.u32 %v10267_v11, %v9396_v52  ;;  %v6221_v52 = vld [vmem:[%s15602_s3 + $0x88] sm:$0xff] }
 0x302   :  { %6159 = vmatpush.bf16.msrb.mxu2 %v9263_v43  ;;  %v9479_v24 = vor.u32 %v10287_v48, %v9476_v41  ;;  %v9463_v43 = vor.u32 %v10283_v1, %v9460_v2  ;;  %v6235_v48 = vld [vmem:[%s15602_s3 + $0xf8] sm:$0xff]  ;;  %v6234_v41 = vld [vmem:[%s15602_s3 + $0xf0] sm:$0xff]  ;;  %v6220_v2 = vld [vmem:[%s15602_s3 + $0x80] sm:$0xff] }
 0x303   :  { %6172 = vmatpush.bf16.msrb.mxu3 %v9327_v55  ;;  %6134 = vmatmul.bf16.vlgmr.msrb.gmra.mxu0 %v15640_v61  ;;  %v5941_v60 = vadd.f32 %v5940_v18, %v5928_v47  ;;  %v6222_v11 = vld [vmem:[%s15602_s3 + $0x90] sm:$0xff] }
 0x304   :  { %6178 = vmatpush.bf16.msra.mxu0 %v9447_v16  ;;  %6147 = vmatmul.bf16.vlgmr.msrb.gmra.mxu1 %v12939_v53  ;;  %v6215_v53 = vld [vmem:[%s15602_s3 + $0x58] sm:$0xff]  ;;  %v10265_v16 = vld [vmem:[%s15600_s1 + $0x1784] sm:$0xf] }
 0x305   :  { %6191 = vmatpush.bf16.msra.mxu1 %v9511_v45  ;;  %6160 = vmatmul.bf16.vlgmr.msrb.gmra.mxu2 %v12952_v14  ;;  %v6216_v14 = vld [vmem:[%s15602_s3 + $0x60] sm:$0xff]  ;;  %v9388_v45 = vld [vmem:[%s15600_s1 + $0x1788] sm:$0xf0] }
 0x306   :  { %6240 = vmatpush.msra.mxu2 %v6219_v8  ;;  %6173 = vmatmul.bf16.vlgmr.msrb.gmra.mxu3 %v12941_v62  ;;  %v10289_v62 = vld [vmem:[%s15600_s1 + $0x1844] sm:$0xf]  ;;  %v9452_v8 = vld [vmem:[%s15600_s1 + $0x1808] sm:$0xf0] }
 0x307   :  { %v9487_v7 = vor.u32 %v10289_v62, %v9484_v51  ;;  %6260 = vmatpush.msra.mxu3 %v6235_v48  ;;  %v6327_v48 = vld [vmem:[%s15606_s7 + $0x28] sm:$0xff] }
 0x308   :  { %6241 = vmatpush.msra.mxu2 %v6218_v26  ;;  %6179 = vmatpush.bf16.msra.mxu0 %v9439_v6  ;;  %v5953_v30 = vpop.f32.mrf.mxu2  ;;  %v5929_v10 = vpop.f32.mrf.mxu0  ;;  %v9391_v26 = vor.u32 %v10265_v16, %v9388_v45  ;;  %v9455_v6 = vor.u32 %v10281_v46, %v9452_v8  ;;  %v6296_v45 = vld [vmem:[%s15604_s5 + $0x78] sm:$0xff]  ;;  %v6294_v8 = vld [vmem:[%s15604_s5 + $0x68] sm:$0xff] }
 0x309   :  { %6192 = vmatpush.bf16.msra.mxu1 %v9503_v59  ;;  %v5954_v20 = vadd.f32 %v5953_v30, %v5941_v60  ;;  %v5966_v12 = vpop.f32.mrf.mxu3  ;;  %v5942_v23 = vpop.f32.mrf.mxu1  ;;  %v6205_v59 = vld [vmem:[%s15602_s3 + $0x8] sm:$0xff]  ;;  %6261 = vmatpush.msra.mxu3 %v6234_v41  ;;  %v6231_v30 = vld [vmem:[%s15602_s3 + $0xd8] sm:$0xff]  ;;  %v6326_v41 = vld [vmem:[%s15606_s7 + $0x20] sm:$0xff] }
 0x30a   :  { %6242 = vmatpush.msra.mxu2 %v6217_v17  ;;  %v6227_v10 = vld [vmem:[%s15602_s3 + $0xb8] sm:$0xff]  ;;  %v6224_v23 = vld [vmem:[%s15602_s3 + $0xa0] sm:$0xff] }
 0x30b   :  { %v5967_v34 = vadd.f32 %v5966_v12, %v5954_v20  ;;  %v6230_v20 = vld [vmem:[%s15602_s3 + $0xd0] sm:$0xff] }
 0x30c   :  { %6243 = vmatpush.msra.mxu2 %v6216_v14  ;;  %6180 = vmatpush.bf16.msra.mxu0 %v9431_v44 }
 0x30d   :  { %6193 = vmatpush.bf16.msra.mxu1 %v9495_v49 }
 0x30e   :  { %6244 = vmatpush.msra.mxu2 %v6215_v53 }
 0x310   :  { %6245 = vmatpush.msra.mxu2 %v6214_v32  ;;  %6181 = vmatpush.bf16.msra.mxu0 %v9423_v19  ;;  %v5955_v55 = vpop.f32.mrf.mxu2 }
 0x311   :  { %6194 = vmatpush.bf16.msra.mxu1 %v9487_v7  ;;  %v5968_v29 = vpop.f32.mrf.mxu3  ;;  %v6295_v55 = vld [vmem:[%s15604_s5 + $0x70] sm:$0xff] }
 0x312   :  { %6246 = vmatpush.msra.mxu2 %v6213_v35 }
 0x314   :  { %6247 = vmatpush.msra.mxu2 %v6212_v9  ;;  %6182 = vmatpush.bf16.msra.mxu0 %v9415_v25  ;;  %v6233_v9 = vld [vmem:[%s15602_s3 + $0xe8] sm:$0xff] }
 0x315   :  { %6195 = vmatpush.bf16.msra.mxu1 %v9479_v24  ;;  %6262 = vmatpush.msra.mxu3 %v6233_v9  ;;  %v6232_v24 = vld [vmem:[%s15602_s3 + $0xe0] sm:$0xff]  ;;  %v6325_v9 = vld [vmem:[%s15606_s7 + $0x18] sm:$0xff] }
 0x316   :  { %6248 = vmatpush.msra.mxu2 %v6211_v42 }
 0x317   :  { %6263 = vmatpush.msra.mxu3 %v6232_v24  ;;  %v10298_v24 = vld [vmem:[%s15603_s4] ss:$0 sm:$0xff] }
 0x318   :  { %6249 = vmatpush.msra.mxu2 %v6210_v40  ;;  %6183 = vmatpush.bf16.msra.mxu0 %v9407_v0  ;;  %v6225_v0 = vld [vmem:[%s15602_s3 + $0xa8] sm:$0xff] }
 0x319   :  { %6196 = vmatpush.bf16.msra.mxu1 %v9471_v27  ;;  %6264 = vmatpush.msra.mxu3 %v6231_v30  ;;  %v6223_v27 = vld [vmem:[%s15602_s3 + $0x98] sm:$0xff] }
 0x31a   :  { %6250 = vmatpush.msra.mxu2 %v6209_v31 }
 0x31b   :  { %6265 = vmatpush.msra.mxu3 %v6230_v20 }
 0x31c   :  { %6251 = vmatpush.msra.mxu2 %v6208_v58  ;;  %6184 = vmatpush.bf16.msra.mxu0 %v9399_v15 }
 0x31d   :  { %6197 = vmatpush.bf16.msra.mxu1 %v9463_v43  ;;  %6266 = vmatpush.msra.mxu3 %v6229_v21  ;;  %v6323_v21 = vld [vmem:[%s15606_s7 + $0x8] sm:$0xff] }
 0x31e   :  { %6252 = vmatpush.msra.mxu2 %v6207_v54 }
 0x31f   :  { %6267 = vmatpush.msra.mxu3 %v6228_v13  ;;  %v6322_v13 = vld [vmem:[%s15606_s7] sm:$0xff] }
 0x320   :  { %6253 = vmatpush.msra.mxu2 %v6206_v33  ;;  %6185 = vmatpush.bf16.msra.mxu0 %v9391_v26  ;;  %v5979_v61 = vpop.f32.mrf.mxu0  ;;  %v6293_v26 = vld [vmem:[%s15604_s5 + $0x60] sm:$0xff] }
 0x321   :  { %6198 = vmatpush.bf16.msra.mxu1 %v9455_v6  ;;  %v5980_v17 = vadd.f32 %v5979_v61, %v5967_v34  ;;  %v5992_v36 = vpop.f32.mrf.mxu1  ;;  %v6226_v34 = vld [vmem:[%s15602_s3 + $0xb0] sm:$0xff]  ;;  %6268 = vmatpush.msra.mxu3 %v6227_v10 }
 0x322   :  { %6254 = vmatpush.msra.mxu2 %v6205_v59  ;;  %v6292_v59 = vld [vmem:[%s15604_s5 + $0x58] sm:$0xff] }
 0x323   :  { %6186 = vmatmul.bf16.vlgmr.msra.gmra.mxu0 %v15641_v63  ;;  %v5993_v3 = vadd.f32 %v5992_v36, %v5980_v17  ;;  %6269 = vmatpush.msra.mxu3 %v6226_v34  ;;  %v6291_v63 = vld [vmem:[%s15604_s5 + $0x50] sm:$0xff]  ;;  %v6290_v36 = vld [vmem:[%s15604_s5 + $0x48] sm:$0xff] }
 0x324   :  { %6255 = vmatpush.msra.mxu2 %v6204_v4  ;;  %6199 = vmatmul.bf16.vlgmr.msra.gmra.mxu1 %v13149_v57 }
 0x325   :  { %6256 = vmatmul.f32.vlgmr.msra.gmra.mxu2 %v14012_v37  ;;  %6270 = vmatpush.msra.mxu3 %v6225_v0  ;;  %v10300_v0 = vld [vmem:[%s15607_s8] ss:$0 sm:$0xff] }
 0x326   :  { %6301 = vmatpush.msrb.mxu0 %v6296_v45 }
 0x327   :  { %6271 = vmatpush.msra.mxu3 %v6224_v23 }
 0x328   :  { %v6005_v14 = vpop.f32.mrf.mxu2  ;;  %v5981_v28 = vpop.f32.mrf.mxu0  ;;  %6302 = vmatpush.msrb.mxu0 %v6295_v55 }
 0x329   :  { %v6006_v44 = vadd.f32 %v6005_v14, %v5993_v3  ;;  %v6018_v49 = vpop.f32.mrf.mxu3  ;;  %v5994_v53 = vpop.f32.mrf.mxu1  ;;  %6272 = vmatpush.msra.mxu3 %v6223_v27  ;;  %v6289_v14 = vld [vmem:[%s15604_s5 + $0x40] sm:$0xff]  ;;  %v6287_v28 = vld [vmem:[%s15604_s5 + $0x30] sm:$0xff] }
 0x32a   :  { %6303 = vmatpush.msrb.mxu0 %v6294_v8  ;;  %v6286_v53 = vld [vmem:[%s15604_s5 + $0x28] sm:$0xff] }
 0x32b   :  { %v6019_v39 = vadd.f32 %v6018_v49, %v6006_v44  ;;  %6273 = vmatpush.msra.mxu3 %v6222_v11  ;;  %v6288_v44 = vld [vmem:[%s15604_s5 + $0x38] sm:$0xff] }
 0x32c   :  { %6304 = vmatpush.msrb.mxu0 %v6293_v26 }
 0x32d   :  { %6274 = vmatpush.msra.mxu3 %v6221_v52 }
 0x32e   :  { %6305 = vmatpush.msrb.mxu0 %v6292_v59 }
 0x32f   :  { %6275 = vmatpush.msra.mxu3 %v6220_v2 }
 0x330   :  { %v6007_v62 = vpop.f32.mrf.mxu2  ;;  %6306 = vmatpush.msrb.mxu0 %v6291_v63 }
 0x331   :  { %v6020_v51 = vpop.f32.mrf.mxu3  ;;  %v6285_v62 = vld [vmem:[%s15604_s5 + $0x20] sm:$0xff] }
 0x332   :  { %6307 = vmatpush.msrb.mxu0 %v6290_v36 }
 0x334   :  { %6308 = vmatpush.msrb.mxu0 %v6289_v14 }
 0x336   :  { %6309 = vmatpush.msrb.mxu0 %v6288_v44 }
 0x338   :  { %6310 = vmatpush.msrb.mxu0 %v6287_v28 }
 0x33a   :  { %6311 = vmatpush.msrb.mxu0 %v6286_v53 }
 0x33c   :  { %6312 = vmatpush.msrb.mxu0 %v6285_v62 }
 0x340   :  { %v6031_v56 = vpop.f32.mrf.mxu0 }
 0x341   :  { %v6032_v32 = vadd.f32 %v6031_v56, %v6019_v39  ;;  %v6044_v47 = vpop.f32.mrf.mxu1  ;;  %v6284_v56 = vld [vmem:[%s15604_s5 + $0x18] sm:$0xff] }
 0x342   :  { %6313 = vmatpush.msrb.mxu0 %v6284_v56 }
 0x343   :  { %v6045_v19 = vadd.f32 %v6044_v47, %v6032_v32 }
 0x348   :  { %v6057_v18 = vpop.f32.mrf.mxu2  ;;  %v6033_v7 = vpop.f32.mrf.mxu0 }
 0x349   :  { %v6070_v57 = vpop.f32.mrf.mxu3  ;;  %v6046_v37 = vpop.f32.mrf.mxu1  ;;  %v6058_v31 = vadd.f32 %v6057_v18, %v6045_v19 }
 0x34a   :  { %v6283_v37 = vld [vmem:[%s15604_s5 + $0x10] sm:$0xff] }
 0x34b   :  { %v6071_v15 = vadd.f32 %v6070_v57, %v6058_v31  ;;  %6314 = vmatpush.msrb.mxu0 %v6283_v37 }
 0x350   :  { %v6059_v5 = vpop.f32.mrf.mxu2 }
 0x351   :  { %v6072_v22 = vpop.f32.mrf.mxu3  ;;  %v6282_v5 = vld [vmem:[%s15604_s5 + $0x8] sm:$0xff] }
 0x352   :  { %6315 = vmatpush.msrb.mxu0 %v6282_v5  ;;  %v6281_v22 = vld [vmem:[%s15604_s5] sm:$0xff] }
 0x354   :  { %6316 = vmatpush.msrb.mxu0 %v6281_v22 }
 0x360   :  { %v6083_v35 = vpop.f32.mrf.mxu0 }
 0x361   :  { %v6096_v60 = vpop.f32.mrf.mxu1  ;;  %v6084_v43 = vadd.f32 %v6083_v35, %v6071_v15  ;;  %v6329_v35 = vld [vmem:[%s15606_s7 + $0x38] sm:$0xff] }
 0x362   :  { %6346 = vmatpush.msrb.mxu1 %v6329_v35 }
 0x363   :  { %v6097_v33 = vadd.f32 %v6096_v60, %v6084_v43  ;;  %v6328_v60 = vld [vmem:[%s15606_s7 + $0x30] sm:$0xff] }
 0x364   :  { %6347 = vmatpush.msrb.mxu1 %v6328_v60 }
 0x366   :  { %6348 = vmatpush.msrb.mxu1 %v6327_v48 }
 0x368   :  { %v6109_v25 = vpop.f32.mrf.mxu2  ;;  %v6085_v38 = vpop.f32.mrf.mxu0  ;;  %6349 = vmatpush.msrb.mxu1 %v6326_v41 }
 0x369   :  { %v6122_v50 = vpop.f32.mrf.mxu3  ;;  %v6098_v42 = vpop.f32.mrf.mxu1  ;;  %v6110_v6 = vadd.f32 %v6109_v25, %v6097_v33  ;;  %v6324_v25 = vld [vmem:[%s15606_s7 + $0x10] sm:$0xff]  ;;  %s6367_s7 = sshll.u32 %s15608_s9, 4  ;;  %s6368_s7 = int_to_ptr.hbm [resolvable:$true] %s6367_s7 }
 0x36a   :  { %6350 = vmatpush.msrb.mxu1 %v6325_v9 }
 0x36b   :  { %v6123_v61 = vadd.f32 %v6122_v50, %v6110_v6 }
 0x36c   :  { %6351 = vmatpush.msrb.mxu1 %v6324_v25 }
 0x36e   :  { %6352 = vmatpush.msrb.mxu1 %v6323_v21 }
 0x370   :  { %v6111_v12 = vpop.f32.mrf.mxu2  ;;  %6353 = vmatpush.msrb.mxu1 %v6322_v13 }
 0x371   :  { %v6124_v40 = vpop.f32.mrf.mxu3  ;;  %v10299_v12 = vld [vmem:[%s15605_s6] ss:$0 sm:$0xff] }
 0x380   :  { %v6135_v1 = vpop.f32.mrf.mxu0 }
 0x381   :  { %v6148_v58 = vpop.f32.mrf.mxu1  ;;  %v6136_v3 = vadd.f32 %v6135_v1, %v6123_v61 }
 0x383   :  { %v6149_v49 = vadd.f32 %v6148_v58, %v6136_v3 }
 0x388   :  { %v6161_v16 = vpop.f32.mrf.mxu2  ;;  %v6137_v46 = vpop.f32.mrf.mxu0 }
 0x389   :  { %v6174_v54 = vpop.f32.mrf.mxu3  ;;  %v6150_v29 = vpop.f32.mrf.mxu1  ;;  %v6162_v39 = vadd.f32 %v6161_v16, %v6149_v49 }
 0x38b   :  { %v6175_v51 = vadd.f32 %v6174_v54, %v6162_v39 }
 0x390   :  { %v6163_v4 = vpop.f32.mrf.mxu2 }
 0x391   :  { %v6176_v17 = vpop.f32.mrf.mxu3 }
 0x3a0   :  { %v6187_v32 = vpop.f32.mrf.mxu0 }
 0x3a1   :  { %v6188_v47 = vadd.f32 %v6187_v32, %v6175_v51  ;;  %v6200_v19 = vpop.f32.mrf.mxu1 }
 0x3a3   :  { %v6201_v18 = vadd.f32 %v6200_v19, %v6188_v47 }
 0x3a5   :  { %6276 = vmatmul.f32.vlgmr.msra.gmra.mxu3 %v6201_v18 }
 0x3a8   :  { %v6189_v57 = vpop.f32.mrf.mxu0  ;;  %v6257_v30 = vpop.f32.mrf.mxu2 }
 0x3a9   :  { %v6202_v7 = vpop.f32.mrf.mxu1  ;;  %v6258_v50 = vadd.f32 %v10298_v24, %v6257_v30 }
 0x428   :  { %v6277_v38 = vpop.f32.mrf.mxu3 }
 0x429   :  { %v6278_v42 = vadd.f32 %v6277_v38, %v6258_v50 }
 0x42b   :  { %v6280_v20 = vmax.f32 %v6278_v42, 0.0 }
 0x42d   :  { %6317 = vmatmul.f32.vlgmr.msrb.gmra.mxu0 %v6280_v20 }
 0x4aa   :  { %v6318_v10 = vpop.f32.mrf.mxu0 }
 0x4ab   :  { %v6319_v40 = vadd.f32 %v10299_v12, %v6318_v10 }
 0x4ad   :  { %v6321_v34 = vmax.f32 %v6319_v40, 0.0 }
 0x4af   :  { %9512 = vmatmul.msk.f32.vlgmr.msrb.gmra.mxu1 %vm6334_vm0, %v6321_v34 }
 0x52c   :  { %v6355_v23 = vpop.f32.mrf.mxu1 }
 0x52d   :  { %v6356_v27 = vadd.f32 %v10300_v0, %v6355_v23 }
 0x52f   :  { %6359 = vst.msk [vmem:[#allocation2] sm:$0x3] %vm6358_vm1, %v6356_v27 }
 0x530   :  { %6370 = dma.vmem_to_hbm [thread:$0]  %s6366_s19, 32, %s6368_s7, [#allocation3]  }
 0x531   :  { %10326 = dma.done.wait [#allocation3], 32  }
 0x532   :  { %10327 = vsyncadd [#allocation3], 4294967264 }
 0x533   :  { %6375 = vsyncpa [#allocation3], 1 }

</bundles_post_ra>
